<compile_context>
chip_gen: v7x
topology: tpu7x:2x2x1
jax: 0.10.0
libtpu: 0.0.40
codegen_flags: <defaults>
</compile_context>

<pallas_src>
import functools
import math

import jax
import jax.numpy as jnp
from jax.experimental import pallas as pl
from jax.experimental.pallas import tpu as pltpu


# ---------------------------------------------------------------------------
# helpers
# ---------------------------------------------------------------------------
def _round_up(x, m):
    return ((x + m - 1) // m) * m


@functools.lru_cache(maxsize=None)
def _vmem_cap_bytes():
    # ~0.7x of the physical per-core VMEM (64 MiB on v7x, 128 MiB on v5e/v6e).
    try:
        return int(0.7 * pltpu.get_tpu_info().vmem_capacity_bytes)
    except Exception:
        return 44 << 20  # safe fallback for v7x's 64 MiB physical VMEM


def _vmem_limit_bytes(per_step_block_bytes):
    # Double-buffered pipeline footprint + headroom, clamped to the per-gen cap.
    return int(min(max(2 * per_step_block_bytes + (4 << 20), 32 << 20),
                   _vmem_cap_bytes()))


def _pick_row_tile(M, per_row_bytes, tile_rows, act_budget_bytes=(8 << 20)):
    """Row-tile size: big (amortize per-step overhead), but >=2 grid steps
    (both v7x TensorCores + pipelining) and within the activation budget."""
    tr = min(_round_up(tile_rows, 8), _round_up(M, 8))
    if M > 8:
        tr = min(tr, max(8, _round_up(-(-M // 2), 8)))   # >= 2 grid steps
    while tr > 8 and tr * per_row_bytes > act_budget_bytes:
        tr = max(8, _round_up(tr // 2, 8))
    return tr


_GELU_C = 0.7978845608028654  # sqrt(2/pi)


def _gelu_tanh(x):
    # TODO(synk): PyTorch F.gelu defaults to the exact erf GELU; the tanh
    # approximation is used here (and in the in-script reference) for robust
    # Mosaic lowering. Max deviation ~1e-3 * |x|.
    return 0.5 * x * (1.0 + jnp.tanh(_GELU_C * (x + 0.044715 * x * x * x)))


def _split_pconv_weight(w_oi, dc):
    """1x1-conv weight (out, in) -> (w_masked (in, out), w_head (dc, out)) so the
    Partial_conv3 concat can be fused into the matmul:
        y = x_full @ w_masked + conv_out @ w_head."""
    w_t = jnp.transpose(w_oi)                      # (in, out)
    w_head = w_t[:dc]
    w_masked = jnp.concatenate([jnp.zeros_like(w_head), w_t[dc:]], axis=0)
    return w_masked, w_head


# ---------------------------------------------------------------------------
# WithBias LayerNorm kernel over the channel (last) axis, channels-last input
# ---------------------------------------------------------------------------
def _withbias_layernorm_kernel(x_ref, w_ref, b_ref, o_ref):
    x = x_ref[...].astype(jnp.float32)
    w = w_ref[...].astype(jnp.float32)      # (1, C), resident (constant index_map)
    b = b_ref[...].astype(jnp.float32)
    inv_c = 1.0 / x.shape[-1]
    # Two-pass variance: robust against catastrophic cancellation.
    mu = jnp.sum(x, axis=-1, keepdims=True) * inv_c
    d = x - mu
    var = jnp.sum(d * d, axis=-1, keepdims=True) * inv_c   # unbiased=False
    o_ref[...] = (d * jax.lax.rsqrt(var + 1e-5) * w + b).astype(o_ref.dtype)


def withbias_layernorm(x, weight, bias, *, tile_rows=1024):
    """x: (..., C). weight, bias: (C,). PyTorch WithBias_LayerNorm semantics."""
    orig_shape = x.shape
    C = orig_shape[-1]
    x2 = x.reshape(-1, C)
    R = x2.shape[0]
    itemsize = jnp.dtype(x2.dtype).itemsize
    tr = _pick_row_tile(R, 2 * C * itemsize, tile_rows)
    per_step = (2 * tr * C + 2 * C) * itemsize

    out = pl.pallas_call(
        _withbias_layernorm_kernel,
        out_shape=jax.ShapeDtypeStruct((R, C), x.dtype),
        grid_spec=pltpu.PrefetchScalarGridSpec(
            num_scalar_prefetch=0,
            grid=(pl.cdiv(R, tr),),
            in_specs=[
                pl.BlockSpec((tr, C), lambda i: (i, 0)),
                pl.BlockSpec((1, C), lambda i: (0, 0)),
                pl.BlockSpec((1, C), lambda i: (0, 0)),
            ],
            out_specs=pl.BlockSpec((tr, C), lambda i: (i, 0)),
        ),
        compiler_params=pltpu.CompilerParams(
            dimension_semantics=("parallel",),
            vmem_limit_bytes=_vmem_limit_bytes(per_step),
        ),
    )(x2, weight.reshape(1, C), bias.reshape(1, C))
    return out.reshape(orig_shape)


# ---------------------------------------------------------------------------
# Partial_conv3 fused into the following 1x1 conv (row-tiled matmul kernels)
# ---------------------------------------------------------------------------
def _pconv_matmul_kernel(x_ref, pc_ref, wm_ref, wh_ref, o_ref):
    acc = jnp.dot(x_ref[...], wm_ref[...], preferred_element_type=jnp.float32)
    acc = acc + jnp.dot(pc_ref[...], wh_ref[...], preferred_element_type=jnp.float32)
    o_ref[...] = acc.astype(o_ref.dtype)


def pconv_matmul(x2, pc2, w_masked, w_head, *, tile_rows=1024):
    """y = concat([pc2, x2[:, dc:]]) @ W^T, without materializing the concat."""
    M, K = x2.shape
    dc = pc2.shape[1]
    N = w_masked.shape[1]
    itemsize = jnp.dtype(x2.dtype).itemsize
    per_row = (K + dc + 2 * N) * itemsize
    tr = _pick_row_tile(M, per_row, tile_rows)
    per_step = tr * per_row + (K * N + dc * N) * itemsize

    return pl.pallas_call(
        _pconv_matmul_kernel,
        out_shape=jax.ShapeDtypeStruct((M, N), x2.dtype),
        grid_spec=pltpu.PrefetchScalarGridSpec(
            num_scalar_prefetch=0,
            grid=(pl.cdiv(M, tr),),
            in_specs=[
                pl.BlockSpec((tr, K), lambda i: (i, 0)),
                pl.BlockSpec((tr, dc), lambda i: (i, 0)),
                pl.BlockSpec((K, N), lambda i: (0, 0)),     # resident weights
                pl.BlockSpec((dc, N), lambda i: (0, 0)),
            ],
            out_specs=pl.BlockSpec((tr, N), lambda i: (i, 0)),
        ),
        compiler_params=pltpu.CompilerParams(
            dimension_semantics=("parallel",),
            vmem_limit_bytes=_vmem_limit_bytes(per_step),
        ),
    )(x2, pc2, w_masked, w_head)


# ---------------------------------------------------------------------------
# Fully fused FeedForward: (pconv-fused conv2) -> GELU gate -> project_out -> +res
# ---------------------------------------------------------------------------
def _ffn_fused_kernel(x_ref, pc_ref, r_ref, w2m_ref, w2h_ref, wp_ref, o_ref):
    y = jnp.dot(x_ref[...], w2m_ref[...], preferred_element_type=jnp.float32)
    y = y + jnp.dot(pc_ref[...], w2h_ref[...], preferred_element_type=jnp.float32)
    hdim = y.shape[-1] // 2
    g = _gelu_tanh(y[:, :hdim]) * y[:, hdim:]
    out = jnp.dot(g.astype(wp_ref.dtype), wp_ref[...],
                  preferred_element_type=jnp.float32)
    o_ref[...] = (r_ref[...].astype(jnp.float32) + out).astype(o_ref.dtype)


def ffn_fused(x2, pc2, res2, w2_masked, w2_head, wp_t, *, tile_rows=1024):
    M, K = x2.shape
    dc = pc2.shape[1]
    N2 = w2_masked.shape[1]      # 2 * hidden
    Nh = N2 // 2
    No = wp_t.shape[1]
    itemsize = jnp.dtype(x2.dtype).itemsize
    per_row = (K + dc + No + 2 * N2 + Nh + 2 * No) * itemsize
    tr = _pick_row_tile(M, per_row, tile_rows)
    per_step = tr * per_row + (K * N2 + dc * N2 + Nh * No) * itemsize

    return pl.pallas_call(
        _ffn_fused_kernel,
        out_shape=jax.ShapeDtypeStruct((M, No), x2.dtype),
        grid_spec=pltpu.PrefetchScalarGridSpec(
            num_scalar_prefetch=0,
            grid=(pl.cdiv(M, tr),),
            in_specs=[
                pl.BlockSpec((tr, K), lambda i: (i, 0)),
                pl.BlockSpec((tr, dc), lambda i: (i, 0)),
                pl.BlockSpec((tr, No), lambda i: (i, 0)),
                pl.BlockSpec((K, N2), lambda i: (0, 0)),    # resident weights
                pl.BlockSpec((dc, N2), lambda i: (0, 0)),
                pl.BlockSpec((Nh, No), lambda i: (0, 0)),
            ],
            out_specs=pl.BlockSpec((tr, No), lambda i: (i, 0)),
        ),
        compiler_params=pltpu.CompilerParams(
            dimension_semantics=("parallel",),
            vmem_limit_bytes=_vmem_limit_bytes(per_step),
        ),
    )(x2, pc2, res2, w2_masked, w2_head, wp_t)


# ---------------------------------------------------------------------------
# Prior_Sp channel attention: one grid step per batch, heads in-block,
# temperature in SMEM, project_out + residual fused, lane-dense (n, C) output.
# ---------------------------------------------------------------------------
def _prior_attn_kernel(qv_ref, k_ref, r_ref, wp_ref, t_ref, o_ref, *, num_heads):
    c = k_ref.shape[-1]
    ch = c // num_heads
    qv = qv_ref[...]                            # (n, 2c): [q | v] channels-last
    q = qv[:, :c].astype(jnp.float32)
    v = qv[:, c:]
    k = k_ref[...].astype(jnp.float32)
    # torch.nn.functional.normalize(dim=-1) normalizes over the spatial axis,
    # which is axis 0 in this (n, c) layout.  rsqrt keeps the divide on the EUP.
    qn = q * jax.lax.rsqrt(jnp.maximum(jnp.sum(q * q, axis=0, keepdims=True), 1e-24))
    kn = k * jax.lax.rsqrt(jnp.maximum(jnp.sum(k * k, axis=0, keepdims=True), 1e-24))
    qn_t = jnp.transpose(qn)                    # (c, n): each head is a plain matmul
    outs = []
    for hh in range(num_heads):
        sl = slice(hh * ch, (hh + 1) * ch)
        attn = jnp.dot(qn_t[sl, :], kn[:, sl],
                       preferred_element_type=jnp.float32)          # (ch, ch)
        attn = attn * t_ref[hh]                                      # SMEM scalar
        attn = attn - jnp.max(attn, axis=-1, keepdims=True)
        p = jnp.exp(attn)
        p = p * pl.reciprocal(jnp.sum(p, axis=-1, keepdims=True), approx=True)
        vh = v[:, sl]
        # out_h^T[n, i] = sum_j vh[n, j] * p[i, j]  -> (n, ch), stays channels-last
        outs.append(jax.lax.dot_general(vh, p.astype(vh.dtype),
                                        (((1,), (1,)), ((), ())),
                                        preferred_element_type=jnp.float32))
    out_nc = jnp.concatenate(outs, axis=-1)                          # (n, c)
    proj = jnp.dot(out_nc.astype(wp_ref.dtype), wp_ref[...],
                   preferred_element_type=jnp.float32)               # project_out
    o_ref[...] = (r_ref[...].astype(jnp.float32) + proj).astype(o_ref.dtype)


def prior_channel_attention(qv3, k3, res3, wp_t, temperature, *, num_heads):
    """qv3: (B, n, 2C) [q|v]; k3/res3: (B, n, C); wp_t: (C, C) = proj_w^T;
    temperature: (num_heads,). Returns res3 + project_out(attention) : (B, n, C)."""
    B, n, c2 = qv3.shape
    c = c2 // 2
    itemsize = jnp.dtype(qv3.dtype).itemsize
    per_step = (n * c2 + 3 * n * c + c * c) * itemsize + 6 * n * c * 4

    kern = functools.partial(_prior_attn_kernel, num_heads=num_heads)
    return pl.pallas_call(
        kern,
        out_shape=jax.ShapeDtypeStruct((B, n, c), qv3.dtype),
        grid_spec=pltpu.PrefetchScalarGridSpec(
            num_scalar_prefetch=0,
            grid=(B,),
            in_specs=[
                pl.BlockSpec((None, n, c2), lambda b: (b, 0, 0)),
                pl.BlockSpec((None, n, c), lambda b: (b, 0, 0)),
                pl.BlockSpec((None, n, c), lambda b: (b, 0, 0)),
                pl.BlockSpec((c, c), lambda b: (0, 0)),               # resident
                pl.BlockSpec(memory_space=pltpu.MemorySpace.SMEM),    # temperature
            ],
            out_specs=pl.BlockSpec((None, n, c), lambda b: (b, 0, 0)),
        ),
        compiler_params=pltpu.CompilerParams(
            dimension_semantics=("parallel",),
            vmem_limit_bytes=_vmem_limit_bytes(per_step),
        ),
    )(qv3, k3, res3, wp_t, temperature)


# ---------------------------------------------------------------------------
# Partial_conv3 3x3 convolution (NHWC, channels-last)
# ---------------------------------------------------------------------------
def partial_conv3_nhwc(x_nhwc, conv_w_oihw):
    """Returns only the convolved first dc channels; the identity channels are
    consumed directly by the fused matmul (concat never materialized)."""
    dc = conv_w_oihw.shape[0]
    w_hwio = jnp.transpose(conv_w_oihw, (2, 3, 1, 0))
    return jax.lax.conv_general_dilated(
        x_nhwc[..., :dc], w_hwio, window_strides=(1, 1), padding=((1, 1), (1, 1)),
        dimension_numbers=("NHWC", "HWIO", "NHWC"),
        precision=jax.lax.Precision.HIGHEST)


# ---------------------------------------------------------------------------
# Module-level forward (Priorformer), channels-last internally
# ---------------------------------------------------------------------------
def prior_sp_block(x_res2, x_ln2, res_ln2, b, h, w, p, *, num_heads=2):
    """Returns x_res + project_out(Prior_Sp attention), in (b*h*w, c) layout."""
    c = x_ln2.shape[-1]
    n = h * w
    dc = p["qv_pc_w"].shape[0]
    pc_q = partial_conv3_nhwc(x_ln2.reshape(b, h, w, c), p["qv_pc_w"]).reshape(b * n, dc)
    pc_k = partial_conv3_nhwc(res_ln2.reshape(b, h, w, c), p["k_pc_w"]).reshape(b * n, dc)
    qv_m, qv_h = _split_pconv_weight(p["qv_conv_w"], dc)
    k_m, k_h = _split_pconv_weight(p["k_conv_w"], dc)
    qv2 = pconv_matmul(x_ln2, pc_q, qv_m, qv_h)          # (b*n, 2c): [q | v]
    k2 = pconv_matmul(res_ln2, pc_k, k_m, k_h)           # (b*n, c)
    out = prior_channel_attention(
        qv2.reshape(b, n, 2 * c), k2.reshape(b, n, c), x_res2.reshape(b, n, c),
        jnp.transpose(p["attn_proj_w"]), p["temperature"].reshape(-1),
        num_heads=num_heads)                              # (b, n, c)
    return out.reshape(b * n, c)


def feed_forward_block(x_res2, x_ln2, b, h, w, p):
    """Returns x_res + FeedForward(x_ln), in (b*h*w, c) layout."""
    c = x_ln2.shape[-1]
    dc = p["ffn_pc_w"].shape[0]
    pc = partial_conv3_nhwc(x_ln2.reshape(b, h, w, c), p["ffn_pc_w"]).reshape(-1, dc)
    w2_m, w2_h = _split_pconv_weight(p["ffn_conv2_w"], dc)
    return ffn_fused(x_ln2, pc, x_res2, w2_m, w2_h, jnp.transpose(p["ffn_proj_w"]))


def priorformer_forward(x_nchw, res_nchw, p, *, num_heads=2):
    b, c, h, w = x_nchw.shape
    n = h * w
    # Single layout change in/out; everything in between stays channels-last.
    x2 = jnp.transpose(x_nchw, (0, 2, 3, 1)).reshape(b * n, c)
    res2 = jnp.transpose(res_nchw, (0, 2, 3, 1)).reshape(b * n, c)

    res_ln = withbias_layernorm(res2, p["norm_res_w"], p["norm_res_b"])
    x_ln = withbias_layernorm(x2, p["norm1_w"], p["norm1_b"])
    x2 = prior_sp_block(x2, x_ln, res_ln, b, h, w, p, num_heads=num_heads)
    x_ln2 = withbias_layernorm(x2, p["norm2_w"], p["norm2_b"])
    x2 = feed_forward_block(x2, x_ln2, b, h, w, p)
    return jnp.transpose(x2.reshape(b, h, w, c), (0, 3, 1, 2))


# ---------------------------------------------------------------------------
# Pure-JAX reference (NCHW, same math as the PyTorch module, no Pallas)
# ---------------------------------------------------------------------------
def _partial_conv3_nchw(x4d, conv_w):
    dc = conv_w.shape[0]
    y1 = jax.lax.conv_general_dilated(
        x4d[:, :dc], conv_w, window_strides=(1, 1), padding=((1, 1), (1, 1)),
        dimension_numbers=("NCHW", "OIHW", "NCHW"),
        precision=jax.lax.Precision.HIGHEST)
    return jnp.concatenate([y1, x4d[:, dc:]], axis=1)


def reference_forward(x4d, res4d, p, *, num_heads=2):
    hi = jax.lax.Precision.HIGHEST

    def ln(t, wv, bv):
        t3 = jnp.transpose(t, (0, 2, 3, 1))
        mu = jnp.mean(t3, axis=-1, keepdims=True)
        var = jnp.mean((t3 - mu) ** 2, axis=-1, keepdims=True)
        y = (t3 - mu) / jnp.sqrt(var + 1e-5) * wv + bv
        return jnp.transpose(y, (0, 3, 1, 2))

    def c1x1(t, w_oi):
        return jnp.einsum("bchw,oc->bohw", t, w_oi, precision=hi)

    def attn_block(xin, resin):
        b, c, h, w = xin.shape
        ch, n = c // num_heads, h * w
        qv = c1x1(_partial_conv3_nchw(xin, p["qv_pc_w"]), p["qv_conv_w"])
        q, v = qv[:, :c], qv[:, c:]
        k = c1x1(_partial_conv3_nchw(resin, p["k_pc_w"]), p["k_conv_w"])
        q = q.reshape(b, num_heads, ch, n)
        k = k.reshape(b, num_heads, ch, n)
        v = v.reshape(b, num_heads, ch, n)
        q = q / jnp.maximum(jnp.sqrt(jnp.sum(q * q, -1, keepdims=True)), 1e-12)
        k = k / jnp.maximum(jnp.sqrt(jnp.sum(k * k, -1, keepdims=True)), 1e-12)
        attn = jnp.einsum("bhcn,bhdn->bhcd", q, k, precision=hi)
        attn = attn * p["temperature"].reshape(1, num_heads, 1, 1)
        attn = attn - jnp.max(attn, -1, keepdims=True)
        attn = jnp.exp(attn)
        attn = attn / jnp.sum(attn, -1, keepdims=True)
        out = jnp.einsum("bhcd,bhdn->bhcn", attn, v, precision=hi)
        return c1x1(out.reshape(b, c, h, w), p["attn_proj_w"])

    def ffn_block(xin):
        t = c1x1(_partial_conv3_nchw(xin, p["ffn_pc_w"]), p["ffn_conv2_w"])
        hd = t.shape[1] // 2
        t = _gelu_tanh(t[:, :hd]) * t[:, hd:]
        return c1x1(t, p["ffn_proj_w"])

    res_n = ln(res4d, p["norm_res_w"], p["norm_res_b"])
    x1 = x4d + attn_block(ln(x4d, p["norm1_w"], p["norm1_b"]), res_n)
    x2 = x1 + ffn_block(ln(x1, p["norm2_w"], p["norm2_b"]))
    return x2


# ---------------------------------------------------------------------------
# main
# ---------------------------------------------------------------------------
if __name__ == "__main__":
    dim, num_heads = 128, 2            # dim multiple of 128 keeps kernels lane-dense
    batch, h, w = 2, 16, 16
    dc = dim // 4                      # Partial_conv3 dim_conv3

    key = jax.random.PRNGKey(0)
    keys = jax.random.split(key, 10)

    def winit(k, shape, fan_in):
        return jax.random.normal(k, shape, dtype=jnp.float32) / math.sqrt(fan_in)

    params = {
        # LayerNorms (PyTorch WithBias init: weight=ones, bias=zeros)
        "norm1_w": jnp.ones((dim,), jnp.float32),
        "norm1_b": jnp.zeros((dim,), jnp.float32),
        "norm_res_w": jnp.ones((dim,), jnp.float32),
        "norm_res_b": jnp.zeros((dim,), jnp.float32),
        "norm2_w": jnp.ones((dim,), jnp.float32),
        "norm2_b": jnp.zeros((dim,), jnp.float32),
        # Prior_Sp (bias=False)
        "qv_pc_w": winit(keys[0], (dc, dc, 3, 3), dc * 9),
        "qv_conv_w": winit(keys[1], (2 * dim, dim), dim),
        "k_pc_w": winit(keys[2], (dc, dc, 3, 3), dc * 9),
        "k_conv_w": winit(keys[3], (dim, dim), dim),
        "attn_proj_w": winit(keys[4], (dim, dim), dim),
        "temperature": jnp.ones((num_heads, 1, 1), jnp.float32),
        # FeedForward (ffn_expansion_factor=1 -> hidden == dim, bias=False)
        "ffn_pc_w": winit(keys[5], (dc, dc, 3, 3), dc * 9),
        "ffn_conv2_w": winit(keys[6], (2 * dim, dim), dim),
        "ffn_proj_w": winit(keys[7], (dim, dim), dim),
    }

    x = jax.random.normal(keys[8], (batch, dim, h, w), dtype=jnp.float32)
    res = jax.random.normal(keys[9], (batch, dim, h, w), dtype=jnp.float32)

    fwd = jax.jit(functools.partial(priorformer_forward, num_heads=num_heads))
    out = jax.block_until_ready(fwd(x, res, params))
    ref = jax.block_until_ready(reference_forward(x, res, params, num_heads=num_heads))

    assert out.shape == ref.shape
    max_err = float(jnp.max(jnp.abs(out - ref)))
    assert jnp.allclose(out, ref, atol=2e-3, rtol=2e-3), f"mismatch vs reference: {max_err}"

    print("KERNEL_OK")
</pallas_src>

<mosaic_0001>
module attributes {stable_mosaic.version = 11 : i64} {
  func.func @_withbias_layernorm_kernel(%arg0: i32, %arg1: memref<256x128xf32, #tpu.memory_space<vmem>>, %arg2: memref<1x128xf32, #tpu.memory_space<vmem>>, %arg3: memref<1x128xf32, #tpu.memory_space<vmem>>, %arg4: memref<256x128xf32, #tpu.memory_space<vmem>>) attributes {dimension_semantics = [#tpu.dimension_semantics<parallel>], iteration_bounds = array<i64: 2>, scalar_prefetch = 0 : i64, scratch_operands = 0 : i64, tpu.core_type = #tpu.core_type<tc>, window_params = [{transform_indices = @transform_0, window_bounds = array<i64: 256, 128>}, {pipeline_mode = #tpu.pipeline_mode<synchronous>, transform_indices = @transform_1, window_bounds = array<i64: 1, 128>}, {pipeline_mode = #tpu.pipeline_mode<synchronous>, transform_indices = @transform_2, window_bounds = array<i64: 1, 128>}, {transform_indices = @transform_3, window_bounds = array<i64: 256, 128>}]} {
    %c0 = arith.constant 0 : index
    %c0_0 = arith.constant 0 : index
    %0 = vector.load %arg1[%c0, %c0_0] : memref<256x128xf32, #tpu.memory_space<vmem>>, vector<256x128xf32>
    %c0_1 = arith.constant 0 : index
    %c0_2 = arith.constant 0 : index
    %1 = vector.load %arg2[%c0_1, %c0_2] : memref<1x128xf32, #tpu.memory_space<vmem>>, vector<1x128xf32>
    %c0_3 = arith.constant 0 : index
    %c0_4 = arith.constant 0 : index
    %2 = vector.load %arg3[%c0_3, %c0_4] : memref<1x128xf32, #tpu.memory_space<vmem>>, vector<1x128xf32>
    %cst = arith.constant dense<0.000000e+00> : vector<256xf32>
    %3 = vector.multi_reduction <add>, %0, %cst [1] : vector<256x128xf32> to vector<256xf32>
    %4 = vector.shape_cast %3 : vector<256xf32> to vector<256x1xf32>
    %cst_5 = arith.constant 7.812500e-03 : f32
    %5 = vector.broadcast %cst_5 : f32 to vector<256x1xf32>
    %6 = arith.mulf %4, %5 : vector<256x1xf32>
    %7 = vector.broadcast %6 : vector<256x1xf32> to vector<256x128xf32>
    %8 = arith.subf %0, %7 : vector<256x128xf32>
    %9 = arith.mulf %8, %8 : vector<256x128xf32>
    %cst_6 = arith.constant dense<0.000000e+00> : vector<256xf32>
    %10 = vector.multi_reduction <add>, %9, %cst_6 [1] : vector<256x128xf32> to vector<256xf32>
    %11 = vector.shape_cast %10 : vector<256xf32> to vector<256x1xf32>
    %cst_7 = arith.constant 7.812500e-03 : f32
    %12 = vector.broadcast %cst_7 : f32 to vector<256x1xf32>
    %13 = arith.mulf %11, %12 : vector<256x1xf32>
    %cst_8 = arith.constant 9.99999974E-6 : f32
    %14 = vector.broadcast %cst_8 : f32 to vector<256x1xf32>
    %15 = arith.addf %13, %14 : vector<256x1xf32>
    %16 = math.rsqrt %15 : vector<256x1xf32>
    %17 = vector.broadcast %16 : vector<256x1xf32> to vector<256x128xf32>
    %18 = arith.mulf %8, %17 : vector<256x128xf32>
    %19 = vector.broadcast %1 : vector<1x128xf32> to vector<256x128xf32>
    %20 = arith.mulf %18, %19 : vector<256x128xf32>
    %21 = vector.broadcast %2 : vector<1x128xf32> to vector<256x128xf32>
    %22 = arith.addf %20, %21 : vector<256x128xf32>
    %c0_9 = arith.constant 0 : index
    %c0_10 = arith.constant 0 : index
    %23 = vector.load %arg4[%c0_9, %c0_10] : memref<256x128xf32, #tpu.memory_space<vmem>>, vector<256x128xf32>
    tpu.vector_store %arg4[%c0_9, %c0_10], %22 {strides = array<i32>} : memref<256x128xf32, #tpu.memory_space<vmem>>, vector<256x128xf32>,
    return
  }
  func.func @transform_0(%arg0: i32) -> (i32, i32) {
    %c0_i32 = arith.constant 0 : i32
    %c0_i32_0 = arith.constant 0 : i32
    return %arg0, %c0_i32 : i32, i32
  }
  func.func @transform_1(%arg0: i32) -> (i32, i32) {
    %c0_i32 = arith.constant 0 : i32
    %c0_i32_0 = arith.constant 0 : i32
    %c0_i32_1 = arith.constant 0 : i32
    return %c0_i32, %c0_i32_0 : i32, i32
  }
  func.func @transform_2(%arg0: i32) -> (i32, i32) {
    %c0_i32 = arith.constant 0 : i32
    %c0_i32_0 = arith.constant 0 : i32
    %c0_i32_1 = arith.constant 0 : i32
    return %c0_i32, %c0_i32_0 : i32, i32
  }
  func.func @transform_3(%arg0: i32) -> (i32, i32) {
    %c0_i32 = arith.constant 0 : i32
    %c0_i32_0 = arith.constant 0 : i32
    return %arg0, %c0_i32 : i32, i32
  }
}

module attributes {stable_mosaic.version = 11 : i64} {
  func.func @_pconv_matmul_kernel(%arg0: i32, %arg1: memref<256x128xf32, #tpu.memory_space<vmem>>, %arg2: memref<256x32xf32, #tpu.memory_space<vmem>>, %arg3: memref<128x256xf32, #tpu.memory_space<vmem>>, %arg4: memref<32x256xf32, #tpu.memory_space<vmem>>, %arg5: memref<256x256xf32, #tpu.memory_space<vmem>>) attributes {dimension_semantics = [#tpu.dimension_semantics<parallel>], iteration_bounds = array<i64: 2>, scalar_prefetch = 0 : i64, scratch_operands = 0 : i64, tpu.core_type = #tpu.core_type<tc>, window_params = [{transform_indices = @transform_0, window_bounds = array<i64: 256, 128>}, {transform_indices = @transform_1, window_bounds = array<i64: 256, 32>}, {pipeline_mode = #tpu.pipeline_mode<synchronous>, transform_indices = @transform_2, window_bounds = array<i64: 128, 256>}, {pipeline_mode = #tpu.pipeline_mode<synchronous>, transform_indices = @transform_3, window_bounds = array<i64: 32, 256>}, {transform_indices = @transform_4, window_bounds = array<i64: 256, 256>}]} {
    %c0 = arith.constant 0 : index
    %c0_0 = arith.constant 0 : index
    %0 = vector.load %arg1[%c0, %c0_0] : memref<256x128xf32, #tpu.memory_space<vmem>>, vector<256x128xf32>
    %c0_1 = arith.constant 0 : index
    %c0_2 = arith.constant 0 : index
    %1 = vector.load %arg3[%c0_1, %c0_2] : memref<128x256xf32, #tpu.memory_space<vmem>>, vector<128x256xf32>
    %cst = arith.constant dense<0.000000e+00> : vector<256x256xf32>
    %2 = tpu.matmul %0, %1, %cst {dimension_numbers = #tpu.dot_dimension_numbers<[1], [0], [0], [1], [0, 0, 1, 1], [], []>} : vector<256x128xf32>, vector<128x256xf32>, vector<256x256xf32> -> vector<256x256xf32>
    %c0_3 = arith.constant 0 : index
    %c0_4 = arith.constant 0 : index
    %3 = vector.load %arg2[%c0_3, %c0_4] : memref<256x32xf32, #tpu.memory_space<vmem>>, vector<256x32xf32>
    %c0_5 = arith.constant 0 : index
    %c0_6 = arith.constant 0 : index
    %4 = vector.load %arg4[%c0_5, %c0_6] : memref<32x256xf32, #tpu.memory_space<vmem>>, vector<32x256xf32>
    %cst_7 = arith.constant dense<0.000000e+00> : vector<256x256xf32>
    %5 = tpu.matmul %3, %4, %cst_7 {dimension_numbers = #tpu.dot_dimension_numbers<[1], [0], [0], [1], [0, 0, 1, 1], [], []>} : vector<256x32xf32>, vector<32x256xf32>, vector<256x256xf32> -> vector<256x256xf32>
    %6 = arith.addf %2, %5 : vector<256x256xf32>
    %c0_8 = arith.constant 0 : index
    %c0_9 = arith.constant 0 : index
    %7 = vector.load %arg5[%c0_8, %c0_9] : memref<256x256xf32, #tpu.memory_space<vmem>>, vector<256x256xf32>
    tpu.vector_store %arg5[%c0_8, %c0_9], %6 {strides = array<i32>} : memref<256x256xf32, #tpu.memory_space<vmem>>, vector<256x256xf32>,
    return
  }
  func.func @transform_0(%arg0: i32) -> (i32, i32) {
    %c0_i32 = arith.constant 0 : i32
    %c0_i32_0 = arith.constant 0 : i32
    return %arg0, %c0_i32 : i32, i32
  }
  func.func @transform_1(%arg0: i32) -> (i32, i32) {
    %c0_i32 = arith.constant 0 : i32
    %c0_i32_0 = arith.constant 0 : i32
    return %arg0, %c0_i32 : i32, i32
  }
  func.func @transform_2(%arg0: i32) -> (i32, i32) {
    %c0_i32 = arith.constant 0 : i32
    %c0_i32_0 = arith.constant 0 : i32
    %c0_i32_1 = arith.constant 0 : i32
    return %c0_i32, %c0_i32_0 : i32, i32
  }
  func.func @transform_3(%arg0: i32) -> (i32, i32) {
    %c0_i32 = arith.constant 0 : i32
    %c0_i32_0 = arith.constant 0 : i32
    %c0_i32_1 = arith.constant 0 : i32
    return %c0_i32, %c0_i32_0 : i32, i32
  }
  func.func @transform_4(%arg0: i32) -> (i32, i32) {
    %c0_i32 = arith.constant 0 : i32
    %c0_i32_0 = arith.constant 0 : i32
    return %arg0, %c0_i32 : i32, i32
  }
}

module attributes {stable_mosaic.version = 11 : i64} {
  func.func @_withbias_layernorm_kernel(%arg0: i32, %arg1: memref<256x128xf32, #tpu.memory_space<vmem>>, %arg2: memref<1x128xf32, #tpu.memory_space<vmem>>, %arg3: memref<1x128xf32, #tpu.memory_space<vmem>>, %arg4: memref<256x128xf32, #tpu.memory_space<vmem>>) attributes {dimension_semantics = [#tpu.dimension_semantics<parallel>], iteration_bounds = array<i64: 2>, scalar_prefetch = 0 : i64, scratch_operands = 0 : i64, tpu.core_type = #tpu.core_type<tc>, window_params = [{transform_indices = @transform_0, window_bounds = array<i64: 256, 128>}, {pipeline_mode = #tpu.pipeline_mode<synchronous>, transform_indices = @transform_1, window_bounds = array<i64: 1, 128>}, {pipeline_mode = #tpu.pipeline_mode<synchronous>, transform_indices = @transform_2, window_bounds = array<i64: 1, 128>}, {transform_indices = @transform_3, window_bounds = array<i64: 256, 128>}]} {
    %c0 = arith.constant 0 : index
    %c0_0 = arith.constant 0 : index
    %0 = vector.load %arg1[%c0, %c0_0] : memref<256x128xf32, #tpu.memory_space<vmem>>, vector<256x128xf32>
    %c0_1 = arith.constant 0 : index
    %c0_2 = arith.constant 0 : index
    %1 = vector.load %arg2[%c0_1, %c0_2] : memref<1x128xf32, #tpu.memory_space<vmem>>, vector<1x128xf32>
    %c0_3 = arith.constant 0 : index
    %c0_4 = arith.constant 0 : index
    %2 = vector.load %arg3[%c0_3, %c0_4] : memref<1x128xf32, #tpu.memory_space<vmem>>, vector<1x128xf32>
    %cst = arith.constant dense<0.000000e+00> : vector<256xf32>
    %3 = vector.multi_reduction <add>, %0, %cst [1] : vector<256x128xf32> to vector<256xf32>
    %4 = vector.shape_cast %3 : vector<256xf32> to vector<256x1xf32>
    %cst_5 = arith.constant 7.812500e-03 : f32
    %5 = vector.broadcast %cst_5 : f32 to vector<256x1xf32>
    %6 = arith.mulf %4, %5 : vector<256x1xf32>
    %7 = vector.broadcast %6 : vector<256x1xf32> to vector<256x128xf32>
    %8 = arith.subf %0, %7 : vector<256x128xf32>
    %9 = arith.mulf %8, %8 : vector<256x128xf32>
    %cst_6 = arith.constant dense<0.000000e+00> : vector<256xf32>
    %10 = vector.multi_reduction <add>, %9, %cst_6 [1] : vector<256x128xf32> to vector<256xf32>
    %11 = vector.shape_cast %10 : vector<256xf32> to vector<256x1xf32>
    %cst_7 = arith.constant 7.812500e-03 : f32
    %12 = vector.broadcast %cst_7 : f32 to vector<256x1xf32>
    %13 = arith.mulf %11, %12 : vector<256x1xf32>
    %cst_8 = arith.constant 9.99999974E-6 : f32
    %14 = vector.broadcast %cst_8 : f32 to vector<256x1xf32>
    %15 = arith.addf %13, %14 : vector<256x1xf32>
    %16 = math.rsqrt %15 : vector<256x1xf32>
    %17 = vector.broadcast %16 : vector<256x1xf32> to vector<256x128xf32>
    %18 = arith.mulf %8, %17 : vector<256x128xf32>
    %19 = vector.broadcast %1 : vector<1x128xf32> to vector<256x128xf32>
    %20 = arith.mulf %18, %19 : vector<256x128xf32>
    %21 = vector.broadcast %2 : vector<1x128xf32> to vector<256x128xf32>
    %22 = arith.addf %20, %21 : vector<256x128xf32>
    %c0_9 = arith.constant 0 : index
    %c0_10 = arith.constant 0 : index
    %23 = vector.load %arg4[%c0_9, %c0_10] : memref<256x128xf32, #tpu.memory_space<vmem>>, vector<256x128xf32>
    tpu.vector_store %arg4[%c0_9, %c0_10], %22 {strides = array<i32>} : memref<256x128xf32, #tpu.memory_space<vmem>>, vector<256x128xf32>,
    return
  }
  func.func @transform_0(%arg0: i32) -> (i32, i32) {
    %c0_i32 = arith.constant 0 : i32
    %c0_i32_0 = arith.constant 0 : i32
    return %arg0, %c0_i32 : i32, i32
  }
  func.func @transform_1(%arg0: i32) -> (i32, i32) {
    %c0_i32 = arith.constant 0 : i32
    %c0_i32_0 = arith.constant 0 : i32
    %c0_i32_1 = arith.constant 0 : i32
    return %c0_i32, %c0_i32_0 : i32, i32
  }
  func.func @transform_2(%arg0: i32) -> (i32, i32) {
    %c0_i32 = arith.constant 0 : i32
    %c0_i32_0 = arith.constant 0 : i32
    %c0_i32_1 = arith.constant 0 : i32
    return %c0_i32, %c0_i32_0 : i32, i32
  }
  func.func @transform_3(%arg0: i32) -> (i32, i32) {
    %c0_i32 = arith.constant 0 : i32
    %c0_i32_0 = arith.constant 0 : i32
    return %arg0, %c0_i32 : i32, i32
  }
}

module attributes {stable_mosaic.version = 11 : i64} {
  func.func @_pconv_matmul_kernel(%arg0: i32, %arg1: memref<256x128xf32, #tpu.memory_space<vmem>>, %arg2: memref<256x32xf32, #tpu.memory_space<vmem>>, %arg3: memref<128x128xf32, #tpu.memory_space<vmem>>, %arg4: memref<32x128xf32, #tpu.memory_space<vmem>>, %arg5: memref<256x128xf32, #tpu.memory_space<vmem>>) attributes {dimension_semantics = [#tpu.dimension_semantics<parallel>], iteration_bounds = array<i64: 2>, scalar_prefetch = 0 : i64, scratch_operands = 0 : i64, tpu.core_type = #tpu.core_type<tc>, window_params = [{transform_indices = @transform_0, window_bounds = array<i64: 256, 128>}, {transform_indices = @transform_1, window_bounds = array<i64: 256, 32>}, {pipeline_mode = #tpu.pipeline_mode<synchronous>, transform_indices = @transform_2, window_bounds = array<i64: 128, 128>}, {pipeline_mode = #tpu.pipeline_mode<synchronous>, transform_indices = @transform_3, window_bounds = array<i64: 32, 128>}, {transform_indices = @transform_4, window_bounds = array<i64: 256, 128>}]} {
    %c0 = arith.constant 0 : index
    %c0_0 = arith.constant 0 : index
    %0 = vector.load %arg1[%c0, %c0_0] : memref<256x128xf32, #tpu.memory_space<vmem>>, vector<256x128xf32>
    %c0_1 = arith.constant 0 : index
    %c0_2 = arith.constant 0 : index
    %1 = vector.load %arg3[%c0_1, %c0_2] : memref<128x128xf32, #tpu.memory_space<vmem>>, vector<128x128xf32>
    %cst = arith.constant dense<0.000000e+00> : vector<256x128xf32>
    %2 = tpu.matmul %0, %1, %cst {dimension_numbers = #tpu.dot_dimension_numbers<[1], [0], [0], [1], [0, 0, 1, 1], [], []>} : vector<256x128xf32>, vector<128x128xf32>, vector<256x128xf32> -> vector<256x128xf32>
    %c0_3 = arith.constant 0 : index
    %c0_4 = arith.constant 0 : index
    %3 = vector.load %arg2[%c0_3, %c0_4] : memref<256x32xf32, #tpu.memory_space<vmem>>, vector<256x32xf32>
    %c0_5 = arith.constant 0 : index
    %c0_6 = arith.constant 0 : index
    %4 = vector.load %arg4[%c0_5, %c0_6] : memref<32x128xf32, #tpu.memory_space<vmem>>, vector<32x128xf32>
    %cst_7 = arith.constant dense<0.000000e+00> : vector<256x128xf32>
    %5 = tpu.matmul %3, %4, %cst_7 {dimension_numbers = #tpu.dot_dimension_numbers<[1], [0], [0], [1], [0, 0, 1, 1], [], []>} : vector<256x32xf32>, vector<32x128xf32>, vector<256x128xf32> -> vector<256x128xf32>
    %6 = arith.addf %2, %5 : vector<256x128xf32>
    %c0_8 = arith.constant 0 : index
    %c0_9 = arith.constant 0 : index
    %7 = vector.load %arg5[%c0_8, %c0_9] : memref<256x128xf32, #tpu.memory_space<vmem>>, vector<256x128xf32>
    tpu.vector_store %arg5[%c0_8, %c0_9], %6 {strides = array<i32>} : memref<256x128xf32, #tpu.memory_space<vmem>>, vector<256x128xf32>,
    return
  }
  func.func @transform_0(%arg0: i32) -> (i32, i32) {
    %c0_i32 = arith.constant 0 : i32
    %c0_i32_0 = arith.constant 0 : i32
    return %arg0, %c0_i32 : i32, i32
  }
  func.func @transform_1(%arg0: i32) -> (i32, i32) {
    %c0_i32 = arith.constant 0 : i32
    %c0_i32_0 = arith.constant 0 : i32
    return %arg0, %c0_i32 : i32, i32
  }
  func.func @transform_2(%arg0: i32) -> (i32, i32) {
    %c0_i32 = arith.constant 0 : i32
    %c0_i32_0 = arith.constant 0 : i32
    %c0_i32_1 = arith.constant 0 : i32
    return %c0_i32, %c0_i32_0 : i32, i32
  }
  func.func @transform_3(%arg0: i32) -> (i32, i32) {
    %c0_i32 = arith.constant 0 : i32
    %c0_i32_0 = arith.constant 0 : i32
    %c0_i32_1 = arith.constant 0 : i32
    return %c0_i32, %c0_i32_0 : i32, i32
  }
  func.func @transform_4(%arg0: i32) -> (i32, i32) {
    %c0_i32 = arith.constant 0 : i32
    %c0_i32_0 = arith.constant 0 : i32
    return %arg0, %c0_i32 : i32, i32
  }
}

module attributes {stable_mosaic.version = 11 : i64} {
  func.func @_ffn_fused_kernel(%arg0: i32, %arg1: memref<256x128xf32, #tpu.memory_space<vmem>>, %arg2: memref<256x32xf32, #tpu.memory_space<vmem>>, %arg3: memref<256x128xf32, #tpu.memory_space<vmem>>, %arg4: memref<128x256xf32, #tpu.memory_space<vmem>>, %arg5: memref<32x256xf32, #tpu.memory_space<vmem>>, %arg6: memref<128x128xf32, #tpu.memory_space<vmem>>, %arg7: memref<256x128xf32, #tpu.memory_space<vmem>>) attributes {dimension_semantics = [#tpu.dimension_semantics<parallel>], iteration_bounds = array<i64: 2>, scalar_prefetch = 0 : i64, scratch_operands = 0 : i64, tpu.core_type = #tpu.core_type<tc>, window_params = [{transform_indices = @transform_0, window_bounds = array<i64: 256, 128>}, {transform_indices = @transform_1, window_bounds = array<i64: 256, 32>}, {transform_indices = @transform_2, window_bounds = array<i64: 256, 128>}, {pipeline_mode = #tpu.pipeline_mode<synchronous>, transform_indices = @transform_3, window_bounds = array<i64: 128, 256>}, {pipeline_mode = #tpu.pipeline_mode<synchronous>, transform_indices = @transform_4, window_bounds = array<i64: 32, 256>}, {pipeline_mode = #tpu.pipeline_mode<synchronous>, transform_indices = @transform_5, window_bounds = array<i64: 128, 128>}, {transform_indices = @transform_6, window_bounds = array<i64: 256, 128>}]} {
    %c0 = arith.constant 0 : index
    %c0_0 = arith.constant 0 : index
    %0 = vector.load %arg1[%c0, %c0_0] : memref<256x128xf32, #tpu.memory_space<vmem>>, vector<256x128xf32>
    %c0_1 = arith.constant 0 : index
    %c0_2 = arith.constant 0 : index
    %1 = vector.load %arg4[%c0_1, %c0_2] : memref<128x256xf32, #tpu.memory_space<vmem>>, vector<128x256xf32>
    %cst = arith.constant dense<0.000000e+00> : vector<256x256xf32>
    %2 = tpu.matmul %0, %1, %cst {dimension_numbers = #tpu.dot_dimension_numbers<[1], [0], [0], [1], [0, 0, 1, 1], [], []>} : vector<256x128xf32>, vector<128x256xf32>, vector<256x256xf32> -> vector<256x256xf32>
    %c0_3 = arith.constant 0 : index
    %c0_4 = arith.constant 0 : index
    %3 = vector.load %arg2[%c0_3, %c0_4] : memref<256x32xf32, #tpu.memory_space<vmem>>, vector<256x32xf32>
    %c0_5 = arith.constant 0 : index
    %c0_6 = arith.constant 0 : index
    %4 = vector.load %arg5[%c0_5, %c0_6] : memref<32x256xf32, #tpu.memory_space<vmem>>, vector<32x256xf32>
    %cst_7 = arith.constant dense<0.000000e+00> : vector<256x256xf32>
    %5 = tpu.matmul %3, %4, %cst_7 {dimension_numbers = #tpu.dot_dimension_numbers<[1], [0], [0], [1], [0, 0, 1, 1], [], []>} : vector<256x32xf32>, vector<32x256xf32>, vector<256x256xf32> -> vector<256x256xf32>
    %6 = arith.addf %2, %5 : vector<256x256xf32>
    %7 = vector.extract_strided_slice %6 {offsets = [0, 0], sizes = [256, 128], strides = [1, 1]} : vector<256x256xf32> to vector<256x128xf32>
    %cst_8 = arith.constant 5.000000e-01 : f32
    %8 = vector.broadcast %cst_8 : f32 to vector<256x128xf32>
    %9 = arith.mulf %8, %7 : vector<256x128xf32>
    %cst_9 = arith.constant 4.471500e-02 : f32
    %10 = vector.broadcast %cst_9 : f32 to vector<256x128xf32>
    %11 = arith.mulf %10, %7 : vector<256x128xf32>
    %12 = arith.mulf %11, %7 : vector<256x128xf32>
    %13 = arith.mulf %12, %7 : vector<256x128xf32>
    %14 = arith.addf %7, %13 : vector<256x128xf32>
    %cst_10 = arith.constant 0.797884583 : f32
    %15 = vector.broadcast %cst_10 : f32 to vector<256x128xf32>
    %16 = arith.mulf %15, %14 : vector<256x128xf32>
    %17 = math.tanh %16 : vector<256x128xf32>
    %cst_11 = arith.constant 1.000000e+00 : f32
    %18 = vector.broadcast %cst_11 : f32 to vector<256x128xf32>
    %19 = arith.addf %18, %17 : vector<256x128xf32>
    %20 = arith.mulf %9, %19 : vector<256x128xf32>
    %21 = vector.extract_strided_slice %6 {offsets = [0, 128], sizes = [256, 128], strides = [1, 1]} : vector<256x256xf32> to vector<256x128xf32>
    %22 = arith.mulf %20, %21 : vector<256x128xf32>
    %c0_12 = arith.constant 0 : index
    %c0_13 = arith.constant 0 : index
    %23 = vector.load %arg6[%c0_12, %c0_13] : memref<128x128xf32, #tpu.memory_space<vmem>>, vector<128x128xf32>
    %cst_14 = arith.constant dense<0.000000e+00> : vector<256x128xf32>
    %24 = tpu.matmul %22, %23, %cst_14 {dimension_numbers = #tpu.dot_dimension_numbers<[1], [0], [0], [1], [0, 0, 1, 1], [], []>} : vector<256x128xf32>, vector<128x128xf32>, vector<256x128xf32> -> vector<256x128xf32>
    %c0_15 = arith.constant 0 : index
    %c0_16 = arith.constant 0 : index
    %25 = vector.load %arg3[%c0_15, %c0_16] : memref<256x128xf32, #tpu.memory_space<vmem>>, vector<256x128xf32>
    %26 = arith.addf %25, %24 : vector<256x128xf32>
    %c0_17 = arith.constant 0 : index
    %c0_18 = arith.constant 0 : index
    %27 = vector.load %arg7[%c0_17, %c0_18] : memref<256x128xf32, #tpu.memory_space<vmem>>, vector<256x128xf32>
    tpu.vector_store %arg7[%c0_17, %c0_18], %26 {strides = array<i32>} : memref<256x128xf32, #tpu.memory_space<vmem>>, vector<256x128xf32>,
    return
  }
  func.func @transform_0(%arg0: i32) -> (i32, i32) {
    %c0_i32 = arith.constant 0 : i32
    %c0_i32_0 = arith.constant 0 : i32
    return %arg0, %c0_i32 : i32, i32
  }
  func.func @transform_1(%arg0: i32) -> (i32, i32) {
    %c0_i32 = arith.constant 0 : i32
    %c0_i32_0 = arith.constant 0 : i32
    return %arg0, %c0_i32 : i32, i32
  }
  func.func @transform_2(%arg0: i32) -> (i32, i32) {
    %c0_i32 = arith.constant 0 : i32
    %c0_i32_0 = arith.constant 0 : i32
    return %arg0, %c0_i32 : i32, i32
  }
  func.func @transform_3(%arg0: i32) -> (i32, i32) {
    %c0_i32 = arith.constant 0 : i32
    %c0_i32_0 = arith.constant 0 : i32
    %c0_i32_1 = arith.constant 0 : i32
    return %c0_i32, %c0_i32_0 : i32, i32
  }
  func.func @transform_4(%arg0: i32) -> (i32, i32) {
    %c0_i32 = arith.constant 0 : i32
    %c0_i32_0 = arith.constant 0 : i32
    %c0_i32_1 = arith.constant 0 : i32
    return %c0_i32, %c0_i32_0 : i32, i32
  }
  func.func @transform_5(%arg0: i32) -> (i32, i32) {
    %c0_i32 = arith.constant 0 : i32
    %c0_i32_0 = arith.constant 0 : i32
    %c0_i32_1 = arith.constant 0 : i32
    return %c0_i32, %c0_i32_0 : i32, i32
  }
  func.func @transform_6(%arg0: i32) -> (i32, i32) {
    %c0_i32 = arith.constant 0 : i32
    %c0_i32_0 = arith.constant 0 : i32
    return %arg0, %c0_i32 : i32, i32
  }
}

module attributes {stable_mosaic.version = 11 : i64} {
  func.func @_prior_attn_kernel(%arg0: i32, %arg1: memref<1x256x256xf32, #tpu.memory_space<vmem>>, %arg2: memref<1x256x128xf32, #tpu.memory_space<vmem>>, %arg3: memref<1x256x128xf32, #tpu.memory_space<vmem>>, %arg4: memref<128x128xf32, #tpu.memory_space<vmem>>, %arg5: memref<2xf32, #tpu.memory_space<smem>>, %arg6: memref<1x256x128xf32, #tpu.memory_space<vmem>>) attributes {dimension_semantics = [#tpu.dimension_semantics<parallel>], iteration_bounds = array<i64: 2>, scalar_prefetch = 0 : i64, scratch_operands = 0 : i64, tpu.core_type = #tpu.core_type<tc>, window_params = [{transform_indices = @transform_0, window_bounds = array<i64: 1, 256, 256>}, {transform_indices = @transform_1, window_bounds = array<i64: 1, 256, 128>}, {transform_indices = @transform_2, window_bounds = array<i64: 1, 256, 128>}, {pipeline_mode = #tpu.pipeline_mode<synchronous>, transform_indices = @transform_3, window_bounds = array<i64: 128, 128>}, {transform_indices = @transform_4, window_bounds = array<i64: 2>}, {transform_indices = @transform_5, window_bounds = array<i64: 1, 256, 128>}]} {
    %c0 = arith.constant 0 : index
    %c0_0 = arith.constant 0 : index
    %c0_1 = arith.constant 0 : index
    %0 = vector.load %arg1[%c0, %c0_0, %c0_1] : memref<1x256x256xf32, #tpu.memory_space<vmem>>, vector<1x256x256xf32>
    %1 = vector.shape_cast %0 : vector<1x256x256xf32> to vector<256x256xf32>
    %2 = vector.extract_strided_slice %1 {offsets = [0, 0], sizes = [256, 128], strides = [1, 1]} : vector<256x256xf32> to vector<256x128xf32>
    %3 = vector.extract_strided_slice %1 {offsets = [0, 128], sizes = [256, 128], strides = [1, 1]} : vector<256x256xf32> to vector<256x128xf32>
    %c0_2 = arith.constant 0 : index
    %c0_3 = arith.constant 0 : index
    %c0_4 = arith.constant 0 : index
    %4 = vector.load %arg2[%c0_2, %c0_3, %c0_4] : memref<1x256x128xf32, #tpu.memory_space<vmem>>, vector<1x256x128xf32>
    %5 = vector.shape_cast %4 : vector<1x256x128xf32> to vector<256x128xf32>
    %6 = arith.mulf %2, %2 : vector<256x128xf32>
    %cst = arith.constant dense<0.000000e+00> : vector<128xf32>
    %7 = vector.multi_reduction <add>, %6, %cst [0] : vector<256x128xf32> to vector<128xf32>
    %8 = vector.shape_cast %7 : vector<128xf32> to vector<1x128xf32>
    %cst_5 = arith.constant 1.000000e-24 : f32
    %9 = vector.broadcast %cst_5 : f32 to vector<1x128xf32>
    %10 = arith.maximumf %8, %9 : vector<1x128xf32>
    %11 = math.rsqrt %10 : vector<1x128xf32>
    %12 = vector.broadcast %11 : vector<1x128xf32> to vector<256x128xf32>
    %13 = arith.mulf %2, %12 : vector<256x128xf32>
    %14 = arith.mulf %5, %5 : vector<256x128xf32>
    %cst_6 = arith.constant dense<0.000000e+00> : vector<128xf32>
    %15 = vector.multi_reduction <add>, %14, %cst_6 [0] : vector<256x128xf32> to vector<128xf32>
    %16 = vector.shape_cast %15 : vector<128xf32> to vector<1x128xf32>
    %cst_7 = arith.constant 1.000000e-24 : f32
    %17 = vector.broadcast %cst_7 : f32 to vector<1x128xf32>
    %18 = arith.maximumf %16, %17 : vector<1x128xf32>
    %19 = math.rsqrt %18 : vector<1x128xf32>
    %20 = vector.broadcast %19 : vector<1x128xf32> to vector<256x128xf32>
    %21 = arith.mulf %5, %20 : vector<256x128xf32>
    %22 = tpu.transpose %13, [1, 0] : vector<256x128xf32> -> vector<128x256xf32>
    %23 = vector.extract_strided_slice %22 {offsets = [0, 0], sizes = [64, 256], strides = [1, 1]} : vector<128x256xf32> to vector<64x256xf32>
    %24 = vector.extract_strided_slice %21 {offsets = [0, 0], sizes = [256, 64], strides = [1, 1]} : vector<256x128xf32> to vector<256x64xf32>
    %cst_8 = arith.constant dense<0.000000e+00> : vector<64x64xf32>
    %25 = tpu.matmul %23, %24, %cst_8 {dimension_numbers = #tpu.dot_dimension_numbers<[1], [0], [0], [1], [0, 0, 1, 1], [], []>} : vector<64x256xf32>, vector<256x64xf32>, vector<64x64xf32> -> vector<64x64xf32>
    %c0_9 = arith.constant 0 : index
    %26 = memref.load %arg5[%c0_9] : memref<2xf32, #tpu.memory_space<smem>>
    %27 = vector.broadcast %26 : f32 to vector<64x64xf32>
    %28 = arith.mulf %25, %27 : vector<64x64xf32>
    %cst_10 = arith.constant dense<0xFF800000> : vector<64xf32>
    %29 = vector.multi_reduction <maximumf>, %28, %cst_10 [1] : vector<64x64xf32> to vector<64xf32>
    %30 = vector.shape_cast %29 : vector<64xf32> to vector<64x1xf32>
    %31 = vector.broadcast %30 : vector<64x1xf32> to vector<64x64xf32>
    %32 = arith.subf %28, %31 : vector<64x64xf32>
    %33 = math.exp %32 : vector<64x64xf32>
    %cst_11 = arith.constant dense<0.000000e+00> : vector<64xf32>
    %34 = vector.multi_reduction <add>, %33, %cst_11 [1] : vector<64x64xf32> to vector<64xf32>
    %35 = vector.shape_cast %34 : vector<64xf32> to vector<64x1xf32>
    %36 = tpu.reciprocal %35 {approx = true} : vector<64x1xf32> -> vector<64x1xf32>
    %37 = vector.broadcast %36 : vector<64x1xf32> to vector<64x64xf32>
    %38 = arith.mulf %33, %37 : vector<64x64xf32>
    %39 = vector.extract_strided_slice %3 {offsets = [0, 0], sizes = [256, 64], strides = [1, 1]} : vector<256x128xf32> to vector<256x64xf32>
    %cst_12 = arith.constant dense<0.000000e+00> : vector<256x64xf32>
    %40 = tpu.matmul %39, %38, %cst_12 {dimension_numbers = #tpu.dot_dimension_numbers<[1], [1], [0], [0], [0, 0, 1, 0], [], []>} : vector<256x64xf32>, vector<64x64xf32>, vector<256x64xf32> -> vector<256x64xf32>
    %41 = vector.extract_strided_slice %22 {offsets = [64, 0], sizes = [64, 256], strides = [1, 1]} : vector<128x256xf32> to vector<64x256xf32>
    %42 = vector.extract_strided_slice %21 {offsets = [0, 64], sizes = [256, 64], strides = [1, 1]} : vector<256x128xf32> to vector<256x64xf32>
    %cst_13 = arith.constant dense<0.000000e+00> : vector<64x64xf32>
    %43 = tpu.matmul %41, %42, %cst_13 {dimension_numbers = #tpu.dot_dimension_numbers<[1], [0], [0], [1], [0, 0, 1, 1], [], []>} : vector<64x256xf32>, vector<256x64xf32>, vector<64x64xf32> -> vector<64x64xf32>
    %c1 = arith.constant 1 : index
    %44 = memref.load %arg5[%c1] : memref<2xf32, #tpu.memory_space<smem>>
    %45 = vector.broadcast %44 : f32 to vector<64x64xf32>
    %46 = arith.mulf %43, %45 : vector<64x64xf32>
    %cst_14 = arith.constant dense<0xFF800000> : vector<64xf32>
    %47 = vector.multi_reduction <maximumf>, %46, %cst_14 [1] : vector<64x64xf32> to vector<64xf32>
    %48 = vector.shape_cast %47 : vector<64xf32> to vector<64x1xf32>
    %49 = vector.broadcast %48 : vector<64x1xf32> to vector<64x64xf32>
    %50 = arith.subf %46, %49 : vector<64x64xf32>
    %51 = math.exp %50 : vector<64x64xf32>
    %cst_15 = arith.constant dense<0.000000e+00> : vector<64xf32>
    %52 = vector.multi_reduction <add>, %51, %cst_15 [1] : vector<64x64xf32> to vector<64xf32>
    %53 = vector.shape_cast %52 : vector<64xf32> to vector<64x1xf32>
    %54 = tpu.reciprocal %53 {approx = true} : vector<64x1xf32> -> vector<64x1xf32>
    %55 = vector.broadcast %54 : vector<64x1xf32> to vector<64x64xf32>
    %56 = arith.mulf %51, %55 : vector<64x64xf32>
    %57 = vector.extract_strided_slice %3 {offsets = [0, 64], sizes = [256, 64], strides = [1, 1]} : vector<256x128xf32> to vector<256x64xf32>
    %cst_16 = arith.constant dense<0.000000e+00> : vector<256x64xf32>
    %58 = tpu.matmul %57, %56, %cst_16 {dimension_numbers = #tpu.dot_dimension_numbers<[1], [1], [0], [0], [0, 0, 1, 0], [], []>} : vector<256x64xf32>, vector<64x64xf32>, vector<256x64xf32> -> vector<256x64xf32>
    %59 = tpu.concatenate %40, %58 in 1 : vector<256x64xf32>, vector<256x64xf32> -> vector<256x128xf32>
    %c0_17 = arith.constant 0 : index
    %c0_18 = arith.constant 0 : index
    %60 = vector.load %arg4[%c0_17, %c0_18] : memref<128x128xf32, #tpu.memory_space<vmem>>, vector<128x128xf32>
    %cst_19 = arith.constant dense<0.000000e+00> : vector<256x128xf32>
    %61 = tpu.matmul %59, %60, %cst_19 {dimension_numbers = #tpu.dot_dimension_numbers<[1], [0], [0], [1], [0, 0, 1, 1], [], []>} : vector<256x128xf32>, vector<128x128xf32>, vector<256x128xf32> -> vector<256x128xf32>
    %c0_20 = arith.constant 0 : index
    %c0_21 = arith.constant 0 : index
    %c0_22 = arith.constant 0 : index
    %62 = vector.load %arg3[%c0_20, %c0_21, %c0_22] : memref<1x256x128xf32, #tpu.memory_space<vmem>>, vector<1x256x128xf32>
    %63 = vector.shape_cast %62 : vector<1x256x128xf32> to vector<256x128xf32>
    %64 = arith.addf %63, %61 : vector<256x128xf32>
    %c0_23 = arith.constant 0 : index
    %c0_24 = arith.constant 0 : index
    %c0_25 = arith.constant 0 : index
    %65 = vector.load %arg6[%c0_23, %c0_24, %c0_25] : memref<1x256x128xf32, #tpu.memory_space<vmem>>, vector<1x256x128xf32>
    %66 = vector.shape_cast %65 : vector<1x256x128xf32> to vector<256x128xf32>
    %67 = vector.shape_cast %64 : vector<256x128xf32> to vector<1x256x128xf32>
    tpu.vector_store %arg6[%c0_23, %c0_24, %c0_25], %67 {strides = array<i32>} : memref<1x256x128xf32, #tpu.memory_space<vmem>>, vector<1x256x128xf32>,
    return
  }
  func.func @transform_0(%arg0: i32) -> (i32, i32, i32) {
    %c0_i32 = arith.constant 0 : i32
    %c0_i32_0 = arith.constant 0 : i32
    %c0_i32_1 = arith.constant 0 : i32
    return %arg0, %c0_i32, %c0_i32_0 : i32, i32, i32
  }
  func.func @transform_1(%arg0: i32) -> (i32, i32, i32) {
    %c0_i32 = arith.constant 0 : i32
    %c0_i32_0 = arith.constant 0 : i32
    %c0_i32_1 = arith.constant 0 : i32
    return %arg0, %c0_i32, %c0_i32_0 : i32, i32, i32
  }
  func.func @transform_2(%arg0: i32) -> (i32, i32, i32) {
    %c0_i32 = arith.constant 0 : i32
    %c0_i32_0 = arith.constant 0 : i32
    %c0_i32_1 = arith.constant 0 : i32
    return %arg0, %c0_i32, %c0_i32_0 : i32, i32, i32
  }
  func.func @transform_3(%arg0: i32) -> (i32, i32) {
    %c0_i32 = arith.constant 0 : i32
    %c0_i32_0 = arith.constant 0 : i32
    %c0_i32_1 = arith.constant 0 : i32
    return %c0_i32, %c0_i32_0 : i32, i32
  }
  func.func @transform_4(%arg0: i32) -> i32 {
    %c0_i32 = arith.constant 0 : i32
    %c0_i32_0 = arith.constant 0 : i32
    return %c0_i32 : i32
  }
  func.func @transform_5(%arg0: i32) -> (i32, i32, i32) {
    %c0_i32 = arith.constant 0 : i32
    %c0_i32_0 = arith.constant 0 : i32
    %c0_i32_1 = arith.constant 0 : i32
    return %arg0, %c0_i32, %c0_i32_0 : i32, i32, i32
  }
}

</mosaic_0001>

<bundles_post_ra>
// kernel: priorformer_forward.8
= control target key start
LH: loop header
LB: loop body
LE: loop exit
PB: predicated region body
PF: predicated region fallthrough
CT: control target
= control target key end

     0   :  { %8 = vsyncpa [#allocation3], 0  ;;  %s1501_s0 = inlined_call_operand.hbm [shape: f32[512,128], index: 0, kind: input, shape index: {}]   ;;  %s1502_s1 = inlined_call_operand.vmem [shape: f32[1,128], index: 1, kind: input, shape index: {}]   ;;  %s1503_s2 = inlined_call_operand.vmem [shape: f32[1,128], index: 2, kind: input, shape index: {}]   ;;  %s1504_s3 = inlined_call_operand.vmem [shape: f32[512,128], index: 3, kind: output, shape index: {}]  }
   0x1   :  { %10 = vsyncpa [#allocation3 + $0x1], 0  ;;  %s964_s12 = smov 0   ;;  %s966_s13 = smov 0  }
   0x2   :  { %s968_s14 = smov 0   ;;  %s970_s15 = smov 0  }
   0x3 LB: > { %s754_s16 = sadd.s32 4294967295, %s939_s15   ;;  %s984_s17 = sadd.s32 1, %s939_s15   ;;  %s939_s15 = sphi %s970_s15, %s1511_s15   ;;  %s935_s14 = sphi %s968_s14, %s1510_s14   ;;  %s931_s13 = sphi %s966_s13, %s1509_s13   ;;  %s927_s12 = sphi %s964_s12, %s1508_s12  }
   0x4   : > { %s20_s18 = ssub.s32 %s939_s15, %s984_s17  ;;  %s23_s19 = sadd.s32 1, %s935_s14 }
   0x5   : > { %p21_p0 = scmp.eq.s32.totalorder %s20_s18, 0  ;;  %p30_p1 = scmp.ne.s32.totalorder %s935_s14, %s931_s13 }
   0x6   : > { %p31_p2 = scmp.eq.s32.totalorder %s939_s15, 0  ;;  %p36_p3 = scmp.ne.s32.totalorder %s931_s13, %s927_s12 }
   0x7   : > { %s994_s20 = scalar_select %p21_p0, %s935_s14, %s23_s19  }
   0x8   : > { %p32_p4 = por %p31_p2, %p30_p1  ;;  %p37_p5 = scmp.eq.s32.totalorder %s754_s16, 0 }
   0x9   : > { %p776_p6 = scmp.lt.s32.totalorder %s939_s15, 2  ;;  %s134_s22 = sand.u32 1, %s935_s14  }
   0xa   : > { %p999_p7 = por %p37_p5, %p36_p3  ;;  %s758_s23 = sshll.u32 %s134_s22, 8 }
   0xb   : > { %s769_s24 = sshll.u32 %s939_s15, 12  ;;  %s138_s28 = scalar_lea.vmem [#allocation2], %s758_s23 }
   0xc   : > { %s1008_s27 = scalar_lea.hbm %s1501_s0, %s769_s24  ;;  %s145_s29 = sshll.u32 %s138_s28, 4  ;;  %s1010_s29 = int_to_ptr.vmem [resolvable:$true] %s145_s29 }
   0xd   : > { %p1012_p8 = pnand %p776_p6, %p32_p4  ;;  %s1017_s4 = scalar_lea.sflag [#allocation3], %s134_s22 }
   0xe   : > { %s875_s5 = scalar_lea.hbm %s1008_s27, 4096  ;;  %s880_s8 = scalar_lea.hbm %s1501_s0, 8192 }
   0xf   : > { %p876_p10 = scmp.ne.s32.totalorder %s1008_s27, %s875_s5  ;;  %p877_p11 = pneg %p1012_p8 }
  0x10   : > { %p881_p0 = scmp.lt.u32.totalorder %s1008_s27, %s1501_s0  ;;  %p882_p1 = scmp.lt.u32.totalorder %s880_s8, %s875_s5 }
  0x11   : > { %p878_p12 = pnand %p877_p11, %p876_p10  ;;  %p884_p3 = scmp.lt.u32.totalorder %s875_s5, %s1008_s27 }
  0x12   : > { %p883_p2 = por %p882_p1, %p881_p0 }
  0x13   : > { %p879_p13 = pneg %p878_p12 }
  0x14   : > { %p885_p4 = por %p884_p3, %p883_p2 }
  0x16   : > { %p886_p5 = pnand %p885_p4, %p879_p13 }
  0x18   : > { %889 = shalt.err (!%p886_p5)
}
  0x19   : > { %s890_s11 = scalar_lea.vmem %s1010_s29, 4096  ;;  %s941_s12 = smov [#allocation2]  }
  0x1a   : > { %p891_p6 = scmp.ne.s32.totalorder %s1010_s29, %s890_s11  ;;  %s895_s18 = sshll.u32 %s941_s12, 4  ;;  %s896_s18 = int_to_ptr.vmem [resolvable:$false] %s895_s18 }
  0x1b   : > { %s897_s19 = scalar_lea.vmem %s896_s18, 8192  ;;  %p898_p9 = scmp.lt.s32.totalorder %s1010_s29, %s896_s18 }
  0x1c   : > { %p893_p10 = pnand %p891_p6, %p877_p11  ;;  %p899_p0 = scmp.lt.s32.totalorder %s897_s19, %s890_s11 }
  0x1e   : > { %p894_p12 = pneg %p893_p10  ;;  %p900_p1 = por %p899_p0, %p898_p9 }
  0x20   : > { %p901_p2 = pnand %p900_p1, %p894_p12 }
  0x22   : > { %904 = shalt.err (!%p901_p2)
}
  0x23   : > { %s942_s22 = smov 128   ;;  %s943_s23 = smov 8  }
  0x24   : > { %775 = dma.hbm_to_vmem [thread:$0]  (!%p1012_p8), %s1008_s27, 4096, %s1010_s29, %s1017_s4, %s942_s22, %s942_s22, %s943_s23  }
  0x25   : > { %p153_p11 = scmp.lt.s32.totalorder %s939_s15, 3  ;;  %p1507_p13 = scmp.ge.s32.totalorder %s939_s15, 1 }
  0x27   : > { %p154_p3 = pnand %p1507_p13, %p153_p11 }
  0x28   : > { %s159_s24 = sand.u32 (!%p154_p3), 1, %s931_s13  }
  0x29   : > { %157 = sbr.rel (%p154_p3) target bundleno = 426 (0x1aa), region = 32  ;;  %s762_s25 = sshll.u32 (!%p154_p3), %s159_s24, 8 }
  0x2a   : > { %s160_s26 = scalar_lea.sflag (!%p154_p3), [#allocation3], %s159_s24  ;;  %s1049_s28 = scalar_lea.vmem (!%p154_p3), [#allocation2], %s762_s25 }
  0x30   : > { %922 = dma.done.wait (%p999_p7), %s160_s26, 4096  }
  0x31   : > { %924 = vsyncadd (%p999_p7), %s160_s26, 4294963200  ;;  %v1056_v0 = vld [vmem:[%s1049_s28] sm:$0xff]  ;;  %v1059_v1 = vld [vmem:[%s1049_s28 + $0x10] sm:$0xff]  ;;  %s763_s21 = sshll.u32 %s754_s16, 5 }
  0x32   : > { %227 = vadd.xlane.f32.xlu0 %v1056_v0  ;;  %231 = vadd.xlane.f32.xlu1 %v1059_v1  ;;  %v1064_v2 = vld [vmem:[%s1049_s28 + $0x8] sm:$0xff]  ;;  %v1067_v3 = vld [vmem:[%s1049_s28 + $0x18] sm:$0xff]  ;;  %v1072_v4 = vld [vmem:[%s1049_s28 + $0x20] sm:$0xff]  ;;  %p188_p7 = scmp.lt.s32.totalorder %s763_s21, 63 }
  0x33   : > { %v1075_v5 = vld [vmem:[%s1049_s28 + $0x28] sm:$0xff]  ;;  %v1080_v6 = vld [vmem:[%s1049_s28 + $0x30] sm:$0xff]  ;;  %v1083_v7 = vld [vmem:[%s1049_s28 + $0x38] sm:$0xff] }
  0x34   : > { %v1088_v8 = vld [vmem:[%s1049_s28 + $0x40] sm:$0xff]  ;;  %v1091_v9 = vld [vmem:[%s1049_s28 + $0x48] sm:$0xff]  ;;  %v1096_v10 = vld [vmem:[%s1049_s28 + $0x50] sm:$0xff]  ;;  %s1513_s21 = smov (!%p188_p7, %s763_s21), 63 }
  0x35   : > { %v1099_v11 = vld [vmem:[%s1049_s28 + $0x58] sm:$0xff]  ;;  %v1104_v12 = vld [vmem:[%s1049_s28 + $0x60] sm:$0xff]  ;;  %v1107_v13 = vld [vmem:[%s1049_s28 + $0x68] sm:$0xff]  ;;  %s764_s27 = sshll.u32 %s1513_s21, 3 }
  0x36   : > { %229 = vadd.xlane.f32.xlu0 %v1064_v2  ;;  %233 = vadd.xlane.f32.xlu1 %v1067_v3  ;;  %v1112_v14 = vld [vmem:[%s1049_s28 + $0x70] sm:$0xff]  ;;  %v1115_v15 = vld [vmem:[%s1049_s28 + $0x78] sm:$0xff]  ;;  %v1120_v16 = vld [vmem:[%s1049_s28 + $0x80] sm:$0xff]  ;;  %s1360_s6 = scalar_lea.vmem %s1504_s3, %s764_s27 }
  0x37   : > { %v1123_v17 = vld [vmem:[%s1049_s28 + $0x88] sm:$0xff]  ;;  %v1128_v18 = vld [vmem:[%s1049_s28 + $0x90] sm:$0xff]  ;;  %v1131_v19 = vld [vmem:[%s1049_s28 + $0x98] sm:$0xff] }
  0x38   : > { %v1136_v20 = vld [vmem:[%s1049_s28 + $0xa0] sm:$0xff]  ;;  %v1139_v21 = vld [vmem:[%s1049_s28 + $0xa8] sm:$0xff]  ;;  %v1144_v22 = vld [vmem:[%s1049_s28 + $0xb0] sm:$0xff] }
  0x39   : > { %v1147_v23 = vld [vmem:[%s1049_s28 + $0xb8] sm:$0xff]  ;;  %v1152_v24 = vld [vmem:[%s1049_s28 + $0xc0] sm:$0xff]  ;;  %v1155_v25 = vld [vmem:[%s1049_s28 + $0xc8] sm:$0xff] }
  0x3a   : > { %235 = vadd.xlane.f32.xlu0 %v1072_v4  ;;  %237 = vadd.xlane.f32.xlu1 %v1075_v5  ;;  %v1160_v26 = vld [vmem:[%s1049_s28 + $0xd0] sm:$0xff]  ;;  %v1163_v27 = vld [vmem:[%s1049_s28 + $0xd8] sm:$0xff]  ;;  %v1168_v28 = vld [vmem:[%s1049_s28 + $0xe0] sm:$0xff] }
  0x3b   : > { %v1171_v29 = vld [vmem:[%s1049_s28 + $0xe8] sm:$0xff]  ;;  %v1176_v30 = vld [vmem:[%s1049_s28 + $0xf0] sm:$0xff]  ;;  %v1179_v31 = vld [vmem:[%s1049_s28 + $0xf8] sm:$0xff] }
  0x3e   : > { %239 = vadd.xlane.f32.xlu0 %v1080_v6  ;;  %241 = vadd.xlane.f32.xlu1 %v1083_v7 }
  0x42   : > { %243 = vadd.xlane.f32.xlu0 %v1088_v8  ;;  %245 = vadd.xlane.f32.xlu1 %v1091_v9 }
  0x46   : > { %247 = vadd.xlane.f32.xlu0 %v1096_v10  ;;  %249 = vadd.xlane.f32.xlu1 %v1099_v11 }
  0x4a   : > { %251 = vadd.xlane.f32.xlu0 %v1104_v12  ;;  %253 = vadd.xlane.f32.xlu1 %v1107_v13 }
  0x4e   : > { %255 = vadd.xlane.f32.xlu0 %v1112_v14  ;;  %257 = vadd.xlane.f32.xlu1 %v1115_v15 }
  0x52   : > { %259 = vadd.xlane.f32.xlu0 %v1120_v16  ;;  %261 = vadd.xlane.f32.xlu1 %v1123_v17 }
  0x56   : > { %263 = vadd.xlane.f32.xlu0 %v1128_v18  ;;  %265 = vadd.xlane.f32.xlu1 %v1131_v19 }
  0x5a   : > { %267 = vadd.xlane.f32.xlu0 %v1136_v20  ;;  %269 = vadd.xlane.f32.xlu1 %v1139_v21 }
  0x5e   : > { %271 = vadd.xlane.f32.xlu0 %v1144_v22  ;;  %273 = vadd.xlane.f32.xlu1 %v1147_v23 }
  0x62   : > { %275 = vadd.xlane.f32.xlu0 %v1152_v24  ;;  %277 = vadd.xlane.f32.xlu1 %v1155_v25 }
  0x66   : > { %279 = vadd.xlane.f32.xlu0 %v1160_v26  ;;  %281 = vadd.xlane.f32.xlu1 %v1163_v27 }
  0x6a   : > { %283 = vadd.xlane.f32.xlu0 %v1168_v28  ;;  %285 = vadd.xlane.f32.xlu1 %v1171_v29 }
  0x6e   : > { %287 = vadd.xlane.f32.xlu0 %v1176_v30  ;;  %289 = vadd.xlane.f32.xlu1 %v1179_v31 }
  0xbf   : > { %v228_v32 = vpop.xlane.xlu0 %227  ;;  %v232_v33 = vpop.xlane.xlu1 %231 }
  0xc0   : > { %v291_v34 = vmul.f32 0.0078125, %v228_v32  ;;  %v293_v35 = vmul.f32 0.0078125, %v232_v33 }
  0xc2   : > { %v1184_v36 = vsub.f32 %v1056_v0, %v291_v34  ;;  %v1187_v37 = vsub.f32 %v1059_v1, %v293_v35 }
  0xc3   : > { %v230_v38 = vpop.xlane.xlu0 %229  ;;  %v234_v39 = vpop.xlane.xlu1 %233 }
  0xc4   : > { %v292_v40 = vmul.f32 0.0078125, %v230_v38  ;;  %v355_v41 = vmul.f32 %v1184_v36, %v1184_v36  ;;  %v294_v42 = vmul.f32 0.0078125, %v234_v39  ;;  %v357_v45 = vmul.f32 %v1187_v37, %v1187_v37 }
  0xc6   : > { %v1192_v43 = vsub.f32 %v1064_v2, %v292_v40  ;;  %387 = vadd.xlane.f32.xlu0 %v355_v41  ;;  %v1195_v44 = vsub.f32 %v1067_v3, %v294_v42 }
  0xc7   : > { %v236_v46 = vpop.xlane.xlu0 %235  ;;  %v238_v47 = vpop.xlane.xlu1 %237 }
  0xc8   : > { %v295_v48 = vmul.f32 0.0078125, %v236_v46  ;;  %v356_v49 = vmul.f32 %v1192_v43, %v1192_v43  ;;  %v296_v50 = vmul.f32 0.0078125, %v238_v47  ;;  %v358_v53 = vmul.f32 %v1195_v44, %v1195_v44 }
  0xca   : > { %v1202_v51 = vsub.f32 %v1072_v4, %v295_v48  ;;  %391 = vadd.xlane.f32.xlu0 %v357_v45  ;;  %389 = vadd.xlane.f32.xlu1 %v356_v49  ;;  %v1205_v52 = vsub.f32 %v1075_v5, %v296_v50 }
  0xcb   : > { %v240_v54 = vpop.xlane.xlu0 %239  ;;  %v242_v55 = vpop.xlane.xlu1 %241 }
  0xcc   : > { %v297_v56 = vmul.f32 0.0078125, %v240_v54  ;;  %v359_v57 = vmul.f32 %v1202_v51, %v1202_v51  ;;  %v298_v58 = vmul.f32 0.0078125, %v242_v55  ;;  %v360_v61 = vmul.f32 %v1205_v52, %v1205_v52 }
  0xce   : > { %v1212_v59 = vsub.f32 %v1080_v6, %v297_v56  ;;  %393 = vadd.xlane.f32.xlu1 %v358_v53  ;;  %395 = vadd.xlane.f32.xlu0 %v359_v57  ;;  %v1215_v60 = vsub.f32 %v1083_v7, %v298_v58 }
  0xcf   : > { %v244_v62 = vpop.xlane.xlu0 %243  ;;  %v246_v63 = vpop.xlane.xlu1 %245 }
  0xd0   : > { %v299_v0 = vmul.f32 0.0078125, %v244_v62  ;;  %v361_v1 = vmul.f32 %v1212_v59, %v1212_v59  ;;  %v300_v2 = vmul.f32 0.0078125, %v246_v63  ;;  %v362_v5 = vmul.f32 %v1215_v60, %v1215_v60 }
  0xd2   : > { %v1222_v3 = vsub.f32 %v1088_v8, %v299_v0  ;;  %397 = vadd.xlane.f32.xlu1 %v360_v61  ;;  %399 = vadd.xlane.f32.xlu0 %v361_v1  ;;  %v1225_v4 = vsub.f32 %v1091_v9, %v300_v2 }
  0xd3   : > { %v248_v6 = vpop.xlane.xlu0 %247  ;;  %v250_v7 = vpop.xlane.xlu1 %249 }
  0xd4   : > { %v301_v32 = vmul.f32 0.0078125, %v248_v6  ;;  %v363_v33 = vmul.f32 %v1222_v3, %v1222_v3  ;;  %v302_v34 = vmul.f32 0.0078125, %v250_v7  ;;  %v364_v9 = vmul.f32 %v1225_v4, %v1225_v4 }
  0xd6   : > { %v1232_v35 = vsub.f32 %v1096_v10, %v301_v32  ;;  %401 = vadd.xlane.f32.xlu1 %v362_v5  ;;  %403 = vadd.xlane.f32.xlu0 %v363_v33  ;;  %v1235_v8 = vsub.f32 %v1099_v11, %v302_v34 }
  0xd7   : > { %v252_v38 = vpop.xlane.xlu0 %251  ;;  %v254_v39 = vpop.xlane.xlu1 %253 }
  0xd8   : > { %v303_v40 = vmul.f32 0.0078125, %v252_v38  ;;  %v365_v41 = vmul.f32 %v1232_v35, %v1232_v35  ;;  %v304_v42 = vmul.f32 0.0078125, %v254_v39  ;;  %v366_v11 = vmul.f32 %v1235_v8, %v1235_v8 }
  0xda   : > { %v1242_v45 = vsub.f32 %v1104_v12, %v303_v40  ;;  %405 = vadd.xlane.f32.xlu1 %v364_v9  ;;  %407 = vadd.xlane.f32.xlu0 %v365_v41  ;;  %v1245_v10 = vsub.f32 %v1107_v13, %v304_v42 }
  0xdb   : > { %v256_v46 = vpop.xlane.xlu0 %255  ;;  %v258_v47 = vpop.xlane.xlu1 %257 }
  0xdc   : > { %v305_v48 = vmul.f32 0.0078125, %v256_v46  ;;  %v367_v49 = vmul.f32 %v1242_v45, %v1242_v45  ;;  %v306_v50 = vmul.f32 0.0078125, %v258_v47  ;;  %v368_v13 = vmul.f32 %v1245_v10, %v1245_v10 }
  0xde   : > { %v1252_v53 = vsub.f32 %v1112_v14, %v305_v48  ;;  %409 = vadd.xlane.f32.xlu1 %v366_v11  ;;  %411 = vadd.xlane.f32.xlu0 %v367_v49  ;;  %v1255_v12 = vsub.f32 %v1115_v15, %v306_v50 }
  0xdf   : > { %v260_v54 = vpop.xlane.xlu0 %259  ;;  %v262_v55 = vpop.xlane.xlu1 %261 }
  0xe0   : > { %v307_v56 = vmul.f32 0.0078125, %v260_v54  ;;  %v369_v57 = vmul.f32 %v1252_v53, %v1252_v53  ;;  %v308_v58 = vmul.f32 0.0078125, %v262_v55  ;;  %v370_v15 = vmul.f32 %v1255_v12, %v1255_v12 }
  0xe2   : > { %v1262_v61 = vsub.f32 %v1120_v16, %v307_v56  ;;  %413 = vadd.xlane.f32.xlu1 %v368_v13  ;;  %415 = vadd.xlane.f32.xlu0 %v369_v57  ;;  %v1265_v14 = vsub.f32 %v1123_v17, %v308_v58 }
  0xe3   : > { %v264_v62 = vpop.xlane.xlu0 %263  ;;  %v266_v63 = vpop.xlane.xlu1 %265 }
  0xe4   : > { %v309_v0 = vmul.f32 0.0078125, %v264_v62  ;;  %v371_v1 = vmul.f32 %v1262_v61, %v1262_v61  ;;  %v310_v2 = vmul.f32 0.0078125, %v266_v63  ;;  %v372_v17 = vmul.f32 %v1265_v14, %v1265_v14 }
  0xe6   : > { %v1272_v5 = vsub.f32 %v1128_v18, %v309_v0  ;;  %417 = vadd.xlane.f32.xlu1 %v370_v15  ;;  %419 = vadd.xlane.f32.xlu0 %v371_v1  ;;  %v1275_v16 = vsub.f32 %v1131_v19, %v310_v2 }
  0xe7   : > { %v268_v6 = vpop.xlane.xlu0 %267  ;;  %v270_v7 = vpop.xlane.xlu1 %269 }
  0xe8   : > { %v311_v32 = vmul.f32 0.0078125, %v268_v6  ;;  %v373_v33 = vmul.f32 %v1272_v5, %v1272_v5  ;;  %v312_v34 = vmul.f32 0.0078125, %v270_v7  ;;  %v374_v19 = vmul.f32 %v1275_v16, %v1275_v16 }
  0xea   : > { %v1282_v9 = vsub.f32 %v1136_v20, %v311_v32  ;;  %421 = vadd.xlane.f32.xlu1 %v372_v17  ;;  %423 = vadd.xlane.f32.xlu0 %v373_v33  ;;  %v1285_v18 = vsub.f32 %v1139_v21, %v312_v34 }
  0xeb   : > { %v272_v38 = vpop.xlane.xlu0 %271  ;;  %v274_v39 = vpop.xlane.xlu1 %273 }
  0xec   : > { %v313_v40 = vmul.f32 0.0078125, %v272_v38  ;;  %v375_v41 = vmul.f32 %v1282_v9, %v1282_v9  ;;  %v314_v42 = vmul.f32 0.0078125, %v274_v39  ;;  %v376_v21 = vmul.f32 %v1285_v18, %v1285_v18 }
  0xee   : > { %v1292_v11 = vsub.f32 %v1144_v22, %v313_v40  ;;  %425 = vadd.xlane.f32.xlu1 %v374_v19  ;;  %427 = vadd.xlane.f32.xlu0 %v375_v41  ;;  %v1295_v20 = vsub.f32 %v1147_v23, %v314_v42 }
  0xef   : > { %v276_v46 = vpop.xlane.xlu0 %275  ;;  %v278_v47 = vpop.xlane.xlu1 %277 }
  0xf0   : > { %v315_v48 = vmul.f32 0.0078125, %v276_v46  ;;  %v377_v49 = vmul.f32 %v1292_v11, %v1292_v11  ;;  %v316_v50 = vmul.f32 0.0078125, %v278_v47  ;;  %v378_v23 = vmul.f32 %v1295_v20, %v1295_v20 }
  0xf2   : > { %v1302_v13 = vsub.f32 %v1152_v24, %v315_v48  ;;  %429 = vadd.xlane.f32.xlu1 %v376_v21  ;;  %431 = vadd.xlane.f32.xlu0 %v377_v49  ;;  %v1305_v22 = vsub.f32 %v1155_v25, %v316_v50 }
  0xf3   : > { %v280_v54 = vpop.xlane.xlu0 %279  ;;  %v282_v55 = vpop.xlane.xlu1 %281 }
  0xf4   : > { %v317_v56 = vmul.f32 0.0078125, %v280_v54  ;;  %v379_v57 = vmul.f32 %v1302_v13, %v1302_v13  ;;  %v318_v58 = vmul.f32 0.0078125, %v282_v55  ;;  %v380_v25 = vmul.f32 %v1305_v22, %v1305_v22 }
  0xf6   : > { %v1312_v15 = vsub.f32 %v1160_v26, %v317_v56  ;;  %433 = vadd.xlane.f32.xlu1 %v378_v23  ;;  %435 = vadd.xlane.f32.xlu0 %v379_v57  ;;  %v1315_v24 = vsub.f32 %v1163_v27, %v318_v58 }
  0xf7   : > { %v284_v62 = vpop.xlane.xlu0 %283  ;;  %v286_v63 = vpop.xlane.xlu1 %285 }
  0xf8   : > { %v319_v0 = vmul.f32 0.0078125, %v284_v62  ;;  %v381_v1 = vmul.f32 %v1312_v15, %v1312_v15  ;;  %v320_v2 = vmul.f32 0.0078125, %v286_v63  ;;  %v382_v27 = vmul.f32 %v1315_v24, %v1315_v24 }
  0xfa   : > { %v1322_v17 = vsub.f32 %v1168_v28, %v319_v0  ;;  %437 = vadd.xlane.f32.xlu1 %v380_v25  ;;  %439 = vadd.xlane.f32.xlu0 %v381_v1  ;;  %v1325_v26 = vsub.f32 %v1171_v29, %v320_v2  ;;  %v1348_v0 = vld [vmem:[%s1502_s1] ss:$0 sm:$0xff] }
  0xfb   : > { %v288_v6 = vpop.xlane.xlu0 %287  ;;  %v290_v7 = vpop.xlane.xlu1 %289 }
  0xfc   : > { %v321_v32 = vmul.f32 0.0078125, %v288_v6  ;;  %v383_v33 = vmul.f32 %v1322_v17, %v1322_v17  ;;  %v322_v34 = vmul.f32 0.0078125, %v290_v7  ;;  %v384_v29 = vmul.f32 %v1325_v26, %v1325_v26 }
  0xfe   : > { %v1332_v19 = vsub.f32 %v1176_v30, %v321_v32  ;;  %441 = vadd.xlane.f32.xlu1 %v382_v27  ;;  %443 = vadd.xlane.f32.xlu0 %v383_v33  ;;  %v1335_v28 = vsub.f32 %v1179_v31, %v322_v34  ;;  %v1354_v32 = vld [vmem:[%s1503_s2] ss:$0 sm:$0xff] }
 0x100   : > { %v385_v38 = vmul.f32 %v1332_v19, %v1332_v19  ;;  %v386_v39 = vmul.f32 %v1335_v28, %v1335_v28 }
 0x102   : > { %445 = vadd.xlane.f32.xlu1 %v384_v29  ;;  %447 = vadd.xlane.f32.xlu0 %v385_v38 }
 0x106   : > { %449 = vadd.xlane.f32.xlu1 %v386_v39 }
 0x153   : > { %v388_v40 = vpop.xlane.xlu0 %387 }
 0x154   : > { %v451_v30 = vmul.f32 0.0078125, %v388_v40 }
 0x156   : > { %v483_v41 = vadd.f32 1e-05, %v451_v30 }
 0x157   : > { %v390_v42 = vpop.xlane.xlu1 %389  ;;  %v392_v21 = vpop.xlane.xlu0 %391 }
 0x158   : > { %811 = vrsqrt.f32 %v483_v41  ;;  %v452_v31 = vmul.f32 0.0078125, %v390_v42  ;;  %v453_v46 = vmul.f32 0.0078125, %v392_v21 }
 0x15a   : > { %v484_v47 = vadd.f32 1e-05, %v452_v31  ;;  %v485_v48 = vadd.f32 1e-05, %v453_v46 }
 0x15b   : > { %v394_v49 = vpop.xlane.xlu1 %393  ;;  %v396_v50 = vpop.xlane.xlu0 %395 }
 0x15c   : > { %813 = vrsqrt.f32 %v484_v47  ;;  %v454_v23 = vmul.f32 0.0078125, %v394_v49  ;;  %v455_v54 = vmul.f32 0.0078125, %v396_v50 }
 0x15d   : > { %815 = vrsqrt.f32 %v485_v48 }
 0x15e   : > { %v486_v55 = vadd.f32 1e-05, %v454_v23  ;;  %v487_v56 = vadd.f32 1e-05, %v455_v54 }
 0x15f   : > { %v398_v57 = vpop.xlane.xlu1 %397  ;;  %v400_v58 = vpop.xlane.xlu0 %399 }
 0x160   : > { %817 = vrsqrt.f32 %v486_v55  ;;  %v456_v25 = vmul.f32 0.0078125, %v398_v57  ;;  %v457_v62 = vmul.f32 0.0078125, %v400_v58 }
 0x161   : > { %819 = vrsqrt.f32 %v487_v56 }
 0x162   : > { %v812_v63 = vpop.eup %811  ;;  %v488_v1 = vadd.f32 1e-05, %v456_v25  ;;  %v489_v2 = vadd.f32 1e-05, %v457_v62 }
 0x163   : > { %v547_v27 = vmul.f32 %v812_v63, %v1184_v36  ;;  %v402_v6 = vpop.xlane.xlu1 %401  ;;  %v404_v7 = vpop.xlane.xlu0 %403 }
 0x164   : > { %821 = vrsqrt.f32 %v488_v1  ;;  %v458_v33 = vmul.f32 0.0078125, %v402_v6  ;;  %v459_v34 = vmul.f32 0.0078125, %v404_v7 }
 0x165   : > { %v585_v29 = vmul.f32 %v1348_v0, %v547_v27  ;;  %823 = vrsqrt.f32 %v489_v2 }
 0x166   : > { %v814_v38 = vpop.eup %813  ;;  %v490_v36 = vadd.f32 1e-05, %v458_v33  ;;  %v491_v39 = vadd.f32 1e-05, %v459_v34 }
 0x167   : > { %v816_v40 = vpop.eup %815  ;;  %v623_v30 = vadd.f32 %v1354_v32, %v585_v29  ;;  %v548_v41 = vmul.f32 %v814_v38, %v1192_v43  ;;  %v406_v42 = vpop.xlane.xlu1 %405 }
 0x168   : > { %v408_v21 = vpop.xlane.xlu0 %407  ;;  %v549_v31 = vmul.f32 %v816_v40, %v1187_v37  ;;  %825 = vrsqrt.f32 %v490_v36  ;;  %v460_v46 = vmul.f32 0.0078125, %v406_v42 }
 0x169   : > { %v461_v47 = vmul.f32 0.0078125, %v408_v21  ;;  %655 = vst [vmem:[%s1360_s6] sm:$0xff] %v623_v30  ;;  %v586_v48 = vmul.f32 %v1348_v0, %v548_v41  ;;  %827 = vrsqrt.f32 %v491_v39 }
 0x16a   : > { %v818_v49 = vpop.eup %817  ;;  %v587_v50 = vmul.f32 %v1348_v0, %v549_v31  ;;  %v492_v23 = vadd.f32 1e-05, %v460_v46 }
 0x16b   : > { %v493_v54 = vadd.f32 1e-05, %v461_v47  ;;  %v820_v55 = vpop.eup %819  ;;  %v624_v43 = vadd.f32 %v1354_v32, %v586_v48  ;;  %v550_v56 = vmul.f32 %v818_v49, %v1195_v44  ;;  %v410_v37 = vpop.xlane.xlu1 %409 }
 0x16c   : > { %v412_v57 = vpop.xlane.xlu0 %411  ;;  %v625_v58 = vadd.f32 %v1354_v32, %v587_v50  ;;  %v551_v25 = vmul.f32 %v820_v55, %v1202_v51  ;;  %829 = vrsqrt.f32 %v492_v23  ;;  %v462_v62 = vmul.f32 0.0078125, %v410_v37 }
 0x16d   : > { %656 = vst [vmem:[%s1360_s6 + $0x8] sm:$0xff] %v624_v43  ;;  %v588_v63 = vmul.f32 %v1348_v0, %v550_v56  ;;  %831 = vrsqrt.f32 %v493_v54  ;;  %v463_v1 = vmul.f32 0.0078125, %v412_v57 }
 0x16e   : > { %v822_v2 = vpop.eup %821  ;;  %657 = vst [vmem:[%s1360_s6 + $0x10] sm:$0xff] %v625_v58  ;;  %v589_v27 = vmul.f32 %v1348_v0, %v551_v25  ;;  %v494_v6 = vadd.f32 1e-05, %v462_v62 }
 0x16f   : > { %v824_v44 = vpop.eup %823  ;;  %v626_v7 = vadd.f32 %v1354_v32, %v588_v63  ;;  %v552_v33 = vmul.f32 %v822_v2, %v1205_v52  ;;  %v495_v51 = vadd.f32 1e-05, %v463_v1  ;;  %v414_v34 = vpop.xlane.xlu1 %413 }
 0x170   : > { %v416_v29 = vpop.xlane.xlu0 %415  ;;  %v627_v38 = vadd.f32 %v1354_v32, %v589_v27  ;;  %v553_v36 = vmul.f32 %v824_v44, %v1212_v59  ;;  %833 = vrsqrt.f32 %v494_v6  ;;  %v464_v39 = vmul.f32 0.0078125, %v414_v34 }
 0x171   : > { %658 = vst [vmem:[%s1360_s6 + $0x18] sm:$0xff] %v626_v7  ;;  %v590_v40 = vmul.f32 %v1348_v0, %v552_v33  ;;  %835 = vrsqrt.f32 %v495_v51  ;;  %v465_v30 = vmul.f32 0.0078125, %v416_v29 }
 0x172   : > { %v826_v41 = vpop.eup %825  ;;  %659 = vst [vmem:[%s1360_s6 + $0x20] sm:$0xff] %v627_v38  ;;  %v591_v42 = vmul.f32 %v1348_v0, %v553_v36  ;;  %v496_v52 = vadd.f32 1e-05, %v464_v39 }
 0x173   : > { %v828_v21 = vpop.eup %827  ;;  %v628_v31 = vadd.f32 %v1354_v32, %v590_v40  ;;  %v554_v46 = vmul.f32 %v826_v41, %v1215_v60  ;;  %v497_v59 = vadd.f32 1e-05, %v465_v30  ;;  %v418_v47 = vpop.xlane.xlu1 %417 }
 0x174   : > { %v420_v48 = vpop.xlane.xlu0 %419  ;;  %v629_v49 = vadd.f32 %v1354_v32, %v591_v42  ;;  %v555_v50 = vmul.f32 %v828_v21, %v1222_v3  ;;  %837 = vrsqrt.f32 %v496_v52  ;;  %v466_v23 = vmul.f32 0.0078125, %v418_v47 }
 0x175   : > { %660 = vst [vmem:[%s1360_s6 + $0x28] sm:$0xff] %v628_v31  ;;  %v592_v54 = vmul.f32 %v1348_v0, %v554_v46  ;;  %839 = vrsqrt.f32 %v497_v59  ;;  %v467_v55 = vmul.f32 0.0078125, %v420_v48 }
 0x176   : > { %v830_v43 = vpop.eup %829  ;;  %661 = vst [vmem:[%s1360_s6 + $0x30] sm:$0xff] %v629_v49  ;;  %v593_v56 = vmul.f32 %v1348_v0, %v555_v50  ;;  %v498_v60 = vadd.f32 1e-05, %v466_v23 }
 0x177   : > { %v832_v37 = vpop.eup %831  ;;  %v630_v57 = vadd.f32 %v1354_v32, %v592_v54  ;;  %v556_v58 = vmul.f32 %v830_v43, %v1225_v4  ;;  %v499_v3 = vadd.f32 1e-05, %v467_v55  ;;  %v422_v25 = vpop.xlane.xlu1 %421 }
 0x178   : > { %v424_v62 = vpop.xlane.xlu0 %423  ;;  %v631_v63 = vadd.f32 %v1354_v32, %v593_v56  ;;  %v557_v1 = vmul.f32 %v832_v37, %v1232_v35  ;;  %841 = vrsqrt.f32 %v498_v60  ;;  %v468_v2 = vmul.f32 0.0078125, %v422_v25 }
 0x179   : > { %662 = vst [vmem:[%s1360_s6 + $0x38] sm:$0xff] %v630_v57  ;;  %v594_v27 = vmul.f32 %v1348_v0, %v556_v58  ;;  %843 = vrsqrt.f32 %v499_v3  ;;  %v469_v6 = vmul.f32 0.0078125, %v424_v62 }
 0x17a   : > { %v834_v44 = vpop.eup %833  ;;  %663 = vst [vmem:[%s1360_s6 + $0x40] sm:$0xff] %v631_v63  ;;  %v595_v7 = vmul.f32 %v1348_v0, %v557_v1  ;;  %v500_v4 = vadd.f32 1e-05, %v468_v2 }
 0x17b   : > { %v836_v33 = vpop.eup %835  ;;  %v632_v51 = vadd.f32 %v1354_v32, %v594_v27  ;;  %v558_v34 = vmul.f32 %v834_v44, %v1235_v8  ;;  %v501_v35 = vadd.f32 1e-05, %v469_v6  ;;  %v426_v29 = vpop.xlane.xlu1 %425 }
 0x17c   : > { %v428_v38 = vpop.xlane.xlu0 %427  ;;  %v633_v36 = vadd.f32 %v1354_v32, %v595_v7  ;;  %v559_v39 = vmul.f32 %v836_v33, %v1242_v45  ;;  %845 = vrsqrt.f32 %v500_v4  ;;  %v470_v40 = vmul.f32 0.0078125, %v426_v29 }
 0x17d   : > { %664 = vst [vmem:[%s1360_s6 + $0x48] sm:$0xff] %v632_v51  ;;  %v596_v30 = vmul.f32 %v1348_v0, %v558_v34  ;;  %847 = vrsqrt.f32 %v501_v35  ;;  %v471_v41 = vmul.f32 0.0078125, %v428_v38 }
 0x17e   : > { %v838_v42 = vpop.eup %837  ;;  %665 = vst [vmem:[%s1360_s6 + $0x50] sm:$0xff] %v633_v36  ;;  %v597_v52 = vmul.f32 %v1348_v0, %v559_v39  ;;  %v502_v8 = vadd.f32 1e-05, %v470_v40 }
 0x17f   : > { %v840_v21 = vpop.eup %839  ;;  %v634_v31 = vadd.f32 %v1354_v32, %v596_v30  ;;  %v560_v46 = vmul.f32 %v838_v42, %v1245_v10  ;;  %v503_v45 = vadd.f32 1e-05, %v471_v41  ;;  %v430_v59 = vpop.xlane.xlu1 %429 }
 0x180   : > { %v432_v47 = vpop.xlane.xlu0 %431  ;;  %v635_v48 = vadd.f32 %v1354_v32, %v597_v52  ;;  %v561_v49 = vmul.f32 %v840_v21, %v1252_v53  ;;  %849 = vrsqrt.f32 %v502_v8  ;;  %v472_v50 = vmul.f32 0.0078125, %v430_v59 }
 0x181   : > { %666 = vst [vmem:[%s1360_s6 + $0x58] sm:$0xff] %v634_v31  ;;  %v598_v23 = vmul.f32 %v1348_v0, %v560_v46  ;;  %851 = vrsqrt.f32 %v503_v45  ;;  %v473_v54 = vmul.f32 0.0078125, %v432_v47 }
 0x182   : > { %v842_v55 = vpop.eup %841  ;;  %667 = vst [vmem:[%s1360_s6 + $0x60] sm:$0xff] %v635_v48  ;;  %v599_v43 = vmul.f32 %v1348_v0, %v561_v49  ;;  %v504_v10 = vadd.f32 1e-05, %v472_v50 }
 0x183   : > { %v844_v56 = vpop.eup %843  ;;  %v636_v60 = vadd.f32 %v1354_v32, %v598_v23  ;;  %v562_v37 = vmul.f32 %v842_v55, %v1255_v12  ;;  %v505_v53 = vadd.f32 1e-05, %v473_v54  ;;  %v434_v57 = vpop.xlane.xlu1 %433 }
 0x184   : > { %v436_v58 = vpop.xlane.xlu0 %435  ;;  %v637_v3 = vadd.f32 %v1354_v32, %v599_v43  ;;  %v563_v25 = vmul.f32 %v844_v56, %v1262_v61  ;;  %853 = vrsqrt.f32 %v504_v10  ;;  %v474_v62 = vmul.f32 0.0078125, %v434_v57 }
 0x185   : > { %668 = vst [vmem:[%s1360_s6 + $0x68] sm:$0xff] %v636_v60  ;;  %v600_v63 = vmul.f32 %v1348_v0, %v562_v37  ;;  %855 = vrsqrt.f32 %v505_v53  ;;  %v475_v1 = vmul.f32 0.0078125, %v436_v58 }
 0x186   : > { %v846_v2 = vpop.eup %845  ;;  %669 = vst [vmem:[%s1360_s6 + $0x70] sm:$0xff] %v637_v3  ;;  %v601_v27 = vmul.f32 %v1348_v0, %v563_v25  ;;  %v506_v12 = vadd.f32 1e-05, %v474_v62 }
 0x187   : > { %v848_v6 = vpop.eup %847  ;;  %v638_v44 = vadd.f32 %v1354_v32, %v600_v63  ;;  %v564_v7 = vmul.f32 %v846_v2, %v1265_v14  ;;  %v507_v61 = vadd.f32 1e-05, %v475_v1  ;;  %v438_v4 = vpop.xlane.xlu1 %437 }
 0x188   : > { %v440_v33 = vpop.xlane.xlu0 %439  ;;  %v639_v51 = vadd.f32 %v1354_v32, %v601_v27  ;;  %v565_v34 = vmul.f32 %v848_v6, %v1272_v5  ;;  %857 = vrsqrt.f32 %v506_v12  ;;  %v476_v35 = vmul.f32 0.0078125, %v438_v4 }
 0x189   : > { %670 = vst [vmem:[%s1360_s6 + $0x78] sm:$0xff] %v638_v44  ;;  %v602_v29 = vmul.f32 %v1348_v0, %v564_v7  ;;  %859 = vrsqrt.f32 %v507_v61  ;;  %v477_v38 = vmul.f32 0.0078125, %v440_v33 }
 0x18a   : > { %v850_v36 = vpop.eup %849  ;;  %671 = vst [vmem:[%s1360_s6 + $0x80] sm:$0xff] %v639_v51  ;;  %v603_v39 = vmul.f32 %v1348_v0, %v565_v34  ;;  %v508_v14 = vadd.f32 1e-05, %v476_v35 }
 0x18b   : > { %v852_v40 = vpop.eup %851  ;;  %v640_v30 = vadd.f32 %v1354_v32, %v602_v29  ;;  %v566_v41 = vmul.f32 %v850_v36, %v1275_v16  ;;  %v509_v5 = vadd.f32 1e-05, %v477_v38  ;;  %v442_v42 = vpop.xlane.xlu1 %441 }
 0x18c   : > { %v444_v52 = vpop.xlane.xlu0 %443  ;;  %v641_v8 = vadd.f32 %v1354_v32, %v603_v39  ;;  %v567_v21 = vmul.f32 %v852_v40, %v1282_v9  ;;  %861 = vrsqrt.f32 %v508_v14  ;;  %v478_v31 = vmul.f32 0.0078125, %v442_v42 }
 0x18d   : > { %672 = vst [vmem:[%s1360_s6 + $0x88] sm:$0xff] %v640_v30  ;;  %v604_v46 = vmul.f32 %v1348_v0, %v566_v41  ;;  %863 = vrsqrt.f32 %v509_v5  ;;  %v479_v45 = vmul.f32 0.0078125, %v444_v52 }
 0x18e   : > { %v854_v59 = vpop.eup %853  ;;  %673 = vst [vmem:[%s1360_s6 + $0x90] sm:$0xff] %v641_v8  ;;  %v605_v47 = vmul.f32 %v1348_v0, %v567_v21  ;;  %v510_v16 = vadd.f32 1e-05, %v478_v31 }
 0x18f   : > { %v856_v48 = vpop.eup %855  ;;  %v642_v49 = vadd.f32 %v1354_v32, %v604_v46  ;;  %v568_v50 = vmul.f32 %v854_v59, %v1285_v18  ;;  %v511_v9 = vadd.f32 1e-05, %v479_v45  ;;  %v446_v23 = vpop.xlane.xlu1 %445 }
 0x190   : > { %v448_v54 = vpop.xlane.xlu0 %447  ;;  %v643_v55 = vadd.f32 %v1354_v32, %v605_v47  ;;  %v569_v43 = vmul.f32 %v856_v48, %v1292_v11  ;;  %865 = vrsqrt.f32 %v510_v16  ;;  %v480_v10 = vmul.f32 0.0078125, %v446_v23 }
 0x191   : > { %674 = vst [vmem:[%s1360_s6 + $0x98] sm:$0xff] %v642_v49  ;;  %v606_v56 = vmul.f32 %v1348_v0, %v568_v50  ;;  %867 = vrsqrt.f32 %v511_v9  ;;  %v481_v60 = vmul.f32 0.0078125, %v448_v54 }
 0x192   : > { %v858_v37 = vpop.eup %857  ;;  %675 = vst [vmem:[%s1360_s6 + $0xa0] sm:$0xff] %v643_v55  ;;  %v607_v18 = vmul.f32 %v1348_v0, %v569_v43  ;;  %v512_v53 = vadd.f32 1e-05, %v480_v10 }
 0x193   : > { %v860_v57 = vpop.eup %859  ;;  %v644_v58 = vadd.f32 %v1354_v32, %v606_v56  ;;  %v570_v3 = vmul.f32 %v858_v37, %v1295_v20  ;;  %v513_v11 = vadd.f32 1e-05, %v481_v60  ;;  %v450_v25 = vpop.xlane.xlu1 %449 }
 0x194   : > { %v645_v62 = vadd.f32 %v1354_v32, %v607_v18  ;;  %v571_v63 = vmul.f32 %v860_v57, %v1302_v13  ;;  %869 = vrsqrt.f32 %v512_v53  ;;  %v482_v1 = vmul.f32 0.0078125, %v450_v25 }
 0x195   : > { %676 = vst [vmem:[%s1360_s6 + $0xa8] sm:$0xff] %v644_v58  ;;  %v608_v2 = vmul.f32 %v1348_v0, %v570_v3  ;;  %871 = vrsqrt.f32 %v513_v11 }
 0x196   : > { %v862_v27 = vpop.eup %861  ;;  %677 = vst [vmem:[%s1360_s6 + $0xb0] sm:$0xff] %v645_v62  ;;  %v609_v12 = vmul.f32 %v1348_v0, %v571_v63  ;;  %v514_v6 = vadd.f32 1e-05, %v482_v1 }
 0x197   : > { %v864_v20 = vpop.eup %863  ;;  %v646_v44 = vadd.f32 %v1354_v32, %v608_v2  ;;  %v572_v7 = vmul.f32 %v862_v27, %v1305_v22 }
 0x198   : > { %v647_v13 = vadd.f32 %v1354_v32, %v609_v12  ;;  %v573_v61 = vmul.f32 %v864_v20, %v1312_v15  ;;  %873 = vrsqrt.f32 %v514_v6 }
 0x199   : > { %678 = vst [vmem:[%s1360_s6 + $0xb8] sm:$0xff] %v646_v44  ;;  %v610_v4 = vmul.f32 %v1348_v0, %v572_v7 }
 0x19a   : > { %v866_v33 = vpop.eup %865  ;;  %679 = vst [vmem:[%s1360_s6 + $0xc0] sm:$0xff] %v647_v13  ;;  %v611_v51 = vmul.f32 %v1348_v0, %v573_v61 }
 0x19b   : > { %v868_v34 = vpop.eup %867  ;;  %v648_v35 = vadd.f32 %v1354_v32, %v610_v4  ;;  %v574_v29 = vmul.f32 %v866_v33, %v1315_v24 }
 0x19c   : > { %v649_v22 = vadd.f32 %v1354_v32, %v611_v51  ;;  %v575_v38 = vmul.f32 %v868_v34, %v1322_v17 }
 0x19d   : > { %680 = vst [vmem:[%s1360_s6 + $0xc8] sm:$0xff] %v648_v35  ;;  %v612_v15 = vmul.f32 %v1348_v0, %v574_v29 }
 0x19e   : > { %v870_v36 = vpop.eup %869  ;;  %681 = vst [vmem:[%s1360_s6 + $0xd0] sm:$0xff] %v649_v22  ;;  %v613_v39 = vmul.f32 %v1348_v0, %v575_v38 }
 0x19f   : > { %v872_v14 = vpop.eup %871  ;;  %v650_v40 = vadd.f32 %v1354_v32, %v612_v15  ;;  %v576_v24 = vmul.f32 %v870_v36, %v1325_v26 }
 0x1a0   : > { %v651_v30 = vadd.f32 %v1354_v32, %v613_v39  ;;  %v577_v41 = vmul.f32 %v872_v14, %v1332_v19 }
 0x1a1   : > { %682 = vst [vmem:[%s1360_s6 + $0xd8] sm:$0xff] %v650_v40  ;;  %v614_v17 = vmul.f32 %v1348_v0, %v576_v24 }
 0x1a2   : > { %v874_v5 = vpop.eup %873  ;;  %683 = vst [vmem:[%s1360_s6 + $0xe0] sm:$0xff] %v651_v30  ;;  %v615_v42 = vmul.f32 %v1348_v0, %v577_v41 }
 0x1a3   : > { %v652_v52 = vadd.f32 %v1354_v32, %v614_v17  ;;  %v578_v8 = vmul.f32 %v874_v5, %v1335_v28 }
 0x1a4   : > { %v653_v21 = vadd.f32 %v1354_v32, %v615_v42 }
 0x1a5   : > { %684 = vst [vmem:[%s1360_s6 + $0xe8] sm:$0xff] %v652_v52  ;;  %v616_v26 = vmul.f32 %v1348_v0, %v578_v8 }
 0x1a6   : > { %685 = vst [vmem:[%s1360_s6 + $0xf0] sm:$0xff] %v653_v21 }
 0x1a7   : > { %v654_v31 = vadd.f32 %v1354_v32, %v616_v26 }
 0x1a9   : > { %686 = vst [vmem:[%s1360_s6 + $0xf8] sm:$0xff] %v654_v31 }
 0x1aa PF: > { %p13_p8 = scmp.ge.s32.totalorder %s984_s17, 4   ;;  %s1508_s12 = smov %s931_s13 }
 0x1ab   : > { %s1509_s13 = smov %s935_s14  ;;  %s1510_s14 = smov %s994_s20 }
 0x1ac   : > { %s1511_s15 = smov %s984_s17  ;;  %15 = sbr.rel (!%p13_p8) target bundleno = 3 (0x3), region = 72 }
 0x1b3   :  { %709 = vsyncpa [#allocation3], 1 }
 0x1b4   :  { %711 = vsyncpa [#allocation3 + $0x1], 1 }

// kernel: priorformer_forward.9
= control target key start
LH: loop header
LB: loop body
LE: loop exit
PB: predicated region body
PF: predicated region fallthrough
CT: control target
= control target key end

     0   :  { %s1284_s15 = smov 0   ;;  %s1662_s0 = inlined_call_operand.vmem [shape: f32[512,128], index: 0, kind: input, shape index: {}]   ;;  %s1663_s1 = inlined_call_operand.vmem [shape: f32[512,32], index: 1, kind: input, shape index: {}]   ;;  %s1664_s2 = inlined_call_operand.vmem [shape: f32[128,256], index: 2, kind: input, shape index: {}]   ;;  %s1665_s3 = inlined_call_operand.vmem [shape: f32[32,256], index: 3, kind: input, shape index: {}]   ;;  %s1666_s4 = inlined_call_operand.vmem [shape: f32[512,256], index: 4, kind: output, shape index: {}]  }
   0x1 LB: > { %s1074_s16 = sadd.s32 4294967295, %s1256_s15   ;;  %p1078_p0 = scmp.ge.s32.totalorder %s1256_s15, 1  ;;  %s1256_s15 = sphi %s1284_s15, %s14_s15  }
   0x2   : > { %p174_p1 = scmp.lt.s32.totalorder %s1256_s15, 3 }
   0x4   : > { %p175_p2 = pnand %p1078_p0, %p174_p1 }
   0x5   : > { %v322_v0 = vld [vmem:[%s1665_s3 + $0x8] sm:$0xff] (!%p175_p2)  ;;  %v324_v1 = vld [vmem:[%s1665_s3 + $0x18] sm:$0xff] (!%p175_p2)  ;;  %s1079_s23 = sshll.u32 (!%p175_p2), %s1074_s16, 5  ;;  %v321_v5 = vld [vmem:[%s1665_s3] sm:$0xff] (!%p175_p2)  ;;  %v1258_v7 = vmov (!%p175_p2), 0.0   ;;  %vm329_vm0 = vcmask (!%p175_p2), 261120  }
   0x6   : > { %178 = sbr.rel (%p175_p2) target bundleno = 370 (0x172), region = 36  ;;  %v258_v2 = vld [vmem:[%s1664_s2 + $0x8] sm:$0xff] (!%p175_p2)  ;;  %v1121_v3 = vpack.c.bf16 (!%p175_p2), %v324_v1, %v322_v0  ;;  %v260_v4 = vld [vmem:[%s1664_s2 + $0x18] sm:$0xff] (!%p175_p2)  ;;  %v323_v6 = vld [vmem:[%s1665_s3 + $0x10] sm:$0xff] (!%p175_p2)  ;;  %490 = vmatprep.mubr.f32.mxu0 (!%p175_p2), %v1258_v7  ;;  %p207_p3 = scmp.lt.s32.totalorder (!%p175_p2), %s1079_s23, 63  ;;  %765 = vmatprep.mubr.f32.mxu1 (!%p175_p2), %v1258_v7 }
   0x7   : > { %v1129_v8 = vpack.c.bf16 (!%p175_p2), %v260_v4, %v258_v2  ;;  %v1123_v9 = vpack.c.bf16 (!%p175_p2), %v323_v6, %v321_v5  ;;  %v257_v10 = vld [vmem:[%s1664_s2] sm:$0xff] (!%p175_p2)  ;;  %v259_v11 = vld [vmem:[%s1664_s2 + $0x10] sm:$0xff] (!%p175_p2)  ;;  %v326_v12 = vld [vmem:[%s1665_s3 + $0x28] sm:$0xff] (!%p175_p2) }
   0x8   : > { %1122 = vmatprep.subr.bf16.mxu0 (!%p175_p2), %v1121_v3  ;;  %v1131_v13 = vpack.c.bf16 (!%p175_p2), %v259_v11, %v257_v10  ;;  %v328_v14 = vld [vmem:[%s1665_s3 + $0x38] sm:$0xff] (!%p175_p2)  ;;  %v262_v15 = vld [vmem:[%s1664_s2 + $0x28] sm:$0xff] (!%p175_p2)  ;;  %v325_v19 = vld [vmem:[%s1665_s3 + $0x20] sm:$0xff] (!%p175_p2) }
   0x9   : > { %v264_v16 = vld [vmem:[%s1664_s2 + $0x38] sm:$0xff] (!%p175_p2)  ;;  %1161 = vmatprep.subr.bf16.mxu1 (!%p175_p2), %v1129_v8  ;;  %1124 = vmatpush1.bf16.msra.mxu0 (!%p175_p2), %v1123_v9  ;;  %v1125_v17 = vpack.c.bf16 (!%p175_p2), %v328_v14, %v326_v12  ;;  %v327_v20 = vld [vmem:[%s1665_s3 + $0x30] sm:$0xff] (!%p175_p2)  ;;  %v261_v21 = vld [vmem:[%s1664_s2 + $0x20] sm:$0xff] (!%p175_p2) }
   0xa   : > { %v1133_v18 = vpack.c.bf16 (!%p175_p2), %v264_v16, %v262_v15  ;;  %1169 = vmatpush1.bf16.msra.mxu1 (!%p175_p2), %v1131_v13  ;;  %v1127_v22 = vpack.c.bf16 (!%p175_p2), %v327_v20, %v325_v19  ;;  %v263_v23 = vld [vmem:[%s1664_s2 + $0x30] sm:$0xff] (!%p175_p2)  ;;  %v266_v24 = vld [vmem:[%s1664_s2 + $0x48] sm:$0xff] (!%p175_p2)  ;;  %v268_v25 = vld [vmem:[%s1664_s2 + $0x58] sm:$0xff] (!%p175_p2) }
   0xb   : > { %1126 = vmatprep.subr.bf16.mxu0 (!%p175_p2), %v1125_v17  ;;  %v1135_v26 = vpack.c.bf16 (!%p175_p2), %v263_v23, %v261_v21  ;;  %v1137_v27 = vpack.c.bf16 (!%p175_p2), %v268_v25, %v266_v24  ;;  %v265_v28 = vld [vmem:[%s1664_s2 + $0x40] sm:$0xff] (!%p175_p2)  ;;  %v267_v29 = vld [vmem:[%s1664_s2 + $0x50] sm:$0xff] (!%p175_p2)  ;;  %v270_v30 = vld [vmem:[%s1664_s2 + $0x68] sm:$0xff] (!%p175_p2) }
   0xc   : > { %1162 = vmatprep.subr.bf16.mxu1 (!%p175_p2), %v1133_v18  ;;  %v272_v31 = vld [vmem:[%s1664_s2 + $0x78] sm:$0xff] (!%p175_p2)  ;;  %v1139_v33 = vpack.c.bf16 (!%p175_p2), %v267_v29, %v265_v28  ;;  %v269_v35 = vld [vmem:[%s1664_s2 + $0x60] sm:$0xff] (!%p175_p2)  ;;  %v271_v36 = vld [vmem:[%s1664_s2 + $0x70] sm:$0xff] (!%p175_p2) }
   0xd   : > { %s1668_s23 = smov (!%p207_p3, %s1079_s23), 63  ;;  %1128 = vmatpush1.bf16.msra.mxu0 %v1127_v22  ;;  %v1141_v34 = vpack.c.bf16 %v272_v31, %v270_v30  ;;  %v274_v37 = vld [vmem:[%s1664_s2 + $0x88] sm:$0xff]  ;;  %v276_v38 = vld [vmem:[%s1664_s2 + $0x98] sm:$0xff]  ;;  %v1143_v40 = vpack.c.bf16 %v271_v36, %v269_v35  ;;  %v273_v42 = vld [vmem:[%s1664_s2 + $0x80] sm:$0xff] }
   0xe   : > { %s1080_s26 = sshll.u32 %s1668_s23, 3  ;;  %1170 = vmatpush1.bf16.msra.mxu1 %v1135_v26  ;;  %1130 = vmatprep.subr.bf16.mxu0 %v1129_v8  ;;  %v1145_v41 = vpack.c.bf16 %v276_v38, %v274_v37  ;;  %v275_v43 = vld [vmem:[%s1664_s2 + $0x90] sm:$0xff]  ;;  %v278_v44 = vld [vmem:[%s1664_s2 + $0xa8] sm:$0xff]  ;;  %v280_v45 = vld [vmem:[%s1664_s2 + $0xb8] sm:$0xff] }
   0xf   : > { %s1356_s7 = scalar_lea.vmem %s1663_s1, %s1080_s26  ;;  %1163 = vmatprep.subr.bf16.mxu1 %v1137_v27  ;;  %v1147_v47 = vpack.c.bf16 %v275_v43, %v273_v42  ;;  %v1149_v48 = vpack.c.bf16 %v280_v45, %v278_v44  ;;  %v277_v49 = vld [vmem:[%s1664_s2 + $0xa0] sm:$0xff]  ;;  %v279_v50 = vld [vmem:[%s1664_s2 + $0xb0] sm:$0xff]  ;;  %v282_v51 = vld [vmem:[%s1664_s2 + $0xc8] sm:$0xff]  ;;  %s1445_s10 = scalar_lea.vmem %s1662_s0, %s1080_s26 }
  0x10   : > { %v289_v32 = vld [vmem:[%s1356_s7] sm:$0xff]  ;;  %v290_v39 = vld [vmem:[%s1356_s7 + $0x8] sm:$0xff]  ;;  %v291_v46 = vld [vmem:[%s1356_s7 + $0x10] sm:$0xff]  ;;  %v1151_v54 = vpack.c.bf16 %v279_v50, %v277_v49  ;;  %s1120_s26 = sshll.u32 %s1668_s23, 4 }
  0x11   : > { %1086 = vmatmul.mubr.msk.f32.vlgmr.msra.gmra.mrb[0].mxu0 %vm329_vm0, %v289_v32  ;;  %v284_v52 = vld [vmem:[%s1664_s2 + $0xd8] sm:$0xff]  ;;  %v281_v56 = vld [vmem:[%s1664_s2 + $0xc0] sm:$0xff]  ;;  %v283_v57 = vld [vmem:[%s1664_s2 + $0xd0] sm:$0xff]  ;;  %s1593_s12 = scalar_lea.vmem %s1666_s4, %s1120_s26 }
  0x12   : > { %1132 = vmatpush1.bf16.msra.mxu0 %v1131_v13  ;;  %496 = vmatprep.mubr.f32.mxu0 %v1258_v7  ;;  %v292_v53 = vld [vmem:[%s1356_s7 + $0x18] sm:$0xff]  ;;  %v1153_v55 = vpack.c.bf16 %v284_v52, %v282_v51  ;;  %v286_v58 = vld [vmem:[%s1664_s2 + $0xe8] sm:$0xff]  ;;  %v293_v60 = vld [vmem:[%s1356_s7 + $0x20] sm:$0xff]  ;;  %v1155_v61 = vpack.c.bf16 %v283_v57, %v281_v56 }
  0x13   : > { %1171 = vmatpush1.bf16.msra.mxu1 %v1139_v33  ;;  %1134 = vmatprep.subr.bf16.mxu0 %v1133_v18  ;;  %v288_v59 = vld [vmem:[%s1664_s2 + $0xf8] sm:$0xff]  ;;  %v285_v63 = vld [vmem:[%s1664_s2 + $0xe0] sm:$0xff]  ;;  %v287_v0 = vld [vmem:[%s1664_s2 + $0xf0] sm:$0xff] }
  0x14   : > { %1164 = vmatprep.subr.bf16.mxu1 %v1141_v34  ;;  %v1157_v62 = vpack.c.bf16 %v288_v59, %v286_v58  ;;  %v294_v1 = vld [vmem:[%s1356_s7 + $0x28] sm:$0xff]  ;;  %v1159_v2 = vpack.c.bf16 %v287_v0, %v285_v63  ;;  %v295_v3 = vld [vmem:[%s1356_s7 + $0x30] sm:$0xff]  ;;  %v228_v4 = vld [vmem:[%s1445_s10 + $0x18] sm:$0xff] }
  0x15   : > { %1087 = vmatmul.mubr.msk.f32.gmra.mrb[2].mxu0 %vm329_vm0, %v290_v39  ;;  %v296_v5 = vld [vmem:[%s1356_s7 + $0x38] sm:$0xff]  ;;  %v229_v6 = vld [vmem:[%s1445_s10 + $0x20] sm:$0xff]  ;;  %v230_v9 = vld [vmem:[%s1445_s10 + $0x28] sm:$0xff] }
  0x16   : > { %502 = vmatprep.mubr.f32.mxu0 %v1258_v7  ;;  %1136 = vmatpush1.bf16.msra.mxu0 %v1135_v26  ;;  %v297_v8 = vld [vmem:[%s1356_s7 + $0x40] sm:$0xff]  ;;  %v298_v10 = vld [vmem:[%s1356_s7 + $0x48] sm:$0xff]  ;;  %v231_v11 = vld [vmem:[%s1445_s10 + $0x30] sm:$0xff] }
  0x17   : > { %1172 = vmatpush1.bf16.msra.mxu1 %v1143_v40  ;;  %1138 = vmatprep.subr.bf16.mxu0 %v1137_v27  ;;  %v299_v12 = vld [vmem:[%s1356_s7 + $0x50] sm:$0xff]  ;;  %v232_v13 = vld [vmem:[%s1445_s10 + $0x38] sm:$0xff]  ;;  %v233_v15 = vld [vmem:[%s1445_s10 + $0x40] sm:$0xff] }
  0x18   : > { %1165 = vmatprep.subr.bf16.mxu1 %v1145_v41  ;;  %v300_v14 = vld [vmem:[%s1356_s7 + $0x58] sm:$0xff]  ;;  %v301_v16 = vld [vmem:[%s1356_s7 + $0x60] sm:$0xff]  ;;  %v234_v17 = vld [vmem:[%s1445_s10 + $0x48] sm:$0xff] }
  0x19   : > { %1088 = vmatmul.mubr.msk.f32.gmra.mrb[4].mxu0 %vm329_vm0, %v291_v46  ;;  %v302_v18 = vld [vmem:[%s1356_s7 + $0x68] sm:$0xff]  ;;  %v235_v19 = vld [vmem:[%s1445_s10 + $0x50] sm:$0xff]  ;;  %v236_v21 = vld [vmem:[%s1445_s10 + $0x58] sm:$0xff] }
  0x1a   : > { %508 = vmatprep.mubr.f32.mxu0 %v1258_v7  ;;  %1140 = vmatpush1.bf16.msra.mxu0 %v1139_v33  ;;  %v303_v20 = vld [vmem:[%s1356_s7 + $0x70] sm:$0xff]  ;;  %v304_v22 = vld [vmem:[%s1356_s7 + $0x78] sm:$0xff]  ;;  %v237_v23 = vld [vmem:[%s1445_s10 + $0x60] sm:$0xff] }
  0x1b   : > { %1173 = vmatpush1.bf16.msra.mxu1 %v1147_v47  ;;  %1142 = vmatprep.subr.bf16.mxu0 %v1141_v34  ;;  %v305_v24 = vld [vmem:[%s1356_s7 + $0x80] sm:$0xff]  ;;  %v238_v25 = vld [vmem:[%s1445_s10 + $0x68] sm:$0xff]  ;;  %v239_v27 = vld [vmem:[%s1445_s10 + $0x70] sm:$0xff] }
  0x1c   : > { %1166 = vmatprep.subr.bf16.mxu1 %v1149_v48  ;;  %v306_v26 = vld [vmem:[%s1356_s7 + $0x88] sm:$0xff]  ;;  %v307_v28 = vld [vmem:[%s1356_s7 + $0x90] sm:$0xff]  ;;  %v240_v29 = vld [vmem:[%s1445_s10 + $0x78] sm:$0xff] }
  0x1d   : > { %1089 = vmatmul.mubr.msk.f32.gmra.mrb[6].mxu0 %vm329_vm0, %v292_v53  ;;  %v308_v30 = vld [vmem:[%s1356_s7 + $0x98] sm:$0xff]  ;;  %v241_v31 = vld [vmem:[%s1445_s10 + $0x80] sm:$0xff]  ;;  %v242_v33 = vld [vmem:[%s1445_s10 + $0x88] sm:$0xff] }
  0x1e   : > { %514 = vmatprep.mubr.f32.mxu0 %v1258_v7  ;;  %1144 = vmatpush1.bf16.msra.mxu0 %v1143_v40  ;;  %v309_v32 = vld [vmem:[%s1356_s7 + $0xa0] sm:$0xff]  ;;  %v310_v34 = vld [vmem:[%s1356_s7 + $0xa8] sm:$0xff]  ;;  %v243_v35 = vld [vmem:[%s1445_s10 + $0x90] sm:$0xff] }
  0x1f   : > { %1174 = vmatpush1.bf16.msra.mxu1 %v1151_v54  ;;  %1146 = vmatprep.subr.bf16.mxu0 %v1145_v41  ;;  %v311_v36 = vld [vmem:[%s1356_s7 + $0xb0] sm:$0xff]  ;;  %v244_v37 = vld [vmem:[%s1445_s10 + $0x98] sm:$0xff]  ;;  %v245_v39 = vld [vmem:[%s1445_s10 + $0xa0] sm:$0xff] }
  0x20   : > { %1167 = vmatprep.subr.bf16.mxu1 %v1153_v55  ;;  %v312_v38 = vld [vmem:[%s1356_s7 + $0xb8] sm:$0xff]  ;;  %v313_v40 = vld [vmem:[%s1356_s7 + $0xc0] sm:$0xff]  ;;  %v246_v41 = vld [vmem:[%s1445_s10 + $0xa8] sm:$0xff] }
  0x21   : > { %1090 = vmatmul.mubr.msk.f32.gmra.mrb[8].mxu0 %vm329_vm0, %v293_v60  ;;  %v314_v42 = vld [vmem:[%s1356_s7 + $0xc8] sm:$0xff]  ;;  %v247_v43 = vld [vmem:[%s1445_s10 + $0xb0] sm:$0xff]  ;;  %v248_v45 = vld [vmem:[%s1445_s10 + $0xb8] sm:$0xff] }
  0x22   : > { %520 = vmatprep.mubr.f32.mxu0 %v1258_v7  ;;  %1148 = vmatpush1.bf16.msra.mxu0 %v1147_v47  ;;  %v315_v44 = vld [vmem:[%s1356_s7 + $0xd0] sm:$0xff]  ;;  %v316_v46 = vld [vmem:[%s1356_s7 + $0xd8] sm:$0xff]  ;;  %v249_v47 = vld [vmem:[%s1445_s10 + $0xc0] sm:$0xff] }
  0x23   : > { %1175 = vmatpush1.bf16.msra.mxu1 %v1155_v61  ;;  %1150 = vmatprep.subr.bf16.mxu0 %v1149_v48  ;;  %v317_v48 = vld [vmem:[%s1356_s7 + $0xe0] sm:$0xff]  ;;  %v250_v49 = vld [vmem:[%s1445_s10 + $0xc8] sm:$0xff]  ;;  %v251_v51 = vld [vmem:[%s1445_s10 + $0xd0] sm:$0xff] }
  0x24   : > { %1168 = vmatprep.subr.bf16.mxu1 %v1157_v62  ;;  %v318_v50 = vld [vmem:[%s1356_s7 + $0xe8] sm:$0xff]  ;;  %v319_v52 = vld [vmem:[%s1356_s7 + $0xf0] sm:$0xff]  ;;  %v252_v53 = vld [vmem:[%s1445_s10 + $0xd8] sm:$0xff] }
  0x25   : > { %1091 = vmatmul.mubr.msk.f32.gmra.mrb[10].mxu0 %vm329_vm0, %v294_v1  ;;  %v225_v56 = vld [vmem:[%s1445_s10] sm:$0xff]  ;;  %v254_v57 = vld [vmem:[%s1445_s10 + $0xe8] sm:$0xff]  ;;  %v255_v59 = vld [vmem:[%s1445_s10 + $0xf0] sm:$0xff] }
  0x26   : > { %526 = vmatprep.mubr.f32.mxu0 %v1258_v7  ;;  %1152 = vmatpush1.bf16.msra.mxu0 %v1151_v54  ;;  %v320_v54 = vld [vmem:[%s1356_s7 + $0xf8] sm:$0xff]  ;;  %v226_v58 = vld [vmem:[%s1445_s10 + $0x8] sm:$0xff]  ;;  %v227_v60 = vld [vmem:[%s1445_s10 + $0x10] sm:$0xff] }
  0x27   : > { %1176 = vmatpush1.bf16.msra.mxu1 %v1159_v2  ;;  %1154 = vmatprep.subr.bf16.mxu0 %v1153_v55  ;;  %v253_v55 = vld [vmem:[%s1445_s10 + $0xe0] sm:$0xff] }
  0x29   : > { %1092 = vmatmul.mubr.msk.f32.gmra.mrb[12].mxu0 %vm329_vm0, %v295_v3 }
  0x2a   : > { %766 = vmatmul.mubr.f32.vlgmr.msra.gmra.mrb[0].mxu1 %v228_v4  ;;  %532 = vmatprep.mubr.f32.mxu0 %v1258_v7 }
  0x2b   : > { %771 = vmatprep.mubr.f32.mxu1 %v1258_v7  ;;  %1156 = vmatpush1.bf16.msra.mxu0 %v1155_v61  ;;  %v256_v61 = vld [vmem:[%s1445_s10 + $0xf8] sm:$0xff] }
  0x2c   : > { %1158 = vmatprep.subr.bf16.mxu0 %v1157_v62 }
  0x2d   : > { %1093 = vmatmul.mubr.msk.f32.gmra.mrb[14].mxu0 %vm329_vm0, %v296_v5 }
  0x2e   : > { %772 = vmatmul.mubr.f32.gmra.mrb[2].mxu1 %v229_v6  ;;  %538 = vmatprep.mubr.f32.mxu0 %v1258_v7 }
  0x2f   : > { %777 = vmatprep.mubr.f32.mxu1 %v1258_v7  ;;  %1160 = vmatpush1.bf16.msra.mxu0 %v1159_v2 }
  0x31   : > { %1094 = vmatmul.mubr.msk.f32.gmra.mrb[16].mxu0 %vm329_vm0, %v297_v8 }
  0x32   : > { %778 = vmatmul.mubr.f32.gmra.mrb[4].mxu1 %v230_v9  ;;  %544 = vmatprep.mubr.f32.mxu0 %v1258_v7 }
  0x33   : > { %783 = vmatprep.mubr.f32.mxu1 %v1258_v7 }
  0x35   : > { %1095 = vmatmul.mubr.msk.f32.gmra.mrb[18].mxu0 %vm329_vm0, %v298_v10 }
  0x36   : > { %784 = vmatmul.mubr.f32.gmra.mrb[6].mxu1 %v231_v11  ;;  %550 = vmatprep.mubr.f32.mxu0 %v1258_v7 }
  0x37   : > { %789 = vmatprep.mubr.f32.mxu1 %v1258_v7 }
  0x39   : > { %1096 = vmatmul.mubr.msk.f32.gmra.mrb[20].mxu0 %vm329_vm0, %v299_v12 }
  0x3a   : > { %790 = vmatmul.mubr.f32.gmra.mrb[8].mxu1 %v232_v13  ;;  %556 = vmatprep.mubr.f32.mxu0 %v1258_v7 }
  0x3b   : > { %795 = vmatprep.mubr.f32.mxu1 %v1258_v7 }
  0x3d   : > { %1097 = vmatmul.mubr.msk.f32.gmra.mrb[22].mxu0 %vm329_vm0, %v300_v14 }
  0x3e   : > { %796 = vmatmul.mubr.f32.gmra.mrb[10].mxu1 %v233_v15  ;;  %562 = vmatprep.mubr.f32.mxu0 %v1258_v7 }
  0x3f   : > { %801 = vmatprep.mubr.f32.mxu1 %v1258_v7 }
  0x41   : > { %1098 = vmatmul.mubr.msk.f32.gmra.mrb[24].mxu0 %vm329_vm0, %v301_v16 }
  0x42   : > { %802 = vmatmul.mubr.f32.gmra.mrb[12].mxu1 %v234_v17  ;;  %568 = vmatprep.mubr.f32.mxu0 %v1258_v7 }
  0x43   : > { %807 = vmatprep.mubr.f32.mxu1 %v1258_v7 }
  0x45   : > { %1099 = vmatmul.mubr.msk.f32.gmra.mrb[26].mxu0 %vm329_vm0, %v302_v18 }
  0x46   : > { %808 = vmatmul.mubr.f32.gmra.mrb[14].mxu1 %v235_v19  ;;  %574 = vmatprep.mubr.f32.mxu0 %v1258_v7 }
  0x47   : > { %813 = vmatprep.mubr.f32.mxu1 %v1258_v7 }
  0x49   : > { %1100 = vmatmul.mubr.msk.f32.gmra.mrb[28].mxu0 %vm329_vm0, %v303_v20 }
  0x4a   : > { %814 = vmatmul.mubr.f32.gmra.mrb[16].mxu1 %v236_v21  ;;  %580 = vmatprep.mubr.f32.mxu0 %v1258_v7 }
  0x4b   : > { %819 = vmatprep.mubr.f32.mxu1 %v1258_v7 }
  0x4d   : > { %1101 = vmatmul.mubr.msk.f32.gmra.mrb[30].mxu0 %vm329_vm0, %v304_v22 }
  0x4e   : > { %820 = vmatmul.mubr.f32.gmra.mrb[18].mxu1 %v237_v23  ;;  %586 = vmatprep.mubr.f32.mxu0 %v1258_v7 }
  0x4f   : > { %825 = vmatprep.mubr.f32.mxu1 %v1258_v7 }
  0x51   : > { %1102 = vmatmul.mubr.msk.f32.gmra.mrb[32].mxu0 %vm329_vm0, %v305_v24 }
  0x52   : > { %826 = vmatmul.mubr.f32.gmra.mrb[20].mxu1 %v238_v25  ;;  %592 = vmatprep.mubr.f32.mxu0 %v1258_v7 }
  0x53   : > { %831 = vmatprep.mubr.f32.mxu1 %v1258_v7 }
  0x55   : > { %1103 = vmatmul.mubr.msk.f32.gmra.mrb[34].mxu0 %vm329_vm0, %v306_v26 }
  0x56   : > { %832 = vmatmul.mubr.f32.gmra.mrb[22].mxu1 %v239_v27  ;;  %598 = vmatprep.mubr.f32.mxu0 %v1258_v7 }
  0x57   : > { %837 = vmatprep.mubr.f32.mxu1 %v1258_v7 }
  0x59   : > { %1104 = vmatmul.mubr.msk.f32.gmra.mrb[36].mxu0 %vm329_vm0, %v307_v28 }
  0x5a   : > { %838 = vmatmul.mubr.f32.gmra.mrb[24].mxu1 %v240_v29  ;;  %604 = vmatprep.mubr.f32.mxu0 %v1258_v7 }
  0x5b   : > { %843 = vmatprep.mubr.f32.mxu1 %v1258_v7 }
  0x5d   : > { %1105 = vmatmul.mubr.msk.f32.gmra.mrb[38].mxu0 %vm329_vm0, %v308_v30 }
  0x5e   : > { %844 = vmatmul.mubr.f32.gmra.mrb[26].mxu1 %v241_v31  ;;  %610 = vmatprep.mubr.f32.mxu0 %v1258_v7 }
  0x5f   : > { %849 = vmatprep.mubr.f32.mxu1 %v1258_v7 }
  0x61   : > { %1106 = vmatmul.mubr.msk.f32.gmra.mrb[40].mxu0 %vm329_vm0, %v309_v32 }
  0x62   : > { %850 = vmatmul.mubr.f32.gmra.mrb[28].mxu1 %v242_v33  ;;  %616 = vmatprep.mubr.f32.mxu0 %v1258_v7 }
  0x63   : > { %855 = vmatprep.mubr.f32.mxu1 %v1258_v7 }
  0x65   : > { %1107 = vmatmul.mubr.msk.f32.gmra.mrb[42].mxu0 %vm329_vm0, %v310_v34 }
  0x66   : > { %856 = vmatmul.mubr.f32.gmra.mrb[30].mxu1 %v243_v35  ;;  %622 = vmatprep.mubr.f32.mxu0 %v1258_v7 }
  0x67   : > { %861 = vmatprep.mubr.f32.mxu1 %v1258_v7 }
  0x69   : > { %1108 = vmatmul.mubr.msk.f32.gmra.mrb[44].mxu0 %vm329_vm0, %v311_v36 }
  0x6a   : > { %862 = vmatmul.mubr.f32.gmra.mrb[32].mxu1 %v244_v37  ;;  %628 = vmatprep.mubr.f32.mxu0 %v1258_v7 }
  0x6b   : > { %867 = vmatprep.mubr.f32.mxu1 %v1258_v7 }
  0x6d   : > { %1109 = vmatmul.mubr.msk.f32.gmra.mrb[46].mxu0 %vm329_vm0, %v312_v38 }
  0x6e   : > { %868 = vmatmul.mubr.f32.gmra.mrb[34].mxu1 %v245_v39  ;;  %634 = vmatprep.mubr.f32.mxu0 %v1258_v7 }
  0x6f   : > { %873 = vmatprep.mubr.f32.mxu1 %v1258_v7 }
  0x71   : > { %1110 = vmatmul.mubr.msk.f32.gmra.mrb[48].mxu0 %vm329_vm0, %v313_v40 }
  0x72   : > { %874 = vmatmul.mubr.f32.gmra.mrb[36].mxu1 %v246_v41  ;;  %640 = vmatprep.mubr.f32.mxu0 %v1258_v7 }
  0x73   : > { %879 = vmatprep.mubr.f32.mxu1 %v1258_v7 }
  0x75   : > { %1111 = vmatmul.mubr.msk.f32.gmra.mrb[50].mxu0 %vm329_vm0, %v314_v42 }
  0x76   : > { %880 = vmatmul.mubr.f32.gmra.mrb[38].mxu1 %v247_v43  ;;  %646 = vmatprep.mubr.f32.mxu0 %v1258_v7 }
  0x77   : > { %885 = vmatprep.mubr.f32.mxu1 %v1258_v7 }
  0x79   : > { %1112 = vmatmul.mubr.msk.f32.gmra.mrb[52].mxu0 %vm329_vm0, %v315_v44 }
  0x7a   : > { %886 = vmatmul.mubr.f32.gmra.mrb[40].mxu1 %v248_v45  ;;  %652 = vmatprep.mubr.f32.mxu0 %v1258_v7 }
  0x7b   : > { %891 = vmatprep.mubr.f32.mxu1 %v1258_v7 }
  0x7d   : > { %1113 = vmatmul.mubr.msk.f32.gmra.mrb[54].mxu0 %vm329_vm0, %v316_v46 }
  0x7e   : > { %892 = vmatmul.mubr.f32.gmra.mrb[42].mxu1 %v249_v47  ;;  %658 = vmatprep.mubr.f32.mxu0 %v1258_v7 }
  0x7f   : > { %897 = vmatprep.mubr.f32.mxu1 %v1258_v7 }
  0x81   : > { %1114 = vmatmul.mubr.msk.f32.gmra.mrb[56].mxu0 %vm329_vm0, %v317_v48 }
  0x82   : > { %898 = vmatmul.mubr.f32.gmra.mrb[44].mxu1 %v250_v49  ;;  %664 = vmatprep.mubr.f32.mxu0 %v1258_v7 }
  0x83   : > { %903 = vmatprep.mubr.f32.mxu1 %v1258_v7 }
  0x85   : > { %1115 = vmatmul.mubr.msk.f32.gmra.mrb[58].mxu0 %vm329_vm0, %v318_v50 }
  0x86   : > { %904 = vmatmul.mubr.f32.gmra.mrb[46].mxu1 %v251_v51  ;;  %670 = vmatprep.mubr.f32.mxu0 %v1258_v7 }
  0x87   : > { %909 = vmatprep.mubr.f32.mxu1 %v1258_v7 }
  0x89   : > { %1116 = vmatmul.mubr.msk.f32.gmra.mrb[60].mxu0 %vm329_vm0, %v319_v52 }
  0x8a   : > { %910 = vmatmul.mubr.f32.gmra.mrb[48].mxu1 %v252_v53  ;;  %676 = vmatprep.mubr.f32.mxu0 %v1258_v7 }
  0x8b   : > { %915 = vmatprep.mubr.f32.mxu1 %v1258_v7 }
  0x8d   : > { %1117 = vmatmul.mubr.msk.f32.gmra.mrb[62].mxu0 %vm329_vm0, %v320_v54 }
  0x8e   : > { %916 = vmatmul.mubr.f32.gmra.mrb[50].mxu1 %v253_v55  ;;  %747 = vmatprep.mubr.f32.mxu0 %v1258_v7 }
  0x8f   : > { %921 = vmatprep.mubr.f32.mxu1 %v1258_v7 }
  0x91   : > { %748 = vmatmul.mubr.f32.vlgmr.msra.gmra.mrb[0].mxu0 %v225_v56 }
  0x92   : > { %922 = vmatmul.mubr.f32.gmra.mrb[52].mxu1 %v254_v57  ;;  %753 = vmatprep.mubr.f32.mxu0 %v1258_v7 }
  0x93   : > { %927 = vmatprep.mubr.f32.mxu1 %v1258_v7 }
  0x95   : > { %754 = vmatmul.mubr.f32.gmra.mrb[2].mxu0 %v226_v58 }
  0x96   : > { %928 = vmatmul.mubr.f32.gmra.mrb[54].mxu1 %v255_v59  ;;  %759 = vmatprep.mubr.f32.mxu0 %v1258_v7 }
  0x97   : > { %933 = vmatprep.mubr.f32.mxu1 %v1258_v7 }
  0x99   : > { %760 = vmatmul.mubr.f32.gmra.mrb[4].mxu0 %v227_v60 }
  0x9a   : > { %934 = vmatmul.mubr.f32.gmra.mrb[56].mxu1 %v256_v61 }
  0xf0   : > { %v510_v62 = vpop.f32.mrb[6].mxu0 }
  0xf1   : > { %v512_v63 = vpop.f32.mrb[7].mxu0 }
  0xf4   : > { %v516_v0 = vpop.f32.mrb[8].mxu0 }
  0xf5   : > { %v518_v1 = vpop.f32.mrb[9].mxu0 }
  0xf8   : > { %v522_v2 = vpop.f32.mrb[10].mxu0 }
  0xf9   : > { %v524_v3 = vpop.f32.mrb[11].mxu0 }
  0xfc   : > { %v528_v4 = vpop.f32.mrb[12].mxu0 }
  0xfd   : > { %v767_v7 = vpop.f32.mrb[0].mxu1  ;;  %v530_v5 = vpop.f32.mrb[13].mxu0 }
  0xfe   : > { %v768_v6 = vadd.f32 %v767_v7, %v510_v62  ;;  %v769_v8 = vpop.f32.mrb[1].mxu1 }
  0xff   : > { %v770_v9 = vadd.f32 %v769_v8, %v512_v63 }
 0x100   : > { %946 = vst [vmem:[%s1593_s12 + $0x30] sm:$0xff] %v768_v6  ;;  %v534_v10 = vpop.f32.mrb[14].mxu0 }
 0x101   : > { %947 = vst [vmem:[%s1593_s12 + $0x38] sm:$0xff] %v770_v9  ;;  %v773_v11 = vpop.f32.mrb[2].mxu1  ;;  %v536_v12 = vpop.f32.mrb[15].mxu0 }
 0x102   : > { %v774_v13 = vadd.f32 %v773_v11, %v516_v0  ;;  %v775_v14 = vpop.f32.mrb[3].mxu1 }
 0x103   : > { %v776_v15 = vadd.f32 %v775_v14, %v518_v1 }
 0x104   : > { %948 = vst [vmem:[%s1593_s12 + $0x40] sm:$0xff] %v774_v13  ;;  %v540_v16 = vpop.f32.mrb[16].mxu0 }
 0x105   : > { %949 = vst [vmem:[%s1593_s12 + $0x48] sm:$0xff] %v776_v15  ;;  %v779_v17 = vpop.f32.mrb[4].mxu1  ;;  %v542_v18 = vpop.f32.mrb[17].mxu0 }
 0x106   : > { %v780_v19 = vadd.f32 %v779_v17, %v522_v2  ;;  %v781_v20 = vpop.f32.mrb[5].mxu1 }
 0x107   : > { %v782_v21 = vadd.f32 %v781_v20, %v524_v3 }
 0x108   : > { %950 = vst [vmem:[%s1593_s12 + $0x50] sm:$0xff] %v780_v19  ;;  %v546_v22 = vpop.f32.mrb[18].mxu0 }
 0x109   : > { %951 = vst [vmem:[%s1593_s12 + $0x58] sm:$0xff] %v782_v21  ;;  %v785_v23 = vpop.f32.mrb[6].mxu1  ;;  %v548_v24 = vpop.f32.mrb[19].mxu0 }
 0x10a   : > { %v786_v25 = vadd.f32 %v785_v23, %v528_v4  ;;  %v787_v26 = vpop.f32.mrb[7].mxu1 }
 0x10b   : > { %v788_v27 = vadd.f32 %v787_v26, %v530_v5 }
 0x10c   : > { %952 = vst [vmem:[%s1593_s12 + $0x60] sm:$0xff] %v786_v25  ;;  %v552_v28 = vpop.f32.mrb[20].mxu0 }
 0x10d   : > { %953 = vst [vmem:[%s1593_s12 + $0x68] sm:$0xff] %v788_v27  ;;  %v791_v29 = vpop.f32.mrb[8].mxu1  ;;  %v554_v30 = vpop.f32.mrb[21].mxu0 }
 0x10e   : > { %v792_v31 = vadd.f32 %v791_v29, %v534_v10  ;;  %v793_v32 = vpop.f32.mrb[9].mxu1 }
 0x10f   : > { %v794_v33 = vadd.f32 %v793_v32, %v536_v12 }
 0x110   : > { %954 = vst [vmem:[%s1593_s12 + $0x70] sm:$0xff] %v792_v31  ;;  %v558_v34 = vpop.f32.mrb[22].mxu0 }
 0x111   : > { %955 = vst [vmem:[%s1593_s12 + $0x78] sm:$0xff] %v794_v33  ;;  %v797_v35 = vpop.f32.mrb[10].mxu1  ;;  %v560_v36 = vpop.f32.mrb[23].mxu0 }
 0x112   : > { %v798_v37 = vadd.f32 %v797_v35, %v540_v16  ;;  %v799_v38 = vpop.f32.mrb[11].mxu1 }
 0x113   : > { %v800_v39 = vadd.f32 %v799_v38, %v542_v18 }
 0x114   : > { %956 = vst [vmem:[%s1593_s12 + $0x80] sm:$0xff] %v798_v37  ;;  %v564_v40 = vpop.f32.mrb[24].mxu0 }
 0x115   : > { %957 = vst [vmem:[%s1593_s12 + $0x88] sm:$0xff] %v800_v39  ;;  %v803_v41 = vpop.f32.mrb[12].mxu1  ;;  %v566_v42 = vpop.f32.mrb[25].mxu0 }
 0x116   : > { %v804_v43 = vadd.f32 %v803_v41, %v546_v22  ;;  %v805_v44 = vpop.f32.mrb[13].mxu1 }
 0x117   : > { %v806_v45 = vadd.f32 %v805_v44, %v548_v24 }
 0x118   : > { %958 = vst [vmem:[%s1593_s12 + $0x90] sm:$0xff] %v804_v43  ;;  %v570_v46 = vpop.f32.mrb[26].mxu0 }
 0x119   : > { %959 = vst [vmem:[%s1593_s12 + $0x98] sm:$0xff] %v806_v45  ;;  %v809_v47 = vpop.f32.mrb[14].mxu1  ;;  %v572_v48 = vpop.f32.mrb[27].mxu0 }
 0x11a   : > { %v810_v49 = vadd.f32 %v809_v47, %v552_v28  ;;  %v811_v50 = vpop.f32.mrb[15].mxu1 }
 0x11b   : > { %v812_v51 = vadd.f32 %v811_v50, %v554_v30 }
 0x11c   : > { %960 = vst [vmem:[%s1593_s12 + $0xa0] sm:$0xff] %v810_v49  ;;  %v576_v52 = vpop.f32.mrb[28].mxu0 }
 0x11d   : > { %961 = vst [vmem:[%s1593_s12 + $0xa8] sm:$0xff] %v812_v51  ;;  %v815_v53 = vpop.f32.mrb[16].mxu1  ;;  %v578_v54 = vpop.f32.mrb[29].mxu0 }
 0x11e   : > { %v816_v55 = vadd.f32 %v815_v53, %v558_v34  ;;  %v817_v56 = vpop.f32.mrb[17].mxu1 }
 0x11f   : > { %v818_v57 = vadd.f32 %v817_v56, %v560_v36 }
 0x120   : > { %962 = vst [vmem:[%s1593_s12 + $0xb0] sm:$0xff] %v816_v55  ;;  %v582_v58 = vpop.f32.mrb[30].mxu0 }
 0x121   : > { %963 = vst [vmem:[%s1593_s12 + $0xb8] sm:$0xff] %v818_v57  ;;  %v821_v59 = vpop.f32.mrb[18].mxu1  ;;  %v584_v60 = vpop.f32.mrb[31].mxu0 }
 0x122   : > { %v822_v61 = vadd.f32 %v821_v59, %v564_v40  ;;  %v823_v62 = vpop.f32.mrb[19].mxu1 }
 0x123   : > { %v824_v63 = vadd.f32 %v823_v62, %v566_v42 }
 0x124   : > { %964 = vst [vmem:[%s1593_s12 + $0xc0] sm:$0xff] %v822_v61  ;;  %v588_v0 = vpop.f32.mrb[32].mxu0 }
 0x125   : > { %965 = vst [vmem:[%s1593_s12 + $0xc8] sm:$0xff] %v824_v63  ;;  %v827_v1 = vpop.f32.mrb[20].mxu1  ;;  %v590_v2 = vpop.f32.mrb[33].mxu0 }
 0x126   : > { %v828_v3 = vadd.f32 %v827_v1, %v570_v46  ;;  %v829_v4 = vpop.f32.mrb[21].mxu1 }
 0x127   : > { %v830_v7 = vadd.f32 %v829_v4, %v572_v48 }
 0x128   : > { %966 = vst [vmem:[%s1593_s12 + $0xd0] sm:$0xff] %v828_v3  ;;  %v594_v5 = vpop.f32.mrb[34].mxu0 }
 0x129   : > { %967 = vst [vmem:[%s1593_s12 + $0xd8] sm:$0xff] %v830_v7  ;;  %v833_v6 = vpop.f32.mrb[22].mxu1  ;;  %v596_v8 = vpop.f32.mrb[35].mxu0 }
 0x12a   : > { %v834_v9 = vadd.f32 %v833_v6, %v576_v52  ;;  %v835_v10 = vpop.f32.mrb[23].mxu1 }
 0x12b   : > { %v836_v11 = vadd.f32 %v835_v10, %v578_v54 }
 0x12c   : > { %968 = vst [vmem:[%s1593_s12 + $0xe0] sm:$0xff] %v834_v9  ;;  %v600_v12 = vpop.f32.mrb[36].mxu0 }
 0x12d   : > { %969 = vst [vmem:[%s1593_s12 + $0xe8] sm:$0xff] %v836_v11  ;;  %v839_v13 = vpop.f32.mrb[24].mxu1  ;;  %v602_v14 = vpop.f32.mrb[37].mxu0 }
 0x12e   : > { %v840_v15 = vadd.f32 %v839_v13, %v582_v58  ;;  %v841_v16 = vpop.f32.mrb[25].mxu1 }
 0x12f   : > { %v842_v17 = vadd.f32 %v841_v16, %v584_v60 }
 0x130   : > { %970 = vst [vmem:[%s1593_s12 + $0xf0] sm:$0xff] %v840_v15  ;;  %v606_v18 = vpop.f32.mrb[38].mxu0 }
 0x131   : > { %971 = vst [vmem:[%s1593_s12 + $0xf8] sm:$0xff] %v842_v17  ;;  %v845_v19 = vpop.f32.mrb[26].mxu1  ;;  %v608_v20 = vpop.f32.mrb[39].mxu0 }
 0x132   : > { %v846_v21 = vadd.f32 %v845_v19, %v588_v0  ;;  %v847_v22 = vpop.f32.mrb[27].mxu1 }
 0x133   : > { %v848_v23 = vadd.f32 %v847_v22, %v590_v2 }
 0x134   : > { %972 = vst [vmem:[%s1593_s12 + $0x100] sm:$0xff] %v846_v21  ;;  %v612_v24 = vpop.f32.mrb[40].mxu0 }
 0x135   : > { %973 = vst [vmem:[%s1593_s12 + $0x108] sm:$0xff] %v848_v23  ;;  %v851_v25 = vpop.f32.mrb[28].mxu1  ;;  %v614_v26 = vpop.f32.mrb[41].mxu0 }
 0x136   : > { %v852_v27 = vadd.f32 %v851_v25, %v594_v5  ;;  %v853_v28 = vpop.f32.mrb[29].mxu1 }
 0x137   : > { %v854_v29 = vadd.f32 %v853_v28, %v596_v8 }
 0x138   : > { %974 = vst [vmem:[%s1593_s12 + $0x110] sm:$0xff] %v852_v27  ;;  %v618_v30 = vpop.f32.mrb[42].mxu0 }
 0x139   : > { %975 = vst [vmem:[%s1593_s12 + $0x118] sm:$0xff] %v854_v29  ;;  %v857_v31 = vpop.f32.mrb[30].mxu1  ;;  %v620_v32 = vpop.f32.mrb[43].mxu0 }
 0x13a   : > { %v858_v33 = vadd.f32 %v857_v31, %v600_v12  ;;  %v859_v34 = vpop.f32.mrb[31].mxu1 }
 0x13b   : > { %v860_v35 = vadd.f32 %v859_v34, %v602_v14 }
 0x13c   : > { %976 = vst [vmem:[%s1593_s12 + $0x120] sm:$0xff] %v858_v33  ;;  %v624_v36 = vpop.f32.mrb[44].mxu0 }
 0x13d   : > { %977 = vst [vmem:[%s1593_s12 + $0x128] sm:$0xff] %v860_v35  ;;  %v863_v37 = vpop.f32.mrb[32].mxu1  ;;  %v626_v38 = vpop.f32.mrb[45].mxu0 }
 0x13e   : > { %v864_v39 = vadd.f32 %v863_v37, %v606_v18  ;;  %v865_v40 = vpop.f32.mrb[33].mxu1 }
 0x13f   : > { %v866_v41 = vadd.f32 %v865_v40, %v608_v20 }
 0x140   : > { %978 = vst [vmem:[%s1593_s12 + $0x130] sm:$0xff] %v864_v39  ;;  %v630_v42 = vpop.f32.mrb[46].mxu0 }
 0x141   : > { %979 = vst [vmem:[%s1593_s12 + $0x138] sm:$0xff] %v866_v41  ;;  %v869_v43 = vpop.f32.mrb[34].mxu1  ;;  %v632_v44 = vpop.f32.mrb[47].mxu0 }
 0x142   : > { %v870_v45 = vadd.f32 %v869_v43, %v612_v24  ;;  %v871_v46 = vpop.f32.mrb[35].mxu1 }
 0x143   : > { %v872_v47 = vadd.f32 %v871_v46, %v614_v26 }
 0x144   : > { %980 = vst [vmem:[%s1593_s12 + $0x140] sm:$0xff] %v870_v45  ;;  %v636_v48 = vpop.f32.mrb[48].mxu0 }
 0x145   : > { %981 = vst [vmem:[%s1593_s12 + $0x148] sm:$0xff] %v872_v47  ;;  %v875_v49 = vpop.f32.mrb[36].mxu1  ;;  %v638_v50 = vpop.f32.mrb[49].mxu0 }
 0x146   : > { %v876_v51 = vadd.f32 %v875_v49, %v618_v30  ;;  %v877_v52 = vpop.f32.mrb[37].mxu1 }
 0x147   : > { %v878_v53 = vadd.f32 %v877_v52, %v620_v32 }
 0x148   : > { %982 = vst [vmem:[%s1593_s12 + $0x150] sm:$0xff] %v876_v51  ;;  %v642_v54 = vpop.f32.mrb[50].mxu0 }
 0x149   : > { %983 = vst [vmem:[%s1593_s12 + $0x158] sm:$0xff] %v878_v53  ;;  %v881_v55 = vpop.f32.mrb[38].mxu1  ;;  %v644_v56 = vpop.f32.mrb[51].mxu0 }
 0x14a   : > { %v882_v57 = vadd.f32 %v881_v55, %v624_v36  ;;  %v883_v58 = vpop.f32.mrb[39].mxu1 }
 0x14b   : > { %v884_v59 = vadd.f32 %v883_v58, %v626_v38 }
 0x14c   : > { %984 = vst [vmem:[%s1593_s12 + $0x160] sm:$0xff] %v882_v57  ;;  %v648_v60 = vpop.f32.mrb[52].mxu0 }
 0x14d   : > { %985 = vst [vmem:[%s1593_s12 + $0x168] sm:$0xff] %v884_v59  ;;  %v887_v61 = vpop.f32.mrb[40].mxu1  ;;  %v650_v62 = vpop.f32.mrb[53].mxu0 }
 0x14e   : > { %v888_v63 = vadd.f32 %v887_v61, %v630_v42  ;;  %v889_v0 = vpop.f32.mrb[41].mxu1 }
 0x14f   : > { %v890_v1 = vadd.f32 %v889_v0, %v632_v44 }
 0x150   : > { %986 = vst [vmem:[%s1593_s12 + $0x170] sm:$0xff] %v888_v63  ;;  %v654_v2 = vpop.f32.mrb[54].mxu0 }
 0x151   : > { %987 = vst [vmem:[%s1593_s12 + $0x178] sm:$0xff] %v890_v1  ;;  %v893_v3 = vpop.f32.mrb[42].mxu1  ;;  %v656_v4 = vpop.f32.mrb[55].mxu0 }
 0x152   : > { %v894_v7 = vadd.f32 %v893_v3, %v636_v48  ;;  %v895_v5 = vpop.f32.mrb[43].mxu1 }
 0x153   : > { %v896_v6 = vadd.f32 %v895_v5, %v638_v50 }
 0x154   : > { %988 = vst [vmem:[%s1593_s12 + $0x180] sm:$0xff] %v894_v7  ;;  %v660_v8 = vpop.f32.mrb[56].mxu0 }
 0x155   : > { %989 = vst [vmem:[%s1593_s12 + $0x188] sm:$0xff] %v896_v6  ;;  %v899_v9 = vpop.f32.mrb[44].mxu1  ;;  %v662_v10 = vpop.f32.mrb[57].mxu0 }
 0x156   : > { %v900_v11 = vadd.f32 %v899_v9, %v642_v54  ;;  %v901_v12 = vpop.f32.mrb[45].mxu1 }
 0x157   : > { %v902_v13 = vadd.f32 %v901_v12, %v644_v56 }
 0x158   : > { %990 = vst [vmem:[%s1593_s12 + $0x190] sm:$0xff] %v900_v11  ;;  %v666_v14 = vpop.f32.mrb[58].mxu0 }
 0x159   : > { %991 = vst [vmem:[%s1593_s12 + $0x198] sm:$0xff] %v902_v13  ;;  %v905_v15 = vpop.f32.mrb[46].mxu1  ;;  %v668_v16 = vpop.f32.mrb[59].mxu0 }
 0x15a   : > { %v906_v17 = vadd.f32 %v905_v15, %v648_v60  ;;  %v907_v18 = vpop.f32.mrb[47].mxu1 }
 0x15b   : > { %v908_v19 = vadd.f32 %v907_v18, %v650_v62 }
 0x15c   : > { %992 = vst [vmem:[%s1593_s12 + $0x1a0] sm:$0xff] %v906_v17  ;;  %v672_v20 = vpop.f32.mrb[60].mxu0 }
 0x15d   : > { %993 = vst [vmem:[%s1593_s12 + $0x1a8] sm:$0xff] %v908_v19  ;;  %v911_v21 = vpop.f32.mrb[48].mxu1  ;;  %v674_v22 = vpop.f32.mrb[61].mxu0 }
 0x15e   : > { %v912_v23 = vadd.f32 %v911_v21, %v654_v2  ;;  %v913_v24 = vpop.f32.mrb[49].mxu1 }
 0x15f   : > { %v914_v25 = vadd.f32 %v913_v24, %v656_v4 }
 0x160   : > { %994 = vst [vmem:[%s1593_s12 + $0x1b0] sm:$0xff] %v912_v23  ;;  %v678_v26 = vpop.f32.mrb[62].mxu0 }
 0x161   : > { %995 = vst [vmem:[%s1593_s12 + $0x1b8] sm:$0xff] %v914_v25  ;;  %v917_v27 = vpop.f32.mrb[50].mxu1  ;;  %v680_v28 = vpop.f32.mrb[63].mxu0 }
 0x162   : > { %v918_v29 = vadd.f32 %v917_v27, %v660_v8  ;;  %v919_v30 = vpop.f32.mrb[51].mxu1 }
 0x163   : > { %v920_v31 = vadd.f32 %v919_v30, %v662_v10 }
 0x164   : > { %996 = vst [vmem:[%s1593_s12 + $0x1c0] sm:$0xff] %v918_v29  ;;  %v749_v32 = vpop.f32.mrb[0].mxu0 }
 0x165   : > { %997 = vst [vmem:[%s1593_s12 + $0x1c8] sm:$0xff] %v920_v31  ;;  %940 = vst [vmem:[%s1593_s12] sm:$0xff] %v749_v32  ;;  %v923_v33 = vpop.f32.mrb[52].mxu1  ;;  %v751_v34 = vpop.f32.mrb[1].mxu0 }
 0x166   : > { %v924_v35 = vadd.f32 %v923_v33, %v666_v14  ;;  %941 = vst [vmem:[%s1593_s12 + $0x8] sm:$0xff] %v751_v34  ;;  %v925_v36 = vpop.f32.mrb[53].mxu1 }
 0x167   : > { %v926_v37 = vadd.f32 %v925_v36, %v668_v16 }
 0x168   : > { %998 = vst [vmem:[%s1593_s12 + $0x1d0] sm:$0xff] %v924_v35  ;;  %v755_v38 = vpop.f32.mrb[2].mxu0 }
 0x169   : > { %999 = vst [vmem:[%s1593_s12 + $0x1d8] sm:$0xff] %v926_v37  ;;  %942 = vst [vmem:[%s1593_s12 + $0x10] sm:$0xff] %v755_v38  ;;  %v929_v39 = vpop.f32.mrb[54].mxu1  ;;  %v757_v40 = vpop.f32.mrb[3].mxu0 }
 0x16a   : > { %v930_v41 = vadd.f32 %v929_v39, %v672_v20  ;;  %943 = vst [vmem:[%s1593_s12 + $0x18] sm:$0xff] %v757_v40  ;;  %v931_v42 = vpop.f32.mrb[55].mxu1 }
 0x16b   : > { %v932_v43 = vadd.f32 %v931_v42, %v674_v22 }
 0x16c   : > { %1000 = vst [vmem:[%s1593_s12 + $0x1e0] sm:$0xff] %v930_v41  ;;  %v761_v44 = vpop.f32.mrb[4].mxu0 }
 0x16d   : > { %1001 = vst [vmem:[%s1593_s12 + $0x1e8] sm:$0xff] %v932_v43  ;;  %944 = vst [vmem:[%s1593_s12 + $0x20] sm:$0xff] %v761_v44  ;;  %v935_v45 = vpop.f32.mrb[56].mxu1  ;;  %v763_v46 = vpop.f32.mrb[5].mxu0 }
 0x16e   : > { %v936_v47 = vadd.f32 %v935_v45, %v678_v26  ;;  %945 = vst [vmem:[%s1593_s12 + $0x28] sm:$0xff] %v763_v46  ;;  %v937_v48 = vpop.f32.mrb[57].mxu1 }
 0x16f   : > { %v938_v49 = vadd.f32 %v937_v48, %v680_v28 }
 0x170   : > { %1002 = vst [vmem:[%s1593_s12 + $0x1f0] sm:$0xff] %v936_v47 }
 0x171   : > { %1003 = vst [vmem:[%s1593_s12 + $0x1f8] sm:$0xff] %v938_v49 }
 0x172 PF: > { %s14_s15 = sadd.s32 1, %s1256_s15  }
 0x173   : > { %p11_p4 = scmp.ge.s32.totalorder %s14_s15, 4  }
 0x175   :  { %13 = sbr.rel (!%p11_p4) target bundleno = 1 (0x1), region = 69 }

// kernel: priorformer_forward.7
= control target key start
LH: loop header
LB: loop body
LE: loop exit
PB: predicated region body
PF: predicated region fallthrough
CT: control target
= control target key end

     0   :  { %s837_s12 = smov 0   ;;  %s1291_s0 = inlined_call_operand.vmem [shape: f32[512,128], index: 0, kind: input, shape index: {}]   ;;  %s1292_s1 = inlined_call_operand.vmem [shape: f32[1,128], index: 1, kind: input, shape index: {}]   ;;  %s1293_s2 = inlined_call_operand.vmem [shape: f32[1,128], index: 2, kind: input, shape index: {}]   ;;  %s1294_s3 = inlined_call_operand.vmem [shape: f32[512,128], index: 3, kind: output, shape index: {}]  }
   0x1 LB: > { %s724_s13 = sadd.s32 4294967295, %s815_s12   ;;  %p728_p0 = scmp.ge.s32.totalorder %s815_s12, 1  ;;  %s815_s12 = sphi %s837_s12, %s13_s12  }
   0x2   : > { %p138_p1 = scmp.lt.s32.totalorder %s815_s12, 3 }
   0x4   : > { %p139_p2 = pnand %p728_p0, %p138_p1 }
   0x5   : > { %s729_s14 = sshll.u32 (!%p139_p2), %s724_s13, 5 }
   0x6   : > { %142 = sbr.rel (%p139_p2) target bundleno = 393 (0x189), region = 32  ;;  %p163_p3 = scmp.lt.s32.totalorder (!%p139_p2), %s729_s14, 63 }
   0xd   : > { %s1296_s14 = smov (!%p163_p3, %s729_s14), 63 }
   0xe   : > { %s730_s15 = sshll.u32 %s1296_s14, 3 }
   0xf   : > { %s853_s18 = scalar_lea.vmem %s1291_s0, %s730_s15  ;;  %s1160_s25 = scalar_lea.vmem %s1294_s3, %s730_s15 }
  0x10   : > { %v856_v0 = vld [vmem:[%s853_s18] sm:$0xff]  ;;  %v859_v1 = vld [vmem:[%s853_s18 + $0x10] sm:$0xff]  ;;  %v864_v2 = vld [vmem:[%s853_s18 + $0x8] sm:$0xff] }
  0x11   : > { %208 = vadd.xlane.f32.xlu0 %v856_v0  ;;  %212 = vadd.xlane.f32.xlu1 %v859_v1  ;;  %v867_v3 = vld [vmem:[%s853_s18 + $0x18] sm:$0xff]  ;;  %v872_v4 = vld [vmem:[%s853_s18 + $0x20] sm:$0xff]  ;;  %v875_v5 = vld [vmem:[%s853_s18 + $0x28] sm:$0xff] }
  0x12   : > { %v880_v6 = vld [vmem:[%s853_s18 + $0x30] sm:$0xff]  ;;  %v883_v7 = vld [vmem:[%s853_s18 + $0x38] sm:$0xff]  ;;  %v888_v8 = vld [vmem:[%s853_s18 + $0x40] sm:$0xff] }
  0x13   : > { %v891_v9 = vld [vmem:[%s853_s18 + $0x48] sm:$0xff]  ;;  %v896_v10 = vld [vmem:[%s853_s18 + $0x50] sm:$0xff]  ;;  %v899_v11 = vld [vmem:[%s853_s18 + $0x58] sm:$0xff] }
  0x14   : > { %v904_v12 = vld [vmem:[%s853_s18 + $0x60] sm:$0xff]  ;;  %v907_v13 = vld [vmem:[%s853_s18 + $0x68] sm:$0xff]  ;;  %v912_v14 = vld [vmem:[%s853_s18 + $0x70] sm:$0xff] }
  0x15   : > { %210 = vadd.xlane.f32.xlu0 %v864_v2  ;;  %214 = vadd.xlane.f32.xlu1 %v867_v3  ;;  %v915_v15 = vld [vmem:[%s853_s18 + $0x78] sm:$0xff]  ;;  %v920_v16 = vld [vmem:[%s853_s18 + $0x80] sm:$0xff]  ;;  %v923_v17 = vld [vmem:[%s853_s18 + $0x88] sm:$0xff] }
  0x16   : > { %v928_v18 = vld [vmem:[%s853_s18 + $0x90] sm:$0xff]  ;;  %v931_v19 = vld [vmem:[%s853_s18 + $0x98] sm:$0xff]  ;;  %v936_v20 = vld [vmem:[%s853_s18 + $0xa0] sm:$0xff] }
  0x17   : > { %v939_v21 = vld [vmem:[%s853_s18 + $0xa8] sm:$0xff]  ;;  %v944_v22 = vld [vmem:[%s853_s18 + $0xb0] sm:$0xff]  ;;  %v947_v23 = vld [vmem:[%s853_s18 + $0xb8] sm:$0xff] }
  0x18   : > { %v952_v24 = vld [vmem:[%s853_s18 + $0xc0] sm:$0xff]  ;;  %v955_v25 = vld [vmem:[%s853_s18 + $0xc8] sm:$0xff]  ;;  %v960_v26 = vld [vmem:[%s853_s18 + $0xd0] sm:$0xff] }
  0x19   : > { %216 = vadd.xlane.f32.xlu0 %v872_v4  ;;  %218 = vadd.xlane.f32.xlu1 %v875_v5  ;;  %v963_v27 = vld [vmem:[%s853_s18 + $0xd8] sm:$0xff]  ;;  %v968_v28 = vld [vmem:[%s853_s18 + $0xe0] sm:$0xff]  ;;  %v971_v29 = vld [vmem:[%s853_s18 + $0xe8] sm:$0xff] }
  0x1a   : > { %v976_v30 = vld [vmem:[%s853_s18 + $0xf0] sm:$0xff]  ;;  %v979_v31 = vld [vmem:[%s853_s18 + $0xf8] sm:$0xff] }
  0x1d   : > { %220 = vadd.xlane.f32.xlu0 %v880_v6  ;;  %222 = vadd.xlane.f32.xlu1 %v883_v7 }
  0x21   : > { %224 = vadd.xlane.f32.xlu0 %v888_v8  ;;  %226 = vadd.xlane.f32.xlu1 %v891_v9 }
  0x25   : > { %228 = vadd.xlane.f32.xlu0 %v896_v10  ;;  %230 = vadd.xlane.f32.xlu1 %v899_v11 }
  0x29   : > { %232 = vadd.xlane.f32.xlu0 %v904_v12  ;;  %234 = vadd.xlane.f32.xlu1 %v907_v13 }
  0x2d   : > { %236 = vadd.xlane.f32.xlu0 %v912_v14  ;;  %238 = vadd.xlane.f32.xlu1 %v915_v15 }
  0x31   : > { %240 = vadd.xlane.f32.xlu0 %v920_v16  ;;  %242 = vadd.xlane.f32.xlu1 %v923_v17 }
  0x35   : > { %244 = vadd.xlane.f32.xlu0 %v928_v18  ;;  %246 = vadd.xlane.f32.xlu1 %v931_v19 }
  0x39   : > { %248 = vadd.xlane.f32.xlu0 %v936_v20  ;;  %250 = vadd.xlane.f32.xlu1 %v939_v21 }
  0x3d   : > { %252 = vadd.xlane.f32.xlu0 %v944_v22  ;;  %254 = vadd.xlane.f32.xlu1 %v947_v23 }
  0x41   : > { %256 = vadd.xlane.f32.xlu0 %v952_v24  ;;  %258 = vadd.xlane.f32.xlu1 %v955_v25 }
  0x45   : > { %260 = vadd.xlane.f32.xlu0 %v960_v26  ;;  %262 = vadd.xlane.f32.xlu1 %v963_v27 }
  0x49   : > { %264 = vadd.xlane.f32.xlu0 %v968_v28  ;;  %266 = vadd.xlane.f32.xlu1 %v971_v29 }
  0x4d   : > { %268 = vadd.xlane.f32.xlu0 %v976_v30  ;;  %270 = vadd.xlane.f32.xlu1 %v979_v31 }
  0x9e   : > { %v209_v32 = vpop.xlane.xlu0 %208  ;;  %v213_v33 = vpop.xlane.xlu1 %212 }
  0x9f   : > { %v272_v34 = vmul.f32 0.0078125, %v209_v32  ;;  %v274_v35 = vmul.f32 0.0078125, %v213_v33 }
  0xa1   : > { %v984_v36 = vsub.f32 %v856_v0, %v272_v34  ;;  %v987_v37 = vsub.f32 %v859_v1, %v274_v35 }
  0xa2   : > { %v211_v38 = vpop.xlane.xlu0 %210  ;;  %v215_v39 = vpop.xlane.xlu1 %214 }
  0xa3   : > { %v273_v40 = vmul.f32 0.0078125, %v211_v38  ;;  %v336_v41 = vmul.f32 %v984_v36, %v984_v36  ;;  %v275_v42 = vmul.f32 0.0078125, %v215_v39  ;;  %v338_v45 = vmul.f32 %v987_v37, %v987_v37 }
  0xa5   : > { %v992_v43 = vsub.f32 %v864_v2, %v273_v40  ;;  %368 = vadd.xlane.f32.xlu0 %v336_v41  ;;  %v995_v44 = vsub.f32 %v867_v3, %v275_v42 }
  0xa6   : > { %v217_v46 = vpop.xlane.xlu0 %216  ;;  %v219_v47 = vpop.xlane.xlu1 %218 }
  0xa7   : > { %v276_v48 = vmul.f32 0.0078125, %v217_v46  ;;  %v337_v49 = vmul.f32 %v992_v43, %v992_v43  ;;  %v277_v50 = vmul.f32 0.0078125, %v219_v47  ;;  %v339_v53 = vmul.f32 %v995_v44, %v995_v44 }
  0xa9   : > { %v1002_v51 = vsub.f32 %v872_v4, %v276_v48  ;;  %372 = vadd.xlane.f32.xlu0 %v338_v45  ;;  %370 = vadd.xlane.f32.xlu1 %v337_v49  ;;  %v1005_v52 = vsub.f32 %v875_v5, %v277_v50 }
  0xaa   : > { %v221_v54 = vpop.xlane.xlu0 %220  ;;  %v223_v55 = vpop.xlane.xlu1 %222 }
  0xab   : > { %v278_v56 = vmul.f32 0.0078125, %v221_v54  ;;  %v340_v57 = vmul.f32 %v1002_v51, %v1002_v51  ;;  %v279_v58 = vmul.f32 0.0078125, %v223_v55  ;;  %v341_v61 = vmul.f32 %v1005_v52, %v1005_v52 }
  0xad   : > { %v1012_v59 = vsub.f32 %v880_v6, %v278_v56  ;;  %374 = vadd.xlane.f32.xlu1 %v339_v53  ;;  %376 = vadd.xlane.f32.xlu0 %v340_v57  ;;  %v1015_v60 = vsub.f32 %v883_v7, %v279_v58 }
  0xae   : > { %v225_v62 = vpop.xlane.xlu0 %224  ;;  %v227_v63 = vpop.xlane.xlu1 %226 }
  0xaf   : > { %v280_v0 = vmul.f32 0.0078125, %v225_v62  ;;  %v342_v1 = vmul.f32 %v1012_v59, %v1012_v59  ;;  %v281_v2 = vmul.f32 0.0078125, %v227_v63  ;;  %v343_v5 = vmul.f32 %v1015_v60, %v1015_v60 }
  0xb1   : > { %v1022_v3 = vsub.f32 %v888_v8, %v280_v0  ;;  %378 = vadd.xlane.f32.xlu1 %v341_v61  ;;  %380 = vadd.xlane.f32.xlu0 %v342_v1  ;;  %v1025_v4 = vsub.f32 %v891_v9, %v281_v2 }
  0xb2   : > { %v229_v6 = vpop.xlane.xlu0 %228  ;;  %v231_v7 = vpop.xlane.xlu1 %230 }
  0xb3   : > { %v282_v32 = vmul.f32 0.0078125, %v229_v6  ;;  %v344_v33 = vmul.f32 %v1022_v3, %v1022_v3  ;;  %v283_v34 = vmul.f32 0.0078125, %v231_v7  ;;  %v345_v9 = vmul.f32 %v1025_v4, %v1025_v4 }
  0xb5   : > { %v1032_v35 = vsub.f32 %v896_v10, %v282_v32  ;;  %382 = vadd.xlane.f32.xlu1 %v343_v5  ;;  %384 = vadd.xlane.f32.xlu0 %v344_v33  ;;  %v1035_v8 = vsub.f32 %v899_v11, %v283_v34 }
  0xb6   : > { %v233_v38 = vpop.xlane.xlu0 %232  ;;  %v235_v39 = vpop.xlane.xlu1 %234 }
  0xb7   : > { %v284_v40 = vmul.f32 0.0078125, %v233_v38  ;;  %v346_v41 = vmul.f32 %v1032_v35, %v1032_v35  ;;  %v285_v42 = vmul.f32 0.0078125, %v235_v39  ;;  %v347_v11 = vmul.f32 %v1035_v8, %v1035_v8 }
  0xb9   : > { %v1042_v45 = vsub.f32 %v904_v12, %v284_v40  ;;  %386 = vadd.xlane.f32.xlu1 %v345_v9  ;;  %388 = vadd.xlane.f32.xlu0 %v346_v41  ;;  %v1045_v10 = vsub.f32 %v907_v13, %v285_v42 }
  0xba   : > { %v237_v46 = vpop.xlane.xlu0 %236  ;;  %v239_v47 = vpop.xlane.xlu1 %238 }
  0xbb   : > { %v286_v48 = vmul.f32 0.0078125, %v237_v46  ;;  %v348_v49 = vmul.f32 %v1042_v45, %v1042_v45  ;;  %v287_v50 = vmul.f32 0.0078125, %v239_v47  ;;  %v349_v13 = vmul.f32 %v1045_v10, %v1045_v10 }
  0xbd   : > { %v1052_v53 = vsub.f32 %v912_v14, %v286_v48  ;;  %390 = vadd.xlane.f32.xlu1 %v347_v11  ;;  %392 = vadd.xlane.f32.xlu0 %v348_v49  ;;  %v1055_v12 = vsub.f32 %v915_v15, %v287_v50 }
  0xbe   : > { %v241_v54 = vpop.xlane.xlu0 %240  ;;  %v243_v55 = vpop.xlane.xlu1 %242 }
  0xbf   : > { %v288_v56 = vmul.f32 0.0078125, %v241_v54  ;;  %v350_v57 = vmul.f32 %v1052_v53, %v1052_v53  ;;  %v289_v58 = vmul.f32 0.0078125, %v243_v55  ;;  %v351_v15 = vmul.f32 %v1055_v12, %v1055_v12 }
  0xc1   : > { %v1062_v61 = vsub.f32 %v920_v16, %v288_v56  ;;  %394 = vadd.xlane.f32.xlu1 %v349_v13  ;;  %396 = vadd.xlane.f32.xlu0 %v350_v57  ;;  %v1065_v14 = vsub.f32 %v923_v17, %v289_v58 }
  0xc2   : > { %v245_v62 = vpop.xlane.xlu0 %244  ;;  %v247_v63 = vpop.xlane.xlu1 %246 }
  0xc3   : > { %v290_v0 = vmul.f32 0.0078125, %v245_v62  ;;  %v352_v1 = vmul.f32 %v1062_v61, %v1062_v61  ;;  %v291_v2 = vmul.f32 0.0078125, %v247_v63  ;;  %v353_v17 = vmul.f32 %v1065_v14, %v1065_v14 }
  0xc5   : > { %v1072_v5 = vsub.f32 %v928_v18, %v290_v0  ;;  %398 = vadd.xlane.f32.xlu1 %v351_v15  ;;  %400 = vadd.xlane.f32.xlu0 %v352_v1  ;;  %v1075_v16 = vsub.f32 %v931_v19, %v291_v2 }
  0xc6   : > { %v249_v6 = vpop.xlane.xlu0 %248  ;;  %v251_v7 = vpop.xlane.xlu1 %250 }
  0xc7   : > { %v292_v32 = vmul.f32 0.0078125, %v249_v6  ;;  %v354_v33 = vmul.f32 %v1072_v5, %v1072_v5  ;;  %v293_v34 = vmul.f32 0.0078125, %v251_v7  ;;  %v355_v19 = vmul.f32 %v1075_v16, %v1075_v16 }
  0xc9   : > { %v1082_v9 = vsub.f32 %v936_v20, %v292_v32  ;;  %402 = vadd.xlane.f32.xlu1 %v353_v17  ;;  %404 = vadd.xlane.f32.xlu0 %v354_v33  ;;  %v1085_v18 = vsub.f32 %v939_v21, %v293_v34 }
  0xca   : > { %v253_v38 = vpop.xlane.xlu0 %252  ;;  %v255_v39 = vpop.xlane.xlu1 %254 }
  0xcb   : > { %v294_v40 = vmul.f32 0.0078125, %v253_v38  ;;  %v356_v41 = vmul.f32 %v1082_v9, %v1082_v9  ;;  %v295_v42 = vmul.f32 0.0078125, %v255_v39  ;;  %v357_v21 = vmul.f32 %v1085_v18, %v1085_v18 }
  0xcd   : > { %v1092_v11 = vsub.f32 %v944_v22, %v294_v40  ;;  %406 = vadd.xlane.f32.xlu1 %v355_v19  ;;  %408 = vadd.xlane.f32.xlu0 %v356_v41  ;;  %v1095_v20 = vsub.f32 %v947_v23, %v295_v42 }
  0xce   : > { %v257_v46 = vpop.xlane.xlu0 %256  ;;  %v259_v47 = vpop.xlane.xlu1 %258 }
  0xcf   : > { %v296_v48 = vmul.f32 0.0078125, %v257_v46  ;;  %v358_v49 = vmul.f32 %v1092_v11, %v1092_v11  ;;  %v297_v50 = vmul.f32 0.0078125, %v259_v47  ;;  %v359_v23 = vmul.f32 %v1095_v20, %v1095_v20 }
  0xd1   : > { %v1102_v13 = vsub.f32 %v952_v24, %v296_v48  ;;  %410 = vadd.xlane.f32.xlu1 %v357_v21  ;;  %412 = vadd.xlane.f32.xlu0 %v358_v49  ;;  %v1105_v22 = vsub.f32 %v955_v25, %v297_v50 }
  0xd2   : > { %v261_v54 = vpop.xlane.xlu0 %260  ;;  %v263_v55 = vpop.xlane.xlu1 %262 }
  0xd3   : > { %v298_v56 = vmul.f32 0.0078125, %v261_v54  ;;  %v360_v57 = vmul.f32 %v1102_v13, %v1102_v13  ;;  %v299_v58 = vmul.f32 0.0078125, %v263_v55  ;;  %v361_v25 = vmul.f32 %v1105_v22, %v1105_v22 }
  0xd5   : > { %v1112_v15 = vsub.f32 %v960_v26, %v298_v56  ;;  %414 = vadd.xlane.f32.xlu1 %v359_v23  ;;  %416 = vadd.xlane.f32.xlu0 %v360_v57  ;;  %v1115_v24 = vsub.f32 %v963_v27, %v299_v58 }
  0xd6   : > { %v265_v62 = vpop.xlane.xlu0 %264  ;;  %v267_v63 = vpop.xlane.xlu1 %266 }
  0xd7   : > { %v300_v0 = vmul.f32 0.0078125, %v265_v62  ;;  %v362_v1 = vmul.f32 %v1112_v15, %v1112_v15  ;;  %v301_v2 = vmul.f32 0.0078125, %v267_v63  ;;  %v363_v27 = vmul.f32 %v1115_v24, %v1115_v24 }
  0xd9   : > { %v1122_v17 = vsub.f32 %v968_v28, %v300_v0  ;;  %418 = vadd.xlane.f32.xlu1 %v361_v25  ;;  %420 = vadd.xlane.f32.xlu0 %v362_v1  ;;  %v1125_v26 = vsub.f32 %v971_v29, %v301_v2  ;;  %v1146_v0 = vld [vmem:[%s1292_s1] ss:$0 sm:$0xff] }
  0xda   : > { %v269_v6 = vpop.xlane.xlu0 %268  ;;  %v271_v7 = vpop.xlane.xlu1 %270 }
  0xdb   : > { %v302_v32 = vmul.f32 0.0078125, %v269_v6  ;;  %v364_v33 = vmul.f32 %v1122_v17, %v1122_v17  ;;  %v303_v34 = vmul.f32 0.0078125, %v271_v7  ;;  %v365_v29 = vmul.f32 %v1125_v26, %v1125_v26 }
  0xdd   : > { %v1132_v19 = vsub.f32 %v976_v30, %v302_v32  ;;  %422 = vadd.xlane.f32.xlu1 %v363_v27  ;;  %424 = vadd.xlane.f32.xlu0 %v364_v33  ;;  %v1135_v28 = vsub.f32 %v979_v31, %v303_v34  ;;  %v1152_v32 = vld [vmem:[%s1293_s2] ss:$0 sm:$0xff] }
  0xdf   : > { %v366_v38 = vmul.f32 %v1132_v19, %v1132_v19  ;;  %v367_v39 = vmul.f32 %v1135_v28, %v1135_v28 }
  0xe1   : > { %426 = vadd.xlane.f32.xlu1 %v365_v29  ;;  %428 = vadd.xlane.f32.xlu0 %v366_v38 }
  0xe5   : > { %430 = vadd.xlane.f32.xlu1 %v367_v39 }
 0x132   : > { %v369_v40 = vpop.xlane.xlu0 %368 }
 0x133   : > { %v432_v30 = vmul.f32 0.0078125, %v369_v40 }
 0x135   : > { %v464_v41 = vadd.f32 1e-05, %v432_v30 }
 0x136   : > { %v371_v42 = vpop.xlane.xlu1 %370  ;;  %v373_v21 = vpop.xlane.xlu0 %372 }
 0x137   : > { %745 = vrsqrt.f32 %v464_v41  ;;  %v433_v31 = vmul.f32 0.0078125, %v371_v42  ;;  %v434_v46 = vmul.f32 0.0078125, %v373_v21 }
 0x139   : > { %v465_v47 = vadd.f32 1e-05, %v433_v31  ;;  %v466_v48 = vadd.f32 1e-05, %v434_v46 }
 0x13a   : > { %v375_v49 = vpop.xlane.xlu1 %374  ;;  %v377_v50 = vpop.xlane.xlu0 %376 }
 0x13b   : > { %747 = vrsqrt.f32 %v465_v47  ;;  %v435_v23 = vmul.f32 0.0078125, %v375_v49  ;;  %v436_v54 = vmul.f32 0.0078125, %v377_v50 }
 0x13c   : > { %749 = vrsqrt.f32 %v466_v48 }
 0x13d   : > { %v467_v55 = vadd.f32 1e-05, %v435_v23  ;;  %v468_v56 = vadd.f32 1e-05, %v436_v54 }
 0x13e   : > { %v379_v57 = vpop.xlane.xlu1 %378  ;;  %v381_v58 = vpop.xlane.xlu0 %380 }
 0x13f   : > { %751 = vrsqrt.f32 %v467_v55  ;;  %v437_v25 = vmul.f32 0.0078125, %v379_v57  ;;  %v438_v62 = vmul.f32 0.0078125, %v381_v58 }
 0x140   : > { %753 = vrsqrt.f32 %v468_v56 }
 0x141   : > { %v746_v63 = vpop.eup %745  ;;  %v469_v1 = vadd.f32 1e-05, %v437_v25  ;;  %v470_v2 = vadd.f32 1e-05, %v438_v62 }
 0x142   : > { %v528_v27 = vmul.f32 %v746_v63, %v984_v36  ;;  %v383_v6 = vpop.xlane.xlu1 %382  ;;  %v385_v7 = vpop.xlane.xlu0 %384 }
 0x143   : > { %755 = vrsqrt.f32 %v469_v1  ;;  %v439_v33 = vmul.f32 0.0078125, %v383_v6  ;;  %v440_v34 = vmul.f32 0.0078125, %v385_v7 }
 0x144   : > { %v566_v29 = vmul.f32 %v1146_v0, %v528_v27  ;;  %757 = vrsqrt.f32 %v470_v2 }
 0x145   : > { %v748_v38 = vpop.eup %747  ;;  %v471_v36 = vadd.f32 1e-05, %v439_v33  ;;  %v472_v39 = vadd.f32 1e-05, %v440_v34 }
 0x146   : > { %v750_v40 = vpop.eup %749  ;;  %v604_v30 = vadd.f32 %v1152_v32, %v566_v29  ;;  %v529_v41 = vmul.f32 %v748_v38, %v992_v43  ;;  %v387_v42 = vpop.xlane.xlu1 %386 }
 0x147   : > { %v389_v21 = vpop.xlane.xlu0 %388  ;;  %v530_v31 = vmul.f32 %v750_v40, %v987_v37  ;;  %759 = vrsqrt.f32 %v471_v36  ;;  %v441_v46 = vmul.f32 0.0078125, %v387_v42 }
 0x148   : > { %v442_v47 = vmul.f32 0.0078125, %v389_v21  ;;  %636 = vst [vmem:[%s1160_s25] sm:$0xff] %v604_v30  ;;  %v567_v48 = vmul.f32 %v1146_v0, %v529_v41  ;;  %761 = vrsqrt.f32 %v472_v39 }
 0x149   : > { %v752_v49 = vpop.eup %751  ;;  %v568_v50 = vmul.f32 %v1146_v0, %v530_v31  ;;  %v473_v23 = vadd.f32 1e-05, %v441_v46 }
 0x14a   : > { %v474_v54 = vadd.f32 1e-05, %v442_v47  ;;  %v754_v55 = vpop.eup %753  ;;  %v605_v43 = vadd.f32 %v1152_v32, %v567_v48  ;;  %v531_v56 = vmul.f32 %v752_v49, %v995_v44  ;;  %v391_v37 = vpop.xlane.xlu1 %390 }
 0x14b   : > { %v393_v57 = vpop.xlane.xlu0 %392  ;;  %v606_v58 = vadd.f32 %v1152_v32, %v568_v50  ;;  %v532_v25 = vmul.f32 %v754_v55, %v1002_v51  ;;  %763 = vrsqrt.f32 %v473_v23  ;;  %v443_v62 = vmul.f32 0.0078125, %v391_v37 }
 0x14c   : > { %637 = vst [vmem:[%s1160_s25 + $0x8] sm:$0xff] %v605_v43  ;;  %v569_v63 = vmul.f32 %v1146_v0, %v531_v56  ;;  %765 = vrsqrt.f32 %v474_v54  ;;  %v444_v1 = vmul.f32 0.0078125, %v393_v57 }
 0x14d   : > { %v756_v2 = vpop.eup %755  ;;  %638 = vst [vmem:[%s1160_s25 + $0x10] sm:$0xff] %v606_v58  ;;  %v570_v27 = vmul.f32 %v1146_v0, %v532_v25  ;;  %v475_v6 = vadd.f32 1e-05, %v443_v62 }
 0x14e   : > { %v758_v44 = vpop.eup %757  ;;  %v607_v7 = vadd.f32 %v1152_v32, %v569_v63  ;;  %v533_v33 = vmul.f32 %v756_v2, %v1005_v52  ;;  %v476_v51 = vadd.f32 1e-05, %v444_v1  ;;  %v395_v34 = vpop.xlane.xlu1 %394 }
 0x14f   : > { %v397_v29 = vpop.xlane.xlu0 %396  ;;  %v608_v38 = vadd.f32 %v1152_v32, %v570_v27  ;;  %v534_v36 = vmul.f32 %v758_v44, %v1012_v59  ;;  %767 = vrsqrt.f32 %v475_v6  ;;  %v445_v39 = vmul.f32 0.0078125, %v395_v34 }
 0x150   : > { %639 = vst [vmem:[%s1160_s25 + $0x18] sm:$0xff] %v607_v7  ;;  %v571_v40 = vmul.f32 %v1146_v0, %v533_v33  ;;  %769 = vrsqrt.f32 %v476_v51  ;;  %v446_v30 = vmul.f32 0.0078125, %v397_v29 }
 0x151   : > { %v760_v41 = vpop.eup %759  ;;  %640 = vst [vmem:[%s1160_s25 + $0x20] sm:$0xff] %v608_v38  ;;  %v572_v42 = vmul.f32 %v1146_v0, %v534_v36  ;;  %v477_v52 = vadd.f32 1e-05, %v445_v39 }
 0x152   : > { %v762_v21 = vpop.eup %761  ;;  %v609_v31 = vadd.f32 %v1152_v32, %v571_v40  ;;  %v535_v46 = vmul.f32 %v760_v41, %v1015_v60  ;;  %v478_v59 = vadd.f32 1e-05, %v446_v30  ;;  %v399_v47 = vpop.xlane.xlu1 %398 }
 0x153   : > { %v401_v48 = vpop.xlane.xlu0 %400  ;;  %v610_v49 = vadd.f32 %v1152_v32, %v572_v42  ;;  %v536_v50 = vmul.f32 %v762_v21, %v1022_v3  ;;  %771 = vrsqrt.f32 %v477_v52  ;;  %v447_v23 = vmul.f32 0.0078125, %v399_v47 }
 0x154   : > { %641 = vst [vmem:[%s1160_s25 + $0x28] sm:$0xff] %v609_v31  ;;  %v573_v54 = vmul.f32 %v1146_v0, %v535_v46  ;;  %773 = vrsqrt.f32 %v478_v59  ;;  %v448_v55 = vmul.f32 0.0078125, %v401_v48 }
 0x155   : > { %v764_v43 = vpop.eup %763  ;;  %642 = vst [vmem:[%s1160_s25 + $0x30] sm:$0xff] %v610_v49  ;;  %v574_v56 = vmul.f32 %v1146_v0, %v536_v50  ;;  %v479_v60 = vadd.f32 1e-05, %v447_v23 }
 0x156   : > { %v766_v37 = vpop.eup %765  ;;  %v611_v57 = vadd.f32 %v1152_v32, %v573_v54  ;;  %v537_v58 = vmul.f32 %v764_v43, %v1025_v4  ;;  %v480_v3 = vadd.f32 1e-05, %v448_v55  ;;  %v403_v25 = vpop.xlane.xlu1 %402 }
 0x157   : > { %v405_v62 = vpop.xlane.xlu0 %404  ;;  %v612_v63 = vadd.f32 %v1152_v32, %v574_v56  ;;  %v538_v1 = vmul.f32 %v766_v37, %v1032_v35  ;;  %775 = vrsqrt.f32 %v479_v60  ;;  %v449_v2 = vmul.f32 0.0078125, %v403_v25 }
 0x158   : > { %643 = vst [vmem:[%s1160_s25 + $0x38] sm:$0xff] %v611_v57  ;;  %v575_v27 = vmul.f32 %v1146_v0, %v537_v58  ;;  %777 = vrsqrt.f32 %v480_v3  ;;  %v450_v6 = vmul.f32 0.0078125, %v405_v62 }
 0x159   : > { %v768_v44 = vpop.eup %767  ;;  %644 = vst [vmem:[%s1160_s25 + $0x40] sm:$0xff] %v612_v63  ;;  %v576_v7 = vmul.f32 %v1146_v0, %v538_v1  ;;  %v481_v4 = vadd.f32 1e-05, %v449_v2 }
 0x15a   : > { %v770_v33 = vpop.eup %769  ;;  %v613_v51 = vadd.f32 %v1152_v32, %v575_v27  ;;  %v539_v34 = vmul.f32 %v768_v44, %v1035_v8  ;;  %v482_v35 = vadd.f32 1e-05, %v450_v6  ;;  %v407_v29 = vpop.xlane.xlu1 %406 }
 0x15b   : > { %v409_v38 = vpop.xlane.xlu0 %408  ;;  %v614_v36 = vadd.f32 %v1152_v32, %v576_v7  ;;  %v540_v39 = vmul.f32 %v770_v33, %v1042_v45  ;;  %779 = vrsqrt.f32 %v481_v4  ;;  %v451_v40 = vmul.f32 0.0078125, %v407_v29 }
 0x15c   : > { %645 = vst [vmem:[%s1160_s25 + $0x48] sm:$0xff] %v613_v51  ;;  %v577_v30 = vmul.f32 %v1146_v0, %v539_v34  ;;  %781 = vrsqrt.f32 %v482_v35  ;;  %v452_v41 = vmul.f32 0.0078125, %v409_v38 }
 0x15d   : > { %v772_v42 = vpop.eup %771  ;;  %646 = vst [vmem:[%s1160_s25 + $0x50] sm:$0xff] %v614_v36  ;;  %v578_v52 = vmul.f32 %v1146_v0, %v540_v39  ;;  %v483_v8 = vadd.f32 1e-05, %v451_v40 }
 0x15e   : > { %v774_v21 = vpop.eup %773  ;;  %v615_v31 = vadd.f32 %v1152_v32, %v577_v30  ;;  %v541_v46 = vmul.f32 %v772_v42, %v1045_v10  ;;  %v484_v45 = vadd.f32 1e-05, %v452_v41  ;;  %v411_v59 = vpop.xlane.xlu1 %410 }
 0x15f   : > { %v413_v47 = vpop.xlane.xlu0 %412  ;;  %v616_v48 = vadd.f32 %v1152_v32, %v578_v52  ;;  %v542_v49 = vmul.f32 %v774_v21, %v1052_v53  ;;  %783 = vrsqrt.f32 %v483_v8  ;;  %v453_v50 = vmul.f32 0.0078125, %v411_v59 }
 0x160   : > { %647 = vst [vmem:[%s1160_s25 + $0x58] sm:$0xff] %v615_v31  ;;  %v579_v23 = vmul.f32 %v1146_v0, %v541_v46  ;;  %785 = vrsqrt.f32 %v484_v45  ;;  %v454_v54 = vmul.f32 0.0078125, %v413_v47 }
 0x161   : > { %v776_v55 = vpop.eup %775  ;;  %648 = vst [vmem:[%s1160_s25 + $0x60] sm:$0xff] %v616_v48  ;;  %v580_v43 = vmul.f32 %v1146_v0, %v542_v49  ;;  %v485_v10 = vadd.f32 1e-05, %v453_v50 }
 0x162   : > { %v778_v56 = vpop.eup %777  ;;  %v617_v60 = vadd.f32 %v1152_v32, %v579_v23  ;;  %v543_v37 = vmul.f32 %v776_v55, %v1055_v12  ;;  %v486_v53 = vadd.f32 1e-05, %v454_v54  ;;  %v415_v57 = vpop.xlane.xlu1 %414 }
 0x163   : > { %v417_v58 = vpop.xlane.xlu0 %416  ;;  %v618_v3 = vadd.f32 %v1152_v32, %v580_v43  ;;  %v544_v25 = vmul.f32 %v778_v56, %v1062_v61  ;;  %787 = vrsqrt.f32 %v485_v10  ;;  %v455_v62 = vmul.f32 0.0078125, %v415_v57 }
 0x164   : > { %649 = vst [vmem:[%s1160_s25 + $0x68] sm:$0xff] %v617_v60  ;;  %v581_v63 = vmul.f32 %v1146_v0, %v543_v37  ;;  %789 = vrsqrt.f32 %v486_v53  ;;  %v456_v1 = vmul.f32 0.0078125, %v417_v58 }
 0x165   : > { %v780_v2 = vpop.eup %779  ;;  %650 = vst [vmem:[%s1160_s25 + $0x70] sm:$0xff] %v618_v3  ;;  %v582_v27 = vmul.f32 %v1146_v0, %v544_v25  ;;  %v487_v12 = vadd.f32 1e-05, %v455_v62 }
 0x166   : > { %v782_v6 = vpop.eup %781  ;;  %v619_v44 = vadd.f32 %v1152_v32, %v581_v63  ;;  %v545_v7 = vmul.f32 %v780_v2, %v1065_v14  ;;  %v488_v61 = vadd.f32 1e-05, %v456_v1  ;;  %v419_v4 = vpop.xlane.xlu1 %418 }
 0x167   : > { %v421_v33 = vpop.xlane.xlu0 %420  ;;  %v620_v51 = vadd.f32 %v1152_v32, %v582_v27  ;;  %v546_v34 = vmul.f32 %v782_v6, %v1072_v5  ;;  %791 = vrsqrt.f32 %v487_v12  ;;  %v457_v35 = vmul.f32 0.0078125, %v419_v4 }
 0x168   : > { %651 = vst [vmem:[%s1160_s25 + $0x78] sm:$0xff] %v619_v44  ;;  %v583_v29 = vmul.f32 %v1146_v0, %v545_v7  ;;  %793 = vrsqrt.f32 %v488_v61  ;;  %v458_v38 = vmul.f32 0.0078125, %v421_v33 }
 0x169   : > { %v784_v36 = vpop.eup %783  ;;  %652 = vst [vmem:[%s1160_s25 + $0x80] sm:$0xff] %v620_v51  ;;  %v584_v39 = vmul.f32 %v1146_v0, %v546_v34  ;;  %v489_v14 = vadd.f32 1e-05, %v457_v35 }
 0x16a   : > { %v786_v40 = vpop.eup %785  ;;  %v621_v30 = vadd.f32 %v1152_v32, %v583_v29  ;;  %v547_v41 = vmul.f32 %v784_v36, %v1075_v16  ;;  %v490_v5 = vadd.f32 1e-05, %v458_v38  ;;  %v423_v42 = vpop.xlane.xlu1 %422 }
 0x16b   : > { %v425_v52 = vpop.xlane.xlu0 %424  ;;  %v622_v8 = vadd.f32 %v1152_v32, %v584_v39  ;;  %v548_v21 = vmul.f32 %v786_v40, %v1082_v9  ;;  %795 = vrsqrt.f32 %v489_v14  ;;  %v459_v31 = vmul.f32 0.0078125, %v423_v42 }
 0x16c   : > { %653 = vst [vmem:[%s1160_s25 + $0x88] sm:$0xff] %v621_v30  ;;  %v585_v46 = vmul.f32 %v1146_v0, %v547_v41  ;;  %797 = vrsqrt.f32 %v490_v5  ;;  %v460_v45 = vmul.f32 0.0078125, %v425_v52 }
 0x16d   : > { %v788_v59 = vpop.eup %787  ;;  %654 = vst [vmem:[%s1160_s25 + $0x90] sm:$0xff] %v622_v8  ;;  %v586_v47 = vmul.f32 %v1146_v0, %v548_v21  ;;  %v491_v16 = vadd.f32 1e-05, %v459_v31 }
 0x16e   : > { %v790_v48 = vpop.eup %789  ;;  %v623_v49 = vadd.f32 %v1152_v32, %v585_v46  ;;  %v549_v50 = vmul.f32 %v788_v59, %v1085_v18  ;;  %v492_v9 = vadd.f32 1e-05, %v460_v45  ;;  %v427_v23 = vpop.xlane.xlu1 %426 }
 0x16f   : > { %v429_v54 = vpop.xlane.xlu0 %428  ;;  %v624_v55 = vadd.f32 %v1152_v32, %v586_v47  ;;  %v550_v43 = vmul.f32 %v790_v48, %v1092_v11  ;;  %799 = vrsqrt.f32 %v491_v16  ;;  %v461_v10 = vmul.f32 0.0078125, %v427_v23 }
 0x170   : > { %655 = vst [vmem:[%s1160_s25 + $0x98] sm:$0xff] %v623_v49  ;;  %v587_v56 = vmul.f32 %v1146_v0, %v549_v50  ;;  %801 = vrsqrt.f32 %v492_v9  ;;  %v462_v60 = vmul.f32 0.0078125, %v429_v54 }
 0x171   : > { %v792_v37 = vpop.eup %791  ;;  %656 = vst [vmem:[%s1160_s25 + $0xa0] sm:$0xff] %v624_v55  ;;  %v588_v18 = vmul.f32 %v1146_v0, %v550_v43  ;;  %v493_v53 = vadd.f32 1e-05, %v461_v10 }
 0x172   : > { %v794_v57 = vpop.eup %793  ;;  %v625_v58 = vadd.f32 %v1152_v32, %v587_v56  ;;  %v551_v3 = vmul.f32 %v792_v37, %v1095_v20  ;;  %v494_v11 = vadd.f32 1e-05, %v462_v60  ;;  %v431_v25 = vpop.xlane.xlu1 %430 }
 0x173   : > { %v626_v62 = vadd.f32 %v1152_v32, %v588_v18  ;;  %v552_v63 = vmul.f32 %v794_v57, %v1102_v13  ;;  %803 = vrsqrt.f32 %v493_v53  ;;  %v463_v1 = vmul.f32 0.0078125, %v431_v25 }
 0x174   : > { %657 = vst [vmem:[%s1160_s25 + $0xa8] sm:$0xff] %v625_v58  ;;  %v589_v2 = vmul.f32 %v1146_v0, %v551_v3  ;;  %805 = vrsqrt.f32 %v494_v11 }
 0x175   : > { %v796_v27 = vpop.eup %795  ;;  %658 = vst [vmem:[%s1160_s25 + $0xb0] sm:$0xff] %v626_v62  ;;  %v590_v12 = vmul.f32 %v1146_v0, %v552_v63  ;;  %v495_v6 = vadd.f32 1e-05, %v463_v1 }
 0x176   : > { %v798_v20 = vpop.eup %797  ;;  %v627_v44 = vadd.f32 %v1152_v32, %v589_v2  ;;  %v553_v7 = vmul.f32 %v796_v27, %v1105_v22 }
 0x177   : > { %v628_v13 = vadd.f32 %v1152_v32, %v590_v12  ;;  %v554_v61 = vmul.f32 %v798_v20, %v1112_v15  ;;  %807 = vrsqrt.f32 %v495_v6 }
 0x178   : > { %659 = vst [vmem:[%s1160_s25 + $0xb8] sm:$0xff] %v627_v44  ;;  %v591_v4 = vmul.f32 %v1146_v0, %v553_v7 }
 0x179   : > { %v800_v33 = vpop.eup %799  ;;  %660 = vst [vmem:[%s1160_s25 + $0xc0] sm:$0xff] %v628_v13  ;;  %v592_v51 = vmul.f32 %v1146_v0, %v554_v61 }
 0x17a   : > { %v802_v34 = vpop.eup %801  ;;  %v629_v35 = vadd.f32 %v1152_v32, %v591_v4  ;;  %v555_v29 = vmul.f32 %v800_v33, %v1115_v24 }
 0x17b   : > { %v630_v22 = vadd.f32 %v1152_v32, %v592_v51  ;;  %v556_v38 = vmul.f32 %v802_v34, %v1122_v17 }
 0x17c   : > { %661 = vst [vmem:[%s1160_s25 + $0xc8] sm:$0xff] %v629_v35  ;;  %v593_v15 = vmul.f32 %v1146_v0, %v555_v29 }
 0x17d   : > { %v804_v36 = vpop.eup %803  ;;  %662 = vst [vmem:[%s1160_s25 + $0xd0] sm:$0xff] %v630_v22  ;;  %v594_v39 = vmul.f32 %v1146_v0, %v556_v38 }
 0x17e   : > { %v806_v14 = vpop.eup %805  ;;  %v631_v40 = vadd.f32 %v1152_v32, %v593_v15  ;;  %v557_v24 = vmul.f32 %v804_v36, %v1125_v26 }
 0x17f   : > { %v632_v30 = vadd.f32 %v1152_v32, %v594_v39  ;;  %v558_v41 = vmul.f32 %v806_v14, %v1132_v19 }
 0x180   : > { %663 = vst [vmem:[%s1160_s25 + $0xd8] sm:$0xff] %v631_v40  ;;  %v595_v17 = vmul.f32 %v1146_v0, %v557_v24 }
 0x181   : > { %v808_v5 = vpop.eup %807  ;;  %664 = vst [vmem:[%s1160_s25 + $0xe0] sm:$0xff] %v632_v30  ;;  %v596_v42 = vmul.f32 %v1146_v0, %v558_v41 }
 0x182   : > { %v633_v52 = vadd.f32 %v1152_v32, %v595_v17  ;;  %v559_v8 = vmul.f32 %v808_v5, %v1135_v28 }
 0x183   : > { %v634_v21 = vadd.f32 %v1152_v32, %v596_v42 }
 0x184   : > { %665 = vst [vmem:[%s1160_s25 + $0xe8] sm:$0xff] %v633_v52  ;;  %v597_v26 = vmul.f32 %v1146_v0, %v559_v8 }
 0x185   : > { %666 = vst [vmem:[%s1160_s25 + $0xf0] sm:$0xff] %v634_v21 }
 0x186   : > { %v635_v31 = vadd.f32 %v1152_v32, %v597_v26 }
 0x188   : > { %667 = vst [vmem:[%s1160_s25 + $0xf8] sm:$0xff] %v635_v31 }
 0x189 PF: > { %s13_s12 = sadd.s32 1, %s815_s12  }
 0x18a   : > { %p10_p4 = scmp.ge.s32.totalorder %s13_s12, 4  }
 0x18c   :  { %12 = sbr.rel (!%p10_p4) target bundleno = 1 (0x1), region = 62 }

// kernel: priorformer_forward.10
= control target key start
LH: loop header
LB: loop body
LE: loop exit
PB: predicated region body
PF: predicated region fallthrough
CT: control target
= control target key end

     0   :  { %s1348_s15 = smov 0   ;;  %s1567_s0 = inlined_call_operand.vmem [shape: f32[512,128], index: 0, kind: input, shape index: {}]   ;;  %s1568_s1 = inlined_call_operand.vmem [shape: f32[512,32], index: 1, kind: input, shape index: {}]   ;;  %s1569_s2 = inlined_call_operand.vmem [shape: f32[128,128], index: 2, kind: input, shape index: {}]   ;;  %s1570_s3 = inlined_call_operand.vmem [shape: f32[32,128], index: 3, kind: input, shape index: {}]   ;;  %s1571_s4 = inlined_call_operand.vmem [shape: f32[512,128], index: 4, kind: output, shape index: {}]  }
   0x1 LB: > { %s954_s16 = sadd.s32 4294967295, %s1321_s15   ;;  %p958_p0 = scmp.ge.s32.totalorder %s1321_s15, 1  ;;  %s1321_s15 = sphi %s1348_s15, %s14_s15  }
   0x2   : > { %p174_p1 = scmp.lt.s32.totalorder %s1321_s15, 3 }
   0x4   : > { %p175_p2 = pnand %p958_p0, %p174_p1 }
   0x5   : > { %v303_v0 = vld [vmem:[%s1570_s3] sm:$0xff] (!%p175_p2)  ;;  %v304_v1 = vld [vmem:[%s1570_s3 + $0x8] sm:$0xff] (!%p175_p2)  ;;  %s959_s23 = sshll.u32 (!%p175_p2), %s954_s16, 5  ;;  %v305_v5 = vld [vmem:[%s1570_s3 + $0x10] sm:$0xff] (!%p175_p2)  ;;  %vm307_vm0 = vcmask (!%p175_p2), 261120  }
   0x6   : > { %178 = sbr.rel (%p175_p2) target bundleno = 305 (0x131), region = 36  ;;  %v255_v2 = vld [vmem:[%s1569_s2] sm:$0xff] (!%p175_p2)  ;;  %v1219_v3 = vpack.c.bf16 (!%p175_p2), %v304_v1, %v303_v0  ;;  %v256_v4 = vld [vmem:[%s1569_s2 + $0x8] sm:$0xff] (!%p175_p2)  ;;  %v306_v6 = vld [vmem:[%s1570_s3 + $0x18] sm:$0xff] (!%p175_p2)  ;;  %p206_p3 = scmp.lt.s32.totalorder (!%p175_p2), %s959_s23, 63 }
   0x7   : > { %v1227_v7 = vpack.c.bf16 (!%p175_p2), %v256_v4, %v255_v2  ;;  %v1223_v8 = vpack.c.bf16 (!%p175_p2), %v306_v6, %v305_v5  ;;  %v257_v9 = vld [vmem:[%s1569_s2 + $0x10] sm:$0xff] (!%p175_p2)  ;;  %v258_v10 = vld [vmem:[%s1569_s2 + $0x18] sm:$0xff] (!%p175_p2)  ;;  %v259_v12 = vld [vmem:[%s1569_s2 + $0x20] sm:$0xff] (!%p175_p2) }
   0x8   : > { %1220 = vmatprep.subr.bf16.mxu0 (!%p175_p2), %v1219_v3  ;;  %v1231_v11 = vpack.c.bf16 (!%p175_p2), %v258_v10, %v257_v9  ;;  %v260_v13 = vld [vmem:[%s1569_s2 + $0x28] sm:$0xff] (!%p175_p2)  ;;  %v261_v16 = vld [vmem:[%s1569_s2 + $0x30] sm:$0xff] (!%p175_p2)  ;;  %v262_v17 = vld [vmem:[%s1569_s2 + $0x38] sm:$0xff] (!%p175_p2) }
   0x9   : > { %1259 = vmatprep.subr.bf16.mxu1 (!%p175_p2), %v1227_v7  ;;  %1222 = vmatpush3.bf16.msra.mxu0 (!%p175_p2), %v1219_v3  ;;  %v1235_v14 = vpack.c.bf16 (!%p175_p2), %v260_v13, %v259_v12  ;;  %v1239_v20 = vpack.c.bf16 (!%p175_p2), %v262_v17, %v261_v16  ;;  %v263_v21 = vld [vmem:[%s1569_s2 + $0x40] sm:$0xff] (!%p175_p2)  ;;  %v264_v22 = vld [vmem:[%s1569_s2 + $0x48] sm:$0xff] (!%p175_p2)  ;;  %v265_v27 = vld [vmem:[%s1569_s2 + $0x50] sm:$0xff] (!%p175_p2) }
   0xa   : > { %1267 = vmatpush3.bf16.msra.mxu1 (!%p175_p2), %v1227_v7  ;;  %1224 = vmatprep.subr.bf16.mxu0 (!%p175_p2), %v1223_v8  ;;  %v1243_v26 = vpack.c.bf16 (!%p175_p2), %v264_v22, %v263_v21  ;;  %v266_v28 = vld [vmem:[%s1569_s2 + $0x58] sm:$0xff] (!%p175_p2)  ;;  %v267_v32 = vld [vmem:[%s1569_s2 + $0x60] sm:$0xff] (!%p175_p2)  ;;  %v268_v33 = vld [vmem:[%s1569_s2 + $0x68] sm:$0xff] (!%p175_p2) }
   0xb   : > { %1260 = vmatprep.subr.bf16.mxu1 (!%p175_p2), %v1231_v11  ;;  %v1247_v31 = vpack.c.bf16 (!%p175_p2), %v266_v28, %v265_v27  ;;  %v1251_v36 = vpack.c.bf16 (!%p175_p2), %v268_v33, %v267_v32  ;;  %v269_v37 = vld [vmem:[%s1569_s2 + $0x70] sm:$0xff] (!%p175_p2)  ;;  %v270_v38 = vld [vmem:[%s1569_s2 + $0x78] sm:$0xff] (!%p175_p2) }
   0xc   : > { %v1255_v41 = vpack.c.bf16 (!%p175_p2), %v270_v38, %v269_v37 }
   0xd   : > { %s1573_s23 = smov (!%p206_p3, %s959_s23), 63  ;;  %1226 = vmatpush3.bf16.msra.mxu0 %v1223_v8 }
   0xe   : > { %s1386_s12 = sshll.u32 %s1573_s23, 3  ;;  %1268 = vmatpush3.bf16.msra.mxu1 %v1231_v11  ;;  %1228 = vmatprep.subr.bf16.mxu0 %v1227_v7 }
   0xf   : > { %s1392_s16 = scalar_lea.vmem %s1568_s1, %s1386_s12  ;;  %s1407_s23 = scalar_lea.vmem %s1567_s0, %s1386_s12  ;;  %1261 = vmatprep.subr.bf16.mxu1 %v1235_v14 }
  0x10   : > { %v271_v15 = vld [vmem:[%s1392_s16] sm:$0xff]  ;;  %v272_v18 = vld [vmem:[%s1392_s16 + $0x8] sm:$0xff]  ;;  %v273_v19 = vld [vmem:[%s1392_s16 + $0x10] sm:$0xff]  ;;  %s1530_s18 = scalar_lea.vmem %s1571_s4, %s1386_s12 }
  0x11   : > { %1091 = vmatprep.mubr.msk.f32.mxu0 %vm307_vm0, %v271_v15  ;;  %v229_v23 = vld [vmem:[%s1407_s23 + $0x30] sm:$0xff]  ;;  %v274_v24 = vld [vmem:[%s1392_s16 + $0x18] sm:$0xff]  ;;  %v275_v25 = vld [vmem:[%s1392_s16 + $0x20] sm:$0xff] }
  0x12   : > { %1092 = vmatmul.mubr.msk.f32.vlgmr.msra.gmra.mrb[0].mxu0 %vm307_vm0, %v272_v18  ;;  %1269 = vmatpush3.bf16.msra.mxu1 %v1235_v14  ;;  %v276_v29 = vld [vmem:[%s1392_s16 + $0x28] sm:$0xff]  ;;  %v277_v30 = vld [vmem:[%s1392_s16 + $0x30] sm:$0xff]  ;;  %v278_v34 = vld [vmem:[%s1392_s16 + $0x38] sm:$0xff] }
  0x13   : > { %1230 = vmatpush3.bf16.msra.mxu0 %v1227_v7  ;;  %1094 = vmatprep.mubr.msk.f32.mxu0 %vm307_vm0, %v273_v19  ;;  %v279_v35 = vld [vmem:[%s1392_s16 + $0x40] sm:$0xff]  ;;  %v280_v39 = vld [vmem:[%s1392_s16 + $0x48] sm:$0xff]  ;;  %v281_v40 = vld [vmem:[%s1392_s16 + $0x50] sm:$0xff] }
  0x14   : > { %1232 = vmatprep.subr.bf16.mxu0 %v1231_v11  ;;  %1262 = vmatprep.subr.bf16.mxu1 %v1239_v20  ;;  %v282_v42 = vld [vmem:[%s1392_s16 + $0x58] sm:$0xff]  ;;  %v283_v43 = vld [vmem:[%s1392_s16 + $0x60] sm:$0xff]  ;;  %v284_v44 = vld [vmem:[%s1392_s16 + $0x68] sm:$0xff] }
  0x15   : > { %1180 = vmatprep.mubr.f32.mxu1 %v229_v23  ;;  %v230_v45 = vld [vmem:[%s1407_s23 + $0x38] sm:$0xff]  ;;  %v285_v46 = vld [vmem:[%s1392_s16 + $0x70] sm:$0xff]  ;;  %v231_v47 = vld [vmem:[%s1407_s23 + $0x40] sm:$0xff] }
  0x16   : > { %1095 = vmatmul.mubr.msk.f32.gmra.mrb[2].mxu0 %vm307_vm0, %v274_v24  ;;  %1270 = vmatpush3.bf16.msra.mxu1 %v1239_v20  ;;  %v286_v48 = vld [vmem:[%s1392_s16 + $0x78] sm:$0xff]  ;;  %v232_v49 = vld [vmem:[%s1407_s23 + $0x48] sm:$0xff]  ;;  %v287_v50 = vld [vmem:[%s1392_s16 + $0x80] sm:$0xff] }
  0x17   : > { %1097 = vmatprep.mubr.msk.f32.mxu0 %vm307_vm0, %v275_v25  ;;  %1234 = vmatpush3.bf16.msra.mxu0 %v1231_v11  ;;  %v233_v51 = vld [vmem:[%s1407_s23 + $0x50] sm:$0xff]  ;;  %v288_v52 = vld [vmem:[%s1392_s16 + $0x88] sm:$0xff]  ;;  %v234_v53 = vld [vmem:[%s1407_s23 + $0x58] sm:$0xff] }
  0x18   : > { %1236 = vmatprep.subr.bf16.mxu0 %v1235_v14  ;;  %1263 = vmatprep.subr.bf16.mxu1 %v1243_v26  ;;  %v289_v54 = vld [vmem:[%s1392_s16 + $0x90] sm:$0xff]  ;;  %v235_v55 = vld [vmem:[%s1407_s23 + $0x60] sm:$0xff]  ;;  %v290_v56 = vld [vmem:[%s1392_s16 + $0x98] sm:$0xff] }
  0x19   : > { %v236_v57 = vld [vmem:[%s1407_s23 + $0x68] sm:$0xff]  ;;  %v291_v58 = vld [vmem:[%s1392_s16 + $0xa0] sm:$0xff]  ;;  %v237_v59 = vld [vmem:[%s1407_s23 + $0x70] sm:$0xff] }
  0x1a   : > { %1098 = vmatmul.mubr.msk.f32.gmra.mrb[4].mxu0 %vm307_vm0, %v276_v29  ;;  %1271 = vmatpush3.bf16.msra.mxu1 %v1243_v26  ;;  %v292_v60 = vld [vmem:[%s1392_s16 + $0xa8] sm:$0xff]  ;;  %v238_v61 = vld [vmem:[%s1407_s23 + $0x78] sm:$0xff]  ;;  %v293_v62 = vld [vmem:[%s1392_s16 + $0xb0] sm:$0xff] }
  0x1b   : > { %1100 = vmatprep.mubr.msk.f32.mxu0 %vm307_vm0, %v277_v30  ;;  %1238 = vmatpush3.bf16.msra.mxu0 %v1235_v14  ;;  %v239_v63 = vld [vmem:[%s1407_s23 + $0x80] sm:$0xff]  ;;  %v294_v0 = vld [vmem:[%s1392_s16 + $0xb8] sm:$0xff]  ;;  %v240_v1 = vld [vmem:[%s1407_s23 + $0x88] sm:$0xff] }
  0x1c   : > { %1240 = vmatprep.subr.bf16.mxu0 %v1239_v20  ;;  %1264 = vmatprep.subr.bf16.mxu1 %v1247_v31  ;;  %v295_v2 = vld [vmem:[%s1392_s16 + $0xc0] sm:$0xff]  ;;  %v241_v3 = vld [vmem:[%s1407_s23 + $0x90] sm:$0xff]  ;;  %v296_v4 = vld [vmem:[%s1392_s16 + $0xc8] sm:$0xff] }
  0x1d   : > { %v242_v5 = vld [vmem:[%s1407_s23 + $0x98] sm:$0xff]  ;;  %v297_v6 = vld [vmem:[%s1392_s16 + $0xd0] sm:$0xff]  ;;  %v243_v7 = vld [vmem:[%s1407_s23 + $0xa0] sm:$0xff] }
  0x1e   : > { %1101 = vmatmul.mubr.msk.f32.gmra.mrb[6].mxu0 %vm307_vm0, %v278_v34  ;;  %1272 = vmatpush3.bf16.msra.mxu1 %v1247_v31  ;;  %v298_v8 = vld [vmem:[%s1392_s16 + $0xd8] sm:$0xff]  ;;  %v244_v9 = vld [vmem:[%s1407_s23 + $0xa8] sm:$0xff]  ;;  %v299_v10 = vld [vmem:[%s1392_s16 + $0xe0] sm:$0xff] }
  0x1f   : > { %1103 = vmatprep.mubr.msk.f32.mxu0 %vm307_vm0, %v279_v35  ;;  %1242 = vmatpush3.bf16.msra.mxu0 %v1239_v20  ;;  %v245_v11 = vld [vmem:[%s1407_s23 + $0xb0] sm:$0xff]  ;;  %v300_v12 = vld [vmem:[%s1392_s16 + $0xe8] sm:$0xff]  ;;  %v246_v13 = vld [vmem:[%s1407_s23 + $0xb8] sm:$0xff] }
  0x20   : > { %1244 = vmatprep.subr.bf16.mxu0 %v1243_v26  ;;  %1265 = vmatprep.subr.bf16.mxu1 %v1251_v36  ;;  %v301_v14 = vld [vmem:[%s1392_s16 + $0xf0] sm:$0xff]  ;;  %v247_v15 = vld [vmem:[%s1407_s23 + $0xc0] sm:$0xff]  ;;  %v302_v16 = vld [vmem:[%s1392_s16 + $0xf8] sm:$0xff] }
  0x21   : > { %v248_v17 = vld [vmem:[%s1407_s23 + $0xc8] sm:$0xff]  ;;  %v223_v18 = vld [vmem:[%s1407_s23] sm:$0xff]  ;;  %v249_v19 = vld [vmem:[%s1407_s23 + $0xd0] sm:$0xff] }
  0x22   : > { %1104 = vmatmul.mubr.msk.f32.gmra.mrb[8].mxu0 %vm307_vm0, %v280_v39  ;;  %1273 = vmatpush3.bf16.msra.mxu1 %v1251_v36  ;;  %v224_v20 = vld [vmem:[%s1407_s23 + $0x8] sm:$0xff]  ;;  %v250_v21 = vld [vmem:[%s1407_s23 + $0xd8] sm:$0xff]  ;;  %v225_v22 = vld [vmem:[%s1407_s23 + $0x10] sm:$0xff] }
  0x23   : > { %1106 = vmatprep.mubr.msk.f32.mxu0 %vm307_vm0, %v281_v40  ;;  %1246 = vmatpush3.bf16.msra.mxu0 %v1243_v26  ;;  %v251_v23 = vld [vmem:[%s1407_s23 + $0xe0] sm:$0xff]  ;;  %v226_v24 = vld [vmem:[%s1407_s23 + $0x18] sm:$0xff]  ;;  %v252_v25 = vld [vmem:[%s1407_s23 + $0xe8] sm:$0xff] }
  0x24   : > { %1248 = vmatprep.subr.bf16.mxu0 %v1247_v31  ;;  %1266 = vmatprep.subr.bf16.mxu1 %v1255_v41  ;;  %v227_v26 = vld [vmem:[%s1407_s23 + $0x20] sm:$0xff]  ;;  %v253_v27 = vld [vmem:[%s1407_s23 + $0xf0] sm:$0xff]  ;;  %v228_v28 = vld [vmem:[%s1407_s23 + $0x28] sm:$0xff] }
  0x25   : > { %v254_v29 = vld [vmem:[%s1407_s23 + $0xf8] sm:$0xff] }
  0x26   : > { %1107 = vmatmul.mubr.msk.f32.gmra.mrb[10].mxu0 %vm307_vm0, %v282_v42  ;;  %1274 = vmatpush3.bf16.msra.mxu1 %v1255_v41 }
  0x27   : > { %1109 = vmatprep.mubr.msk.f32.mxu0 %vm307_vm0, %v283_v43  ;;  %1250 = vmatpush3.bf16.msra.mxu0 %v1247_v31 }
  0x28   : > { %1252 = vmatprep.subr.bf16.mxu0 %v1251_v36 }
  0x29   : > { %1181 = vmatmul.mubr.f32.vlgmr.msra.gmra.mrb[0].mxu1 %v230_v45 }
  0x2a   : > { %1110 = vmatmul.mubr.msk.f32.gmra.mrb[12].mxu0 %vm307_vm0, %v284_v44  ;;  %1183 = vmatprep.mubr.f32.mxu1 %v231_v47 }
  0x2b   : > { %1112 = vmatprep.mubr.msk.f32.mxu0 %vm307_vm0, %v285_v46  ;;  %1254 = vmatpush3.bf16.msra.mxu0 %v1251_v36 }
  0x2c   : > { %1256 = vmatprep.subr.bf16.mxu0 %v1255_v41 }
  0x2d   : > { %1184 = vmatmul.mubr.f32.gmra.mrb[2].mxu1 %v232_v49 }
  0x2e   : > { %1113 = vmatmul.mubr.msk.f32.gmra.mrb[14].mxu0 %vm307_vm0, %v286_v48  ;;  %1186 = vmatprep.mubr.f32.mxu1 %v233_v51 }
  0x2f   : > { %1115 = vmatprep.mubr.msk.f32.mxu0 %vm307_vm0, %v287_v50  ;;  %1258 = vmatpush3.bf16.msra.mxu0 %v1255_v41 }
  0x31   : > { %1187 = vmatmul.mubr.f32.gmra.mrb[4].mxu1 %v234_v53 }
  0x32   : > { %1116 = vmatmul.mubr.msk.f32.gmra.mrb[16].mxu0 %vm307_vm0, %v288_v52  ;;  %1189 = vmatprep.mubr.f32.mxu1 %v235_v55 }
  0x33   : > { %1118 = vmatprep.mubr.msk.f32.mxu0 %vm307_vm0, %v289_v54 }
  0x35   : > { %1190 = vmatmul.mubr.f32.gmra.mrb[6].mxu1 %v236_v57 }
  0x36   : > { %1119 = vmatmul.mubr.msk.f32.gmra.mrb[18].mxu0 %vm307_vm0, %v290_v56  ;;  %1192 = vmatprep.mubr.f32.mxu1 %v237_v59 }
  0x37   : > { %1121 = vmatprep.mubr.msk.f32.mxu0 %vm307_vm0, %v291_v58 }
  0x39   : > { %1193 = vmatmul.mubr.f32.gmra.mrb[8].mxu1 %v238_v61 }
  0x3a   : > { %1122 = vmatmul.mubr.msk.f32.gmra.mrb[20].mxu0 %vm307_vm0, %v292_v60  ;;  %1195 = vmatprep.mubr.f32.mxu1 %v239_v63 }
  0x3b   : > { %1124 = vmatprep.mubr.msk.f32.mxu0 %vm307_vm0, %v293_v62 }
  0x3d   : > { %1196 = vmatmul.mubr.f32.gmra.mrb[10].mxu1 %v240_v1 }
  0x3e   : > { %1125 = vmatmul.mubr.msk.f32.gmra.mrb[22].mxu0 %vm307_vm0, %v294_v0  ;;  %1198 = vmatprep.mubr.f32.mxu1 %v241_v3 }
  0x3f   : > { %1127 = vmatprep.mubr.msk.f32.mxu0 %vm307_vm0, %v295_v2 }
  0x41   : > { %1199 = vmatmul.mubr.f32.gmra.mrb[12].mxu1 %v242_v5 }
  0x42   : > { %1128 = vmatmul.mubr.msk.f32.gmra.mrb[24].mxu0 %vm307_vm0, %v296_v4  ;;  %1201 = vmatprep.mubr.f32.mxu1 %v243_v7 }
  0x43   : > { %1130 = vmatprep.mubr.msk.f32.mxu0 %vm307_vm0, %v297_v6 }
  0x45   : > { %1202 = vmatmul.mubr.f32.gmra.mrb[14].mxu1 %v244_v9 }
  0x46   : > { %1131 = vmatmul.mubr.msk.f32.gmra.mrb[26].mxu0 %vm307_vm0, %v298_v8  ;;  %1204 = vmatprep.mubr.f32.mxu1 %v245_v11 }
  0x47   : > { %1133 = vmatprep.mubr.msk.f32.mxu0 %vm307_vm0, %v299_v10 }
  0x49   : > { %1205 = vmatmul.mubr.f32.gmra.mrb[16].mxu1 %v246_v13 }
  0x4a   : > { %1134 = vmatmul.mubr.msk.f32.gmra.mrb[28].mxu0 %vm307_vm0, %v300_v12  ;;  %1207 = vmatprep.mubr.f32.mxu1 %v247_v15 }
  0x4b   : > { %1136 = vmatprep.mubr.msk.f32.mxu0 %vm307_vm0, %v301_v14 }
  0x4d   : > { %1208 = vmatmul.mubr.f32.gmra.mrb[18].mxu1 %v248_v17 }
  0x4e   : > { %1137 = vmatmul.mubr.msk.f32.gmra.mrb[30].mxu0 %vm307_vm0, %v302_v16  ;;  %1210 = vmatprep.mubr.f32.mxu1 %v249_v19 }
  0x4f   : > { %1171 = vmatprep.mubr.f32.mxu0 %v223_v18 }
  0x51   : > { %1211 = vmatmul.mubr.f32.gmra.mrb[20].mxu1 %v250_v21 }
  0x52   : > { %1172 = vmatmul.mubr.f32.vlgmr.msra.gmra.mrb[0].mxu0 %v224_v20  ;;  %1213 = vmatprep.mubr.f32.mxu1 %v251_v23 }
  0x53   : > { %1174 = vmatprep.mubr.f32.mxu0 %v225_v22 }
  0x55   : > { %1214 = vmatmul.mubr.f32.gmra.mrb[22].mxu1 %v252_v25 }
  0x56   : > { %1175 = vmatmul.mubr.f32.gmra.mrb[2].mxu0 %v226_v24  ;;  %1216 = vmatprep.mubr.f32.mxu1 %v253_v27 }
  0x57   : > { %1177 = vmatprep.mubr.f32.mxu0 %v227_v26 }
  0x59   : > { %1217 = vmatmul.mubr.f32.gmra.mrb[24].mxu1 %v254_v29 }
  0x5a   : > { %1178 = vmatmul.mubr.f32.gmra.mrb[4].mxu0 %v228_v28 }
  0xf1   : > { %v1102_v30 = vpop.f32.mrb[6].mxu0 }
  0xf2   : > { %v500_v31 = vpop.f32.mrb[7].mxu0 }
  0xf5   : > { %v1105_v32 = vpop.f32.mrb[8].mxu0 }
  0xf6   : > { %v510_v33 = vpop.f32.mrb[9].mxu0 }
  0xf9   : > { %v1108_v34 = vpop.f32.mrb[10].mxu0 }
  0xfa   : > { %v520_v35 = vpop.f32.mrb[11].mxu0 }
  0xfc   : > { %v1182_v37 = vpop.f32.mrb[0].mxu1 }
  0xfd   : > { %v1111_v36 = vpop.f32.mrb[12].mxu0  ;;  %v731_v39 = vadd.f32 %v1182_v37, %v1102_v30  ;;  %v725_v40 = vpop.f32.mrb[1].mxu1 }
  0xfe   : > { %v530_v38 = vpop.f32.mrb[13].mxu0  ;;  %v726_v41 = vadd.f32 %v725_v40, %v500_v31 }
  0xff   : > { %861 = vst [vmem:[%s1530_s18 + $0x38] sm:$0xff] %v731_v39 }
 0x100   : > { %860 = vst [vmem:[%s1530_s18 + $0x30] sm:$0xff] %v726_v41  ;;  %v1185_v43 = vpop.f32.mrb[2].mxu1 }
 0x101   : > { %v1114_v42 = vpop.f32.mrb[14].mxu0  ;;  %v741_v45 = vadd.f32 %v1185_v43, %v1105_v32  ;;  %v735_v46 = vpop.f32.mrb[3].mxu1 }
 0x102   : > { %v540_v44 = vpop.f32.mrb[15].mxu0  ;;  %v736_v47 = vadd.f32 %v735_v46, %v510_v33 }
 0x103   : > { %863 = vst [vmem:[%s1530_s18 + $0x48] sm:$0xff] %v741_v45 }
 0x104   : > { %862 = vst [vmem:[%s1530_s18 + $0x40] sm:$0xff] %v736_v47  ;;  %v1188_v49 = vpop.f32.mrb[4].mxu1 }
 0x105   : > { %v1117_v48 = vpop.f32.mrb[16].mxu0  ;;  %v751_v51 = vadd.f32 %v1188_v49, %v1108_v34  ;;  %v745_v52 = vpop.f32.mrb[5].mxu1 }
 0x106   : > { %v550_v50 = vpop.f32.mrb[17].mxu0  ;;  %v746_v53 = vadd.f32 %v745_v52, %v520_v35 }
 0x107   : > { %865 = vst [vmem:[%s1530_s18 + $0x58] sm:$0xff] %v751_v51 }
 0x108   : > { %864 = vst [vmem:[%s1530_s18 + $0x50] sm:$0xff] %v746_v53  ;;  %v1191_v55 = vpop.f32.mrb[6].mxu1 }
 0x109   : > { %v1120_v54 = vpop.f32.mrb[18].mxu0  ;;  %v761_v57 = vadd.f32 %v1191_v55, %v1111_v36  ;;  %v755_v58 = vpop.f32.mrb[7].mxu1 }
 0x10a   : > { %v560_v56 = vpop.f32.mrb[19].mxu0  ;;  %v756_v59 = vadd.f32 %v755_v58, %v530_v38 }
 0x10b   : > { %867 = vst [vmem:[%s1530_s18 + $0x68] sm:$0xff] %v761_v57 }
 0x10c   : > { %866 = vst [vmem:[%s1530_s18 + $0x60] sm:$0xff] %v756_v59  ;;  %v1194_v61 = vpop.f32.mrb[8].mxu1 }
 0x10d   : > { %v1123_v60 = vpop.f32.mrb[20].mxu0  ;;  %v771_v63 = vadd.f32 %v1194_v61, %v1114_v42  ;;  %v765_v0 = vpop.f32.mrb[9].mxu1 }
 0x10e   : > { %v570_v62 = vpop.f32.mrb[21].mxu0  ;;  %v766_v1 = vadd.f32 %v765_v0, %v540_v44 }
 0x10f   : > { %869 = vst [vmem:[%s1530_s18 + $0x78] sm:$0xff] %v771_v63 }
 0x110   : > { %868 = vst [vmem:[%s1530_s18 + $0x70] sm:$0xff] %v766_v1  ;;  %v1197_v3 = vpop.f32.mrb[10].mxu1 }
 0x111   : > { %v1126_v2 = vpop.f32.mrb[22].mxu0  ;;  %v781_v5 = vadd.f32 %v1197_v3, %v1117_v48  ;;  %v775_v6 = vpop.f32.mrb[11].mxu1 }
 0x112   : > { %v580_v4 = vpop.f32.mrb[23].mxu0  ;;  %v776_v7 = vadd.f32 %v775_v6, %v550_v50 }
 0x113   : > { %871 = vst [vmem:[%s1530_s18 + $0x88] sm:$0xff] %v781_v5 }
 0x114   : > { %870 = vst [vmem:[%s1530_s18 + $0x80] sm:$0xff] %v776_v7  ;;  %v1200_v9 = vpop.f32.mrb[12].mxu1 }
 0x115   : > { %v1129_v8 = vpop.f32.mrb[24].mxu0  ;;  %v791_v11 = vadd.f32 %v1200_v9, %v1120_v54  ;;  %v785_v12 = vpop.f32.mrb[13].mxu1 }
 0x116   : > { %v590_v10 = vpop.f32.mrb[25].mxu0  ;;  %v786_v13 = vadd.f32 %v785_v12, %v560_v56 }
 0x117   : > { %873 = vst [vmem:[%s1530_s18 + $0x98] sm:$0xff] %v791_v11 }
 0x118   : > { %872 = vst [vmem:[%s1530_s18 + $0x90] sm:$0xff] %v786_v13  ;;  %v1203_v15 = vpop.f32.mrb[14].mxu1 }
 0x119   : > { %v1132_v14 = vpop.f32.mrb[26].mxu0  ;;  %v801_v17 = vadd.f32 %v1203_v15, %v1123_v60  ;;  %v795_v18 = vpop.f32.mrb[15].mxu1 }
 0x11a   : > { %v600_v16 = vpop.f32.mrb[27].mxu0  ;;  %v796_v19 = vadd.f32 %v795_v18, %v570_v62 }
 0x11b   : > { %875 = vst [vmem:[%s1530_s18 + $0xa8] sm:$0xff] %v801_v17 }
 0x11c   : > { %874 = vst [vmem:[%s1530_s18 + $0xa0] sm:$0xff] %v796_v19  ;;  %v1206_v21 = vpop.f32.mrb[16].mxu1 }
 0x11d   : > { %v1135_v20 = vpop.f32.mrb[28].mxu0  ;;  %v811_v23 = vadd.f32 %v1206_v21, %v1126_v2  ;;  %v805_v24 = vpop.f32.mrb[17].mxu1 }
 0x11e   : > { %v610_v22 = vpop.f32.mrb[29].mxu0  ;;  %v806_v25 = vadd.f32 %v805_v24, %v580_v4 }
 0x11f   : > { %877 = vst [vmem:[%s1530_s18 + $0xb8] sm:$0xff] %v811_v23 }
 0x120   : > { %876 = vst [vmem:[%s1530_s18 + $0xb0] sm:$0xff] %v806_v25  ;;  %v1209_v27 = vpop.f32.mrb[18].mxu1 }
 0x121   : > { %v1138_v26 = vpop.f32.mrb[30].mxu0  ;;  %v821_v29 = vadd.f32 %v1209_v27, %v1129_v8  ;;  %v815_v30 = vpop.f32.mrb[19].mxu1 }
 0x122   : > { %v620_v28 = vpop.f32.mrb[31].mxu0  ;;  %v816_v31 = vadd.f32 %v815_v30, %v590_v10 }
 0x123   : > { %879 = vst [vmem:[%s1530_s18 + $0xc8] sm:$0xff] %v821_v29 }
 0x124   : > { %878 = vst [vmem:[%s1530_s18 + $0xc0] sm:$0xff] %v816_v31  ;;  %v1212_v33 = vpop.f32.mrb[20].mxu1 }
 0x125   : > { %v1173_v32 = vpop.f32.mrb[0].mxu0  ;;  %v831_v35 = vadd.f32 %v1212_v33, %v1132_v14  ;;  %v825_v36 = vpop.f32.mrb[21].mxu1 }
 0x126   : > { %855 = vst [vmem:[%s1530_s18 + $0x8] sm:$0xff] %v1173_v32  ;;  %v695_v34 = vpop.f32.mrb[1].mxu0  ;;  %v826_v37 = vadd.f32 %v825_v36, %v600_v16 }
 0x127   : > { %854 = vst [vmem:[%s1530_s18] sm:$0xff] %v695_v34  ;;  %881 = vst [vmem:[%s1530_s18 + $0xd8] sm:$0xff] %v831_v35 }
 0x128   : > { %880 = vst [vmem:[%s1530_s18 + $0xd0] sm:$0xff] %v826_v37  ;;  %v1215_v39 = vpop.f32.mrb[22].mxu1 }
 0x129   : > { %v1176_v38 = vpop.f32.mrb[2].mxu0  ;;  %v841_v41 = vadd.f32 %v1215_v39, %v1135_v20  ;;  %v835_v42 = vpop.f32.mrb[23].mxu1 }
 0x12a   : > { %857 = vst [vmem:[%s1530_s18 + $0x18] sm:$0xff] %v1176_v38  ;;  %v705_v40 = vpop.f32.mrb[3].mxu0  ;;  %v836_v43 = vadd.f32 %v835_v42, %v610_v22 }
 0x12b   : > { %856 = vst [vmem:[%s1530_s18 + $0x10] sm:$0xff] %v705_v40  ;;  %883 = vst [vmem:[%s1530_s18 + $0xe8] sm:$0xff] %v841_v41 }
 0x12c   : > { %882 = vst [vmem:[%s1530_s18 + $0xe0] sm:$0xff] %v836_v43  ;;  %v1218_v45 = vpop.f32.mrb[24].mxu1 }
 0x12d   : > { %v1179_v44 = vpop.f32.mrb[4].mxu0  ;;  %v851_v47 = vadd.f32 %v1218_v45, %v1138_v26  ;;  %v845_v48 = vpop.f32.mrb[25].mxu1 }
 0x12e   : > { %859 = vst [vmem:[%s1530_s18 + $0x28] sm:$0xff] %v1179_v44  ;;  %v715_v46 = vpop.f32.mrb[5].mxu0  ;;  %v846_v49 = vadd.f32 %v845_v48, %v620_v28 }
 0x12f   : > { %858 = vst [vmem:[%s1530_s18 + $0x20] sm:$0xff] %v715_v46  ;;  %885 = vst [vmem:[%s1530_s18 + $0xf8] sm:$0xff] %v851_v47 }
 0x130   : > { %884 = vst [vmem:[%s1530_s18 + $0xf0] sm:$0xff] %v846_v49 }
 0x131 PF: > { %s14_s15 = sadd.s32 1, %s1321_s15  }
 0x132   : > { %p11_p4 = scmp.ge.s32.totalorder %s14_s15, 4  }
 0x134   :  { %13 = sbr.rel (!%p11_p4) target bundleno = 1 (0x1), region = 69 }

// kernel: priorformer_forward.13
= control target key start
LH: loop header
LB: loop body
LE: loop exit
PB: predicated region body
PF: predicated region fallthrough
CT: control target
= control target key end

     0   :  { %11 = vsyncpa [#allocation3], 0  ;;  %s3240_s0 = inlined_call_operand.vmem [shape: f32[512,128], index: 0, kind: input, shape index: {}]   ;;  %s3241_s1 = inlined_call_operand.vmem [shape: f32[512,32], index: 1, kind: input, shape index: {}]   ;;  %s3242_s2 = inlined_call_operand.vmem [shape: f32[512,128], index: 2, kind: input, shape index: {}]   ;;  %s3243_s3 = inlined_call_operand.vmem [shape: f32[128,256], index: 3, kind: input, shape index: {}]   ;;  %s3244_s4 = inlined_call_operand.vmem [shape: f32[32,256], index: 4, kind: input, shape index: {}]   ;;  %s3245_s5 = inlined_call_operand.vmem [shape: f32[128,128], index: 5, kind: input, shape index: {}]   ;;  %s3246_s6 = inlined_call_operand.hbm [shape: f32[512,128], index: 6, kind: output, shape index: {}]  }
   0x1   :  { %13 = vsyncpa [#allocation3 + $0x1], 0  ;;  %s2295_s21 = smov 0   ;;  %s2297_s22 = smov 0  }
   0x2   :  { %s2299_s23 = smov 0   ;;  %s2301_s24 = smov 0  }
   0x3 LB: > { %s2316_s25 = sadd.s32 4294967295, %s2254_s24   ;;  %s1769_s26 = sadd.s32 4294967294, %s2254_s24   ;;  %s2254_s24 = sphi %s2301_s24, %s3252_s24   ;;  %s2250_s23 = sphi %s2299_s23, %s3251_s23   ;;  %s2246_s22 = sphi %s2297_s22, %s3250_s22   ;;  %s2242_s21 = sphi %s2295_s21, %s3249_s21  }
   0x4   : > { %s2320_s27 = sadd.s32 1, %s2254_s24   ;;  %s167_s28 = sadd.s32 1, %s2250_s23 }
   0x5   : > { %s164_s29 = ssub.s32 %s2254_s24, %s2320_s27  ;;  %p177_p0 = scmp.ne.s32.totalorder %s2250_s23, %s2246_s22 }
   0x6   : > { %p165_p1 = scmp.eq.s32.totalorder %s164_s29, 0  ;;  %p178_p2 = scmp.eq.s32.totalorder %s2316_s25, 1 }
   0x7   : > { %p183_p3 = scmp.ne.s32.totalorder %s2246_s22, %s2242_s21  ;;  %p184_p4 = scmp.eq.s32.totalorder %s1769_s26, 1 }
   0x8   : > { %s2331_s30 = scalar_select %p165_p1, %s2250_s23, %s167_s28  }
   0x9   : > { %p2333_p5 = por %p178_p2, %p177_p0  ;;  %p2337_p6 = por %p184_p4, %p183_p3 }
   0xa   : > { %p1772_p7 = scmp.ge.s32.totalorder %s2254_s24, 1  ;;  %p238_p8 = scmp.lt.s32.totalorder %s2254_s24, 3 }
   0xc   : > { %p239_p9 = pnand %p1772_p7, %p238_p8 }
   0xd   : > { %v394_v0 = vld [vmem:[%s3244_s4 + $0x8] sm:$0xff] (!%p239_p9)  ;;  %v396_v1 = vld [vmem:[%s3244_s4 + $0x18] sm:$0xff] (!%p239_p9)  ;;  %v393_v2 = vld [vmem:[%s3244_s4] sm:$0xff] (!%p239_p9)  ;;  %s1774_s15 = sshll.u32 (!%p239_p9), %s2316_s25, 5  ;;  %v2256_v7 = vmov (!%p239_p9), 0.0   ;;  %vm401_vm0 = vcmask (!%p239_p9), 261120  }
   0xe   : > { %242 = sbr.rel (%p239_p9) target bundleno = 652 (0x28c), region = 44  ;;  %v1946_v3 = vpack.c.bf16 (!%p239_p9), %v396_v1, %v394_v0  ;;  %v395_v4 = vld [vmem:[%s3244_s4 + $0x10] sm:$0xff] (!%p239_p9)  ;;  %v398_v5 = vld [vmem:[%s3244_s4 + $0x28] sm:$0xff] (!%p239_p9)  ;;  %v400_v6 = vld [vmem:[%s3244_s4 + $0x38] sm:$0xff] (!%p239_p9)  ;;  %562 = vmatprep.mubr.f32.mxu0 (!%p239_p9), %v2256_v7  ;;  %p279_p10 = scmp.lt.s32.totalorder (!%p239_p9), %s1774_s15, 63  ;;  %610 = vmatprep.mubr.f32.mxu1 (!%p239_p9), %v2256_v7 }
   0xf   : > { %v1948_v8 = vpack.c.bf16 (!%p239_p9), %v395_v4, %v393_v2  ;;  %v1950_v9 = vpack.c.bf16 (!%p239_p9), %v400_v6, %v398_v5  ;;  %v397_v10 = vld [vmem:[%s3244_s4 + $0x20] sm:$0xff] (!%p239_p9)  ;;  %v399_v11 = vld [vmem:[%s3244_s4 + $0x30] sm:$0xff] (!%p239_p9)  ;;  %v330_v12 = vld [vmem:[%s3243_s3 + $0x8] sm:$0xff] (!%p239_p9)  ;;  %s2257_s20 = smov (!%p239_p9), [#allocation2]  }
  0x10   : > { %1947 = vmatprep.subr.bf16.mxu0 (!%p239_p9), %v1946_v3  ;;  %v332_v13 = vld [vmem:[%s3243_s3 + $0x18] sm:$0xff] (!%p239_p9)  ;;  %2018 = vmatprep.subr.bf16.mxu1 (!%p239_p9), %v1946_v3  ;;  %v1952_v14 = vpack.c.bf16 (!%p239_p9), %v399_v11, %v397_v10  ;;  %v329_v16 = vld [vmem:[%s3243_s3] sm:$0xff] (!%p239_p9)  ;;  %v331_v17 = vld [vmem:[%s3243_s3 + $0x10] sm:$0xff] (!%p239_p9) }
  0x11   : > { %1949 = vmatpush1.bf16.msra.mxu0 (!%p239_p9), %v1948_v8  ;;  %2020 = vmatpush1.bf16.msra.mxu1 (!%p239_p9), %v1948_v8  ;;  %v1954_v15 = vpack.c.bf16 (!%p239_p9), %v332_v13, %v330_v12  ;;  %v334_v18 = vld [vmem:[%s3243_s3 + $0x28] sm:$0xff] (!%p239_p9)  ;;  %v336_v19 = vld [vmem:[%s3243_s3 + $0x38] sm:$0xff] (!%p239_p9)  ;;  %v1956_v21 = vpack.c.bf16 (!%p239_p9), %v331_v17, %v329_v16  ;;  %v333_v23 = vld [vmem:[%s3243_s3 + $0x20] sm:$0xff] (!%p239_p9) }
  0x12   : > { %1951 = vmatprep.subr.bf16.mxu0 (!%p239_p9), %v1950_v9  ;;  %2019 = vmatprep.subr.bf16.mxu1 (!%p239_p9), %v1950_v9  ;;  %v1958_v22 = vpack.c.bf16 (!%p239_p9), %v336_v19, %v334_v18  ;;  %v335_v24 = vld [vmem:[%s3243_s3 + $0x30] sm:$0xff] (!%p239_p9)  ;;  %v338_v25 = vld [vmem:[%s3243_s3 + $0x48] sm:$0xff] (!%p239_p9)  ;;  %v340_v26 = vld [vmem:[%s3243_s3 + $0x58] sm:$0xff] (!%p239_p9) }
  0x13   : > { %v1960_v28 = vpack.c.bf16 (!%p239_p9), %v335_v24, %v333_v23  ;;  %v1962_v29 = vpack.c.bf16 (!%p239_p9), %v340_v26, %v338_v25  ;;  %v337_v30 = vld [vmem:[%s3243_s3 + $0x40] sm:$0xff] (!%p239_p9)  ;;  %v339_v31 = vld [vmem:[%s3243_s3 + $0x50] sm:$0xff] (!%p239_p9)  ;;  %v342_v32 = vld [vmem:[%s3243_s3 + $0x68] sm:$0xff] (!%p239_p9) }
  0x14   : > { %v344_v33 = vld [vmem:[%s3243_s3 + $0x78] sm:$0xff] (!%p239_p9)  ;;  %v1964_v35 = vpack.c.bf16 (!%p239_p9), %v339_v31, %v337_v30  ;;  %v341_v37 = vld [vmem:[%s3243_s3 + $0x60] sm:$0xff] (!%p239_p9)  ;;  %v343_v38 = vld [vmem:[%s3243_s3 + $0x70] sm:$0xff] (!%p239_p9) }
  0x15   : > { %s3254_s15 = smov (!%p279_p10, %s1774_s15), 63  ;;  %1953 = vmatpush1.bf16.msra.mxu0 %v1952_v14  ;;  %2021 = vmatpush1.bf16.msra.mxu1 %v1952_v14  ;;  %v1966_v36 = vpack.c.bf16 %v344_v33, %v342_v32  ;;  %v346_v39 = vld [vmem:[%s3243_s3 + $0x88] sm:$0xff]  ;;  %v348_v40 = vld [vmem:[%s3243_s3 + $0x98] sm:$0xff]  ;;  %v1968_v43 = vpack.c.bf16 %v343_v38, %v341_v37  ;;  %v345_v46 = vld [vmem:[%s3243_s3 + $0x80] sm:$0xff] }
  0x16   : > { %s2376_s16 = sshll.u32 %s3254_s15, 3  ;;  %1955 = vmatprep.subr.bf16.mxu0 %v1954_v15  ;;  %v1970_v45 = vpack.c.bf16 %v348_v40, %v346_v39  ;;  %v347_v47 = vld [vmem:[%s3243_s3 + $0x90] sm:$0xff]  ;;  %v350_v48 = vld [vmem:[%s3243_s3 + $0xa8] sm:$0xff]  ;;  %v352_v49 = vld [vmem:[%s3243_s3 + $0xb8] sm:$0xff] }
  0x17   : > { %s2388_s29 = scalar_lea.vmem %s3241_s1, %s2376_s16  ;;  %v1972_v51 = vpack.c.bf16 %v347_v47, %v345_v46  ;;  %v1974_v53 = vpack.c.bf16 %v352_v49, %v350_v48  ;;  %v349_v54 = vld [vmem:[%s3243_s3 + $0xa0] sm:$0xff]  ;;  %v351_v55 = vld [vmem:[%s3243_s3 + $0xb0] sm:$0xff]  ;;  %v354_v56 = vld [vmem:[%s3243_s3 + $0xc8] sm:$0xff]  ;;  %s2515_s14 = scalar_lea.vmem %s3240_s0, %s2376_s16 }
  0x18   : > { %v361_v20 = vld [vmem:[%s2388_s29] sm:$0xff]  ;;  %v362_v27 = vld [vmem:[%s2388_s29 + $0x8] sm:$0xff]  ;;  %v363_v34 = vld [vmem:[%s2388_s29 + $0x10] sm:$0xff]  ;;  %v1976_v59 = vpack.c.bf16 %v351_v55, %v349_v54  ;;  %s3118_s10 = scalar_lea.vmem %s3242_s2, %s2376_s16  ;;  %s1817_s16 = sshll.u32 %s2316_s25, 12 }
  0x19   : > { %1780 = vmatmul.mubr.msk.f32.vlgmr.msra.gmra.mrb[0].mxu0 %vm401_vm0, %v361_v20  ;;  %v369_v41 = vld [vmem:[%s2388_s29 + $0x40] sm:$0xff]  ;;  %v364_v42 = vld [vmem:[%s2388_s29 + $0x18] sm:$0xff]  ;;  %v370_v44 = vld [vmem:[%s2388_s29 + $0x48] sm:$0xff]  ;;  %s3191_s18 = scalar_lea.hbm %s3246_s6, %s1817_s16 }
  0x1a   : > { %1957 = vmatpush1.bf16.msra.mxu0 %v1956_v21  ;;  %568 = vmatprep.mubr.f32.mxu0 %v2256_v7  ;;  %v365_v50 = vld [vmem:[%s2388_s29 + $0x20] sm:$0xff]  ;;  %v371_v52 = vld [vmem:[%s2388_s29 + $0x50] sm:$0xff]  ;;  %v356_v57 = vld [vmem:[%s3243_s3 + $0xd8] sm:$0xff] }
  0x1b   : > { %1959 = vmatprep.subr.bf16.mxu0 %v1958_v22  ;;  %1788 = vmatmul.mubr.msk.f32.vlgmr.msra.gmra.mrb[0].mxu1 %vm401_vm0, %v369_v41  ;;  %v366_v58 = vld [vmem:[%s2388_s29 + $0x28] sm:$0xff]  ;;  %v372_v60 = vld [vmem:[%s2388_s29 + $0x58] sm:$0xff]  ;;  %v1978_v61 = vpack.c.bf16 %v356_v57, %v354_v56  ;;  %v353_v62 = vld [vmem:[%s3243_s3 + $0xc0] sm:$0xff] }
  0x1c   : > { %616 = vmatprep.mubr.f32.mxu1 %v2256_v7  ;;  %v355_v63 = vld [vmem:[%s3243_s3 + $0xd0] sm:$0xff]  ;;  %v358_v0 = vld [vmem:[%s3243_s3 + $0xe8] sm:$0xff]  ;;  %v360_v1 = vld [vmem:[%s3243_s3 + $0xf8] sm:$0xff] }
  0x1d   : > { %1781 = vmatmul.mubr.msk.f32.gmra.mrb[2].mxu0 %vm401_vm0, %v362_v27  ;;  %v367_v2 = vld [vmem:[%s2388_s29 + $0x30] sm:$0xff]  ;;  %v1980_v3 = vpack.c.bf16 %v355_v63, %v353_v62  ;;  %v373_v4 = vld [vmem:[%s2388_s29 + $0x60] sm:$0xff]  ;;  %v1982_v5 = vpack.c.bf16 %v360_v1, %v358_v0  ;;  %v368_v9 = vld [vmem:[%s2388_s29 + $0x38] sm:$0xff] }
  0x1e   : > { %1961 = vmatpush1.bf16.msra.mxu0 %v1960_v28  ;;  %574 = vmatprep.mubr.f32.mxu0 %v2256_v7  ;;  %v357_v6 = vld [vmem:[%s3243_s3 + $0xe0] sm:$0xff]  ;;  %v359_v8 = vld [vmem:[%s3243_s3 + $0xf0] sm:$0xff]  ;;  %v374_v11 = vld [vmem:[%s2388_s29 + $0x68] sm:$0xff] }
  0x1f   : > { %1963 = vmatprep.subr.bf16.mxu0 %v1962_v29  ;;  %1789 = vmatmul.mubr.msk.f32.gmra.mrb[2].mxu1 %vm401_vm0, %v370_v44  ;;  %v1984_v10 = vpack.c.bf16 %v359_v8, %v357_v6  ;;  %v1332_v12 = vld [vmem:[%s3245_s5] sm:$0xff]  ;;  %v1333_v13 = vld [vmem:[%s3245_s5 + $0x8] sm:$0xff]  ;;  %v375_v15 = vld [vmem:[%s2388_s29 + $0x70] sm:$0xff] }
  0x20   : > { %622 = vmatprep.mubr.f32.mxu1 %v2256_v7  ;;  %v297_v14 = vld [vmem:[%s2515_s14] sm:$0xff]  ;;  %v1986_v16 = vpack.c.bf16 %v1333_v13, %v1332_v12  ;;  %v298_v17 = vld [vmem:[%s2515_s14 + $0x8] sm:$0xff]  ;;  %v376_v18 = vld [vmem:[%s2388_s29 + $0x78] sm:$0xff] }
  0x21   : > { %1782 = vmatmul.mubr.msk.f32.gmra.mrb[4].mxu0 %vm401_vm0, %v363_v34  ;;  %v299_v19 = vld [vmem:[%s2515_s14 + $0x10] sm:$0xff]  ;;  %v377_v20 = vld [vmem:[%s2388_s29 + $0x80] sm:$0xff]  ;;  %v300_v21 = vld [vmem:[%s2515_s14 + $0x18] sm:$0xff] }
  0x22   : > { %1965 = vmatpush1.bf16.msra.mxu0 %v1964_v35  ;;  %580 = vmatprep.mubr.f32.mxu0 %v2256_v7  ;;  %v378_v22 = vld [vmem:[%s2388_s29 + $0x88] sm:$0xff]  ;;  %v301_v23 = vld [vmem:[%s2515_s14 + $0x20] sm:$0xff]  ;;  %v379_v24 = vld [vmem:[%s2388_s29 + $0x90] sm:$0xff] }
  0x23   : > { %1967 = vmatprep.subr.bf16.mxu0 %v1966_v36  ;;  %1790 = vmatmul.mubr.msk.f32.gmra.mrb[4].mxu1 %vm401_vm0, %v371_v52  ;;  %v302_v25 = vld [vmem:[%s2515_s14 + $0x28] sm:$0xff]  ;;  %v380_v26 = vld [vmem:[%s2388_s29 + $0x98] sm:$0xff]  ;;  %v303_v27 = vld [vmem:[%s2515_s14 + $0x30] sm:$0xff] }
  0x24   : > { %628 = vmatprep.mubr.f32.mxu1 %v2256_v7  ;;  %1987 = vmatprep.subr.bf16.mxu1 %v1986_v16  ;;  %v381_v28 = vld [vmem:[%s2388_s29 + $0xa0] sm:$0xff]  ;;  %v304_v29 = vld [vmem:[%s2515_s14 + $0x38] sm:$0xff]  ;;  %v382_v30 = vld [vmem:[%s2388_s29 + $0xa8] sm:$0xff] }
  0x25   : > { %1783 = vmatmul.mubr.msk.f32.gmra.mrb[6].mxu0 %vm401_vm0, %v364_v42  ;;  %1989 = vmatpush3.bf16.msra.mxu1 %v1986_v16  ;;  %v305_v31 = vld [vmem:[%s2515_s14 + $0x40] sm:$0xff]  ;;  %v383_v32 = vld [vmem:[%s2388_s29 + $0xb0] sm:$0xff]  ;;  %v306_v33 = vld [vmem:[%s2515_s14 + $0x48] sm:$0xff] }
  0x26   : > { %1969 = vmatpush1.bf16.msra.mxu0 %v1968_v43  ;;  %586 = vmatprep.mubr.f32.mxu0 %v2256_v7  ;;  %v384_v34 = vld [vmem:[%s2388_s29 + $0xb8] sm:$0xff]  ;;  %v307_v35 = vld [vmem:[%s2515_s14 + $0x50] sm:$0xff]  ;;  %v385_v36 = vld [vmem:[%s2388_s29 + $0xc0] sm:$0xff] }
  0x27   : > { %1971 = vmatprep.subr.bf16.mxu0 %v1970_v45  ;;  %1791 = vmatmul.mubr.msk.f32.gmra.mrb[6].mxu1 %vm401_vm0, %v372_v60  ;;  %v308_v37 = vld [vmem:[%s2515_s14 + $0x58] sm:$0xff]  ;;  %v386_v38 = vld [vmem:[%s2388_s29 + $0xc8] sm:$0xff]  ;;  %v309_v39 = vld [vmem:[%s2515_s14 + $0x60] sm:$0xff] }
  0x28   : > { %634 = vmatprep.mubr.f32.mxu1 %v2256_v7  ;;  %v387_v40 = vld [vmem:[%s2388_s29 + $0xd0] sm:$0xff]  ;;  %v310_v41 = vld [vmem:[%s2515_s14 + $0x68] sm:$0xff]  ;;  %v388_v42 = vld [vmem:[%s2388_s29 + $0xd8] sm:$0xff] }
  0x29   : > { %1784 = vmatmul.mubr.msk.f32.gmra.mrb[8].mxu0 %vm401_vm0, %v365_v50  ;;  %v311_v43 = vld [vmem:[%s2515_s14 + $0x70] sm:$0xff]  ;;  %v389_v44 = vld [vmem:[%s2388_s29 + $0xe0] sm:$0xff]  ;;  %v312_v45 = vld [vmem:[%s2515_s14 + $0x78] sm:$0xff] }
  0x2a   : > { %1973 = vmatpush1.bf16.msra.mxu0 %v1972_v51  ;;  %592 = vmatprep.mubr.f32.mxu0 %v2256_v7  ;;  %v390_v46 = vld [vmem:[%s2388_s29 + $0xe8] sm:$0xff]  ;;  %v313_v47 = vld [vmem:[%s2515_s14 + $0x80] sm:$0xff]  ;;  %v391_v48 = vld [vmem:[%s2388_s29 + $0xf0] sm:$0xff] }
  0x2b   : > { %1975 = vmatprep.subr.bf16.mxu0 %v1974_v53  ;;  %1792 = vmatmul.mubr.msk.f32.gmra.mrb[8].mxu1 %vm401_vm0, %v373_v4  ;;  %v314_v49 = vld [vmem:[%s2515_s14 + $0x88] sm:$0xff]  ;;  %v392_v50 = vld [vmem:[%s2388_s29 + $0xf8] sm:$0xff]  ;;  %v315_v51 = vld [vmem:[%s2515_s14 + $0x90] sm:$0xff]  ;;  %s2196_s29 = sshll.u32 %s2257_s20, 4  ;;  %s2197_s29 = int_to_ptr.vmem [resolvable:$false] %s2196_s29 }
  0x2c   : > { %640 = vmatprep.mubr.f32.mxu1 %v2256_v7  ;;  %v316_v52 = vld [vmem:[%s2515_s14 + $0x98] sm:$0xff]  ;;  %v317_v53 = vld [vmem:[%s2515_s14 + $0xa0] sm:$0xff]  ;;  %v318_v54 = vld [vmem:[%s2515_s14 + $0xa8] sm:$0xff]  ;;  %s2198_s26 = scalar_lea.vmem %s2197_s29, 8192 }
  0x2d   : > { %1785 = vmatmul.mubr.msk.f32.gmra.mrb[10].mxu0 %vm401_vm0, %v366_v58  ;;  %v1334_v55 = vld [vmem:[%s3245_s5 + $0x10] sm:$0xff]  ;;  %v1335_v56 = vld [vmem:[%s3245_s5 + $0x18] sm:$0xff]  ;;  %v1337_v60 = vld [vmem:[%s3245_s5 + $0x28] sm:$0xff] }
  0x2e   : > { %1977 = vmatpush1.bf16.msra.mxu0 %v1976_v59  ;;  %598 = vmatprep.mubr.f32.mxu0 %v2256_v7  ;;  %v319_v57 = vld [vmem:[%s2515_s14 + $0xb0] sm:$0xff]  ;;  %v1990_v58 = vpack.c.bf16 %v1335_v56, %v1334_v55  ;;  %v1336_v59 = vld [vmem:[%s3245_s5 + $0x20] sm:$0xff]  ;;  %v1339_v0 = vld [vmem:[%s3245_s5 + $0x38] sm:$0xff] }
  0x2f   : > { %1979 = vmatprep.subr.bf16.mxu0 %v1978_v61  ;;  %1793 = vmatmul.mubr.msk.f32.gmra.mrb[10].mxu1 %vm401_vm0, %v374_v11  ;;  %v320_v61 = vld [vmem:[%s2515_s14 + $0xb8] sm:$0xff]  ;;  %v1994_v62 = vpack.c.bf16 %v1337_v60, %v1336_v59  ;;  %v1338_v63 = vld [vmem:[%s3245_s5 + $0x30] sm:$0xff]  ;;  %v321_v1 = vld [vmem:[%s2515_s14 + $0xc0] sm:$0xff] }
  0x30   : > { %646 = vmatprep.mubr.f32.mxu1 %v2256_v7  ;;  %1991 = vmatprep.subr.bf16.mxu1 %v1990_v58  ;;  %v1341_v4 = vld [vmem:[%s3245_s5 + $0x48] sm:$0xff]  ;;  %v1342_v8 = vld [vmem:[%s3245_s5 + $0x50] sm:$0xff]  ;;  %v1344_v12 = vld [vmem:[%s3245_s5 + $0x60] sm:$0xff] }
  0x31   : > { %1786 = vmatmul.mubr.msk.f32.gmra.mrb[12].mxu0 %vm401_vm0, %v367_v2  ;;  %1993 = vmatpush3.bf16.msra.mxu1 %v1990_v58  ;;  %v1998_v2 = vpack.c.bf16 %v1339_v0, %v1338_v63  ;;  %v1345_v13 = vld [vmem:[%s3245_s5 + $0x68] sm:$0xff]  ;;  %v1346_v16 = vld [vmem:[%s3245_s5 + $0x70] sm:$0xff] }
  0x32   : > { %1981 = vmatpush1.bf16.msra.mxu0 %v1980_v3  ;;  %604 = vmatprep.mubr.f32.mxu0 %v2256_v7  ;;  %v1340_v3 = vld [vmem:[%s3245_s5 + $0x40] sm:$0xff] }
  0x33   : > { %1983 = vmatprep.subr.bf16.mxu0 %v1982_v5  ;;  %1794 = vmatmul.mubr.msk.f32.gmra.mrb[12].mxu1 %vm401_vm0, %v375_v15  ;;  %v322_v5 = vld [vmem:[%s2515_s14 + $0xc8] sm:$0xff]  ;;  %v2002_v6 = vpack.c.bf16 %v1341_v4, %v1340_v3  ;;  %v2010_v15 = vpack.c.bf16 %v1345_v13, %v1344_v12 }
  0x34   : > { %652 = vmatprep.mubr.f32.mxu1 %v2256_v7  ;;  %1995 = vmatprep.subr.bf16.mxu1 %v1994_v62 }
  0x35   : > { %1787 = vmatmul.mubr.msk.f32.gmra.mrb[14].mxu0 %vm401_vm0, %v368_v9  ;;  %1997 = vmatpush3.bf16.msra.mxu1 %v1994_v62  ;;  %v1343_v9 = vld [vmem:[%s3245_s5 + $0x58] sm:$0xff] }
  0x36   : > { %1985 = vmatpush1.bf16.msra.mxu0 %v1984_v10  ;;  %819 = vmatprep.mubr.f32.mxu0 %v2256_v7  ;;  %v323_v10 = vld [vmem:[%s2515_s14 + $0xd0] sm:$0xff]  ;;  %v2006_v11 = vpack.c.bf16 %v1343_v9, %v1342_v8 }
  0x37   : > { %1795 = vmatmul.mubr.msk.f32.gmra.mrb[14].mxu1 %vm401_vm0, %v376_v18  ;;  %1999 = vmatprep.subr.bf16.mxu1 %v1998_v2  ;;  %v325_v18 = vld [vmem:[%s2515_s14 + $0xe0] sm:$0xff] }
  0x38   : > { %658 = vmatprep.mubr.f32.mxu1 %v2256_v7 }
  0x39   : > { %820 = vmatmul.mubr.f32.vlgmr.msra.gmra.mrb[0].mxu0 %v297_v14  ;;  %2001 = vmatpush3.bf16.msra.mxu1 %v1998_v2  ;;  %v324_v14 = vld [vmem:[%s2515_s14 + $0xd8] sm:$0xff] }
  0x3a   : > { %825 = vmatprep.mubr.f32.mxu0 %v2256_v7  ;;  %2003 = vmatprep.subr.bf16.mxu1 %v2002_v6 }
  0x3b   : > { %1796 = vmatmul.mubr.msk.f32.gmra.mrb[16].mxu1 %vm401_vm0, %v377_v20  ;;  %v326_v20 = vld [vmem:[%s2515_s14 + $0xe8] sm:$0xff] }
  0x3c   : > { %664 = vmatprep.mubr.f32.mxu1 %v2256_v7 }
  0x3d   : > { %826 = vmatmul.mubr.f32.gmra.mrb[2].mxu0 %v298_v17  ;;  %2005 = vmatpush3.bf16.msra.mxu1 %v2002_v6  ;;  %v1347_v17 = vld [vmem:[%s3245_s5 + $0x78] sm:$0xff] }
  0x3e   : > { %831 = vmatprep.mubr.f32.mxu0 %v2256_v7  ;;  %2007 = vmatprep.subr.bf16.mxu1 %v2006_v11 }
  0x3f   : > { %1797 = vmatmul.mubr.msk.f32.gmra.mrb[18].mxu1 %vm401_vm0, %v378_v22  ;;  %v328_v22 = vld [vmem:[%s2515_s14 + $0xf8] sm:$0xff] }
  0x40   : > { %670 = vmatprep.mubr.f32.mxu1 %v2256_v7 }
  0x41   : > { %832 = vmatmul.mubr.f32.gmra.mrb[4].mxu0 %v299_v19  ;;  %2009 = vmatpush3.bf16.msra.mxu1 %v2006_v11  ;;  %v2014_v19 = vpack.c.bf16 %v1347_v17, %v1346_v16 }
  0x42   : > { %837 = vmatprep.mubr.f32.mxu0 %v2256_v7  ;;  %2011 = vmatprep.subr.bf16.mxu1 %v2010_v15 }
  0x43   : > { %1798 = vmatmul.mubr.msk.f32.gmra.mrb[20].mxu1 %vm401_vm0, %v379_v24 }
  0x44   : > { %676 = vmatprep.mubr.f32.mxu1 %v2256_v7 }
  0x45   : > { %838 = vmatmul.mubr.f32.gmra.mrb[6].mxu0 %v300_v21  ;;  %2013 = vmatpush3.bf16.msra.mxu1 %v2010_v15  ;;  %v327_v21 = vld [vmem:[%s2515_s14 + $0xf0] sm:$0xff]  ;;  %s275_s14 = sand.u32 1, %s2246_s22  }
  0x46   : > { %843 = vmatprep.mubr.f32.mxu0 %v2256_v7  ;;  %2015 = vmatprep.subr.bf16.mxu1 %v2014_v19  ;;  %s1773_s15 = sshll.u32 %s275_s14, 8  ;;  %s3199_s25 = scalar_lea.sflag [#allocation3], %s275_s14 }
  0x47   : > { %1799 = vmatmul.mubr.msk.f32.gmra.mrb[22].mxu1 %vm401_vm0, %v380_v26  ;;  %s3124_s11 = scalar_lea.vmem [#allocation2], %s1773_s15 }
  0x48   : > { %682 = vmatprep.mubr.f32.mxu1 %v2256_v7  ;;  %s1683_s12 = sshll.u32 %s3124_s11, 4  ;;  %s3193_s12 = int_to_ptr.vmem [resolvable:$true] %s1683_s12 }
  0x49   : > { %844 = vmatmul.mubr.f32.gmra.mrb[8].mxu0 %v301_v23  ;;  %2017 = vmatpush3.bf16.msra.mxu1 %v2014_v19  ;;  %s2192_s19 = scalar_lea.vmem %s3193_s12, 4096  ;;  %p2199_p0 = scmp.lt.s32.totalorder %s3193_s12, %s2197_s29 }
  0x4a   : > { %849 = vmatprep.mubr.f32.mxu0 %v2256_v7  ;;  %p2193_p11 = scmp.ne.s32.totalorder %s3193_s12, %s2192_s19  ;;  %p2200_p1 = scmp.lt.s32.totalorder %s2198_s26, %s2192_s19 }
  0x4b   : > { %1800 = vmatmul.mubr.msk.f32.gmra.mrb[24].mxu1 %vm401_vm0, %v381_v28 }
  0x4c   : > { %688 = vmatprep.mubr.f32.mxu1 %v2256_v7  ;;  %p2194_p12 = pnand %p2193_p11, %p2333_p5  ;;  %p2201_p2 = por %p2200_p1, %p2199_p0 }
  0x4d   : > { %850 = vmatmul.mubr.f32.gmra.mrb[10].mxu0 %v302_v25 }
  0x4e   : > { %855 = vmatprep.mubr.f32.mxu0 %v2256_v7  ;;  %p2195_p13 = pneg %p2194_p12 }
  0x4f   : > { %1801 = vmatmul.mubr.msk.f32.gmra.mrb[26].mxu1 %vm401_vm0, %v382_v30 }
  0x50   : > { %694 = vmatprep.mubr.f32.mxu1 %v2256_v7  ;;  %p2202_p3 = pnand %p2201_p2, %p2195_p13 }
  0x51   : > { %856 = vmatmul.mubr.f32.gmra.mrb[12].mxu0 %v303_v27 }
  0x52   : > { %861 = vmatprep.mubr.f32.mxu0 %v2256_v7 }
  0x53   : > { %1802 = vmatmul.mubr.msk.f32.gmra.mrb[28].mxu1 %vm401_vm0, %v383_v32 }
  0x54   : > { %700 = vmatprep.mubr.f32.mxu1 %v2256_v7 }
  0x55   : > { %862 = vmatmul.mubr.f32.gmra.mrb[14].mxu0 %v304_v29 }
  0x56   : > { %867 = vmatprep.mubr.f32.mxu0 %v2256_v7 }
  0x57   : > { %1803 = vmatmul.mubr.msk.f32.gmra.mrb[30].mxu1 %vm401_vm0, %v384_v34 }
  0x58   : > { %706 = vmatprep.mubr.f32.mxu1 %v2256_v7 }
  0x59   : > { %868 = vmatmul.mubr.f32.gmra.mrb[16].mxu0 %v305_v31 }
  0x5a   : > { %873 = vmatprep.mubr.f32.mxu0 %v2256_v7 }
  0x5b   : > { %1804 = vmatmul.mubr.msk.f32.gmra.mrb[32].mxu1 %vm401_vm0, %v385_v36 }
  0x5c   : > { %712 = vmatprep.mubr.f32.mxu1 %v2256_v7 }
  0x5d   : > { %874 = vmatmul.mubr.f32.gmra.mrb[18].mxu0 %v306_v33 }
  0x5e   : > { %879 = vmatprep.mubr.f32.mxu0 %v2256_v7 }
  0x5f   : > { %1805 = vmatmul.mubr.msk.f32.gmra.mrb[34].mxu1 %vm401_vm0, %v386_v38 }
  0x60   : > { %718 = vmatprep.mubr.f32.mxu1 %v2256_v7 }
  0x61   : > { %880 = vmatmul.mubr.f32.gmra.mrb[20].mxu0 %v307_v35 }
  0x62   : > { %885 = vmatprep.mubr.f32.mxu0 %v2256_v7 }
  0x63   : > { %1806 = vmatmul.mubr.msk.f32.gmra.mrb[36].mxu1 %vm401_vm0, %v387_v40 }
  0x64   : > { %724 = vmatprep.mubr.f32.mxu1 %v2256_v7 }
  0x65   : > { %886 = vmatmul.mubr.f32.gmra.mrb[22].mxu0 %v308_v37 }
  0x66   : > { %891 = vmatprep.mubr.f32.mxu0 %v2256_v7 }
  0x67   : > { %1807 = vmatmul.mubr.msk.f32.gmra.mrb[38].mxu1 %vm401_vm0, %v388_v42 }
  0x68   : > { %730 = vmatprep.mubr.f32.mxu1 %v2256_v7 }
  0x69   : > { %892 = vmatmul.mubr.f32.gmra.mrb[24].mxu0 %v309_v39 }
  0x6a   : > { %897 = vmatprep.mubr.f32.mxu0 %v2256_v7 }
  0x6b   : > { %1808 = vmatmul.mubr.msk.f32.gmra.mrb[40].mxu1 %vm401_vm0, %v389_v44 }
  0x6c   : > { %736 = vmatprep.mubr.f32.mxu1 %v2256_v7 }
  0x6d   : > { %898 = vmatmul.mubr.f32.gmra.mrb[26].mxu0 %v310_v41 }
  0x6e   : > { %903 = vmatprep.mubr.f32.mxu0 %v2256_v7 }
  0x6f   : > { %1809 = vmatmul.mubr.msk.f32.gmra.mrb[42].mxu1 %vm401_vm0, %v390_v46 }
  0x70   : > { %742 = vmatprep.mubr.f32.mxu1 %v2256_v7 }
  0x71   : > { %904 = vmatmul.mubr.f32.gmra.mrb[28].mxu0 %v311_v43 }
  0x72   : > { %909 = vmatprep.mubr.f32.mxu0 %v2256_v7 }
  0x73   : > { %1810 = vmatmul.mubr.msk.f32.gmra.mrb[44].mxu1 %vm401_vm0, %v391_v48 }
  0x74   : > { %748 = vmatprep.mubr.f32.mxu1 %v2256_v7 }
  0x75   : > { %910 = vmatmul.mubr.f32.gmra.mrb[30].mxu0 %v312_v45 }
  0x76   : > { %915 = vmatprep.mubr.f32.mxu0 %v2256_v7 }
  0x77   : > { %1811 = vmatmul.mubr.msk.f32.gmra.mrb[46].mxu1 %vm401_vm0, %v392_v50 }
  0x79   : > { %916 = vmatmul.mubr.f32.gmra.mrb[32].mxu0 %v313_v47 }
  0x7a   : > { %921 = vmatprep.mubr.f32.mxu0 %v2256_v7 }
  0x7d   : > { %922 = vmatmul.mubr.f32.gmra.mrb[34].mxu0 %v314_v49 }
  0x7e   : > { %927 = vmatprep.mubr.f32.mxu0 %v2256_v7 }
  0x81   : > { %928 = vmatmul.mubr.f32.gmra.mrb[36].mxu0 %v315_v51 }
  0x82   : > { %933 = vmatprep.mubr.f32.mxu0 %v2256_v7 }
  0x85   : > { %934 = vmatmul.mubr.f32.gmra.mrb[38].mxu0 %v316_v52 }
  0x86   : > { %939 = vmatprep.mubr.f32.mxu0 %v2256_v7 }
  0x89   : > { %940 = vmatmul.mubr.f32.gmra.mrb[40].mxu0 %v317_v53 }
  0x8a   : > { %945 = vmatprep.mubr.f32.mxu0 %v2256_v7 }
  0x8d   : > { %946 = vmatmul.mubr.f32.gmra.mrb[42].mxu0 %v318_v54 }
  0x8e   : > { %951 = vmatprep.mubr.f32.mxu0 %v2256_v7 }
  0x91   : > { %952 = vmatmul.mubr.f32.gmra.mrb[44].mxu0 %v319_v57 }
  0x92   : > { %957 = vmatprep.mubr.f32.mxu0 %v2256_v7 }
  0x95   : > { %958 = vmatmul.mubr.f32.gmra.mrb[46].mxu0 %v320_v61 }
  0x96   : > { %963 = vmatprep.mubr.f32.mxu0 %v2256_v7 }
  0x99   : > { %964 = vmatmul.mubr.f32.gmra.mrb[48].mxu0 %v321_v1 }
  0x9a   : > { %969 = vmatprep.mubr.f32.mxu0 %v2256_v7 }
  0x9d   : > { %970 = vmatmul.mubr.f32.gmra.mrb[50].mxu0 %v322_v5 }
  0x9e   : > { %975 = vmatprep.mubr.f32.mxu0 %v2256_v7 }
  0xa1   : > { %976 = vmatmul.mubr.f32.gmra.mrb[52].mxu0 %v323_v10 }
  0xa2   : > { %981 = vmatprep.mubr.f32.mxu0 %v2256_v7 }
  0xa5   : > { %982 = vmatmul.mubr.f32.gmra.mrb[54].mxu0 %v324_v14 }
  0xa6   : > { %987 = vmatprep.mubr.f32.mxu0 %v2256_v7 }
  0xa9   : > { %988 = vmatmul.mubr.f32.gmra.mrb[56].mxu0 %v325_v18 }
  0xaa   : > { %993 = vmatprep.mubr.f32.mxu0 %v2256_v7 }
  0xad   : > { %994 = vmatmul.mubr.f32.gmra.mrb[58].mxu0 %v326_v20 }
  0xae   : > { %999 = vmatprep.mubr.f32.mxu0 %v2256_v7 }
  0xb1   : > { %1000 = vmatmul.mubr.f32.gmra.mrb[60].mxu0 %v327_v21 }
  0xb2   : > { %1005 = vmatprep.mubr.f32.mxu0 %v2256_v7 }
  0xb5   : > { %1006 = vmatmul.mubr.f32.gmra.mrb[62].mxu0 %v328_v22 }
  0xee   : > { %v2686_v23 = vpop.f32.mrb[0].mxu1 }
  0xef   : > { %v2688_v24 = vpop.f32.mrb[1].mxu1 }
  0xf2   : > { %v2690_v25 = vpop.f32.mrb[2].mxu1 }
  0xf3   : > { %v2692_v26 = vpop.f32.mrb[3].mxu1 }
  0xf6   : > { %v2694_v27 = vpop.f32.mrb[4].mxu1 }
  0xf7   : > { %v2696_v28 = vpop.f32.mrb[5].mxu1 }
  0xfa   : > { %v2698_v29 = vpop.f32.mrb[6].mxu1 }
  0xfb   : > { %v2700_v30 = vpop.f32.mrb[7].mxu1 }
  0xfe   : > { %v2702_v31 = vpop.f32.mrb[8].mxu1 }
  0xff   : > { %v2704_v7 = vpop.f32.mrb[9].mxu1 }
 0x102   : > { %v2706_v32 = vpop.f32.mrb[10].mxu1 }
 0x103   : > { %v2708_v33 = vpop.f32.mrb[11].mxu1 }
 0x106   : > { %v2710_v35 = vpop.f32.mrb[12].mxu1 }
 0x107   : > { %v2712_v38 = vpop.f32.mrb[13].mxu1 }
 0x10a   : > { %v2714_v41 = vpop.f32.mrb[14].mxu1 }
 0x10b   : > { %v2718_v45 = vpop.f32.mrb[15].mxu1 }
 0x10c   : > { %v821_v34 = vpop.f32.mrb[0].mxu0 }
 0x10d   : > { %v1044_v36 = vmul.f32 0.044715, %v821_v34  ;;  %v823_v37 = vpop.f32.mrb[1].mxu0  ;;  %v1012_v19 = vmul.f32 0.5, %v821_v34 }
 0x10e   : > { %v2722_v49 = vpop.f32.mrb[16].mxu1 }
 0x10f   : > { %v1076_v39 = vmul.f32 %v1044_v36, %v821_v34  ;;  %v2727_v54 = vpop.f32.mrb[17].mxu1 }
 0x110   : > { %v827_v40 = vpop.f32.mrb[2].mxu0 }
 0x111   : > { %v1108_v42 = vmul.f32 %v1076_v39, %v821_v34  ;;  %v1045_v43 = vmul.f32 0.044715, %v827_v40  ;;  %v2716_v44 = vpop.f32.mrb[3].mxu0 }
 0x112   : > { %v2732_v58 = vpop.f32.mrb[18].mxu1 }
 0x113   : > { %v1140_v46 = vadd.f32 %v1108_v42, %v821_v34  ;;  %v1077_v47 = vmul.f32 %v1045_v43, %v827_v40  ;;  %v2738_v63 = vpop.f32.mrb[19].mxu1 }
 0x114   : > { %v2720_v48 = vpop.f32.mrb[4].mxu0 }
 0x115   : > { %v1172_v50 = vmul.f32 0.7978846, %v1140_v46  ;;  %v1109_v51 = vmul.f32 %v1077_v47, %v827_v40  ;;  %v1046_v52 = vmul.f32 0.044715, %v2720_v48  ;;  %v2725_v53 = vpop.f32.mrb[5].mxu0 }
 0x116   : > { %v2744_v3 = vpop.f32.mrb[20].mxu1 }
 0x117   : > { %2128 = vtanh.f32 %v1172_v50  ;;  %v1141_v55 = vadd.f32 %v1109_v51, %v827_v40  ;;  %v1078_v56 = vmul.f32 %v1046_v52, %v2720_v48  ;;  %v2750_v9 = vpop.f32.mrb[21].mxu1 }
 0x118   : > { %v2730_v57 = vpop.f32.mrb[6].mxu0 }
 0x119   : > { %v1173_v59 = vmul.f32 0.7978846, %v1141_v55  ;;  %v1110_v60 = vmul.f32 %v1078_v56, %v2720_v48  ;;  %v1047_v61 = vmul.f32 0.044715, %v2730_v57  ;;  %v2736_v62 = vpop.f32.mrb[7].mxu0  ;;  %v1013_v55 = vmul.f32 0.5, %v827_v40 }
 0x11a   : > { %v2756_v13 = vpop.f32.mrb[22].mxu1 }
 0x11b   : > { %2130 = vtanh.f32 %v1173_v59  ;;  %v1142_v0 = vadd.f32 %v1110_v60, %v2720_v48  ;;  %v1079_v1 = vmul.f32 %v1047_v61, %v2730_v57  ;;  %v2762_v21 = vpop.f32.mrb[23].mxu1 }
 0x11c   : > { %v2742_v2 = vpop.f32.mrb[8].mxu0 }
 0x11d   : > { %v1174_v4 = vmul.f32 0.7978846, %v1142_v0  ;;  %v1111_v5 = vmul.f32 %v1079_v1, %v2730_v57  ;;  %v1048_v6 = vmul.f32 0.044715, %v2742_v2  ;;  %v2748_v8 = vpop.f32.mrb[9].mxu0 }
 0x11e   : > { %v2768_v43 = vpop.f32.mrb[24].mxu1 }
 0x11f   : > { %2132 = vtanh.f32 %v1174_v4  ;;  %v1143_v10 = vadd.f32 %v1111_v5, %v2730_v57  ;;  %v1080_v11 = vmul.f32 %v1048_v6, %v2742_v2  ;;  %v2774_v59 = vpop.f32.mrb[25].mxu1 }
 0x120   : > { %v2754_v12 = vpop.f32.mrb[10].mxu0 }
 0x121   : > { %v2129_v14 = vpop.eup %2128  ;;  %v1175_v15 = vmul.f32 0.7978846, %v1143_v10  ;;  %v1112_v16 = vmul.f32 %v1080_v11, %v2742_v2  ;;  %v1049_v17 = vmul.f32 0.044715, %v2754_v12  ;;  %v2760_v18 = vpop.f32.mrb[11].mxu0 }
 0x122   : > { %v1236_v20 = vadd.f32 1.0, %v2129_v14  ;;  %v2780_v4 = vpop.f32.mrb[26].mxu1  ;;  %v1014_v14 = vmul.f32 0.5, %v2720_v48 }
 0x123   : > { %2134 = vtanh.f32 %v1175_v15  ;;  %v1144_v22 = vadd.f32 %v1112_v16, %v2742_v2  ;;  %v1081_v36 = vmul.f32 %v1049_v17, %v2754_v12  ;;  %v2788_v16 = vpop.f32.mrb[27].mxu1 }
 0x124   : > { %v1268_v39 = vmul.f32 %v1236_v20, %v1012_v19  ;;  %v2766_v42 = vpop.f32.mrb[12].mxu0 }
 0x125   : > { %v2131_v46 = vpop.eup %2130  ;;  %v1176_v47 = vmul.f32 0.7978846, %v1144_v22  ;;  %v1113_v50 = vmul.f32 %v1081_v36, %v2754_v12  ;;  %v1050_v51 = vmul.f32 0.044715, %v2766_v42  ;;  %v2772_v34 = vpop.f32.mrb[13].mxu0 }
 0x126   : > { %v1300_v52 = vmul.f32 %v1268_v39, %v823_v37  ;;  %v1237_v56 = vadd.f32 1.0, %v2131_v46  ;;  %v2792_v36 = vpop.f32.mrb[28].mxu1 }
 0x127   : > { %2136 = vtanh.f32 %v1176_v47  ;;  %v1145_v60 = vadd.f32 %v1113_v50, %v2754_v12  ;;  %v1082_v61 = vmul.f32 %v1050_v51, %v2766_v42  ;;  %v2798_v50 = vpop.f32.mrb[29].mxu1 }
 0x128   : > { %v1269_v0 = vmul.f32 %v1237_v56, %v1013_v55  ;;  %v2778_v1 = vpop.f32.mrb[14].mxu0  ;;  %1898 = vmatprep.mubr.f32.mxu1 %v1300_v52  ;;  %v1015_v52 = vmul.f32 0.5, %v2730_v57 }
 0x129   : > { %v2133_v5 = vpop.eup %2132  ;;  %v1177_v6 = vmul.f32 0.7978846, %v1145_v60  ;;  %v1114_v10 = vmul.f32 %v1082_v61, %v2766_v42  ;;  %v1051_v37 = vmul.f32 0.044715, %v2778_v1  ;;  %v2784_v40 = vpop.f32.mrb[15].mxu0 }
 0x12a   : > { %v1301_v11 = vmul.f32 %v1269_v0, %v2716_v44  ;;  %v1238_v15 = vadd.f32 1.0, %v2133_v5 }
 0x12b   : > { %2138 = vtanh.f32 %v1177_v6  ;;  %v1146_v17 = vadd.f32 %v1114_v10, %v2766_v42  ;;  %v1083_v19 = vmul.f32 %v1051_v37, %v2778_v1 }
 0x12c   : > { %v1270_v20 = vmul.f32 %v1238_v15, %v1014_v14  ;;  %v869_v22 = vpop.f32.mrb[16].mxu0  ;;  %1899 = vmatmul.mubr.f32.vlgmr.msra.gmra.mrb[48].mxu1 %v1301_v11  ;;  %v1016_v14 = vmul.f32 0.5, %v2742_v2 }
 0x12d   : > { %v2135_v39 = vpop.eup %2134  ;;  %v1178_v46 = vmul.f32 0.7978846, %v1146_v17  ;;  %v1115_v47 = vmul.f32 %v1083_v19, %v2778_v1  ;;  %v2796_v44 = vadd.f32 %v869_v22, %v2686_v23  ;;  %v871_v48 = vpop.f32.mrb[17].mxu0 }
 0x12e   : > { %v1302_v51 = vmul.f32 %v1270_v20, %v2725_v53  ;;  %v1239_v55 = vadd.f32 1.0, %v2135_v39  ;;  %v2803_v56 = vadd.f32 %v871_v48, %v2688_v24  ;;  %v2807_v23 = vpop.f32.mrb[30].mxu1 }
 0x12f   : > { %2140 = vtanh.f32 %v1178_v46  ;;  %v1147_v60 = vadd.f32 %v1115_v47, %v2778_v1  ;;  %v1052_v61 = vmul.f32 0.044715, %v2796_v44  ;;  %v2813_v24 = vpop.f32.mrb[31].mxu1 }
 0x130   : > { %v1271_v0 = vmul.f32 %v1239_v55, %v1015_v52  ;;  %v875_v5 = vpop.f32.mrb[18].mxu0  ;;  %1901 = vmatprep.mubr.f32.mxu1 %v1302_v51  ;;  %v1017_v52 = vmul.f32 0.5, %v2754_v12 }
 0x131   : > { %v2137_v6 = vpop.eup %2136  ;;  %v1179_v10 = vmul.f32 0.7978846, %v1147_v60  ;;  %v1084_v53 = vmul.f32 %v1052_v61, %v2796_v44  ;;  %v2811_v57 = vadd.f32 %v875_v5, %v2690_v25  ;;  %v877_v37 = vpop.f32.mrb[19].mxu0 }
 0x132   : > { %v1303_v11 = vmul.f32 %v1271_v0, %v2736_v62  ;;  %v1240_v15 = vadd.f32 1.0, %v2137_v6  ;;  %v2818_v17 = vadd.f32 %v877_v37, %v2692_v26  ;;  %v2822_v25 = vpop.f32.mrb[32].mxu1 }
 0x133   : > { %2142 = vtanh.f32 %v1179_v10  ;;  %v1116_v19 = vmul.f32 %v1084_v53, %v2796_v44  ;;  %v1053_v20 = vmul.f32 0.044715, %v2811_v57  ;;  %v2829_v48 = vpop.f32.mrb[33].mxu1 }
 0x134   : > { %v1272_v22 = vmul.f32 %v1240_v15, %v1016_v14  ;;  %v881_v39 = vpop.f32.mrb[20].mxu0  ;;  %1902 = vmatmul.mubr.f32.gmra.mrb[50].mxu1 %v1303_v11  ;;  %v1018_v15 = vmul.f32 0.5, %v2766_v42 }
 0x135   : > { %v2139_v46 = vpop.eup %2138  ;;  %v1148_v47 = vadd.f32 %v1116_v19, %v2796_v44  ;;  %v1085_v62 = vmul.f32 %v1053_v20, %v2811_v57  ;;  %v2827_v2 = vadd.f32 %v881_v39, %v2694_v27  ;;  %v883_v26 = vpop.f32.mrb[21].mxu0 }
 0x136   : > { %v1304_v51 = vmul.f32 %v1272_v22, %v2748_v8  ;;  %v1241_v55 = vadd.f32 1.0, %v2139_v46  ;;  %v2834_v60 = vadd.f32 %v883_v26, %v2696_v28  ;;  %v2838_v27 = vpop.f32.mrb[34].mxu1 }
 0x137   : > { %v1180_v61 = vmul.f32 0.7978846, %v1148_v47  ;;  %v1117_v0 = vmul.f32 %v1085_v62, %v2811_v57  ;;  %v1054_v5 = vmul.f32 0.044715, %v2827_v2  ;;  %v2845_v11 = vpop.f32.mrb[35].mxu1 }
 0x138   : > { %v1273_v6 = vmul.f32 %v1241_v55, %v1017_v52  ;;  %v887_v10 = vpop.f32.mrb[22].mxu0  ;;  %1904 = vmatprep.mubr.f32.mxu1 %v1304_v51 }
 0x139   : > { %v2141_v53 = vpop.eup %2140  ;;  %2144 = vtanh.f32 %v1180_v61  ;;  %v1149_v8 = vadd.f32 %v1117_v0, %v2811_v57  ;;  %v1086_v12 = vmul.f32 %v1054_v5, %v2827_v2  ;;  %v2843_v37 = vadd.f32 %v887_v10, %v2698_v29  ;;  %v889_v28 = vpop.f32.mrb[23].mxu0 }
 0x13a   : > { %v1305_v14 = vmul.f32 %v1273_v6, %v2760_v18  ;;  %v1242_v19 = vadd.f32 1.0, %v2141_v53  ;;  %v2850_v20 = vadd.f32 %v889_v28, %v2700_v30  ;;  %v2854_v29 = vpop.f32.mrb[36].mxu1  ;;  %v1019_v61 = vmul.f32 0.5, %v2778_v1 }
 0x13b   : > { %v1181_v22 = vmul.f32 0.7978846, %v1149_v8  ;;  %v1118_v39 = vmul.f32 %v1086_v12, %v2827_v2  ;;  %v1055_v46 = vmul.f32 0.044715, %v2843_v37  ;;  %v2861_v52 = vpop.f32.mrb[37].mxu1 }
 0x13c   : > { %v1274_v47 = vmul.f32 %v1242_v19, %v1018_v15  ;;  %v893_v62 = vpop.f32.mrb[24].mxu0  ;;  %1905 = vmatmul.mubr.f32.gmra.mrb[52].mxu1 %v1305_v14 }
 0x13d   : > { %v2143_v26 = vpop.eup %2142  ;;  %2146 = vtanh.f32 %v1181_v22  ;;  %v1150_v18 = vadd.f32 %v1118_v39, %v2827_v2  ;;  %v1087_v42 = vmul.f32 %v1055_v46, %v2843_v37  ;;  %v2859_v51 = vadd.f32 %v893_v62, %v2702_v31  ;;  %v895_v30 = vpop.f32.mrb[25].mxu0 }
 0x13e   : > { %v1306_v55 = vmul.f32 %v1274_v47, %v2772_v34  ;;  %v1243_v0 = vadd.f32 1.0, %v2143_v26  ;;  %v2866_v5 = vadd.f32 %v895_v30, %v2704_v7  ;;  %v2870_v31 = vpop.f32.mrb[38].mxu1  ;;  %v1020_v62 = vmul.f32 0.5, %v2796_v44 }
 0x13f   : > { %v1182_v6 = vmul.f32 0.7978846, %v1150_v18  ;;  %v1119_v10 = vmul.f32 %v1087_v42, %v2843_v37  ;;  %v1056_v53 = vmul.f32 0.044715, %v2859_v51  ;;  %v2877_v14 = vpop.f32.mrb[39].mxu1 }
 0x140   : > { %v1275_v8 = vmul.f32 %v1243_v0, %v1019_v61  ;;  %v899_v12 = vpop.f32.mrb[26].mxu0  ;;  %1907 = vmatprep.mubr.f32.mxu1 %v1306_v55 }
 0x141   : > { %2148 = vtanh.f32 %v1182_v6  ;;  %v1151_v28 = vadd.f32 %v1119_v10, %v2843_v37  ;;  %v1088_v34 = vmul.f32 %v1056_v53, %v2859_v51  ;;  %v2875_v1 = vadd.f32 %v899_v12, %v2706_v32  ;;  %v901_v7 = vpop.f32.mrb[27].mxu0  ;;  %v2886_v32 = vpop.f32.mrb[40].mxu1 }
 0x142   : > { %v1307_v15 = vmul.f32 %v1275_v8, %v2784_v40  ;;  %v2881_v19 = vadd.f32 %v901_v7, %v2708_v33  ;;  %v2893_v55 = vpop.f32.mrb[41].mxu1  ;;  %v1021_v12 = vmul.f32 0.5, %v2811_v57 }
 0x143   : > { %v2145_v22 = vpop.eup %2144  ;;  %v1183_v39 = vmul.f32 0.7978846, %v1151_v28  ;;  %v1120_v46 = vmul.f32 %v1088_v34, %v2859_v51  ;;  %v1057_v47 = vmul.f32 0.044715, %v2875_v1  ;;  %v2902_v34 = vpop.f32.mrb[42].mxu1 }
 0x144   : > { %v1244_v26 = vadd.f32 1.0, %v2145_v22  ;;  %v905_v18 = vpop.f32.mrb[28].mxu0  ;;  %1908 = vmatmul.mubr.f32.gmra.mrb[54].mxu1 %v1307_v15 }
 0x145   : > { %2150 = vtanh.f32 %v1183_v39  ;;  %v1152_v42 = vadd.f32 %v1120_v46, %v2859_v51  ;;  %v1089_v40 = vmul.f32 %v1057_v47, %v2875_v1  ;;  %v2891_v33 = vadd.f32 %v905_v18, %v2710_v35  ;;  %v907_v30 = vpop.f32.mrb[29].mxu0  ;;  %v2909_v39 = vpop.f32.mrb[43].mxu1 }
 0x146   : > { %v1276_v61 = vmul.f32 %v1244_v26, %v1020_v62  ;;  %v2896_v0 = vadd.f32 %v907_v30, %v2712_v38  ;;  %v2918_v30 = vpop.f32.mrb[44].mxu1 }
 0x147   : > { %v2147_v44 = vpop.eup %2146  ;;  %v1184_v6 = vmul.f32 0.7978846, %v1152_v42  ;;  %v1121_v10 = vmul.f32 %v1089_v40, %v2875_v1  ;;  %v1058_v53 = vmul.f32 0.044715, %v2891_v33  ;;  %v1022_v42 = vmul.f32 0.5, %v2827_v2 }
 0x148   : > { %v1308_v8 = vmul.f32 %v1276_v61, %v2803_v56  ;;  %v1245_v28 = vadd.f32 1.0, %v2147_v44  ;;  %v911_v35 = vpop.f32.mrb[30].mxu0 }
 0x149   : > { %2152 = vtanh.f32 %v1184_v6  ;;  %v1153_v7 = vadd.f32 %v1121_v10, %v2875_v1  ;;  %v1090_v38 = vmul.f32 %v1058_v53, %v2891_v33  ;;  %v2907_v15 = vadd.f32 %v911_v35, %v2714_v41  ;;  %v913_v22 = vpop.f32.mrb[31].mxu0  ;;  %v2925_v10 = vpop.f32.mrb[45].mxu1 }
 0x14a   : > { %v1277_v46 = vmul.f32 %v1245_v28, %v1021_v12  ;;  %v2912_v56 = vadd.f32 %v913_v22, %v2718_v45  ;;  %1910 = vmatprep.mubr.f32.mxu1 %v1308_v8  ;;  %v2934_v22 = vpop.f32.mrb[46].mxu1 }
 0x14b   : > { %v2149_v57 = vpop.eup %2148  ;;  %v1185_v47 = vmul.f32 0.7978846, %v1153_v7  ;;  %v1122_v62 = vmul.f32 %v1090_v38, %v2891_v33  ;;  %v1059_v26 = vmul.f32 0.044715, %v2907_v15  ;;  %v1023_v7 = vmul.f32 0.5, %v2843_v37 }
 0x14c   : > { %v1309_v18 = vmul.f32 %v1277_v46, %v2818_v17  ;;  %v1246_v41 = vadd.f32 1.0, %v2149_v57  ;;  %v917_v40 = vpop.f32.mrb[32].mxu0 }
 0x14d   : > { %2154 = vtanh.f32 %v1185_v47  ;;  %v1154_v61 = vadd.f32 %v1122_v62, %v2891_v33  ;;  %v1091_v45 = vmul.f32 %v1059_v26, %v2907_v15  ;;  %v2923_v44 = vadd.f32 %v917_v40, %v2722_v49  ;;  %v919_v6 = vpop.f32.mrb[33].mxu0  ;;  %v2941_v62 = vpop.f32.mrb[47].mxu1 }
 0x14e   : > { %v1278_v53 = vmul.f32 %v1246_v41, %v1022_v42  ;;  %v2928_v17 = vadd.f32 %v919_v6, %v2727_v54  ;;  %1911 = vmatmul.mubr.f32.gmra.mrb[56].mxu1 %v1309_v18 }
 0x14f   : > { %v2151_v2 = vpop.eup %2150  ;;  %v1186_v8 = vmul.f32 0.7978846, %v1154_v61  ;;  %v1123_v12 = vmul.f32 %v1091_v45, %v2907_v15  ;;  %v1060_v28 = vmul.f32 0.044715, %v2923_v44  ;;  %v1024_v61 = vmul.f32 0.5, %v2859_v51 }
 0x150   : > { %v1310_v35 = vmul.f32 %v1278_v53, %v2834_v60  ;;  %v1247_v49 = vadd.f32 1.0, %v2151_v2  ;;  %v923_v38 = vpop.f32.mrb[34].mxu0 }
 0x151   : > { %2156 = vtanh.f32 %v1186_v8  ;;  %v1155_v46 = vadd.f32 %v1123_v12, %v2907_v15  ;;  %v1092_v54 = vmul.f32 %v1060_v28, %v2923_v44  ;;  %v2939_v57 = vadd.f32 %v923_v38, %v2732_v58  ;;  %v925_v47 = vpop.f32.mrb[35].mxu0 }
 0x152   : > { %v1279_v26 = vmul.f32 %v1247_v49, %v1023_v7  ;;  %v2944_v60 = vadd.f32 %v925_v47, %v2738_v63  ;;  %1913 = vmatprep.mubr.f32.mxu1 %v1310_v35  ;;  %v1025_v49 = vmul.f32 0.5, %v2875_v1 }
 0x153   : > { %v2153_v37 = vpop.eup %2152  ;;  %v1187_v18 = vmul.f32 0.7978846, %v1155_v46  ;;  %v1124_v42 = vmul.f32 %v1092_v54, %v2923_v44  ;;  %v1061_v41 = vmul.f32 0.044715, %v2939_v57 }
 0x154   : > { %v1311_v40 = vmul.f32 %v1279_v26, %v2850_v20  ;;  %v1248_v58 = vadd.f32 1.0, %v2153_v37  ;;  %v929_v45 = vpop.f32.mrb[36].mxu0 }
 0x155   : > { %2158 = vtanh.f32 %v1187_v18  ;;  %v1156_v6 = vadd.f32 %v1124_v42, %v2923_v44  ;;  %v1093_v53 = vmul.f32 %v1061_v41, %v2939_v57  ;;  %v2953_v63 = vadd.f32 %v929_v45, %v2744_v3  ;;  %v931_v2 = vpop.f32.mrb[37].mxu0 }
 0x156   : > { %v1280_v8 = vmul.f32 %v1248_v58, %v1024_v61  ;;  %v2956_v12 = vadd.f32 %v931_v2, %v2750_v9  ;;  %1914 = vmatmul.mubr.f32.gmra.mrb[58].mxu1 %v1311_v40  ;;  %v1026_v40 = vmul.f32 0.5, %v2891_v33 }
 0x157   : > { %v2155_v28 = vpop.eup %2154  ;;  %v1188_v20 = vmul.f32 0.7978846, %v1156_v6  ;;  %v1125_v51 = vmul.f32 %v1093_v53, %v2939_v57  ;;  %v1062_v35 = vmul.f32 0.044715, %v2953_v63 }
 0x158   : > { %v1312_v7 = vmul.f32 %v1280_v8, %v2866_v5  ;;  %v1249_v38 = vadd.f32 1.0, %v2155_v28  ;;  %v935_v46 = vpop.f32.mrb[38].mxu0 }
 0x159   : > { %2160 = vtanh.f32 %v1188_v20  ;;  %v1157_v3 = vadd.f32 %v1125_v51, %v2939_v57  ;;  %v1094_v54 = vmul.f32 %v1062_v35, %v2953_v63  ;;  %v2965_v9 = vadd.f32 %v935_v46, %v2756_v13  ;;  %v937_v47 = vpop.f32.mrb[39].mxu0 }
 0x15a   : > { %v1281_v26 = vmul.f32 %v1249_v38, %v1025_v49  ;;  %v2968_v37 = vadd.f32 %v937_v47, %v2762_v21  ;;  %1916 = vmatprep.mubr.f32.mxu1 %v1312_v7  ;;  %v1027_v51 = vmul.f32 0.5, %v2907_v15 }
 0x15b   : > { %v2157_v18 = vpop.eup %2156  ;;  %v1189_v5 = vmul.f32 0.7978846, %v1157_v3  ;;  %v1126_v1 = vmul.f32 %v1094_v54, %v2953_v63  ;;  %v1063_v42 = vmul.f32 0.044715, %v2965_v9 }
 0x15c   : > { %v1313_v41 = vmul.f32 %v1281_v26, %v2881_v19  ;;  %v1250_v61 = vadd.f32 1.0, %v2157_v18  ;;  %v941_v58 = vpop.f32.mrb[40].mxu0  ;;  %v1028_v18 = vmul.f32 0.5, %v2923_v44 }
 0x15d   : > { %2162 = vtanh.f32 %v1189_v5  ;;  %v1158_v13 = vadd.f32 %v1126_v1, %v2953_v63  ;;  %v1095_v45 = vmul.f32 %v1063_v42, %v2965_v9  ;;  %v2977_v21 = vadd.f32 %v941_v58, %v2768_v43  ;;  %v943_v6 = vpop.f32.mrb[41].mxu0 }
 0x15e   : > { %v1282_v53 = vmul.f32 %v1250_v61, %v1026_v40  ;;  %v2980_v2 = vadd.f32 %v943_v6, %v2774_v59  ;;  %1917 = vmatmul.mubr.f32.gmra.mrb[60].mxu1 %v1313_v41  ;;  %v1029_v6 = vmul.f32 0.5, %v2939_v57 }
 0x15f   : > { %v2159_v8 = vpop.eup %2158  ;;  %v1190_v19 = vmul.f32 0.7978846, %v1158_v13  ;;  %v1127_v33 = vmul.f32 %v1095_v45, %v2965_v9  ;;  %v1064_v28 = vmul.f32 0.044715, %v2977_v21 }
 0x160   : > { %v1314_v20 = vmul.f32 %v1282_v53, %v2896_v0  ;;  %v1251_v35 = vadd.f32 1.0, %v2159_v8  ;;  %v947_v7 = vpop.f32.mrb[42].mxu0 }
 0x161   : > { %2164 = vtanh.f32 %v1190_v19  ;;  %v1159_v43 = vadd.f32 %v1127_v33, %v2965_v9  ;;  %v1096_v49 = vmul.f32 %v1064_v28, %v2977_v21  ;;  %v2989_v59 = vadd.f32 %v947_v7, %v2780_v4  ;;  %v949_v38 = vpop.f32.mrb[43].mxu0 }
 0x162   : > { %v1283_v46 = vmul.f32 %v1251_v35, %v1027_v51  ;;  %v2992_v3 = vadd.f32 %v949_v38, %v2788_v16  ;;  %1919 = vmatprep.mubr.f32.mxu1 %v1314_v20 }
 0x163   : > { %v2161_v54 = vpop.eup %2160  ;;  %v1191_v0 = vmul.f32 0.7978846, %v1159_v43  ;;  %v1128_v15 = vmul.f32 %v1096_v49, %v2977_v21  ;;  %v1065_v47 = vmul.f32 0.044715, %v2989_v59  ;;  %v1030_v43 = vmul.f32 0.5, %v2953_v63 }
 0x164   : > { %v1315_v26 = vmul.f32 %v1283_v46, %v2912_v56  ;;  %v1252_v5 = vadd.f32 1.0, %v2161_v54  ;;  %v953_v1 = vpop.f32.mrb[44].mxu0 }
 0x165   : > { %2166 = vtanh.f32 %v1191_v0  ;;  %v1160_v4 = vadd.f32 %v1128_v15, %v2977_v21  ;;  %v1097_v42 = vmul.f32 %v1065_v47, %v2989_v59  ;;  %v3001_v16 = vadd.f32 %v953_v1, %v2792_v36  ;;  %v955_v41 = vpop.f32.mrb[45].mxu0 }
 0x166   : > { %v1284_v40 = vmul.f32 %v1252_v5, %v1028_v18  ;;  %v3004_v61 = vadd.f32 %v955_v41, %v2798_v50  ;;  %1920 = vmatmul.mubr.f32.gmra.mrb[62].mxu1 %v1315_v26  ;;  %v1031_v5 = vmul.f32 0.5, %v2965_v9 }
 0x167   : > { %v2163_v58 = vpop.eup %2162  ;;  %v1192_v56 = vmul.f32 0.7978846, %v1160_v4  ;;  %v1129_v44 = vmul.f32 %v1097_v42, %v2989_v59  ;;  %v1066_v13 = vmul.f32 0.044715, %v3001_v16 }
 0x168   : > { %v1316_v45 = vmul.f32 %v1284_v40, %v2928_v17  ;;  %v1253_v53 = vadd.f32 1.0, %v2163_v58  ;;  %v959_v8 = vpop.f32.mrb[46].mxu0 }
 0x169   : > { %2168 = vtanh.f32 %v1192_v56  ;;  %v1161_v36 = vadd.f32 %v1129_v44, %v2989_v59  ;;  %v1098_v19 = vmul.f32 %v1066_v13, %v3001_v16  ;;  %v3013_v50 = vadd.f32 %v959_v8, %v2807_v23  ;;  %v961_v33 = vpop.f32.mrb[47].mxu0 }
 0x16a   : > { %v1285_v28 = vmul.f32 %v1253_v53, %v1029_v6  ;;  %v3016_v20 = vadd.f32 %v961_v33, %v2813_v24  ;;  %1922 = vmatprep.mubr.f32.mxu1 %v1316_v45  ;;  %v1032_v45 = vmul.f32 0.5, %v2977_v21 }
 0x16b   : > { %v2165_v51 = vpop.eup %2164  ;;  %v1193_v17 = vmul.f32 0.7978846, %v1161_v36  ;;  %v1130_v57 = vmul.f32 %v1098_v19, %v3001_v16  ;;  %v1067_v35 = vmul.f32 0.044715, %v3013_v50 }
 0x16c   : > { %v1317_v7 = vmul.f32 %v1285_v28, %v2944_v60  ;;  %v1254_v49 = vadd.f32 1.0, %v2165_v51  ;;  %v965_v38 = vpop.f32.mrb[48].mxu0 }
 0x16d   : > { %2170 = vtanh.f32 %v1193_v17  ;;  %v1162_v23 = vadd.f32 %v1130_v57, %v3001_v16  ;;  %v1099_v46 = vmul.f32 %v1067_v35, %v3013_v50  ;;  %v3025_v24 = vadd.f32 %v965_v38, %v2822_v25  ;;  %v967_v54 = vpop.f32.mrb[49].mxu0 }
 0x16e   : > { %v1286_v0 = vmul.f32 %v1254_v49, %v1030_v43  ;;  %v3028_v15 = vadd.f32 %v967_v54, %v2829_v48  ;;  %1923 = vmatmul.mubr.f32.gmra.mrb[64].mxu1 %v1317_v7  ;;  %v1033_v57 = vmul.f32 0.5, %v2989_v59 }
 0x16f   : > { %v2167_v47 = vpop.eup %2166  ;;  %v1194_v60 = vmul.f32 0.7978846, %v1162_v23  ;;  %v1131_v63 = vmul.f32 %v1099_v46, %v3013_v50  ;;  %v1068_v26 = vmul.f32 0.044715, %v3025_v24 }
 0x170   : > { %v1318_v18 = vmul.f32 %v1286_v0, %v2956_v12  ;;  %v1255_v1 = vadd.f32 1.0, %v2167_v47  ;;  %v971_v4 = vpop.f32.mrb[50].mxu0  ;;  %v1034_v47 = vmul.f32 0.5, %v3001_v16 }
 0x171   : > { %2172 = vtanh.f32 %v1194_v60  ;;  %v1163_v25 = vadd.f32 %v1131_v63, %v3013_v50  ;;  %v1100_v42 = vmul.f32 %v1068_v26, %v3025_v24  ;;  %v3037_v48 = vadd.f32 %v971_v4, %v2838_v27  ;;  %v973_v41 = vpop.f32.mrb[51].mxu0 }
 0x172   : > { %v1287_v40 = vmul.f32 %v1255_v1, %v1031_v5  ;;  %v3040_v58 = vadd.f32 %v973_v41, %v2845_v11  ;;  %1925 = vmatprep.mubr.f32.mxu1 %v1318_v18  ;;  %v1035_v41 = vmul.f32 0.5, %v3013_v50 }
 0x173   : > { %v2169_v56 = vpop.eup %2168  ;;  %v1195_v12 = vmul.f32 0.7978846, %v1163_v25  ;;  %v1132_v9 = vmul.f32 %v1100_v42, %v3025_v24  ;;  %v1069_v44 = vmul.f32 0.044715, %v3037_v48 }
 0x174   : > { %v1319_v13 = vmul.f32 %v1287_v40, %v2968_v37  ;;  %v1256_v6 = vadd.f32 1.0, %v2169_v56  ;;  %v977_v53 = vpop.f32.mrb[52].mxu0 }
 0x175   : > { %2174 = vtanh.f32 %v1195_v12  ;;  %v1164_v27 = vadd.f32 %v1132_v9, %v3025_v24  ;;  %v1101_v8 = vmul.f32 %v1069_v44, %v3037_v48  ;;  %v3049_v11 = vadd.f32 %v977_v53, %v2854_v29  ;;  %v979_v36 = vpop.f32.mrb[53].mxu0 }
 0x176   : > { %v1288_v19 = vmul.f32 %v1256_v6, %v1032_v45  ;;  %v3052_v33 = vadd.f32 %v979_v36, %v2861_v52  ;;  %1926 = vmatmul.mubr.f32.gmra.mrb[66].mxu1 %v1319_v13 }
 0x177   : > { %v2171_v28 = vpop.eup %2170  ;;  %v1196_v37 = vmul.f32 0.7978846, %v1164_v27  ;;  %v1133_v21 = vmul.f32 %v1101_v8, %v3037_v48  ;;  %v1070_v51 = vmul.f32 0.044715, %v3049_v11  ;;  %v1036_v27 = vmul.f32 0.5, %v3025_v24 }
 0x178   : > { %v1320_v17 = vmul.f32 %v1288_v19, %v2980_v2  ;;  %v1257_v35 = vadd.f32 1.0, %v2171_v28  ;;  %v983_v7 = vpop.f32.mrb[54].mxu0 }
 0x179   : > { %2176 = vtanh.f32 %v1196_v37  ;;  %v1165_v29 = vadd.f32 %v1133_v21, %v3037_v48  ;;  %v1102_v43 = vmul.f32 %v1070_v51, %v3049_v11  ;;  %v3061_v52 = vadd.f32 %v983_v7, %v2870_v31  ;;  %v985_v49 = vpop.f32.mrb[55].mxu0 }
 0x17a   : > { %v1289_v38 = vmul.f32 %v1257_v35, %v1033_v57  ;;  %v3064_v23 = vadd.f32 %v985_v49, %v2877_v14  ;;  %1928 = vmatprep.mubr.f32.mxu1 %v1320_v17  ;;  %v1037_v35 = vmul.f32 0.5, %v3037_v48  ;;  %v1038_v48 = vmul.f32 0.5, %v3049_v11 }
 0x17b   : > { %v2173_v46 = vpop.eup %2172  ;;  %v1197_v2 = vmul.f32 0.7978846, %v1165_v29  ;;  %v1134_v59 = vmul.f32 %v1102_v43, %v3049_v11  ;;  %v1071_v54 = vmul.f32 0.044715, %v3061_v52 }
 0x17c   : > { %v1321_v0 = vmul.f32 %v1289_v38, %v2992_v3  ;;  %v1258_v60 = vadd.f32 1.0, %v2173_v46  ;;  %v989_v63 = vpop.f32.mrb[56].mxu0 }
 0x17d   : > { %2178 = vtanh.f32 %v1197_v2  ;;  %v1166_v31 = vadd.f32 %v1134_v59, %v3049_v11  ;;  %v1103_v26 = vmul.f32 %v1071_v54, %v3061_v52  ;;  %v3073_v14 = vadd.f32 %v989_v63, %v2886_v32  ;;  %v991_v18 = vpop.f32.mrb[57].mxu0 }
 0x17e   : > { %v1290_v5 = vmul.f32 %v1258_v60, %v1034_v47  ;;  %v3076_v1 = vadd.f32 %v991_v18, %v2893_v55  ;;  %1929 = vmatmul.mubr.f32.gmra.mrb[68].mxu1 %v1321_v0 }
 0x17f   : > { %v2175_v4 = vpop.eup %2174  ;;  %v1198_v3 = vmul.f32 0.7978846, %v1166_v31  ;;  %v1135_v16 = vmul.f32 %v1103_v26, %v3061_v52  ;;  %v1072_v25 = vmul.f32 0.044715, %v3073_v14 }
 0x180   : > { %v1322_v42 = vmul.f32 %v1290_v5, %v3004_v61  ;;  %v1259_v40 = vadd.f32 1.0, %v2175_v4  ;;  %v995_v56 = vpop.f32.mrb[58].mxu0  ;;  %v1039_v5 = vmul.f32 0.5, %v3061_v52 }
 0x181   : > { %2180 = vtanh.f32 %v1198_v3  ;;  %v1167_v32 = vadd.f32 %v1135_v16, %v3061_v52  ;;  %v1104_v12 = vmul.f32 %v1072_v25, %v3073_v14  ;;  %v3085_v55 = vadd.f32 %v995_v56, %v2902_v34  ;;  %v997_v9 = vpop.f32.mrb[59].mxu0 }
 0x182   : > { %v1291_v44 = vmul.f32 %v1259_v40, %v1035_v41  ;;  %v3088_v13 = vadd.f32 %v997_v9, %v2909_v39  ;;  %1931 = vmatprep.mubr.f32.mxu1 %v1322_v42  ;;  %v1040_v42 = vmul.f32 0.5, %v3073_v14 }
 0x183   : > { %v2177_v45 = vpop.eup %2176  ;;  %v1199_v61 = vmul.f32 0.7978846, %v1167_v32  ;;  %v1136_v50 = vmul.f32 %v1104_v12, %v3073_v14  ;;  %v1073_v6 = vmul.f32 0.044715, %v3085_v55  ;;  %v1041_v52 = vmul.f32 0.5, %v3085_v55 }
 0x184   : > { %v1323_v53 = vmul.f32 %v1291_v44, %v3016_v20  ;;  %v1260_v8 = vadd.f32 1.0, %v2177_v45  ;;  %v1001_v36 = vpop.f32.mrb[60].mxu0 }
 0x185   : > { %2182 = vtanh.f32 %v1199_v61  ;;  %v1168_v34 = vadd.f32 %v1136_v50, %v3073_v14  ;;  %v1105_v19 = vmul.f32 %v1073_v6, %v3085_v55  ;;  %v1002_v39 = vadd.f32 %v1001_v36, %v2918_v30  ;;  %v1003_v28 = vpop.f32.mrb[61].mxu0 }
 0x186   : > { %v1292_v37 = vmul.f32 %v1260_v8, %v1036_v27  ;;  %v1004_v21 = vadd.f32 %v1003_v28, %v2925_v10  ;;  %1932 = vmatmul.mubr.f32.gmra.mrb[70].mxu1 %v1323_v53  ;;  %v1573_v27 = vld [vmem:[%s3118_s10] sm:$0xff]  ;;  %v1575_v28 = vld [vmem:[%s3118_s10 + $0x10] sm:$0xff] }
 0x187   : > { %v2179_v51 = vpop.eup %2178  ;;  %v1200_v17 = vmul.f32 0.7978846, %v1168_v34  ;;  %v1137_v20 = vmul.f32 %v1105_v19, %v3085_v55  ;;  %v1074_v57 = vmul.f32 0.044715, %v1002_v39  ;;  %v1042_v44 = vmul.f32 0.5, %v1002_v39 }
 0x188   : > { %v1324_v24 = vmul.f32 %v1292_v37, %v3028_v15  ;;  %v1261_v7 = vadd.f32 1.0, %v2179_v51  ;;  %v1007_v29 = vpop.f32.mrb[62].mxu0 }
 0x189   : > { %2184 = vtanh.f32 %v1200_v17  ;;  %v1169_v43 = vadd.f32 %v1137_v20, %v3085_v55  ;;  %v1106_v30 = vmul.f32 %v1074_v57, %v1002_v39  ;;  %v1008_v49 = vadd.f32 %v1007_v29, %v2934_v22  ;;  %v1009_v38 = vpop.f32.mrb[63].mxu0  ;;  %v1578_v20 = vld [vmem:[%s3118_s10 + $0x28] sm:$0xff]  ;;  %v1577_v57 = vld [vmem:[%s3118_s10 + $0x20] sm:$0xff] }
 0x18a   : > { %v1293_v10 = vmul.f32 %v1261_v7, %v1037_v35  ;;  %v1010_v46 = vadd.f32 %v1009_v38, %v2941_v62  ;;  %1934 = vmatprep.mubr.f32.mxu1 %v1324_v24 }
 0x18b   : > { %v2181_v2 = vpop.eup %2180  ;;  %v1201_v59 = vmul.f32 0.7978846, %v1169_v43  ;;  %v1138_v54 = vmul.f32 %v1106_v30, %v1002_v39  ;;  %v1075_v0 = vmul.f32 0.044715, %v1008_v49  ;;  %v1043_v6 = vmul.f32 0.5, %v1008_v49  ;;  %v1580_v43 = vld [vmem:[%s3118_s10 + $0x38] sm:$0xff] }
 0x18c   : > { %v1325_v15 = vmul.f32 %v1293_v10, %v3040_v58  ;;  %v1262_v47 = vadd.f32 1.0, %v2181_v2  ;;  %v1579_v30 = vld [vmem:[%s3118_s10 + $0x30] sm:$0xff]  ;;  %v1582_v2 = vld [vmem:[%s3118_s10 + $0x48] sm:$0xff] }
 0x18d   : > { %2186 = vtanh.f32 %v1201_v59  ;;  %v1170_v60 = vadd.f32 %v1138_v54, %v1002_v39  ;;  %v1107_v63 = vmul.f32 %v1075_v0, %v1008_v49  ;;  %v1576_v39 = vld [vmem:[%s3118_s10 + $0x18] sm:$0xff]  ;;  %v1581_v59 = vld [vmem:[%s3118_s10 + $0x40] sm:$0xff] }
 0x18e   : > { %v1294_v31 = vmul.f32 %v1262_v47, %v1038_v48  ;;  %1935 = vmatmul.mubr.f32.gmra.mrb[72].mxu1 %v1325_v15  ;;  %v1584_v47 = vld [vmem:[%s3118_s10 + $0x58] sm:$0xff] }
 0x18f   : > { %v2183_v22 = vpop.eup %2182  ;;  %v1202_v26 = vmul.f32 0.7978846, %v1170_v60  ;;  %v1139_v18 = vmul.f32 %v1107_v63, %v1008_v49  ;;  %v1583_v60 = vld [vmem:[%s3118_s10 + $0x50] sm:$0xff] }
 0x190   : > { %v1326_v62 = vmul.f32 %v1294_v31, %v3052_v33  ;;  %v1263_v4 = vadd.f32 1.0, %v2183_v22 }
 0x191   : > { %2188 = vtanh.f32 %v1202_v26  ;;  %v1171_v3 = vadd.f32 %v1139_v18, %v1008_v49  ;;  %v1586_v18 = vld [vmem:[%s3118_s10 + $0x68] sm:$0xff] }
 0x192   : > { %v1295_v16 = vmul.f32 %v1263_v4, %v1039_v5  ;;  %1937 = vmatprep.mubr.f32.mxu1 %v1326_v62  ;;  %v1585_v62 = vld [vmem:[%s3118_s10 + $0x60] sm:$0xff] }
 0x193   : > { %v2185_v58 = vpop.eup %2184  ;;  %v1203_v11 = vmul.f32 0.7978846, %v1171_v3 }
 0x194   : > { %v1327_v25 = vmul.f32 %v1295_v16, %v3064_v23  ;;  %v1264_v41 = vadd.f32 1.0, %v2185_v58  ;;  %v1588_v58 = vld [vmem:[%s3118_s10 + $0x78] sm:$0xff] }
 0x195   : > { %2190 = vtanh.f32 %v1203_v11  ;;  %v1587_v11 = vld [vmem:[%s3118_s10 + $0x70] sm:$0xff] }
 0x196   : > { %v1296_v40 = vmul.f32 %v1264_v41, %v1040_v42  ;;  %1938 = vmatmul.mubr.f32.gmra.mrb[74].mxu1 %v1327_v25 }
 0x197   : > { %v2187_v56 = vpop.eup %2186 }
 0x198   : > { %v1328_v33 = vmul.f32 %v1296_v40, %v3076_v1  ;;  %v1265_v32 = vadd.f32 1.0, %v2187_v56  ;;  %v1590_v56 = vld [vmem:[%s3118_s10 + $0x88] sm:$0xff] }
 0x19a   : > { %v1297_v12 = vmul.f32 %v1265_v32, %v1041_v52  ;;  %1940 = vmatprep.mubr.f32.mxu1 %v1328_v33  ;;  %v1589_v33 = vld [vmem:[%s3118_s10 + $0x80] sm:$0xff] }
 0x19b   : > { %v2189_v9 = vpop.eup %2188 }
 0x19c   : > { %v1329_v23 = vmul.f32 %v1297_v12, %v3088_v13  ;;  %v1266_v14 = vadd.f32 1.0, %v2189_v9  ;;  %v1574_v13 = vld [vmem:[%s3118_s10 + $0x8] sm:$0xff] }
 0x19e   : > { %v1298_v45 = vmul.f32 %v1266_v14, %v1042_v44  ;;  %1941 = vmatmul.mubr.f32.gmra.mrb[76].mxu1 %v1329_v23  ;;  %v1592_v23 = vld [vmem:[%s3118_s10 + $0x98] sm:$0xff]  ;;  %v1591_v44 = vld [vmem:[%s3118_s10 + $0x90] sm:$0xff] }
 0x19f   : > { %v2191_v61 = vpop.eup %2190 }
 0x1a0   : > { %v1330_v50 = vmul.f32 %v1298_v45, %v1004_v21  ;;  %v1267_v53 = vadd.f32 1.0, %v2191_v61 }
 0x1a2   : > { %v1299_v1 = vmul.f32 %v1267_v53, %v1043_v6  ;;  %1943 = vmatprep.mubr.f32.mxu1 %v1330_v50  ;;  %v1594_v6 = vld [vmem:[%s3118_s10 + $0xa8] sm:$0xff]  ;;  %v1593_v53 = vld [vmem:[%s3118_s10 + $0xa0] sm:$0xff] }
 0x1a4   : > { %v1331_v55 = vmul.f32 %v1299_v1, %v1010_v46 }
 0x1a6   : > { %1944 = vmatmul.mubr.f32.gmra.mrb[78].mxu1 %v1331_v55 }
 0x1ff   : > { %v1900_v8 = vpop.f32.mrb[48].mxu1 }
 0x200   : > { %v1606_v36 = vadd.f32 %v1900_v8, %v1574_v13  ;;  %v1414_v34 = vpop.f32.mrb[49].mxu1  ;;  %v1596_v8 = vld [vmem:[%s3118_s10 + $0xb8] sm:$0xff] }
 0x201   : > { %v1605_v19 = vadd.f32 %v1573_v27, %v1414_v34 }
 0x202   : > { %1638 = vst [vmem:[%s3124_s11 + $0x8] sm:$0xff] %v1606_v36  ;;  %v1595_v36 = vld [vmem:[%s3118_s10 + $0xb0] sm:$0xff] }
 0x203   : > { %1637 = vst [vmem:[%s3124_s11] sm:$0xff] %v1605_v19 }
 0x207   : > { %v1903_v37 = vpop.f32.mrb[50].mxu1 }
 0x208   : > { %v1608_v21 = vadd.f32 %v1903_v37, %v1576_v39  ;;  %v1424_v51 = vpop.f32.mrb[51].mxu1  ;;  %v1598_v37 = vld [vmem:[%s3118_s10 + $0xc8] sm:$0xff] }
 0x209   : > { %v1607_v17 = vadd.f32 %v1575_v28, %v1424_v51 }
 0x20a   : > { %1640 = vst [vmem:[%s3124_s11 + $0x18] sm:$0xff] %v1608_v21  ;;  %v1597_v21 = vld [vmem:[%s3118_s10 + $0xc0] sm:$0xff] }
 0x20b   : > { %1639 = vst [vmem:[%s3124_s11 + $0x10] sm:$0xff] %v1607_v17 }
 0x20f   : > { %v1906_v24 = vpop.f32.mrb[52].mxu1 }
 0x210   : > { %v1610_v35 = vadd.f32 %v1906_v24, %v1578_v20  ;;  %v1434_v7 = vpop.f32.mrb[53].mxu1  ;;  %v1600_v24 = vld [vmem:[%s3118_s10 + $0xd8] sm:$0xff] }
 0x211   : > { %v1609_v29 = vadd.f32 %v1577_v57, %v1434_v7 }
 0x212   : > { %1642 = vst [vmem:[%s3124_s11 + $0x28] sm:$0xff] %v1610_v35  ;;  %v1599_v35 = vld [vmem:[%s3118_s10 + $0xd0] sm:$0xff] }
 0x213   : > { %1641 = vst [vmem:[%s3124_s11 + $0x20] sm:$0xff] %v1609_v29 }
 0x217   : > { %v1909_v49 = vpop.f32.mrb[54].mxu1 }
 0x218   : > { %v1612_v38 = vadd.f32 %v1909_v49, %v1580_v43  ;;  %v1444_v10 = vpop.f32.mrb[55].mxu1  ;;  %v1602_v49 = vld [vmem:[%s3118_s10 + $0xe8] sm:$0xff] }
 0x219   : > { %v1611_v46 = vadd.f32 %v1579_v30, %v1444_v10 }
 0x21a   : > { %1644 = vst [vmem:[%s3124_s11 + $0x38] sm:$0xff] %v1612_v38  ;;  %v1601_v38 = vld [vmem:[%s3118_s10 + $0xe0] sm:$0xff] }
 0x21b   : > { %1643 = vst [vmem:[%s3124_s11 + $0x30] sm:$0xff] %v1611_v46 }
 0x221   : > { %v1912_v54 = vpop.f32.mrb[56].mxu1 }
 0x222   : > { %v1614_v0 = vadd.f32 %v1912_v54, %v1582_v2  ;;  %v1454_v15 = vpop.f32.mrb[57].mxu1  ;;  %v1604_v54 = vld [vmem:[%s3118_s10 + $0xf8] sm:$0xff] }
 0x223   : > { %v1613_v48 = vadd.f32 %v1581_v59, %v1454_v15 }
 0x224   : > { %1646 = vst [vmem:[%s3124_s11 + $0x48] sm:$0xff] %v1614_v0  ;;  %v1603_v0 = vld [vmem:[%s3118_s10 + $0xf0] sm:$0xff] }
 0x225   : > { %1645 = vst [vmem:[%s3124_s11 + $0x40] sm:$0xff] %v1613_v48 }
 0x229   : > { %v1915_v63 = vpop.f32.mrb[58].mxu1 }
 0x22a   : > { %v1616_v31 = vadd.f32 %v1915_v63, %v1584_v47  ;;  %v1464_v22 = vpop.f32.mrb[59].mxu1 }
 0x22b   : > { %v1615_v26 = vadd.f32 %v1583_v60, %v1464_v22 }
 0x22c   : > { %1648 = vst [vmem:[%s3124_s11 + $0x58] sm:$0xff] %v1616_v31 }
 0x22d   : > { %1647 = vst [vmem:[%s3124_s11 + $0x50] sm:$0xff] %v1615_v26 }
 0x231   : > { %v1918_v5 = vpop.f32.mrb[60].mxu1 }
 0x232   : > { %v1618_v4 = vadd.f32 %v1918_v5, %v1586_v18  ;;  %v1474_v3 = vpop.f32.mrb[61].mxu1 }
 0x233   : > { %v1617_v16 = vadd.f32 %v1585_v62, %v1474_v3 }
 0x234   : > { %1650 = vst [vmem:[%s3124_s11 + $0x68] sm:$0xff] %v1618_v4 }
 0x235   : > { %1649 = vst [vmem:[%s3124_s11 + $0x60] sm:$0xff] %v1617_v16 }
 0x239   : > { %v1921_v25 = vpop.f32.mrb[62].mxu1 }
 0x23a   : > { %v1620_v42 = vadd.f32 %v1921_v25, %v1588_v58  ;;  %v1484_v41 = vpop.f32.mrb[63].mxu1 }
 0x23b   : > { %v1619_v40 = vadd.f32 %v1587_v11, %v1484_v41 }
 0x23c   : > { %1652 = vst [vmem:[%s3124_s11 + $0x78] sm:$0xff] %v1620_v42 }
 0x23d   : > { %1651 = vst [vmem:[%s3124_s11 + $0x70] sm:$0xff] %v1619_v40 }
 0x241   : > { %v1924_v52 = vpop.f32.mrb[64].mxu1 }
 0x242   : > { %v1622_v32 = vadd.f32 %v1924_v52, %v1590_v56  ;;  %v1494_v12 = vpop.f32.mrb[65].mxu1 }
 0x243   : > { %v1621_v9 = vadd.f32 %v1589_v33, %v1494_v12 }
 0x244   : > { %1654 = vst [vmem:[%s3124_s11 + $0x88] sm:$0xff] %v1622_v32 }
 0x245   : > { %1653 = vst [vmem:[%s3124_s11 + $0x80] sm:$0xff] %v1621_v9 }
 0x249   : > { %v1927_v14 = vpop.f32.mrb[66].mxu1 }
 0x24a   : > { %v1624_v45 = vadd.f32 %v1927_v14, %v1592_v23  ;;  %v1504_v61 = vpop.f32.mrb[67].mxu1 }
 0x24b   : > { %v1623_v50 = vadd.f32 %v1591_v44, %v1504_v61 }
 0x24c   : > { %1656 = vst [vmem:[%s3124_s11 + $0x98] sm:$0xff] %v1624_v45 }
 0x24d   : > { %1655 = vst [vmem:[%s3124_s11 + $0x90] sm:$0xff] %v1623_v50 }
 0x251   : > { %v1930_v1 = vpop.f32.mrb[68].mxu1 }
 0x252   : > { %v1626_v55 = vadd.f32 %v1930_v1, %v1594_v6  ;;  %v1514_v13 = vpop.f32.mrb[69].mxu1 }
 0x253   : > { %v1625_v27 = vadd.f32 %v1593_v53, %v1514_v13 }
 0x254   : > { %1658 = vst [vmem:[%s3124_s11 + $0xa8] sm:$0xff] %v1626_v55 }
 0x255   : > { %1657 = vst [vmem:[%s3124_s11 + $0xa0] sm:$0xff] %v1625_v27 }
 0x259   : > { %v1933_v34 = vpop.f32.mrb[70].mxu1 }
 0x25a   : > { %v1628_v19 = vadd.f32 %v1933_v34, %v1596_v8  ;;  %v1524_v39 = vpop.f32.mrb[71].mxu1 }
 0x25b   : > { %v1627_v28 = vadd.f32 %v1595_v36, %v1524_v39 }
 0x25c   : > { %1660 = vst [vmem:[%s3124_s11 + $0xb8] sm:$0xff] %v1628_v19 }
 0x25d   : > { %1659 = vst [vmem:[%s3124_s11 + $0xb0] sm:$0xff] %v1627_v28 }
 0x261   : > { %v1936_v51 = vpop.f32.mrb[72].mxu1 }
 0x262   : > { %v1630_v17 = vadd.f32 %v1936_v51, %v1598_v37  ;;  %v1534_v20 = vpop.f32.mrb[73].mxu1 }
 0x263   : > { %v1629_v57 = vadd.f32 %v1597_v21, %v1534_v20 }
 0x264   : > { %1662 = vst [vmem:[%s3124_s11 + $0xc8] sm:$0xff] %v1630_v17 }
 0x265   : > { %1661 = vst [vmem:[%s3124_s11 + $0xc0] sm:$0xff] %v1629_v57 }
 0x269   : > { %v1939_v7 = vpop.f32.mrb[74].mxu1 }
 0x26a   : > { %v1632_v29 = vadd.f32 %v1939_v7, %v1600_v24  ;;  %v1544_v43 = vpop.f32.mrb[75].mxu1 }
 0x26b   : > { %v1631_v30 = vadd.f32 %v1599_v35, %v1544_v43 }
 0x26c   : > { %1664 = vst [vmem:[%s3124_s11 + $0xd8] sm:$0xff] %v1632_v29 }
 0x26d   : > { %1663 = vst [vmem:[%s3124_s11 + $0xd0] sm:$0xff] %v1631_v30 }
 0x271   : > { %v1942_v10 = vpop.f32.mrb[76].mxu1 }
 0x272   : > { %v1634_v46 = vadd.f32 %v1942_v10, %v1602_v49  ;;  %v1554_v2 = vpop.f32.mrb[77].mxu1 }
 0x273   : > { %v1633_v59 = vadd.f32 %v1601_v38, %v1554_v2 }
 0x274   : > { %1666 = vst [vmem:[%s3124_s11 + $0xe8] sm:$0xff] %v1634_v46 }
 0x275   : > { %1665 = vst [vmem:[%s3124_s11 + $0xe0] sm:$0xff] %v1633_v59 }
 0x279   : > { %v1945_v15 = vpop.f32.mrb[78].mxu1 }
 0x27a   : > { %v1636_v48 = vadd.f32 %v1945_v15, %v1604_v54  ;;  %v1564_v47 = vpop.f32.mrb[79].mxu1 }
 0x27b   : > { %v1635_v60 = vadd.f32 %v1603_v0, %v1564_v47 }
 0x27c   : > { %1668 = vst [vmem:[%s3124_s11 + $0xf8] sm:$0xff] %v1636_v48 }
 0x27d   : > { %1667 = vst [vmem:[%s3124_s11 + $0xf0] sm:$0xff] %v1635_v60 }
 0x27e   : > { %2205 = shalt.err (!%p2202_p3)
}
 0x27f   : > { %s2206_s14 = scalar_lea.hbm %s3191_s18, 4096  ;;  %s2210_s10 = scalar_lea.hbm %s3246_s6, 8192 }
 0x280   : > { %p2207_p4 = scmp.ne.s32.totalorder %s3191_s18, %s2206_s14  ;;  %p2211_p9 = scmp.lt.u32.totalorder %s3191_s18, %s3246_s6 }
 0x281   : > { %p2212_p10 = scmp.lt.u32.totalorder %s2210_s10, %s2206_s14  ;;  %p2214_p12 = scmp.lt.u32.totalorder %s2206_s14, %s3191_s18 }
 0x282   : > { %p2208_p7 = pnand %p2207_p4, %p2333_p5 }
 0x283   : > { %p2213_p11 = por %p2212_p10, %p2211_p9 }
 0x284   : > { %p2209_p8 = pneg %p2208_p7 }
 0x285   : > { %p2215_p13 = por %p2214_p12, %p2213_p11 }
 0x287   : > { %p2216_p0 = pnand %p2215_p13, %p2209_p8 }
 0x289   : > { %2219 = shalt.err (!%p2216_p0)
}
 0x28a   : > { %s2258_s16 = smov 128   ;;  %s2259_s13 = smov 8  }
 0x28b   : > { %2086 = dma.vmem_to_hbm [thread:$0]  (%p2333_p5), %s3193_s12, 4096, %s3191_s18, %s3199_s25, %s2258_s16, %s2258_s16, %s2259_s13  }
 0x28c PF: > { %p2092_p1 = scmp.ge.s32.totalorder %s2254_s24, 2  ;;  %s1698_s17 = sand.u32 1, %s2242_s21  }
 0x28d   : > { %s1699_s19 = scalar_lea.sflag [#allocation3], %s1698_s17 }
 0x28e   : > { %p2089_p2 = pnand %p2092_p1, %p2337_p6 }
 0x290   : > { %2237 = dma.done.wait (!%p2089_p2), %s1699_s19, 4096  }
 0x291   : > { %2239 = vsyncadd (!%p2089_p2), %s1699_s19, 4294963200  ;;  %p16_p3 = scmp.ge.s32.totalorder %s2320_s27, 4   ;;  %s3249_s21 = smov %s2246_s22 }
 0x292   : > { %s3250_s22 = smov %s2250_s23  ;;  %s3251_s23 = smov %s2331_s30 }
 0x293   : > { %s3252_s24 = smov %s2320_s27  ;;  %18 = sbr.rel (!%p16_p3) target bundleno = 3 (0x3), region = 85 }
 0x29a   :  { %1704 = vsyncpa [#allocation3], 1 }
 0x29b   :  { %1706 = vsyncpa [#allocation3 + $0x1], 1 }

// kernel: priorformer_forward.11
= control target key start
LH: loop header
LB: loop body
LE: loop exit
PB: predicated region body
PF: predicated region fallthrough
CT: control target
= control target key end

     0   :  { %10 = vsyncpa [#allocation3], 0  ;;  %s3610_s18 = smov 0   ;;  %s4799_s0 = inlined_call_operand.vmem [shape: f32[2,256,256], index: 0, kind: input, shape index: {}]   ;;  %s4800_s1 = inlined_call_operand.vmem [shape: f32[2,256,128], index: 1, kind: input, shape index: {}]   ;;  %s4801_s2 = inlined_call_operand.vmem [shape: f32[2,256,128], index: 2, kind: input, shape index: {}]   ;;  %s4802_s3 = inlined_call_operand.vmem [shape: f32[128,128], index: 3, kind: input, shape index: {}]   ;;  %s4803_s4 = inlined_call_operand.vmem [shape: f32[2], index: 4, kind: input, shape index: {}]   ;;  %s4804_s5 = inlined_call_operand.vmem [shape: f32[2,256,128], index: 5, kind: output, shape index: {}]  }
   0x1 LB: > { %s2490_s19 = sadd.s32 4294967295, %s3576_s18   ;;  %p2492_p0 = scmp.ge.s32.totalorder %s3576_s18, 1  ;;  %s3576_s18 = sphi %s3610_s18, %s16_s18  }
   0x2   : > { %p167_p1 = scmp.lt.s32.totalorder %s3576_s18, 3  ;;  %s183_s22 = sshll.u32 %s4803_s4, 4  ;;  %s184_s22 = int_to_ptr.vmem [resolvable:$true] %s183_s22 }
   0x3   : > { %p3192_p3 = scmp.eq.s32.totalorder %s2490_s19, 0  ;;  %s3551_s24 = scalar_lea.vmem %s184_s22, 16 }
   0x4   : > { %p3621_p2 = pnand %p2492_p0, %p167_p1  ;;  %p3552_p6 = scmp.ne.s32.totalorder %s184_s22, %s3551_s24 }
   0x5   : > { %p3559_p10 = scmp.lt.s32.totalorder %s184_s22, %s184_s22  ;;  %p3560_p11 = scmp.lt.s32.totalorder %s3551_s24, %s3551_s24 }
   0x6   : > { %p3188_p4 = pneg %p3621_p2 }
   0x7   : > { %p3561_p12 = por %p3560_p11, %p3559_p10 }
   0x8   : > { %p3189_p5 = pnand %p3192_p3, %p3188_p4 }
   0xa   : > { %p3553_p7 = pneg %p3189_p5 }
   0xc   : > { %p3554_p8 = pnand %p3553_p7, %p3552_p6 }
   0xe   : > { %p3555_p9 = pneg %p3554_p8 }
  0x10   : > { %p3562_p13 = pnand %p3561_p12, %p3555_p9 }
  0x12   : > { %3565 = shalt.err (!%p3562_p13)
}
  0x13   : > { %s3578_s25 = smov [#allocation2]   ;;  %220 = sbr.rel (%p3621_p2) target bundleno = 1532 (0x5fc), region = 40 }
  0x14   : > { %3191 = dma.vmem_to_smem (!%p3189_p5), %s184_s22, 16, %s3578_s25, [#allocation3]  }
  0x1a   : > { %3571 = dma.done.wait (%p3192_p3), [#allocation3], 16  }
  0x1b   : > { %3573 = vsyncadd (%p3192_p3), [#allocation3], 4294967280 }
  0x1c   : > { %226 = sfence }
  0x1d   : > { %p259_p0 = scmp.lt.s32.totalorder %s2490_s19, 1  ;;  %s3579_s9 = smov 64   ;;  %vm760_vm0 = vcmask 523264  }
  0x1e   : > { %s750_s10 = sld [smem:[#allocation2]]  ;;  %s2545_s11 = sld [smem:[#allocation2 + $0x1]]  ;;  %vm4385_vm1 = vmpackc.low %vm760_vm0, %vm760_vm0 }
  0x1f   : > { %s4851_s19 = smov (!%p259_p0, %s2490_s19), 1 }
  0x20   : > { %s3632_s26 = sshll.u32 %s4851_s19, 8  ;;  %s2588_s30 = sshll.u32 %s4851_s19, 9 }
  0x21   : > { %s3638_s29 = scalar_lea.vmem %s4800_s1, %s3632_s26  ;;  %s3676_s8 = scalar_lea.vmem %s4799_s0, %s2588_s30 }
  0x22   : > { %v3641_v0 = vld [vmem:[%s3638_s29] sm:$0xff]  ;;  %v3644_v1 = vld [vmem:[%s3638_s29 + $0x8] sm:$0xff]  ;;  %v3647_v2 = vld [vmem:[%s3638_s29 + $0x10] sm:$0xff]  ;;  %s4724_s24 = scalar_lea.vmem %s4801_s2, %s3632_s26  ;;  %s4732_s28 = scalar_lea.vmem %s4804_s5, %s3632_s26 }
  0x23   : > { %v3650_v3 = vld [vmem:[%s3638_s29 + $0x18] sm:$0xff]  ;;  %v478_v4 = vmul.f32 %v3641_v0, %v3641_v0  ;;  %v479_v5 = vmul.f32 %v3644_v1, %v3644_v1  ;;  %v480_v6 = vmul.f32 %v3647_v2, %v3647_v2  ;;  %v3659_v7 = vld [vmem:[%s3638_s29 + $0x20] sm:$0xff]  ;;  %v3664_v10 = vld [vmem:[%s3638_s29 + $0x28] sm:$0xff] }
  0x24   : > { %v481_v8 = vmul.f32 %v3650_v3, %v3650_v3  ;;  %v482_v11 = vmul.f32 %v3659_v7, %v3659_v7  ;;  %v3669_v13 = vld [vmem:[%s3638_s29 + $0x30] sm:$0xff]  ;;  %v483_v14 = vmul.f32 %v3664_v10, %v3664_v10  ;;  %v3679_v16 = vld [vmem:[%s3638_s29 + $0x38] sm:$0xff]  ;;  %v3684_v19 = vld [vmem:[%s3638_s29 + $0x40] sm:$0xff] }
  0x25   : > { %v510_v9 = vadd.f32 %v479_v5, %v478_v4  ;;  %v484_v17 = vmul.f32 %v3669_v13, %v3669_v13  ;;  %v3687_v20 = vld [vmem:[%s3676_s8] sm:$0xff]  ;;  %v485_v21 = vmul.f32 %v3679_v16, %v3679_v16  ;;  %v3692_v23 = vld [vmem:[%s3676_s8 + $0x10] sm:$0xff]  ;;  %v3703_v27 = vld [vmem:[%s3638_s29 + $0x48] sm:$0xff]  ;;  %v486_v30 = vmul.f32 %v3684_v19, %v3684_v19 }
  0x26   : > { %v3695_v24 = vld [vmem:[%s3676_s8 + $0x20] sm:$0xff]  ;;  %v3698_v25 = vld [vmem:[%s3676_s8 + $0x30] sm:$0xff]  ;;  %v375_v26 = vmul.f32 %v3687_v20, %v3687_v20  ;;  %v376_v28 = vmul.f32 %v3692_v23, %v3692_v23  ;;  %v487_v36 = vmul.f32 %v3703_v27, %v3703_v27  ;;  %v3725_v39 = vld [vmem:[%s3638_s29 + $0x58] sm:$0xff] }
  0x27   : > { %v511_v12 = vadd.f32 %v510_v9, %v480_v6  ;;  %v377_v29 = vmul.f32 %v3695_v24, %v3695_v24  ;;  %v3712_v32 = vld [vmem:[%s3676_s8 + $0x40] sm:$0xff]  ;;  %v3715_v33 = vld [vmem:[%s3638_s29 + $0x50] sm:$0xff]  ;;  %v378_v34 = vmul.f32 %v3698_v25, %v3698_v25  ;;  %v489_v48 = vmul.f32 %v3725_v39, %v3725_v39  ;;  %v3745_v51 = vld [vmem:[%s3638_s29 + $0x68] sm:$0xff] }
  0x28   : > { %v407_v35 = vadd.f32 %v376_v28, %v375_v26  ;;  %v3722_v38 = vld [vmem:[%s3676_s8 + $0x50] sm:$0xff]  ;;  %v379_v40 = vmul.f32 %v3712_v32, %v3712_v32  ;;  %v488_v42 = vmul.f32 %v3715_v33, %v3715_v33  ;;  %v3732_v44 = vld [vmem:[%s3676_s8 + $0x60] sm:$0xff]  ;;  %v491_v60 = vmul.f32 %v3745_v51, %v3745_v51  ;;  %v3765_v63 = vld [vmem:[%s3638_s29 + $0x78] sm:$0xff] }
  0x29   : > { %v512_v15 = vadd.f32 %v511_v12, %v481_v8  ;;  %v3735_v45 = vld [vmem:[%s3638_s29 + $0x60] sm:$0xff]  ;;  %v380_v46 = vmul.f32 %v3722_v38, %v3722_v38  ;;  %v3742_v50 = vld [vmem:[%s3676_s8 + $0x70] sm:$0xff]  ;;  %v381_v52 = vmul.f32 %v3732_v44, %v3732_v44 }
  0x2a   : > { %v408_v41 = vadd.f32 %v407_v35, %v377_v29  ;;  %4820 = vst [vmem:[#allocation5_spill] sm:$0xff] %v3742_v50  ;;  %v490_v54 = vmul.f32 %v3735_v45, %v3735_v45  ;;  %v3752_v56 = vld [vmem:[%s3676_s8 + $0x80] sm:$0xff]  ;;  %v3755_v57 = vld [vmem:[%s3638_s29 + $0x70] sm:$0xff]  ;;  %v382_v58 = vmul.f32 %v3742_v50, %v3742_v50 }
  0x2b   : > { %v513_v18 = vadd.f32 %v512_v15, %v482_v11  ;;  %4821 = vst [vmem:[#allocation6_spill] sm:$0xff] %v3752_v56  ;;  %v3762_v62 = vld [vmem:[%s3676_s8 + $0x90] sm:$0xff]  ;;  %v383_v4 = vmul.f32 %v3752_v56, %v3752_v56  ;;  %v492_v6 = vmul.f32 %v3755_v57, %v3755_v57  ;;  %v3772_v9 = vld [vmem:[%s3676_s8 + $0xa0] sm:$0xff]  ;;  %v493_v15 = vmul.f32 %v3765_v63, %v3765_v63 }
  0x2c   : > { %v409_v47 = vadd.f32 %v408_v41, %v378_v34  ;;  %4822 = vst [vmem:[#allocation7_spill] sm:$0xff] %v3762_v62  ;;  %4823 = vst [vmem:[#allocation8_spill] sm:$0xff] %v3772_v9  ;;  %v3775_v11 = vld [vmem:[%s3638_s29 + $0x80] sm:$0xff]  ;;  %v384_v12 = vmul.f32 %v3762_v62, %v3762_v62  ;;  %v3805_v41 = vld [vmem:[%s3638_s29 + $0x98] sm:$0xff] }
  0x2d   : > { %v514_v22 = vadd.f32 %v513_v18, %v483_v14  ;;  %v3782_v18 = vld [vmem:[%s3676_s8 + $0xb0] sm:$0xff]  ;;  %v494_v28 = vmul.f32 %v3775_v11, %v3775_v11  ;;  %v3922_v62 = vld [vmem:[%s3638_s29 + $0xf8] sm:$0xff] }
  0x2e   : > { %v410_v53 = vadd.f32 %v409_v47, %v379_v40  ;;  %4824 = vst [vmem:[#allocation9_spill] sm:$0xff] %v3782_v18  ;;  %v386_v34 = vmul.f32 %v3782_v18, %v3782_v18  ;;  %v3802_v40 = vld [vmem:[%s3676_s8 + $0xd0] sm:$0xff] }
  0x2f   : > { %v515_v31 = vadd.f32 %v514_v22, %v484_v17  ;;  %v385_v22 = vmul.f32 %v3772_v9, %v3772_v9  ;;  %4826 = vst [vmem:[#allocation11_spill] sm:$0xff] %v3802_v40  ;;  %v3912_v18 = vld [vmem:[%s3638_s29 + $0xf0] sm:$0xff] }
  0x30   : > { %v411_v59 = vadd.f32 %v410_v53, %v380_v46  ;;  %v3929_v56 = vld [vmem:[%s3676_s8 + $0x190] sm:$0xff] }
  0x31   : > { %v516_v37 = vadd.f32 %v515_v31, %v485_v21  ;;  %v3785_v21 = vld [vmem:[%s3638_s29 + $0x88] sm:$0xff]  ;;  %v3795_v31 = vld [vmem:[%s3638_s29 + $0x90] sm:$0xff] }
  0x32   : > { %v412_v5 = vadd.f32 %v411_v59, %v381_v52  ;;  %v496_v46 = vmul.f32 %v3795_v31, %v3795_v31  ;;  %v388_v52 = vmul.f32 %v3802_v40, %v3802_v40  ;;  %v3825_v59 = vld [vmem:[%s3638_s29 + $0xa8] sm:$0xff]  ;;  %v3902_v40 = vld [vmem:[%s3676_s8 + $0x170] sm:$0xff] }
  0x33   : > { %v517_v43 = vadd.f32 %v516_v37, %v486_v30  ;;  %v3792_v30 = vld [vmem:[%s3676_s8 + $0xc0] sm:$0xff]  ;;  %4830 = vst [vmem:[#allocation15_spill] sm:$0xff] %v3902_v40 }
  0x34   : > { %v413_v14 = vadd.f32 %v412_v5, %v382_v58  ;;  %4825 = vst [vmem:[#allocation10_spill] sm:$0xff] %v3792_v30  ;;  %v3822_v58 = vld [vmem:[%s3676_s8 + $0xf0] sm:$0xff] }
  0x35   : > { %v518_v49 = vadd.f32 %v517_v43, %v487_v36  ;;  %v495_v36 = vmul.f32 %v3785_v21, %v3785_v21  ;;  %4828 = vst [vmem:[#allocation13_spill] sm:$0xff] %v3822_v58 }
  0x36   : > { %v414_v26 = vadd.f32 %v413_v14, %v383_v4 }
  0x37   : > { %v519_v55 = vadd.f32 %v518_v49, %v488_v42  ;;  %v387_v42 = vmul.f32 %v3792_v30, %v3792_v30  ;;  %v3815_v49 = vld [vmem:[%s3638_s29 + $0xa0] sm:$0xff] }
  0x38   : > { %v415_v35 = vadd.f32 %v414_v26, %v384_v12  ;;  %v498_v4 = vmul.f32 %v3815_v49, %v3815_v49  ;;  %v390_v12 = vmul.f32 %v3822_v58, %v3822_v58  ;;  %v3845_v26 = vld [vmem:[%s3638_s29 + $0xb8] sm:$0xff] }
  0x39   : > { %v520_v61 = vadd.f32 %v519_v55, %v489_v48  ;;  %v3812_v48 = vld [vmem:[%s3676_s8 + $0xe0] sm:$0xff] }
  0x3a   : > { %v416_v43 = vadd.f32 %v415_v35, %v385_v22  ;;  %4827 = vst [vmem:[#allocation12_spill] sm:$0xff] %v3812_v48  ;;  %v3842_v22 = vld [vmem:[%s3676_s8 + $0x110] sm:$0xff] }
  0x3b   : > { %v521_v8 = vadd.f32 %v520_v61, %v490_v54  ;;  %v497_v54 = vmul.f32 %v3805_v41, %v3805_v41 }
  0x3c   : > { %v417_v53 = vadd.f32 %v416_v43, %v386_v34 }
  0x3d   : > { %v522_v17 = vadd.f32 %v521_v8, %v491_v60  ;;  %v389_v60 = vmul.f32 %v3812_v48, %v3812_v48  ;;  %v3835_v8 = vld [vmem:[%s3638_s29 + $0xb0] sm:$0xff] }
  0x3e   : > { %v418_v61 = vadd.f32 %v417_v53, %v387_v42  ;;  %v500_v34 = vmul.f32 %v3835_v8, %v3835_v8  ;;  %v392_v42 = vmul.f32 %v3842_v22, %v3842_v22  ;;  %v3865_v53 = vld [vmem:[%s3638_s29 + $0xc8] sm:$0xff] }
  0x3f   : > { %v523_v29 = vadd.f32 %v522_v17, %v492_v6  ;;  %v3832_v6 = vld [vmem:[%s3676_s8 + $0x100] sm:$0xff] }
  0x40   : > { %v419_v14 = vadd.f32 %v418_v61, %v388_v52  ;;  %v3862_v52 = vld [vmem:[%s3676_s8 + $0x130] sm:$0xff] }
  0x41   : > { %v524_v37 = vadd.f32 %v523_v29, %v493_v15  ;;  %v499_v15 = vmul.f32 %v3825_v59, %v3825_v59 }
  0x42   : > { %v420_v29 = vadd.f32 %v419_v14, %v389_v60 }
  0x43   : > { %v525_v47 = vadd.f32 %v524_v37, %v494_v28  ;;  %v391_v28 = vmul.f32 %v3832_v6, %v3832_v6  ;;  %v3855_v37 = vld [vmem:[%s3638_s29 + $0xc0] sm:$0xff] }
  0x44   : > { %v421_v43 = vadd.f32 %v420_v29, %v390_v12  ;;  %v502_v60 = vmul.f32 %v3855_v37, %v3855_v37  ;;  %v394_v12 = vmul.f32 %v3862_v52, %v3862_v52  ;;  %v3885_v29 = vld [vmem:[%s3638_s29 + $0xd8] sm:$0xff] }
  0x45   : > { %v526_v55 = vadd.f32 %v525_v47, %v495_v36  ;;  %v3852_v36 = vld [vmem:[%s3676_s8 + $0x120] sm:$0xff]  ;;  %v505_v58 = vmul.f32 %v3885_v29, %v3885_v29 }
  0x47   : > { %v527_v5 = vadd.f32 %v526_v55, %v496_v46  ;;  %v501_v46 = vmul.f32 %v3845_v26, %v3845_v26  ;;  %v422_v55 = vadd.f32 %v421_v43, %v391_v28  ;;  %v3882_v28 = vld [vmem:[%s3676_s8 + $0x150] sm:$0xff] }
  0x49   : > { %v528_v17 = vadd.f32 %v527_v5, %v497_v54  ;;  %v393_v54 = vmul.f32 %v3852_v36, %v3852_v36  ;;  %v3875_v5 = vld [vmem:[%s3638_s29 + $0xd0] sm:$0xff]  ;;  %v423_v14 = vadd.f32 %v422_v55, %v392_v42  ;;  %v3892_v42 = vld [vmem:[%s3676_s8 + $0x160] sm:$0xff] }
  0x4a   : > { %v504_v43 = vmul.f32 %v3875_v5, %v3875_v5  ;;  %4829 = vst [vmem:[#allocation14_spill] sm:$0xff] %v3892_v42  ;;  %v3895_v55 = vld [vmem:[%s3638_s29 + $0xe0] sm:$0xff] }
  0x4b   : > { %v529_v35 = vadd.f32 %v528_v17, %v498_v4  ;;  %v3872_v4 = vld [vmem:[%s3676_s8 + $0x140] sm:$0xff] }
  0x4d   : > { %v530_v47 = vadd.f32 %v529_v35, %v499_v15  ;;  %v503_v15 = vmul.f32 %v3865_v53, %v3865_v53  ;;  %v424_v35 = vadd.f32 %v423_v14, %v393_v54  ;;  %v3905_v54 = vld [vmem:[%s3638_s29 + $0xe8] sm:$0xff] }
  0x4f   : > { %v531_v61 = vadd.f32 %v530_v47, %v500_v34  ;;  %v395_v34 = vmul.f32 %v3872_v4, %v3872_v4 }
  0x51   : > { %v532_v17 = vadd.f32 %v531_v61, %v501_v46  ;;  %v396_v46 = vmul.f32 %v3882_v28, %v3882_v28  ;;  %v425_v61 = vadd.f32 %v424_v35, %v394_v12  ;;  %v3915_v12 = vld [vmem:[%s3676_s8 + $0x180] sm:$0xff] }
  0x52   : > { %4831 = vst [vmem:[#allocation16_spill] sm:$0xff] %v3915_v12 }
  0x53   : > { %v533_v47 = vadd.f32 %v532_v17, %v502_v60  ;;  %v397_v60 = vmul.f32 %v3892_v42, %v3892_v42  ;;  %v426_v14 = vadd.f32 %v425_v61, %v395_v34  ;;  %v506_v17 = vmul.f32 %v3895_v55, %v3895_v55 }
  0x54   : > { %v399_v61 = vmul.f32 %v3915_v12, %v3915_v12 }
  0x55   : > { %v534_v48 = vadd.f32 %v533_v47, %v503_v15  ;;  %v398_v15 = vmul.f32 %v3902_v40, %v3902_v40  ;;  %v427_v35 = vadd.f32 %v426_v14, %v396_v46  ;;  %v507_v47 = vmul.f32 %v3905_v54, %v3905_v54 }
  0x56   : > { %v509_v46 = vmul.f32 %v3922_v62, %v3922_v62 }
  0x57   : > { %v535_v30 = vadd.f32 %v534_v48, %v504_v43  ;;  %v428_v34 = vadd.f32 %v427_v35, %v397_v60  ;;  %v508_v48 = vmul.f32 %v3912_v18, %v3912_v18  ;;  %v3936_v35 = vld [vmem:[%s3676_s8 + $0x1a0] sm:$0xff] }
  0x58   : > { %4832 = vst [vmem:[#allocation17_spill] sm:$0xff] %v3936_v35  ;;  %v401_v12 = vmul.f32 %v3936_v35, %v3936_v35  ;;  %v3956_v35 = vld [vmem:[%s3676_s8 + $0x1e0] sm:$0xff] }
  0x59   : > { %v536_v9 = vadd.f32 %v535_v30, %v505_v58  ;;  %v429_v40 = vadd.f32 %v428_v34, %v398_v15  ;;  %v400_v58 = vmul.f32 %v3929_v56, %v3929_v56  ;;  %v3941_v15 = vld [vmem:[%s3676_s8 + $0x1b0] sm:$0xff] }
  0x5b   : > { %v537_v43 = vadd.f32 %v536_v9, %v506_v17  ;;  %v430_v60 = vadd.f32 %v429_v40, %v399_v61  ;;  %v3946_v40 = vld [vmem:[%s3676_s8 + $0x1c0] sm:$0xff] }
  0x5d   : > { %v538_v14 = vadd.f32 %v537_v43, %v507_v47  ;;  %v431_v50 = vadd.f32 %v430_v60, %v400_v58  ;;  %v402_v47 = vmul.f32 %v3941_v15, %v3941_v15 }
  0x5f   : > { %v539_v30 = vadd.f32 %v538_v14, %v508_v48  ;;  %v432_v48 = vadd.f32 %v431_v50, %v401_v12  ;;  %v405_v50 = vmul.f32 %v3956_v35, %v3956_v35  ;;  %v3961_v12 = vld [vmem:[%s3676_s8 + $0x1f0] sm:$0xff] }
  0x60   : > { %4833 = vst [vmem:[#allocation18_spill] sm:$0xff] %v3961_v12 }
  0x61   : > { %v540_v9 = vadd.f32 %v539_v30, %v509_v46  ;;  %v403_v46 = vmul.f32 %v3946_v40, %v3946_v40  ;;  %v433_v14 = vadd.f32 %v432_v48, %v402_v47  ;;  %v3951_v30 = vld [vmem:[%s3676_s8 + $0x1d0] sm:$0xff] }
  0x63   : > { %v541_v17 = vrot.slane %v540_v9, 4 }
  0x65   : > { %v542_v34 = vadd.f32 %v541_v17, %v540_v9  ;;  %v404_v9 = vmul.f32 %v3951_v30, %v3951_v30  ;;  %v434_v17 = vadd.f32 %v433_v14, %v403_v46 }
  0x67   : > { %v543_v42 = vrot.slane %v542_v34, 2 }
  0x69   : > { %v544_v43 = vadd.f32 %v543_v42, %v542_v34  ;;  %v435_v42 = vadd.f32 %v434_v17, %v404_v9  ;;  %v406_v34 = vmul.f32 %v3961_v12, %v3961_v12 }
  0x6b   : > { %v545_v61 = vrot.slane %v544_v43, 1  ;;  %v436_v47 = vadd.f32 %v435_v42, %v405_v50 }
  0x6d   : > { %v546_v58 = vadd.f32 %v545_v61, %v544_v43  ;;  %v437_v43 = vadd.f32 %v436_v47, %v406_v34 }
  0x6f   : > { %v547_v60 = vmax.f32 %v546_v58, 1e-24  ;;  %v438_v17 = vrot.slane %v437_v43, 4 }
  0x71   : > { %3476 = vrsqrt.f32 %v547_v60  ;;  %v439_v47 = vadd.f32 %v438_v17, %v437_v43 }
  0x73   : > { %v440_v17 = vrot.slane %v439_v47, 2 }
  0x7b   : > { %v3965_v48 = vpop.eup %3476 }
  0x7c   : > { %v565_v61 = vmul.f32 %v3965_v48, %v3775_v11  ;;  %v566_v46 = vmul.f32 %v3965_v48, %v3785_v21  ;;  %v549_v14 = vmul.f32 %v3965_v48, %v3641_v0  ;;  %v550_v58 = vmul.f32 %v3965_v48, %v3644_v1 }
  0x7d   : > { %v569_v9 = vmul.f32 %v3965_v48, %v3815_v49  ;;  %v570_v11 = vmul.f32 %v3965_v48, %v3825_v59  ;;  %v567_v21 = vmul.f32 %v3965_v48, %v3795_v31  ;;  %v568_v0 = vmul.f32 %v3965_v48, %v3805_v41 }
  0x7e   : > { %v3204_v60 = vpack.i.bf16 %v566_v46, %v565_v61  ;;  %v3209_v50 = vpack.i.bf16 %v550_v58, %v549_v14  ;;  %v551_v1 = vmul.f32 %v3965_v48, %v3647_v2  ;;  %v552_v49 = vmul.f32 %v3965_v48, %v3650_v3 }
  0x7f   : > { %v3214_v42 = vpack.i.bf16 %v568_v0, %v567_v21  ;;  %v571_v34 = vmul.f32 %v3965_v48, %v3835_v8  ;;  %v3224_v59 = vpack.i.bf16 %v570_v11, %v569_v9  ;;  %v572_v31 = vmul.f32 %v3965_v48, %v3845_v26 }
  0x80   : > { %3205 = vrot.lane.b32.xlu0 %v3204_v60, %s3579_s9  ;;  %v3219_v41 = vpack.i.bf16 %v552_v49, %v551_v1  ;;  %v553_v2 = vmul.f32 %v3965_v48, %v3659_v7  ;;  %v554_v3 = vmul.f32 %v3965_v48, %v3664_v10  ;;  %v3040_v60 = vpack.c.bf16 %v566_v46, %v565_v61 }
  0x81   : > { %3215 = vrot.lane.b32.xlu1 %v3214_v42, %s3579_s9  ;;  %v3042_v12 = vpack.c.bf16 %v550_v58, %v549_v14  ;;  %v3234_v8 = vpack.i.bf16 %v572_v31, %v571_v34  ;;  %v573_v43 = vmul.f32 %v3965_v48, %v3855_v37  ;;  %v574_v26 = vmul.f32 %v3965_v48, %v3865_v53 }
  0x82   : > { %v555_v7 = vmul.f32 %v3965_v48, %v3669_v13  ;;  %v556_v10 = vmul.f32 %v3965_v48, %v3679_v16  ;;  %3041 = vmatprep.subr.bf16.mxu0 %v3040_v60  ;;  %v3044_v61 = vpack.c.bf16 %v568_v0, %v567_v21  ;;  %v3046_v46 = vpack.c.bf16 %v552_v49, %v551_v1 }
  0x83   : > { %3043 = vmatpush3.bf16.msra.mxu0 %v3042_v12  ;;  %v3048_v14 = vpack.c.bf16 %v570_v11, %v569_v9  ;;  %v3244_v37 = vpack.i.bf16 %v574_v26, %v573_v43  ;;  %v575_v53 = vmul.f32 %v3965_v48, %v3875_v5  ;;  %v576_v58 = vmul.f32 %v3965_v48, %v3885_v29 }
  0x84   : > { %3210 = vrot.lane.b32.xlu0 %v3209_v50, %s3579_s9  ;;  %v3229_v50 = vpack.i.bf16 %v554_v3, %v553_v2  ;;  %3045 = vmatprep.subr.bf16.mxu0 %v3044_v61  ;;  %v441_v42 = vadd.f32 %v440_v17, %v439_v47  ;;  %v3239_v13 = vpack.i.bf16 %v556_v10, %v555_v7 }
  0x85   : > { %3220 = vrot.lane.b32.xlu1 %v3219_v41, %s3579_s9  ;;  %v557_v16 = vmul.f32 %v3965_v48, %v3684_v19  ;;  %v558_v12 = vmul.f32 %v3965_v48, %v3703_v27  ;;  %v3050_v9 = vpack.c.bf16 %v554_v3, %v553_v2  ;;  %v3052_v11 = vpack.c.bf16 %v572_v31, %v571_v34 }
  0x86   : > { %v3254_v5 = vpack.i.bf16 %v576_v58, %v575_v53  ;;  %v442_v21 = vrot.slane %v441_v42, 1  ;;  %v559_v0 = vmul.f32 %v3965_v48, %v3715_v33  ;;  %v560_v19 = vmul.f32 %v3965_v48, %v3725_v39 }
  0x87   : > { %3047 = vmatpush3.bf16.msra.mxu0 %v3046_v46  ;;  %v3249_v29 = vpack.i.bf16 %v558_v12, %v557_v16  ;;  %v3054_v1 = vpack.c.bf16 %v556_v10, %v555_v7  ;;  %v3056_v27 = vpack.c.bf16 %v574_v26, %v573_v43  ;;  %v577_v47 = vmul.f32 %v3965_v48, %v3895_v55 }
  0x88   : > { %3225 = vrot.lane.b32.xlu0 %v3224_v59, %s3579_s9  ;;  %3049 = vmatprep.subr.bf16.mxu0 %v3048_v14  ;;  %v443_v49 = vadd.f32 %v442_v21, %v441_v42  ;;  %v3259_v34 = vpack.i.bf16 %v560_v19, %v559_v0  ;;  %v578_v59 = vmul.f32 %v3965_v48, %v3905_v54  ;;  %v4837_v21 = vld [vmem:[#allocation6_spill] sm:$0xff] }
  0x89   : > { %3230 = vrot.lane.b32.xlu1 %v3229_v50, %s3579_s9  ;;  %v3058_v33 = vpack.c.bf16 %v558_v12, %v557_v16  ;;  %v3060_v39 = vpack.c.bf16 %v576_v58, %v575_v53  ;;  %v561_v2 = vmul.f32 %v3965_v48, %v3735_v45  ;;  %v562_v3 = vmul.f32 %v3965_v48, %v3745_v51  ;;  %v4834_v12 = vld [vmem:[#allocation14_spill] sm:$0xff] }
  0x8a   : > { %v444_v31 = vmax.f32 %v443_v49, 1e-24  ;;  %v3376_v41 = vpack.i.bf16 %v578_v59, %v577_v47  ;;  %v3062_v60 = vpack.c.bf16 %v560_v19, %v559_v0  ;;  %v3064_v55 = vpack.c.bf16 %v578_v59, %v577_v47  ;;  %v4838_v0 = vld [vmem:[#allocation16_spill] sm:$0xff]  ;;  %v4839_v19 = vld [vmem:[#allocation7_spill] sm:$0xff]  ;;  %v4841_v47 = vld [vmem:[#allocation17_spill] sm:$0xff] }
  0x8b   : > { %3051 = vmatpush3.bf16.msra.mxu0 %v3050_v9  ;;  %v3381_v54 = vpack.i.bf16 %v562_v3, %v561_v2  ;;  %v580_v43 = vmul.f32 %v3965_v48, %v3922_v62  ;;  %v3066_v26 = vpack.c.bf16 %v562_v3, %v561_v2  ;;  %v563_v51 = vmul.f32 %v3965_v48, %v3755_v57  ;;  %v4835_v9 = vld [vmem:[#allocation5_spill] sm:$0xff]  ;;  %v4840_v49 = vld [vmem:[#allocation8_spill] sm:$0xff]  ;;  %v4843_v3 = vld [vmem:[#allocation10_spill] sm:$0xff] }
  0x8c   : > { %3235 = vrot.lane.b32.xlu0 %v3234_v8, %s3579_s9  ;;  %3053 = vmatprep.subr.bf16.mxu0 %v3052_v11  ;;  %3478 = vrsqrt.f32 %v444_v31  ;;  %v579_v8 = vmul.f32 %v3965_v48, %v3912_v18  ;;  %v564_v17 = vmul.f32 %v3965_v48, %v3765_v63 }
  0x8d   : > { %3240 = vrot.lane.b32.xlu1 %v3239_v13, %s3579_s9 }
  0x8e   : > { %v3068_v45 = vpack.c.bf16 %v580_v43, %v579_v8  ;;  %v3386_v50 = vpack.i.bf16 %v580_v43, %v579_v8  ;;  %v3070_v7 = vpack.c.bf16 %v564_v17, %v563_v51  ;;  %v3391_v18 = vpack.i.bf16 %v564_v17, %v563_v51 }
  0x8f   : > { %3055 = vmatpush3.bf16.msra.mxu0 %v3054_v1 }
  0x90   : > { %3245 = vrot.lane.b32.xlu0 %v3244_v37, %s3579_s9  ;;  %3057 = vmatprep.subr.bf16.mxu0 %v3056_v27 }
  0x91   : > { %3250 = vrot.lane.b32.xlu1 %v3249_v29, %s3579_s9 }
  0x93   : > { %3059 = vmatpush3.bf16.msra.mxu0 %v3058_v33 }
  0x94   : > { %3255 = vrot.lane.b32.xlu0 %v3254_v5, %s3579_s9  ;;  %3061 = vmatprep.subr.bf16.mxu0 %v3060_v39  ;;  %v4836_v5 = vld [vmem:[#allocation15_spill] sm:$0xff]  ;;  %v4842_v39 = vld [vmem:[#allocation9_spill] sm:$0xff] }
  0x95   : > { %3260 = vrot.lane.b32.xlu1 %v3259_v34, %s3579_s9 }
  0x96   : > { %v3479_v62 = vpop.eup %3478 }
  0x97   : > { %3063 = vmatpush3.bf16.msra.mxu0 %v3062_v60  ;;  %v446_v10 = vmul.f32 %v3479_v62, %v3687_v20  ;;  %v462_v57 = vmul.f32 %v3479_v62, %v3832_v6  ;;  %v447_v63 = vmul.f32 %v3479_v62, %v3692_v23  ;;  %v463_v48 = vmul.f32 %v3479_v62, %v3842_v22 }
  0x98   : > { %3065 = vmatprep.subr.bf16.mxu0 %v3064_v55  ;;  %v448_v14 = vmul.f32 %v3479_v62, %v3695_v24  ;;  %v464_v37 = vmul.f32 %v3479_v62, %v3852_v36  ;;  %v449_v58 = vmul.f32 %v3479_v62, %v3698_v25  ;;  %v465_v42 = vmul.f32 %v3479_v62, %v3862_v52 }
  0x99   : > { %3377 = vrot.lane.b32.xlu1 %v3376_v41, %s3579_s9  ;;  %v3264_v61 = vpack.i.bf16 %v446_v10, %v462_v57  ;;  %v3266_v46 = vpack.i.bf16 %v447_v63, %v463_v48  ;;  %v450_v6 = vmul.f32 %v3479_v62, %v3712_v32  ;;  %v466_v23 = vmul.f32 %v3479_v62, %v3872_v4  ;;  %v4080_v57 = vld [vmem:[%s3676_s8 + $0x8] sm:$0xff] }
  0x9a   : > { %v3268_v53 = vpack.i.bf16 %v448_v14, %v464_v37  ;;  %v3270_v20 = vpack.i.bf16 %v449_v58, %v465_v42  ;;  %v451_v13 = vmul.f32 %v3479_v62, %v3722_v38  ;;  %v467_v24 = vmul.f32 %v3479_v62, %v3882_v28  ;;  %v294_v14 = vld [vmem:[%s3676_s8 + $0x78] sm:$0xff]  ;;  %2848 = vmatprep.mubr.msk.f32.mxu1 %vm760_vm0, %v4080_v57 }
  0x9b   : > { %3067 = vmatpush3.bf16.msra.mxu0 %v3066_v26  ;;  %v3272_v22 = vpack.i.bf16 %v450_v6, %v466_v23  ;;  %v452_v16 = vmul.f32 %v3479_v62, %v3732_v44  ;;  %v468_v25 = vmul.f32 %v3479_v62, %v4834_v12  ;;  %v453_v11 = vmul.f32 %v3479_v62, %v4835_v9  ;;  %v292_v23 = vld [vmem:[%s3676_s8 + $0x68] sm:$0xff] }
  0x9c   : > { %3069 = vmatprep.subr.bf16.mxu0 %v3068_v45  ;;  %v3274_v36 = vpack.i.bf16 %v451_v13, %v467_v24  ;;  %v469_v32 = vmul.f32 %v3479_v62, %v4836_v5  ;;  %v454_v29 = vmul.f32 %v3479_v62, %v4837_v21  ;;  %v470_v38 = vmul.f32 %v3479_v62, %v4838_v0  ;;  %v4845_v45 = vld [vmem:[#allocation12_spill] sm:$0xff] }
  0x9d   : > { %3382 = vrot.lane.b32.xlu1 %v3381_v54, %s3579_s9  ;;  %v3276_v52 = vpack.i.bf16 %v452_v16, %v468_v25  ;;  %v455_v1 = vmul.f32 %v3479_v62, %v4839_v19  ;;  %v471_v44 = vmul.f32 %v3479_v62, %v3929_v56  ;;  %v456_v34 = vmul.f32 %v3479_v62, %v4840_v49  ;;  %v4844_v54 = vld [vmem:[#allocation11_spill] sm:$0xff] }
  0x9e   : > { %v3278_v4 = vpack.i.bf16 %v453_v11, %v469_v32  ;;  %v3280_v28 = vpack.i.bf16 %v454_v29, %v470_v38  ;;  %v472_v59 = vmul.f32 %v3479_v62, %v4841_v47  ;;  %v457_v31 = vmul.f32 %v3479_v62, %v4842_v39 }
  0x9f   : > { %3071 = vmatpush3.bf16.msra.mxu0 %v3070_v7  ;;  %v3282_v27 = vpack.i.bf16 %v455_v1, %v471_v44  ;;  %v473_v41 = vmul.f32 %v3479_v62, %v3941_v15  ;;  %v458_v60 = vmul.f32 %v3479_v62, %v4843_v3  ;;  %v474_v55 = vmul.f32 %v3479_v62, %v3946_v40  ;;  %v4847_v40 = vld [vmem:[#allocation18_spill] sm:$0xff] }
  0xa0   : > { %v3284_v33 = vpack.i.bf16 %v456_v34, %v472_v59  ;;  %v459_v8 = vmul.f32 %v3479_v62, %v4844_v54  ;;  %v475_v43 = vmul.f32 %v3479_v62, %v3951_v30  ;;  %v460_v51 = vmul.f32 %v3479_v62, %v4845_v45 }
  0xa1   : > { %3387 = vrot.lane.b32.xlu1 %v3386_v50, %s3579_s9  ;;  %v3286_v2 = vpack.i.bf16 %v457_v31, %v473_v41  ;;  %v3288_v56 = vpack.i.bf16 %v458_v60, %v474_v55  ;;  %v476_v15 = vmul.f32 %v3479_v62, %v3956_v35  ;;  %v4846_v50 = vld [vmem:[#allocation13_spill] sm:$0xff]  ;;  %v284_v35 = vld [vmem:[%s3676_s8 + $0x28] sm:$0xff] }
  0xa2   : > { %v3290_v26 = vpack.i.bf16 %v459_v8, %v475_v43  ;;  %v461_v7 = vmul.f32 %v3479_v62, %v4846_v50 }
  0xa3   : > { %v3292_v17 = vpack.i.bf16 %v460_v51, %v476_v15 }
  0xa5   : > { %3392 = vrot.lane.b32.xlu1 %v3391_v18, %s3579_s9  ;;  %v477_v18 = vmul.f32 %v3479_v62, %v4847_v40  ;;  %v286_v62 = vld [vmem:[%s3676_s8 + $0x38] sm:$0xff] }
  0xa7   : > { %v3294_v10 = vpack.i.bf16 %v461_v7, %v477_v18 }
  0xa9   : > { %1525 = vrot.lane.b32.xlu1 %v4080_v57, %s3579_s9 }
  0xad   : > { %1529 = vrot.lane.b32.xlu1 %v284_v35, %s3579_s9 }
  0xb1   : > { %1531 = vrot.lane.b32.xlu1 %v286_v62, %s3579_s9 }
  0xb2   : > { %3265 = vxpose.xlu0.b32.start [1/16] %v3264_v61, 128 }
  0xb6   : > { %3267 = vxpose.xlu0.b32.cont [2/16] %v3266_v46, 128  ;;  %v290_v46 = vld [vmem:[%s3676_s8 + $0x58] sm:$0xff] }
  0xb7   : > { %1535 = vrot.lane.b32.xlu1 %v290_v46, %s3579_s9 }
  0xba   : > { %3269 = vxpose.xlu0.b32.cont [3/16] %v3268_v53, 128  ;;  %v282_v53 = vld [vmem:[%s3676_s8 + $0x18] sm:$0xff] }
  0xbb   : > { %1539 = vrot.lane.b32.xlu1 %v294_v14, %s3579_s9 }
  0xbe   : > { %3271 = vxpose.xlu0.b32.cont [4/16] %v3270_v20, 128  ;;  %v288_v20 = vld [vmem:[%s3676_s8 + $0x48] sm:$0xff] }
  0xc2   : > { %3273 = vxpose.xlu0.b32.cont [5/16] %v3272_v22, 128 }
  0xc6   : > { %3275 = vxpose.xlu0.b32.cont [6/16] %v3274_v36, 128 }
  0xca   : > { %3277 = vxpose.xlu0.b32.cont [7/16] %v3276_v52, 128 }
  0xce   : > { %3279 = vxpose.xlu0.b32.cont [8/16] %v3278_v4, 128 }
  0xd2   : > { %3281 = vxpose.xlu0.b32.cont [9/16] %v3280_v28, 128 }
  0xd6   : > { %3283 = vxpose.xlu0.b32.cont [10/16] %v3282_v27, 128 }
  0xda   : > { %3285 = vxpose.xlu0.b32.cont [11/16] %v3284_v33, 128 }
  0xde   : > { %3287 = vxpose.xlu0.b32.cont [12/16] %v3286_v2, 128 }
  0xe2   : > { %3289 = vxpose.xlu0.b32.cont [13/16] %v3288_v56, 128 }
  0xe6   : > { %3291 = vxpose.xlu0.b32.cont [14/16] %v3290_v26, 128 }
  0xea   : > { %3293 = vxpose.xlu0.b32.cont [15/16] %v3292_v17, 128 }
  0xee   : > { %3295 = vxpose.xlu0.b32.end [16/16] %v3294_v10, 128 }
  0xf2   : > { %v3206_v30 = vpop.permute.xlu0 %3205 }
  0xf3   : > { %v3208_v61 = vunpack.i.h.bf16 %v3206_v30  ;;  %v3207_v63 = vunpack.i.l.bf16 %v3206_v30  ;;  %v3216_v37 = vpop.permute.xlu1 %3215 }
  0xf4   : > { %v3218_v11 = vunpack.i.h.bf16 %v3216_v37  ;;  %v3217_v5 = vunpack.i.l.bf16 %v3216_v37 }
  0xf5   : > { %v3096_v48 = vpack.c.bf16 %v3208_v61, %v3207_v63 }
  0xf6   : > { %v3211_v58 = vpop.permute.xlu0 %3210  ;;  %v3100_v27 = vpack.c.bf16 %v3218_v11, %v3217_v5 }
  0xf7   : > { %3097 = vmatprep.subr.bf16.mxu0 %v3096_v48  ;;  %v3221_v42 = vpop.permute.xlu1 %3220  ;;  %v3213_v52 = vunpack.i.h.bf16 %v3211_v58  ;;  %v3212_v9 = vunpack.i.l.bf16 %v3211_v58 }
  0xf8   : > { %v3223_v0 = vunpack.i.h.bf16 %v3221_v42  ;;  %v3222_v38 = vunpack.i.l.bf16 %v3221_v42 }
  0xf9   : > { %v3098_v29 = vpack.c.bf16 %v3213_v52, %v3212_v9 }
  0xfa   : > { %v3226_v6 = vpop.permute.xlu0 %3225  ;;  %v3102_v47 = vpack.c.bf16 %v3223_v0, %v3222_v38 }
  0xfb   : > { %v3231_v22 = vpop.permute.xlu1 %3230  ;;  %v3228_v19 = vunpack.i.h.bf16 %v3226_v6  ;;  %v3227_v1 = vunpack.i.l.bf16 %v3226_v6 }
  0xfc   : > { %v3233_v59 = vunpack.i.h.bf16 %v3231_v22  ;;  %v3232_v33 = vunpack.i.l.bf16 %v3231_v22 }
  0xfd   : > { %v3104_v39 = vpack.c.bf16 %v3228_v19, %v3227_v1 }
  0xfe   : > { %v3236_v13 = vpop.permute.xlu0 %3235  ;;  %v3106_v56 = vpack.c.bf16 %v3233_v59, %v3232_v33 }
  0xff   : > { %v3241_v24 = vpop.permute.xlu1 %3240  ;;  %v3238_v31 = vunpack.i.h.bf16 %v3236_v13  ;;  %v3237_v41 = vunpack.i.l.bf16 %v3236_v13 }
 0x100   : > { %v3243_v54 = vunpack.i.h.bf16 %v3241_v24  ;;  %v3242_v8 = vunpack.i.l.bf16 %v3241_v24 }
 0x101   : > { %v3108_v43 = vpack.c.bf16 %v3238_v31, %v3237_v41 }
 0x102   : > { %v3246_v36 = vpop.permute.xlu0 %3245  ;;  %v3110_v50 = vpack.c.bf16 %v3243_v54, %v3242_v8 }
 0x103   : > { %v4098_v16 = vpop.permute.xlu1 %3250  ;;  %v3248_v26 = vunpack.i.h.bf16 %v3246_v36  ;;  %v3247_v45 = vunpack.i.l.bf16 %v3246_v36 }
 0x104   : > { %v3253_v7 = vunpack.i.h.bf16 %v4098_v16  ;;  %v3252_v40 = vunpack.i.l.bf16 %v4098_v16 }
 0x105   : > { %v3112_v10 = vpack.c.bf16 %v3248_v26, %v3247_v45 }
 0x106   : > { %v4100_v12 = vpop.permute.xlu0 %3255  ;;  %v3114_v62 = vpack.c.bf16 %v3253_v7, %v3252_v40  ;;  %v751_v7 = vstv %s750_s10 }
 0x107   : > { %v4102_v25 = vpop.permute.xlu1 %3260  ;;  %v3258_v30 = vunpack.i.h.bf16 %v4100_v12  ;;  %v3257_v61 = vunpack.i.l.bf16 %v4100_v12 }
 0x108   : > { %v3263_v46 = vunpack.i.h.bf16 %v4102_v25  ;;  %v3262_v14 = vunpack.i.l.bf16 %v4102_v25 }
 0x109   : > { %v3116_v37 = vpack.c.bf16 %v3258_v30, %v3257_v61 }
 0x10a   : > { %v3118_v24 = vpack.c.bf16 %v3263_v46, %v3262_v14 }
 0x10b   : > { %v4104_v28 = vpop.permute.xlu1 %3377 }
 0x10c   : > { %v3379_v58 = vunpack.i.l.bf16 %v4104_v28 }
 0x10f   : > { %v3383_v55 = vpop.permute.xlu1 %3382 }
 0x110   : > { %v3385_v36 = vunpack.i.h.bf16 %v3383_v55  ;;  %v3384_v16 = vunpack.i.l.bf16 %v3383_v55 }
 0x113   : > { %v3388_v18 = vpop.permute.xlu1 %3387 }
 0x114   : > { %v3390_v22 = vunpack.i.h.bf16 %v3388_v18  ;;  %v3389_v13 = vunpack.i.l.bf16 %v3388_v18 }
 0x117   : > { %1527 = vrot.lane.b32.xlu0 %v282_v53, %s3579_s9  ;;  %v3380_v53 = vunpack.i.h.bf16 %v4104_v28 }
 0x119   : > { %v3120_v25 = vpack.c.bf16 %v3380_v53, %v3379_v58 }
 0x11b   : > { %1533 = vrot.lane.b32.xlu0 %v288_v20, %s3579_s9 }
 0x11f   : > { %1537 = vrot.lane.b32.xlu0 %v292_v23, %s3579_s9  ;;  %v3393_v23 = vpop.permute.xlu1 %3392 }
 0x120   : > { %v3395_v52 = vunpack.i.h.bf16 %v3393_v23  ;;  %v3394_v9 = vunpack.i.l.bf16 %v3393_v23 }
 0x132   : > { %v3296_v32 = vpop.trf.xlu0 }
 0x133   : > { %v3297_v4 = vunpack.i.l.bf16 %v3296_v32  ;;  %v3300_v21 = vunpack.i.h.bf16 %v3296_v32  ;;  %v3124_v32 = vpack.c.bf16 %v3390_v22, %v3389_v13 }
 0x135   : > { %709 = vmatprep.mubr.f32.mxu0 %v3297_v4  ;;  %v3122_v4 = vpack.c.bf16 %v3385_v36, %v3384_v16 }
 0x136   : > { %v3301_v44 = vpop.trf.xlu0  ;;  %710 = vmatmul.mubr.f32.vlgmr.msra.gmra.mrb[0].mxu0 %v3300_v21  ;;  %v3126_v21 = vpack.c.bf16 %v3395_v52, %v3394_v9 }
 0x137   : > { %3099 = vmatpush3.bf16.msra.mxu0 %v3098_v29  ;;  %v3302_v49 = vunpack.i.l.bf16 %v3301_v44  ;;  %v3305_v34 = vunpack.i.h.bf16 %v3301_v44 }
 0x138   : > { %3101 = vmatprep.subr.bf16.mxu0 %v3100_v27 }
 0x139   : > { %714 = vmatprep.mubr.f32.mxu0 %v3302_v49 }
 0x13a   : > { %v3306_v2 = vpop.trf.xlu0  ;;  %715 = vmatmul.mubr.f32.gmra.mrb[2].mxu0 %v3305_v34 }
 0x13b   : > { %3103 = vmatpush3.bf16.msra.mxu0 %v3102_v47  ;;  %v3307_v3 = vunpack.i.l.bf16 %v3306_v2  ;;  %v3310_v60 = vunpack.i.h.bf16 %v3306_v2 }
 0x13c   : > { %3105 = vmatprep.subr.bf16.mxu0 %v3104_v39 }
 0x13d   : > { %719 = vmatprep.mubr.f32.mxu0 %v3307_v3 }
 0x13e   : > { %v3311_v51 = vpop.trf.xlu0  ;;  %720 = vmatmul.mubr.f32.gmra.mrb[4].mxu0 %v3310_v60 }
 0x13f   : > { %3107 = vmatpush3.bf16.msra.mxu0 %v3106_v56  ;;  %v3312_v15 = vunpack.i.l.bf16 %v3311_v51  ;;  %v3315_v17 = vunpack.i.h.bf16 %v3311_v51 }
 0x140   : > { %3109 = vmatprep.subr.bf16.mxu0 %v3108_v43 }
 0x141   : > { %724 = vmatprep.mubr.f32.mxu0 %v3312_v15  ;;  %v1526_v15 = vpop.permute.xlu1 %1525 }
 0x142   : > { %v3316_v63 = vpop.trf.xlu0  ;;  %725 = vmatmul.mubr.f32.gmra.mrb[6].mxu0 %v3315_v17 }
 0x143   : > { %3111 = vmatpush3.bf16.msra.mxu0 %v3110_v50  ;;  %v3317_v35 = vunpack.i.l.bf16 %v3316_v63  ;;  %v3320_v48 = vunpack.i.h.bf16 %v3316_v63 }
 0x144   : > { %3113 = vmatprep.subr.bf16.mxu0 %v3112_v10 }
 0x145   : > { %729 = vmatprep.mubr.f32.mxu0 %v3317_v35 }
 0x146   : > { %v3321_v42 = vpop.trf.xlu0  ;;  %730 = vmatmul.mubr.f32.gmra.mrb[8].mxu0 %v3320_v48 }
 0x147   : > { %3115 = vmatpush3.bf16.msra.mxu0 %v3114_v62  ;;  %v3322_v20 = vunpack.i.l.bf16 %v3321_v42  ;;  %v3325_v6 = vunpack.i.h.bf16 %v3321_v42 }
 0x148   : > { %3117 = vmatprep.subr.bf16.mxu0 %v3116_v37 }
 0x149   : > { %734 = vmatprep.mubr.f32.mxu0 %v3322_v20 }
 0x14a   : > { %v3326_v12 = vpop.trf.xlu0  ;;  %735 = vmatmul.mubr.f32.gmra.mrb[10].mxu0 %v3325_v6 }
 0x14b   : > { %3119 = vmatpush3.bf16.msra.mxu0 %v3118_v24  ;;  %v3327_v11 = vunpack.i.l.bf16 %v3326_v12  ;;  %v3330_v5 = vunpack.i.h.bf16 %v3326_v12 }
 0x14c   : > { %3121 = vmatprep.subr.bf16.mxu0 %v3120_v25 }
 0x14d   : > { %739 = vmatprep.mubr.f32.mxu0 %v3327_v11 }
 0x14e   : > { %v3331_v29 = vpop.trf.xlu0  ;;  %740 = vmatmul.mubr.f32.gmra.mrb[12].mxu0 %v3330_v5 }
 0x14f   : > { %3123 = vmatpush3.bf16.msra.mxu0 %v3122_v4  ;;  %v3332_v0 = vunpack.i.l.bf16 %v3331_v29  ;;  %v3335_v38 = vunpack.i.h.bf16 %v3331_v29 }
 0x150   : > { %3125 = vmatprep.subr.bf16.mxu0 %v3124_v32 }
 0x151   : > { %744 = vmatprep.mubr.f32.mxu0 %v3332_v0 }
 0x152   : > { %v3336_v28 = vpop.trf.xlu0  ;;  %745 = vmatmul.mubr.f32.gmra.mrb[14].mxu0 %v3335_v38 }
 0x153   : > { %v3340_v19 = vunpack.i.h.bf16 %v3336_v28  ;;  %3127 = vmatpush3.bf16.msra.mxu0 %v3126_v21  ;;  %v3337_v1 = vunpack.i.l.bf16 %v3336_v28 }
 0x155   : > { %1386 = vmatprep.mubr.f32.mxu0 %v3337_v1 }
 0x156   : > { %v3341_v44 = vpop.trf.xlu0  ;;  %1387 = vmatmul.mubr.f32.vlgmr.msra.gmra.mrb[16].mxu0 %v3340_v19 }
 0x157   : > { %v3342_v27 = vunpack.i.l.bf16 %v3341_v44  ;;  %v3345_v49 = vunpack.i.h.bf16 %v3341_v44  ;;  %v1428_v44 = vstv %s2545_s11 }
 0x159   : > { %1391 = vmatprep.mubr.f32.mxu0 %v3342_v27 }
 0x15a   : > { %v3346_v34 = vpop.trf.xlu0  ;;  %1392 = vmatmul.mubr.f32.gmra.mrb[18].mxu0 %v3345_v49 }
 0x15b   : > { %v3347_v47 = vunpack.i.l.bf16 %v3346_v34  ;;  %v3350_v59 = vunpack.i.h.bf16 %v3346_v34 }
 0x15d   : > { %1396 = vmatprep.mubr.f32.mxu0 %v3347_v47 }
 0x15e   : > { %v3351_v33 = vpop.trf.xlu0  ;;  %1397 = vmatmul.mubr.f32.gmra.mrb[20].mxu0 %v3350_v59 }
 0x15f   : > { %v3352_v39 = vunpack.i.l.bf16 %v3351_v33  ;;  %v3355_v31 = vunpack.i.h.bf16 %v3351_v33 }
 0x161   : > { %1401 = vmatprep.mubr.f32.mxu0 %v3352_v39 }
 0x162   : > { %v3356_v41 = vpop.trf.xlu0  ;;  %1402 = vmatmul.mubr.f32.gmra.mrb[22].mxu0 %v3355_v31  ;;  %v4154_v31 = vld [vmem:[%s3676_s8 + $0x88] sm:$0xff] }
 0x163   : > { %v3357_v2 = vunpack.i.l.bf16 %v3356_v41  ;;  %v3360_v3 = vunpack.i.h.bf16 %v3356_v41 }
 0x165   : > { %1406 = vmatprep.mubr.f32.mxu0 %v3357_v2 }
 0x166   : > { %v3361_v60 = vpop.trf.xlu0  ;;  %1407 = vmatmul.mubr.f32.gmra.mrb[24].mxu0 %v3360_v3 }
 0x167   : > { %v3362_v55 = vunpack.i.l.bf16 %v3361_v60  ;;  %v3365_v56 = vunpack.i.h.bf16 %v3361_v60 }
 0x169   : > { %1411 = vmatprep.mubr.f32.mxu0 %v3362_v55 }
 0x16a   : > { %v3366_v54 = vpop.trf.xlu0  ;;  %1412 = vmatmul.mubr.f32.gmra.mrb[26].mxu0 %v3365_v56 }
 0x16b   : > { %v3367_v8 = vunpack.i.l.bf16 %v3366_v54  ;;  %v3370_v43 = vunpack.i.h.bf16 %v3366_v54 }
 0x16d   : > { %1416 = vmatprep.mubr.f32.mxu0 %v3367_v8 }
 0x16e   : > { %v3371_v26 = vpop.trf.xlu0  ;;  %1417 = vmatmul.mubr.f32.gmra.mrb[28].mxu0 %v3370_v43 }
 0x16f   : > { %v3372_v45 = vunpack.i.l.bf16 %v3371_v26  ;;  %v3375_v51 = vunpack.i.h.bf16 %v3371_v26 }
 0x171   : > { %1421 = vmatprep.mubr.f32.mxu0 %v3372_v45 }
 0x172   : > { %1422 = vmatmul.mubr.f32.gmra.mrb[30].mxu0 %v3375_v51 }
 0x173   : > { %2912 = vmatprep.mubr.msk.f32.mxu0 %vm760_vm0, %v1526_v15 }
 0x209   : > { %v2624_v17 = vpop.f32.mrb[0].mxu0 }
 0x20a   : > { %v2625_v50 = vpop.f32.mrb[1].mxu0 }
 0x20b   : > { %v2626_v40 = vadd.f32 %v2625_v50, %v2624_v17 }
 0x20d   : > { %v2627_v18 = vpop.f32.mrb[2].mxu0  ;;  %v4117_v10 = vmul.f32 %v2626_v40, %v751_v7 }
 0x20e   : > { %v2628_v30 = vpop.f32.mrb[3].mxu0 }
 0x20f   : > { %v2629_v61 = vadd.f32 %v2628_v30, %v2627_v18  ;;  %v761_v63 = vsel %vm760_vm0, %v4117_v10, -inf }
 0x210   : > { %762 = vmax.xlane.f32.xlu1 %v761_v63 }
 0x211   : > { %v2630_v35 = vpop.f32.mrb[4].mxu0  ;;  %v4121_v48 = vmul.f32 %v2629_v61, %v751_v7 }
 0x212   : > { %v2631_v57 = vpop.f32.mrb[5].mxu0 }
 0x213   : > { %v2632_v62 = vadd.f32 %v2631_v57, %v2630_v35  ;;  %v764_v46 = vsel %vm760_vm0, %v4121_v48, -inf }
 0x214   : > { %765 = vmax.xlane.f32.xlu1 %v764_v46 }
 0x215   : > { %v2633_v14 = vpop.f32.mrb[6].mxu0  ;;  %v4125_v37 = vmul.f32 %v2632_v62, %v751_v7 }
 0x216   : > { %v2634_v53 = vpop.f32.mrb[7].mxu0 }
 0x217   : > { %v2635_v58 = vadd.f32 %v2634_v53, %v2633_v14  ;;  %v767_v42 = vsel %vm760_vm0, %v4125_v37, -inf }
 0x218   : > { %768 = vmax.xlane.f32.xlu1 %v767_v42 }
 0x219   : > { %v2636_v20 = vpop.f32.mrb[8].mxu0  ;;  %v4129_v6 = vmul.f32 %v2635_v58, %v751_v7 }
 0x21a   : > { %v2637_v23 = vpop.f32.mrb[9].mxu0 }
 0x21b   : > { %v2638_v22 = vadd.f32 %v2637_v23, %v2636_v20  ;;  %v770_v13 = vsel %vm760_vm0, %v4129_v6, -inf }
 0x21c   : > { %771 = vmax.xlane.f32.xlu0 %v770_v13  ;;  %v4187_v13 = vld [vmem:[%s3676_s8 + $0x98] sm:$0xff] }
 0x21d   : > { %v2639_v24 = vpop.f32.mrb[10].mxu0  ;;  %v4133_v36 = vmul.f32 %v2638_v22, %v751_v7 }
 0x21e   : > { %v2640_v16 = vpop.f32.mrb[11].mxu0 }
 0x21f   : > { %v2641_v12 = vadd.f32 %v2640_v16, %v2639_v24  ;;  %v773_v25 = vsel %vm760_vm0, %v4133_v36, -inf  ;;  %v4191_v24 = vpop.permute.xlu1 %1529 }
 0x220   : > { %774 = vmax.xlane.f32.xlu1 %v773_v25 }
 0x221   : > { %v2642_v52 = vpop.f32.mrb[12].mxu0  ;;  %v4137_v9 = vmul.f32 %v2641_v12, %v751_v7 }
 0x222   : > { %v2643_v11 = vpop.f32.mrb[13].mxu0 }
 0x223   : > { %v2644_v5 = vadd.f32 %v2643_v11, %v2642_v52  ;;  %v776_v32 = vsel %vm760_vm0, %v4137_v9, -inf  ;;  %v4193_v16 = vpop.permute.xlu1 %1531  ;;  %v4199_v52 = vpop.permute.xlu0 %1527 }
 0x224   : > { %777 = vmax.xlane.f32.xlu1 %v776_v32 }
 0x225   : > { %v2645_v4 = vpop.f32.mrb[14].mxu0  ;;  %v4141_v21 = vmul.f32 %v2644_v5, %v751_v7 }
 0x226   : > { %v2646_v29 = vpop.f32.mrb[15].mxu0 }
 0x227   : > { %v2647_v0 = vadd.f32 %v2646_v29, %v2645_v4  ;;  %v779_v38 = vsel %vm760_vm0, %v4141_v21, -inf  ;;  %v4195_v12 = vpop.permute.xlu1 %1535  ;;  %v4202_v32 = vpop.permute.xlu0 %1533 }
 0x228   : > { %780 = vmax.xlane.f32.xlu1 %v779_v38 }
 0x229   : > { %v2720_v28 = vpop.f32.mrb[16].mxu0  ;;  %v4145_v19 = vmul.f32 %v2647_v0, %v751_v7 }
 0x22a   : > { %v2721_v1 = vpop.f32.mrb[17].mxu0 }
 0x22b   : > { %v2722_v27 = vadd.f32 %v2721_v1, %v2720_v28  ;;  %v782_v49 = vsel %vm760_vm0, %v4145_v19, -inf  ;;  %v4197_v25 = vpop.permute.xlu1 %1539  ;;  %v4205_v28 = vpop.permute.xlu0 %1537 }
 0x22c   : > { %783 = vmax.xlane.f32.xlu1 %v782_v49 }
 0x22d   : > { %v2723_v34 = vpop.f32.mrb[18].mxu0  ;;  %v4149_v47 = vmul.f32 %v2722_v27, %v1428_v44 }
 0x22e   : > { %v2724_v59 = vpop.f32.mrb[19].mxu0 }
 0x22f   : > { %v2725_v33 = vadd.f32 %v2724_v59, %v2723_v34  ;;  %v1437_v39 = vsel %vm760_vm0, %v4149_v47, -inf }
 0x230   : > { %1438 = vmax.xlane.f32.xlu1 %v1437_v39 }
 0x231   : > { %v2726_v41 = vpop.f32.mrb[20].mxu0  ;;  %v4156_v2 = vmul.f32 %v2725_v33, %v1428_v44 }
 0x232   : > { %v2727_v3 = vpop.f32.mrb[21].mxu0  ;;  %1541 = vrot.lane.b32.xlu0 %v4154_v31, %s3579_s9 }
 0x233   : > { %v2728_v60 = vadd.f32 %v2727_v3, %v2726_v41  ;;  %v1440_v55 = vsel %vm760_vm0, %v4156_v2, -inf }
 0x234   : > { %1441 = vmax.xlane.f32.xlu1 %v1440_v55 }
 0x235   : > { %v2729_v56 = vpop.f32.mrb[22].mxu0  ;;  %v4162_v54 = vmul.f32 %v2728_v60, %v1428_v44 }
 0x236   : > { %v2730_v8 = vpop.f32.mrb[23].mxu0 }
 0x237   : > { %v2731_v43 = vadd.f32 %v2730_v8, %v2729_v56  ;;  %v1443_v26 = vsel %vm760_vm0, %v4162_v54, -inf }
 0x238   : > { %1444 = vmax.xlane.f32.xlu1 %v1443_v26 }
 0x239   : > { %v2732_v45 = vpop.f32.mrb[24].mxu0  ;;  %v4166_v51 = vmul.f32 %v2731_v43, %v1428_v44 }
 0x23a   : > { %v2733_v15 = vpop.f32.mrb[25].mxu0 }
 0x23b   : > { %v2734_v17 = vadd.f32 %v2733_v15, %v2732_v45  ;;  %v1446_v50 = vsel %vm760_vm0, %v4166_v51, -inf }
 0x23c   : > { %1447 = vmax.xlane.f32.xlu1 %v1446_v50 }
 0x23d   : > { %v2735_v7 = vpop.f32.mrb[26].mxu0  ;;  %v4170_v40 = vmul.f32 %v2734_v17, %v1428_v44 }
 0x23e   : > { %v2736_v18 = vpop.f32.mrb[27].mxu0 }
 0x23f   : > { %v2737_v30 = vadd.f32 %v2736_v18, %v2735_v7  ;;  %v1449_v61 = vsel %vm760_vm0, %v4170_v40, -inf }
 0x240   : > { %1450 = vmax.xlane.f32.xlu1 %v1449_v61 }
 0x241   : > { %v2738_v63 = vpop.f32.mrb[28].mxu0  ;;  %v4174_v35 = vmul.f32 %v2737_v30, %v1428_v44 }
 0x242   : > { %v2739_v57 = vpop.f32.mrb[29].mxu0 }
 0x243   : > { %v2740_v62 = vadd.f32 %v2739_v57, %v2738_v63  ;;  %v1452_v46 = vsel %vm760_vm0, %v4174_v35, -inf }
 0x244   : > { %1453 = vmax.xlane.f32.xlu1 %v1452_v46 }
 0x245   : > { %v2741_v14 = vpop.f32.mrb[30].mxu0  ;;  %v4178_v53 = vmul.f32 %v2740_v62, %v1428_v44 }
 0x246   : > { %v2742_v58 = vpop.f32.mrb[31].mxu0 }
 0x247   : > { %v2743_v42 = vadd.f32 %v2742_v58, %v2741_v14  ;;  %v1455_v20 = vsel %vm760_vm0, %v4178_v53, -inf }
 0x248   : > { %1456 = vmax.xlane.f32.xlu1 %v1455_v20 }
 0x249   : > { %v4182_v23 = vmul.f32 %v2743_v42, %v1428_v44 }
 0x24b   : > { %v1458_v22 = vsel %vm760_vm0, %v4182_v23, -inf }
 0x24c   : > { %1459 = vmax.xlane.f32.xlu1 %v1458_v22 }
 0x25d   : > { %1543 = vrot.lane.b32.xlu1 %v4187_v13, %s3579_s9 }
 0x29d   : > { %v763_v11 = vpop.xlane.xlu1 %762 }
 0x29e   : > { %v785_v5 = vsub.f32 %v4117_v10, %v763_v11 }
 0x2a0   : > { %v793_v4 = vmul.f32 1.442695, %v785_v5 }
 0x2a1   : > { %v766_v29 = vpop.xlane.xlu1 %765 }
 0x2a2   : > { %3480 = vpow2.f32 %v793_v4  ;;  %v786_v0 = vsub.f32 %v4121_v48, %v766_v29 }
 0x2a4   : > { %v795_v38 = vmul.f32 1.442695, %v786_v0 }
 0x2a5   : > { %v769_v1 = vpop.xlane.xlu1 %768 }
 0x2a6   : > { %3482 = vpow2.f32 %v795_v38  ;;  %v787_v44 = vsub.f32 %v4125_v37, %v769_v1 }
 0x2a8   : > { %v797_v27 = vmul.f32 1.442695, %v787_v44 }
 0x2a9   : > { %v772_v49 = vpop.xlane.xlu0 %771 }
 0x2aa   : > { %3484 = vpow2.f32 %v797_v27  ;;  %v788_v34 = vsub.f32 %v4129_v6, %v772_v49 }
 0x2ac   : > { %v4209_v10 = vpop.eup %3480  ;;  %v799_v59 = vmul.f32 1.442695, %v788_v34 }
 0x2ad   : > { %v775_v33 = vpop.xlane.xlu1 %774  ;;  %v809_v39 = vsel %vm760_vm0, %v4209_v10, 0.0 }
 0x2ae   : > { %3486 = vpow2.f32 %v799_v59  ;;  %v789_v48 = vsub.f32 %v4133_v36, %v775_v33  ;;  %810 = vadd.xlane.f32.xlu1 %v809_v39 }
 0x2b0   : > { %v4214_v41 = vpop.eup %3482  ;;  %v801_v3 = vmul.f32 1.442695, %v789_v48 }
 0x2b1   : > { %v778_v37 = vpop.xlane.xlu1 %777  ;;  %v812_v60 = vsel %vm760_vm0, %v4214_v41, 0.0 }
 0x2b2   : > { %3488 = vpow2.f32 %v801_v3  ;;  %v790_v6 = vsub.f32 %v4137_v9, %v778_v37  ;;  %813 = vadd.xlane.f32.xlu0 %v812_v60 }
 0x2b4   : > { %v4219_v55 = vpop.eup %3484  ;;  %v803_v56 = vmul.f32 1.442695, %v790_v6 }
 0x2b5   : > { %v4221_v8 = vpop.xlane.xlu1 %780  ;;  %v815_v36 = vsel %vm760_vm0, %v4219_v55, 0.0 }
 0x2b6   : > { %3490 = vpow2.f32 %v803_v56  ;;  %816 = vadd.xlane.f32.xlu0 %v815_v36  ;;  %v4280_v56 = vld [vmem:[%s3676_s8 + $0xb8] sm:$0xff]  ;;  %v4285_v36 = vld [vmem:[%s3676_s8 + $0xa8] sm:$0xff] }
 0x2b8   : > { %v4225_v43 = vpop.eup %3486 }
 0x2b9   : > { %v4227_v26 = vpop.xlane.xlu1 %783  ;;  %v818_v45 = vsel %vm760_vm0, %v4225_v43, 0.0 }
 0x2ba   : > { %819 = vadd.xlane.f32.xlu1 %v818_v45  ;;  %v792_v45 = vsub.f32 %v4145_v19, %v4227_v26  ;;  %v4312_v26 = vld [vmem:[%s3676_s8 + $0x118] sm:$0xff] }
 0x2bc   : > { %v4231_v9 = vpop.eup %3488 }
 0x2bd   : > { %v1439_v15 = vpop.xlane.xlu1 %1438  ;;  %v821_v17 = vsel %vm760_vm0, %v4231_v9, 0.0 }
 0x2be   : > { %v1461_v50 = vsub.f32 %v4149_v47, %v1439_v15  ;;  %822 = vadd.xlane.f32.xlu0 %v821_v17  ;;  %v791_v15 = vsub.f32 %v4141_v21, %v4221_v8  ;;  %v807_v17 = vmul.f32 1.442695, %v792_v45  ;;  %v4302_v21 = vld [vmem:[%s3676_s8 + $0xd8] sm:$0xff] }
 0x2bf   : > { %v4307_v8 = vld [vmem:[%s3676_s8 + $0xf8] sm:$0xff] }
 0x2c0   : > { %v4236_v7 = vpop.eup %3490  ;;  %v1469_v18 = vmul.f32 1.442695, %v1461_v50  ;;  %v805_v50 = vmul.f32 1.442695, %v791_v15  ;;  %v4408_v15 = vld [vmem:[%s3676_s8 + $0x1c8] sm:$0xff] }
 0x2c1   : > { %v1442_v30 = vpop.xlane.xlu1 %1441  ;;  %v824_v61 = vsel %vm760_vm0, %v4236_v7, 0.0 }
 0x2c2   : > { %3492 = vpow2.f32 %v1469_v18  ;;  %v1462_v63 = vsub.f32 %v4156_v2, %v1442_v30  ;;  %825 = vadd.xlane.f32.xlu1 %v824_v61 }
 0x2c4   : > { %v1471_v57 = vmul.f32 1.442695, %v1462_v63  ;;  %v4315_v63 = vld [vmem:[%s3676_s8 + $0xc8] sm:$0xff] }
 0x2c5   : > { %v1445_v62 = vpop.xlane.xlu1 %1444 }
 0x2c6   : > { %3494 = vpow2.f32 %v1471_v57  ;;  %v1463_v46 = vsub.f32 %v4162_v54, %v1445_v62  ;;  %v4322_v57 = vld [vmem:[%s3676_s8 + $0x138] sm:$0xff]  ;;  %v4325_v62 = vld [vmem:[%s3676_s8 + $0xe8] sm:$0xff] }
 0x2c8   : > { %v1473_v14 = vmul.f32 1.442695, %v1463_v46 }
 0x2c9   : > { %v1448_v58 = vpop.xlane.xlu1 %1447 }
 0x2ca   : > { %3496 = vpow2.f32 %v1473_v14  ;;  %v1464_v47 = vsub.f32 %v4166_v51, %v1448_v58  ;;  %v4334_v14 = vld [vmem:[%s3676_s8 + $0x158] sm:$0xff]  ;;  %v4337_v58 = vld [vmem:[%s3676_s8 + $0x108] sm:$0xff] }
 0x2cc   : > { %v4243_v42 = vpop.eup %3492  ;;  %v1475_v20 = vmul.f32 1.442695, %v1464_v47  ;;  %v4339_v47 = vpop.permute.xlu0 %1541 }
 0x2cd   : > { %v1451_v22 = vpop.xlane.xlu1 %1450  ;;  %v1485_v11 = vsel %vm760_vm0, %v4243_v42, 0.0 }
 0x2ce   : > { %3498 = vpow2.f32 %v1475_v20  ;;  %v1465_v2 = vsub.f32 %v4170_v40, %v1451_v22  ;;  %1486 = vadd.xlane.f32.xlu1 %v1485_v11  ;;  %v4346_v22 = vld [vmem:[%s3676_s8 + $0x178] sm:$0xff]  ;;  %v4349_v11 = vld [vmem:[%s3676_s8 + $0x128] sm:$0xff] }
 0x2d0   : > { %v4248_v5 = vpop.eup %3494  ;;  %v1477_v4 = vmul.f32 1.442695, %v1465_v2 }
 0x2d1   : > { %v1454_v54 = vpop.xlane.xlu1 %1453  ;;  %v1488_v29 = vsel %vm760_vm0, %v4248_v5, 0.0 }
 0x2d2   : > { %3500 = vpow2.f32 %v1477_v4  ;;  %v1466_v51 = vsub.f32 %v4174_v35, %v1454_v54  ;;  %1489 = vadd.xlane.f32.xlu1 %v1488_v29  ;;  %v4356_v4 = vld [vmem:[%s3676_s8 + $0x198] sm:$0xff]  ;;  %v4359_v54 = vld [vmem:[%s3676_s8 + $0x148] sm:$0xff] }
 0x2d4   : > { %v4253_v0 = vpop.eup %3496  ;;  %v1479_v38 = vmul.f32 1.442695, %v1466_v51  ;;  %v4366_v51 = vld [vmem:[%s3676_s8 + $0x1b8] sm:$0xff] }
 0x2d5   : > { %v1457_v1 = vpop.xlane.xlu1 %1456  ;;  %v1491_v44 = vsel %vm760_vm0, %v4253_v0, 0.0 }
 0x2d6   : > { %3502 = vpow2.f32 %v1479_v38  ;;  %v1467_v40 = vsub.f32 %v4178_v53, %v1457_v1  ;;  %1492 = vadd.xlane.f32.xlu1 %v1491_v44  ;;  %v4369_v38 = vld [vmem:[%s3676_s8 + $0x168] sm:$0xff] }
 0x2d8   : > { %v4258_v27 = vpop.eup %3498  ;;  %v1481_v49 = vmul.f32 1.442695, %v1467_v40  ;;  %v4376_v40 = vld [vmem:[%s3676_s8 + $0x1d8] sm:$0xff] }
 0x2d9   : > { %v1460_v34 = vpop.xlane.xlu1 %1459  ;;  %v1494_v59 = vsel %vm760_vm0, %v4258_v27, 0.0 }
 0x2da   : > { %3504 = vpow2.f32 %v1481_v49  ;;  %v1468_v35 = vsub.f32 %v4182_v23, %v1460_v34  ;;  %1495 = vadd.xlane.f32.xlu1 %v1494_v59  ;;  %v4379_v34 = vld [vmem:[%s3676_s8 + $0x188] sm:$0xff] }
 0x2dc   : > { %v4263_v33 = vpop.eup %3500  ;;  %v1483_v39 = vmul.f32 1.442695, %v1468_v35 }
 0x2dd   : > { %v1497_v53 = vsel %vm760_vm0, %v4263_v33, 0.0  ;;  %v4327_v46 = vpop.permute.xlu1 %1543 }
 0x2de   : > { %3506 = vpow2.f32 %v1483_v39  ;;  %1498 = vadd.xlane.f32.xlu1 %v1497_v53  ;;  %v3545_v53 = vld [vmem:[%s3676_s8 + $0x28] sm:$0xff] }
 0x2df   : > { %3508 = vpow2.f32 %v807_v17 }
 0x2e0   : > { %v4267_v48 = vpop.eup %3502  ;;  %3510 = vpow2.f32 %v805_v50 }
 0x2e1   : > { %v1500_v3 = vsel %vm760_vm0, %v4267_v48, 0.0 }
 0x2e2   : > { %1501 = vadd.xlane.f32.xlu1 %v1500_v3 }
 0x2e4   : > { %v4271_v37 = vpop.eup %3504 }
 0x2e5   : > { %v1503_v23 = vsel %vm760_vm0, %v4271_v37, 0.0 }
 0x2e6   : > { %1504 = vadd.xlane.f32.xlu1 %v1503_v23  ;;  %v4394_v23 = vld [vmem:[%s3676_s8 + $0x1f8] sm:$0xff] }
 0x2e8   : > { %v4275_v60 = vpop.eup %3506 }
 0x2e9   : > { %v1506_v6 = vsel %vm760_vm0, %v4275_v60, 0.0  ;;  %v4293_v18 = vpop.eup %3508 }
 0x2ea   : > { %1507 = vadd.xlane.f32.xlu0 %v1506_v6  ;;  %v830_v30 = vsel %vm760_vm0, %v4293_v18, 0.0  ;;  %v4297_v61 = vpop.eup %3510 }
 0x2eb   : > { %v827_v19 = vsel %vm760_vm0, %v4297_v61, 0.0 }
 0x2f7   : > { %1547 = vrot.lane.b32.xlu1 %v4280_v56, %s3579_s9 }
 0x300   : > { %1545 = vrot.lane.b32.xlu0 %v4285_v36, %s3579_s9 }
 0x31b   : > { %831 = vadd.xlane.f32.xlu1 %v830_v30 }
 0x31f   : > { %828 = vadd.xlane.f32.xlu0 %v827_v19  ;;  %v4415_v19 = vld [vmem:[%s3676_s8 + $0x1e8] sm:$0xff] }
 0x32c   : > { %1551 = vrot.lane.b32.xlu1 %v4302_v21, %s3579_s9 }
 0x330   : > { %1555 = vrot.lane.b32.xlu1 %v4307_v8, %s3579_s9 }
 0x334   : > { %1559 = vrot.lane.b32.xlu1 %v4312_v26, %s3579_s9 }
 0x335   : > { %1549 = vrot.lane.b32.xlu0 %v4315_v63, %s3579_s9 }
 0x338   : > { %1563 = vrot.lane.b32.xlu1 %v4322_v57, %s3579_s9 }
 0x339   : > { %1553 = vrot.lane.b32.xlu0 %v4325_v62, %s3579_s9 }
 0x33b   : > { %v811_v20 = vpop.xlane.xlu1 %810 }
 0x33c   : > { %1567 = vrot.lane.b32.xlu1 %v4334_v14, %s3579_s9  ;;  %3512 = vrcp.f32 %v811_v20 }
 0x33d   : > { %1557 = vrot.lane.b32.xlu0 %v4337_v58, %s3579_s9 }
 0x33f   : > { %v814_v2 = vpop.xlane.xlu0 %813 }
 0x340   : > { %3514 = vrcp.f32 %v814_v2  ;;  %1571 = vrot.lane.b32.xlu1 %v4346_v22, %s3579_s9 }
 0x341   : > { %1561 = vrot.lane.b32.xlu0 %v4349_v11, %s3579_s9 }
 0x343   : > { %v817_v29 = vpop.xlane.xlu0 %816 }
 0x344   : > { %1575 = vrot.lane.b32.xlu1 %v4356_v4, %s3579_s9  ;;  %3516 = vrcp.f32 %v817_v29 }
 0x345   : > { %1565 = vrot.lane.b32.xlu0 %v4359_v54, %s3579_s9 }
 0x346   : > { %v3513_v44 = vpop.eup %3512 }
 0x347   : > { %v820_v1 = vpop.xlane.xlu1 %819  ;;  %v841_v35 = vmul.f32 %v3513_v44, %v4209_v10  ;;  %v4397_v10 = vld [vmem:[%s3676_s8 + $0x1a8] sm:$0xff] }
 0x348   : > { %3518 = vrcp.f32 %v820_v1  ;;  %1579 = vrot.lane.b32.xlu1 %v4366_v51, %s3579_s9 }
 0x349   : > { %1569 = vrot.lane.b32.xlu0 %v4369_v38, %s3579_s9 }
 0x34a   : > { %v3515_v49 = vpop.eup %3514 }
 0x34b   : > { %v823_v59 = vpop.xlane.xlu0 %822  ;;  %v842_v39 = vmul.f32 %v3515_v49, %v4214_v41 }
 0x34c   : > { %1583 = vrot.lane.b32.xlu1 %v4376_v40, %s3579_s9  ;;  %3520 = vrcp.f32 %v823_v59 }
 0x34d   : > { %v3072_v3 = vpack.c.bf16 %v842_v39, %v841_v35  ;;  %1573 = vrot.lane.b32.xlu0 %v4379_v34, %s3579_s9 }
 0x34e   : > { %v3517_v6 = vpop.eup %3516 }
 0x34f   : > { %3074 = vmatprep.subr.msk.bf16.mxu1 %vm4385_vm1, %v3072_v3  ;;  %v826_v41 = vpop.xlane.xlu1 %825  ;;  %v843_v17 = vmul.f32 %v3517_v6, %v4219_v55 }
 0x350   : > { %3522 = vrcp.f32 %v826_v41  ;;  %3077 = vmatpush3.bf16.xpose.msk.msra.mxu1 %vm4385_vm1, %v3072_v3  ;;  %1587 = vrot.lane.b32.xlu1 %v4394_v23, %s3579_s9 }
 0x351   : > { %1577 = vrot.lane.b32.xlu0 %v4397_v10, %s3579_s9 }
 0x352   : > { %v3519_v45 = vpop.eup %3518 }
 0x353   : > { %v844_v50 = vmul.f32 %v3519_v45, %v4225_v43 }
 0x355   : > { %v3078_v30 = vpack.c.bf16 %v844_v50, %v843_v17  ;;  %1581 = vrot.lane.b32.xlu0 %v4408_v15, %s3579_s9 }
 0x356   : > { %v3521_v20 = vpop.eup %3520 }
 0x357   : > { %3080 = vmatprep.subr.msk.bf16.mxu1 %vm4385_vm1, %v3078_v30  ;;  %v845_v43 = vmul.f32 %v3521_v20, %v4231_v9 }
 0x358   : > { %3083 = vmatpush3.bf16.xpose.msk.msra.mxu1 %vm4385_vm1, %v3078_v30 }
 0x359   : > { %1585 = vrot.lane.b32.xlu0 %v4415_v19, %s3579_s9 }
 0x35a   : > { %v3523_v2 = vpop.eup %3522 }
 0x35b   : > { %v1487_v55 = vpop.xlane.xlu1 %1486  ;;  %v846_v29 = vmul.f32 %v3523_v2, %v4236_v7 }
 0x35c   : > { %3524 = vrcp.f32 %v1487_v55 }
 0x35d   : > { %v3084_v1 = vpack.c.bf16 %v846_v29, %v845_v43 }
 0x35f   : > { %3086 = vmatprep.subr.msk.bf16.mxu1 %vm4385_vm1, %v3084_v1  ;;  %v1490_v44 = vpop.xlane.xlu1 %1489 }
 0x360   : > { %3526 = vrcp.f32 %v1490_v44  ;;  %3089 = vmatpush3.bf16.xpose.msk.msra.mxu1 %vm4385_vm1, %v3084_v1 }
 0x363   : > { %v1493_v49 = vpop.xlane.xlu1 %1492 }
 0x364   : > { %3528 = vrcp.f32 %v1493_v49 }
 0x366   : > { %v3525_v35 = vpop.eup %3524 }
 0x367   : > { %v1496_v59 = vpop.xlane.xlu1 %1495  ;;  %v1517_v9 = vmul.f32 %v3525_v35, %v4243_v42 }
 0x368   : > { %3530 = vrcp.f32 %v1496_v59 }
 0x36a   : > { %v3527_v39 = vpop.eup %3526 }
 0x36b   : > { %v1499_v3 = vpop.xlane.xlu1 %1498  ;;  %v1518_v7 = vmul.f32 %v3527_v39, %v4248_v5 }
 0x36c   : > { %3532 = vrcp.f32 %v1499_v3 }
 0x36d   : > { %v3128_v41 = vpack.c.bf16 %v1518_v7, %v1517_v9 }
 0x36e   : > { %v3529_v45 = vpop.eup %3528 }
 0x36f   : > { %3130 = vmatprep.subr.msk.bf16.mxu0 %vm4385_vm1, %v3128_v41  ;;  %v1502_v6 = vpop.xlane.xlu1 %1501  ;;  %v1519_v30 = vmul.f32 %v3529_v45, %v4253_v0  ;;  %v3544_v45 = vld [vmem:[%s3676_s8 + $0x18] sm:$0xff] }
 0x370   : > { %3534 = vrcp.f32 %v1502_v6  ;;  %3133 = vmatpush3.bf16.xpose.msk.msra.mxu0 %vm4385_vm1, %v3128_v41 }
 0x372   : > { %v3531_v17 = vpop.eup %3530 }
 0x373   : > { %v1505_v50 = vpop.xlane.xlu1 %1504  ;;  %v1520_v20 = vmul.f32 %v3531_v17, %v4258_v27 }
 0x374   : > { %3536 = vrcp.f32 %v1505_v50 }
 0x375   : > { %v3134_v42 = vpack.c.bf16 %v1520_v20, %v1519_v30  ;;  %v3546_v30 = vld [vmem:[%s3676_s8 + $0x38] sm:$0xff]  ;;  %v3547_v20 = vld [vmem:[%s3676_s8 + $0x48] sm:$0xff] }
 0x376   : > { %v3533_v2 = vpop.eup %3532 }
 0x377   : > { %v1508_v5 = vpop.xlane.xlu0 %1507  ;;  %3136 = vmatprep.subr.msk.bf16.mxu0 %vm4385_vm1, %v3134_v42  ;;  %v1521_v43 = vmul.f32 %v3533_v2, %v4263_v33 }
 0x378   : > { %3538 = vrcp.f32 %v1508_v5  ;;  %3139 = vmatpush3.bf16.xpose.msk.msra.mxu0 %vm4385_vm1, %v3134_v42  ;;  %v3548_v5 = vld [vmem:[%s3676_s8 + $0x58] sm:$0xff] }
 0x37a   : > { %v3535_v55 = vpop.eup %3534 }
 0x37b   : > { %v1522_v29 = vmul.f32 %v3535_v55, %v4267_v48  ;;  %v3549_v55 = vld [vmem:[%s3676_s8 + $0x68] sm:$0xff] }
 0x37d   : > { %v3140_v1 = vpack.c.bf16 %v1522_v29, %v1521_v43  ;;  %v3550_v29 = vld [vmem:[%s3676_s8 + $0x78] sm:$0xff] }
 0x37e   : > { %v3537_v0 = vpop.eup %3536 }
 0x37f   : > { %3142 = vmatprep.subr.msk.bf16.mxu0 %vm4385_vm1, %v3140_v1  ;;  %v1523_v44 = vmul.f32 %v3537_v0, %v4271_v37 }
 0x380   : > { %3145 = vmatpush3.bf16.xpose.msk.msra.mxu0 %vm4385_vm1, %v3140_v1 }
 0x382   : > { %v3539_v27 = vpop.eup %3538 }
 0x383   : > { %v1524_v49 = vmul.f32 %v3539_v27, %v4275_v60 }
 0x385   : > { %v3146_v59 = vpack.c.bf16 %v1524_v49, %v1523_v44 }
 0x387   : > { %3148 = vmatprep.subr.msk.bf16.mxu0 %vm4385_vm1, %v3146_v59 }
 0x388   : > { %3151 = vmatpush3.bf16.xpose.msk.msra.mxu0 %vm4385_vm1, %v3146_v59 }
 0x38f   : > { %2913 = vmatmul.mubr.msk.f32.vlgmr.msra.gmra.mrb[32].mxu0 %vm760_vm0, %v4199_v52  ;;  %v1546_v52 = vpop.permute.xlu0 %1545 }
 0x390   : > { %2915 = vmatprep.mubr.msk.f32.mxu0 %vm760_vm0, %v4191_v24  ;;  %v1548_v24 = vpop.permute.xlu1 %1547 }
 0x393   : > { %2916 = vmatmul.mubr.msk.f32.gmra.mrb[34].mxu0 %vm760_vm0, %v4193_v16 }
 0x394   : > { %2918 = vmatprep.mubr.msk.f32.mxu0 %vm760_vm0, %v4202_v32 }
 0x397   : > { %2919 = vmatmul.mubr.msk.f32.gmra.mrb[36].mxu0 %vm760_vm0, %v4195_v12 }
 0x398   : > { %2921 = vmatprep.mubr.msk.f32.mxu0 %vm760_vm0, %v4205_v28 }
 0x39b   : > { %2922 = vmatmul.mubr.msk.f32.gmra.mrb[38].mxu0 %vm760_vm0, %v4197_v25 }
 0x39c   : > { %2924 = vmatprep.mubr.msk.f32.mxu0 %vm760_vm0, %v4339_v47 }
 0x39f   : > { %2925 = vmatmul.mubr.msk.f32.gmra.mrb[40].mxu0 %vm760_vm0, %v4327_v46 }
 0x3a0   : > { %2927 = vmatprep.mubr.msk.f32.mxu0 %vm760_vm0, %v1546_v52 }
 0x3a3   : > { %2928 = vmatmul.mubr.msk.f32.gmra.mrb[42].mxu0 %vm760_vm0, %v1548_v24 }
 0x3a8   : > { %v832_v16 = vpop.xlane.xlu1 %831 }
 0x3a9   : > { %3540 = vrcp.f32 %v832_v16 }
 0x3ac   : > { %v829_v12 = vpop.xlane.xlu0 %828  ;;  %v1552_v32 = vpop.permute.xlu1 %1551 }
 0x3ad   : > { %3542 = vrcp.f32 %v829_v12 }
 0x3b0   : > { %v1550_v28 = vpop.permute.xlu0 %1549  ;;  %v1556_v33 = vpop.permute.xlu1 %1555 }
 0x3b1   : > { %2930 = vmatprep.mubr.msk.f32.mxu0 %vm760_vm0, %v1550_v28 }
 0x3b2   : > { %2931 = vmatmul.mubr.msk.f32.gmra.mrb[44].mxu0 %vm760_vm0, %v1552_v32 }
 0x3b3   : > { %v3541_v37 = vpop.eup %3540 }
 0x3b4   : > { %v1554_v25 = vpop.permute.xlu0 %1553  ;;  %v1560_v48 = vpop.permute.xlu1 %1559  ;;  %v848_v35 = vmul.f32 %v3541_v37, %v4293_v18 }
 0x3b5   : > { %2933 = vmatprep.mubr.msk.f32.mxu0 %vm760_vm0, %v1554_v25 }
 0x3b6   : > { %2934 = vmatmul.mubr.msk.f32.gmra.mrb[46].mxu0 %vm760_vm0, %v1556_v33 }
 0x3b7   : > { %v3543_v60 = vpop.eup %3542 }
 0x3b8   : > { %v1558_v46 = vpop.permute.xlu0 %1557  ;;  %v847_v47 = vmul.f32 %v3543_v60, %v4297_v61  ;;  %v1564_v39 = vpop.permute.xlu1 %1563 }
 0x3b9   : > { %2936 = vmatprep.mubr.msk.f32.mxu0 %vm760_vm0, %v1558_v46 }
 0x3ba   : > { %2937 = vmatmul.mubr.msk.f32.gmra.mrb[48].mxu0 %vm760_vm0, %v1560_v48  ;;  %v3090_v3 = vpack.c.bf16 %v848_v35, %v847_v47 }
 0x3bc   : > { %v1562_v9 = vpop.permute.xlu0 %1561  ;;  %3092 = vmatprep.subr.msk.bf16.mxu1 %vm4385_vm1, %v3090_v3  ;;  %v1568_v7 = vpop.permute.xlu1 %1567 }
 0x3bd   : > { %3095 = vmatpush3.bf16.xpose.msk.msra.mxu1 %vm4385_vm1, %v3090_v3  ;;  %2939 = vmatprep.mubr.msk.f32.mxu0 %vm760_vm0, %v1562_v9 }
 0x3be   : > { %2940 = vmatmul.mubr.msk.f32.gmra.mrb[50].mxu0 %vm760_vm0, %v1564_v39 }
 0x3c0   : > { %v1566_v18 = vpop.permute.xlu0 %1565  ;;  %v1572_v61 = vpop.permute.xlu1 %1571 }
 0x3c1   : > { %2942 = vmatprep.mubr.msk.f32.mxu0 %vm760_vm0, %v1566_v18 }
 0x3c2   : > { %2943 = vmatmul.mubr.msk.f32.gmra.mrb[52].mxu0 %vm760_vm0, %v1568_v7 }
 0x3c4   : > { %v1570_v41 = vpop.permute.xlu0 %1569  ;;  %v1576_v6 = vpop.permute.xlu1 %1575  ;;  %2849 = vmatmul.mubr.msk.f32.vlgmr.msra.gmra.mrb[0].mxu1 %vm760_vm0, %v3544_v45 }
 0x3c5   : > { %2945 = vmatprep.mubr.msk.f32.mxu0 %vm760_vm0, %v1570_v41  ;;  %2851 = vmatprep.mubr.msk.f32.mxu1 %vm760_vm0, %v3545_v53 }
 0x3c6   : > { %2946 = vmatmul.mubr.msk.f32.gmra.mrb[54].mxu0 %vm760_vm0, %v1572_v61 }
 0x3c8   : > { %v1574_v17 = vpop.permute.xlu0 %1573  ;;  %v1580_v50 = vpop.permute.xlu1 %1579  ;;  %2852 = vmatmul.mubr.msk.f32.gmra.mrb[2].mxu1 %vm760_vm0, %v3546_v30 }
 0x3c9   : > { %2948 = vmatprep.mubr.msk.f32.mxu0 %vm760_vm0, %v1574_v17  ;;  %2854 = vmatprep.mubr.msk.f32.mxu1 %vm760_vm0, %v3547_v20 }
 0x3ca   : > { %2949 = vmatmul.mubr.msk.f32.gmra.mrb[56].mxu0 %vm760_vm0, %v1576_v6 }
 0x3cc   : > { %v1578_v42 = vpop.permute.xlu0 %1577  ;;  %2855 = vmatmul.mubr.msk.f32.gmra.mrb[4].mxu1 %vm760_vm0, %v3548_v5  ;;  %v1584_v2 = vpop.permute.xlu1 %1583 }
 0x3cd   : > { %2951 = vmatprep.mubr.msk.f32.mxu0 %vm760_vm0, %v1578_v42  ;;  %2857 = vmatprep.mubr.msk.f32.mxu1 %vm760_vm0, %v3549_v55 }
 0x3ce   : > { %2952 = vmatmul.mubr.msk.f32.gmra.mrb[58].mxu0 %vm760_vm0, %v1580_v50 }
 0x3d0   : > { %v1582_v43 = vpop.permute.xlu0 %1581  ;;  %2858 = vmatmul.mubr.msk.f32.gmra.mrb[6].mxu1 %vm760_vm0, %v3550_v29  ;;  %v1588_v1 = vpop.permute.xlu1 %1587 }
 0x3d1   : > { %2954 = vmatprep.mubr.msk.f32.mxu0 %vm760_vm0, %v1582_v43  ;;  %2860 = vmatprep.mubr.msk.f32.mxu1 %vm760_vm0, %v4154_v31  ;;  %v2062_v31 = vld [vmem:[%s4802_s3] sm:$0xff] }
 0x3d2   : > { %2955 = vmatmul.mubr.msk.f32.gmra.mrb[60].mxu0 %vm760_vm0, %v1584_v2 }
 0x3d4   : > { %v1586_v0 = vpop.permute.xlu0 %1585  ;;  %2861 = vmatmul.mubr.msk.f32.gmra.mrb[8].mxu1 %vm760_vm0, %v4187_v13  ;;  %v2063_v13 = vld [vmem:[%s4802_s3 + $0x8] sm:$0xff] }
 0x3d5   : > { %2957 = vmatprep.mubr.msk.f32.mxu0 %vm760_vm0, %v1586_v0  ;;  %2863 = vmatprep.mubr.msk.f32.mxu1 %vm760_vm0, %v4285_v36  ;;  %v2064_v36 = vld [vmem:[%s4802_s3 + $0x10] sm:$0xff] }
 0x3d6   : > { %2958 = vmatmul.mubr.msk.f32.gmra.mrb[62].mxu0 %vm760_vm0, %v1588_v1 }
 0x3d8   : > { %2864 = vmatmul.mubr.msk.f32.gmra.mrb[10].mxu1 %vm760_vm0, %v4280_v56  ;;  %v3152_v56 = vpack.c.bf16 %v2063_v13, %v2062_v31 }
 0x3d9   : > { %2866 = vmatprep.mubr.msk.f32.mxu1 %vm760_vm0, %v4315_v63  ;;  %v2067_v63 = vld [vmem:[%s4802_s3 + $0x28] sm:$0xff] }
 0x3da   : > { %3153 = vmatprep.subr.bf16.mxu1 %v3152_v56 }
 0x3db   : > { %3155 = vmatpush3.bf16.msra.mxu1 %v3152_v56 }
 0x3dc   : > { %2867 = vmatmul.mubr.msk.f32.gmra.mrb[12].mxu1 %vm760_vm0, %v4302_v21  ;;  %v2065_v21 = vld [vmem:[%s4802_s3 + $0x18] sm:$0xff] }
 0x3dd   : > { %2869 = vmatprep.mubr.msk.f32.mxu1 %vm760_vm0, %v4325_v62  ;;  %v2068_v62 = vld [vmem:[%s4802_s3 + $0x30] sm:$0xff] }
 0x3e0   : > { %2870 = vmatmul.mubr.msk.f32.gmra.mrb[14].mxu1 %vm760_vm0, %v4307_v8  ;;  %v2066_v8 = vld [vmem:[%s4802_s3 + $0x20] sm:$0xff] }
 0x3e1   : > { %2872 = vmatprep.mubr.msk.f32.mxu1 %vm760_vm0, %v4337_v58 }
 0x3e4   : > { %2873 = vmatmul.mubr.msk.f32.gmra.mrb[16].mxu1 %vm760_vm0, %v4312_v26  ;;  %v3156_v26 = vpack.c.bf16 %v2065_v21, %v2064_v36 }
 0x3e5   : > { %2875 = vmatprep.mubr.msk.f32.mxu1 %vm760_vm0, %v4349_v11  ;;  %v2071_v11 = vld [vmem:[%s4802_s3 + $0x48] sm:$0xff] }
 0x3e6   : > { %3157 = vmatprep.subr.bf16.mxu1 %v3156_v26 }
 0x3e7   : > { %3159 = vmatpush3.bf16.msra.mxu1 %v3156_v26 }
 0x3e8   : > { %2876 = vmatmul.mubr.msk.f32.gmra.mrb[18].mxu1 %vm760_vm0, %v4322_v57  ;;  %v3160_v57 = vpack.c.bf16 %v2067_v63, %v2066_v8 }
 0x3e9   : > { %2878 = vmatprep.mubr.msk.f32.mxu1 %vm760_vm0, %v4359_v54  ;;  %v2072_v54 = vld [vmem:[%s4802_s3 + $0x50] sm:$0xff] }
 0x3ea   : > { %3161 = vmatprep.subr.bf16.mxu1 %v3160_v57 }
 0x3eb   : > { %3163 = vmatpush3.bf16.msra.mxu1 %v3160_v57 }
 0x3ec   : > { %2879 = vmatmul.mubr.msk.f32.gmra.mrb[20].mxu1 %vm760_vm0, %v4334_v14  ;;  %v2069_v14 = vld [vmem:[%s4802_s3 + $0x38] sm:$0xff] }
 0x3ed   : > { %2881 = vmatprep.mubr.msk.f32.mxu1 %vm760_vm0, %v4369_v38  ;;  %v3164_v58 = vpack.c.bf16 %v2069_v14, %v2068_v62 }
 0x3ef   : > { %3165 = vmatprep.subr.bf16.mxu1 %v3164_v58 }
 0x3f0   : > { %2882 = vmatmul.mubr.msk.f32.gmra.mrb[22].mxu1 %vm760_vm0, %v4346_v22  ;;  %v2070_v22 = vld [vmem:[%s4802_s3 + $0x40] sm:$0xff] }
 0x3f1   : > { %2884 = vmatprep.mubr.msk.f32.mxu1 %vm760_vm0, %v4379_v34  ;;  %3167 = vmatpush3.bf16.msra.mxu1 %v3164_v58  ;;  %v2075_v34 = vld [vmem:[%s4802_s3 + $0x68] sm:$0xff] }
 0x3f4   : > { %2885 = vmatmul.mubr.msk.f32.gmra.mrb[24].mxu1 %vm760_vm0, %v4356_v4  ;;  %v3168_v4 = vpack.c.bf16 %v2071_v11, %v2070_v22 }
 0x3f5   : > { %2887 = vmatprep.mubr.msk.f32.mxu1 %vm760_vm0, %v4397_v10  ;;  %v2076_v10 = vld [vmem:[%s4802_s3 + $0x70] sm:$0xff] }
 0x3f6   : > { %3169 = vmatprep.subr.bf16.mxu1 %v3168_v4 }
 0x3f7   : > { %3171 = vmatpush3.bf16.msra.mxu1 %v3168_v4 }
 0x3f8   : > { %2888 = vmatmul.mubr.msk.f32.gmra.mrb[26].mxu1 %vm760_vm0, %v4366_v51  ;;  %v2073_v51 = vld [vmem:[%s4802_s3 + $0x58] sm:$0xff] }
 0x3f9   : > { %2890 = vmatprep.mubr.msk.f32.mxu1 %vm760_vm0, %v4408_v15  ;;  %v3172_v38 = vpack.c.bf16 %v2073_v51, %v2072_v54  ;;  %v2077_v15 = vld [vmem:[%s4802_s3 + $0x78] sm:$0xff] }
 0x3fb   : > { %3173 = vmatprep.subr.bf16.mxu1 %v3172_v38 }
 0x3fc   : > { %2891 = vmatmul.mubr.msk.f32.gmra.mrb[28].mxu1 %vm760_vm0, %v4376_v40  ;;  %v2074_v40 = vld [vmem:[%s4802_s3 + $0x60] sm:$0xff] }
 0x3fd   : > { %2893 = vmatprep.mubr.msk.f32.mxu1 %vm760_vm0, %v4415_v19  ;;  %3175 = vmatpush3.bf16.msra.mxu1 %v3172_v38  ;;  %v3180_v19 = vpack.c.bf16 %v2077_v15, %v2076_v10 }
 0x400   : > { %2894 = vmatmul.mubr.msk.f32.gmra.mrb[30].mxu1 %vm760_vm0, %v4394_v23  ;;  %v3176_v23 = vpack.c.bf16 %v2075_v34, %v2074_v40 }
 0x402   : > { %3177 = vmatprep.subr.bf16.mxu1 %v3176_v23 }
 0x403   : > { %3179 = vmatpush3.bf16.msra.mxu1 %v3176_v23 }
 0x404   : > { %3181 = vmatprep.subr.bf16.mxu1 %v3180_v19 }
 0x407   : > { %3183 = vmatpush3.bf16.msra.mxu1 %v3180_v19 }
 0x462   : > { %v2914_v27 = vpop.f32.mrb[32].mxu0 }
 0x463   : > { %v1743_v44 = vpop.f32.mrb[33].mxu0 }
 0x464   : > { %v3396_v49 = vpack.i.bf16 %v2914_v27, %v1743_v44 }
 0x466   : > { %3397 = vrot.lane.b32.xlu0 %v3396_v49, %s3579_s9  ;;  %v2917_v59 = vpop.f32.mrb[34].mxu0 }
 0x467   : > { %v1753_v52 = vpop.f32.mrb[35].mxu0 }
 0x468   : > { %v3401_v24 = vpack.i.bf16 %v2917_v59, %v1753_v52 }
 0x46a   : > { %3402 = vrot.lane.b32.xlu1 %v3401_v24, %s3579_s9  ;;  %v2920_v16 = vpop.f32.mrb[36].mxu0 }
 0x46b   : > { %v1763_v12 = vpop.f32.mrb[37].mxu0 }
 0x46c   : > { %v3406_v32 = vpack.i.bf16 %v2920_v16, %v1763_v12 }
 0x46e   : > { %3407 = vrot.lane.b32.xlu0 %v3406_v32, %s3579_s9  ;;  %v2923_v28 = vpop.f32.mrb[38].mxu0 }
 0x46f   : > { %v1773_v33 = vpop.f32.mrb[39].mxu0 }
 0x470   : > { %v3411_v25 = vpack.i.bf16 %v2923_v28, %v1773_v33 }
 0x472   : > { %3412 = vrot.lane.b32.xlu1 %v3411_v25, %s3579_s9  ;;  %v2926_v48 = vpop.f32.mrb[40].mxu0 }
 0x473   : > { %v1783_v37 = vpop.f32.mrb[41].mxu0 }
 0x474   : > { %v3416_v60 = vpack.i.bf16 %v2926_v48, %v1783_v37 }
 0x476   : > { %3417 = vrot.lane.b32.xlu0 %v3416_v60, %s3579_s9  ;;  %v2929_v46 = vpop.f32.mrb[42].mxu0 }
 0x477   : > { %v1793_v47 = vpop.f32.mrb[43].mxu0 }
 0x478   : > { %v3421_v35 = vpack.i.bf16 %v2929_v46, %v1793_v47 }
 0x47a   : > { %3422 = vrot.lane.b32.xlu1 %v3421_v35, %s3579_s9 }
 0x485   : > { %v2932_v39 = vpop.f32.mrb[44].mxu0 }
 0x486   : > { %v1803_v3 = vpop.f32.mrb[45].mxu0 }
 0x487   : > { %v3426_v9 = vpack.i.bf16 %v2932_v39, %v1803_v3 }
 0x489   : > { %3427 = vrot.lane.b32.xlu0 %v3426_v9, %s3579_s9  ;;  %v2935_v7 = vpop.f32.mrb[46].mxu0 }
 0x48a   : > { %v1813_v18 = vpop.f32.mrb[47].mxu0 }
 0x48b   : > { %v3431_v61 = vpack.i.bf16 %v2935_v7, %v1813_v18 }
 0x48d   : > { %3432 = vrot.lane.b32.xlu1 %v3431_v61, %s3579_s9  ;;  %v2938_v41 = vpop.f32.mrb[48].mxu0 }
 0x48e   : > { %v1823_v6 = vpop.f32.mrb[49].mxu0 }
 0x48f   : > { %v3436_v45 = vpack.i.bf16 %v2938_v41, %v1823_v6 }
 0x491   : > { %3437 = vrot.lane.b32.xlu0 %v3436_v45, %s3579_s9  ;;  %v2941_v53 = vpop.f32.mrb[50].mxu0 }
 0x492   : > { %v1833_v17 = vpop.f32.mrb[51].mxu0 }
 0x493   : > { %v3441_v50 = vpack.i.bf16 %v2941_v53, %v1833_v17 }
 0x495   : > { %3442 = vrot.lane.b32.xlu1 %v3441_v50, %s3579_s9  ;;  %v2944_v30 = vpop.f32.mrb[52].mxu0 }
 0x496   : > { %v1843_v20 = vpop.f32.mrb[53].mxu0 }
 0x497   : > { %v3446_v42 = vpack.i.bf16 %v2944_v30, %v1843_v20  ;;  %v2850_v5 = vpop.f32.mrb[0].mxu1 }
 0x498   : > { %v1035_v2 = vpop.f32.mrb[1].mxu1 }
 0x499   : > { %3447 = vrot.lane.b32.xlu0 %v3446_v42, %s3579_s9  ;;  %v2947_v55 = vpop.f32.mrb[54].mxu0 }
 0x49a   : > { %v1853_v43 = vpop.f32.mrb[55].mxu0 }
 0x49b   : > { %v3451_v29 = vpack.i.bf16 %v2947_v55, %v1853_v43  ;;  %v2853_v1 = vpop.f32.mrb[2].mxu1 }
 0x49c   : > { %v1045_v0 = vpop.f32.mrb[3].mxu1 }
 0x49d   : > { %3452 = vrot.lane.b32.xlu1 %v3451_v29, %s3579_s9  ;;  %v2950_v31 = vpop.f32.mrb[56].mxu0 }
 0x49e   : > { %v1863_v13 = vpop.f32.mrb[57].mxu0 }
 0x49f   : > { %v3456_v56 = vpack.i.bf16 %v2950_v31, %v1863_v13  ;;  %v2856_v36 = vpop.f32.mrb[4].mxu1 }
 0x4a0   : > { %v1055_v21 = vpop.f32.mrb[5].mxu1 }
 0x4a1   : > { %3457 = vrot.lane.b32.xlu0 %v3456_v56, %s3579_s9  ;;  %v2953_v8 = vpop.f32.mrb[58].mxu0 }
 0x4a2   : > { %v1873_v26 = vpop.f32.mrb[59].mxu0 }
 0x4a3   : > { %v3461_v63 = vpack.i.bf16 %v2953_v8, %v1873_v26  ;;  %v2859_v57 = vpop.f32.mrb[6].mxu1 }
 0x4a4   : > { %v1065_v62 = vpop.f32.mrb[7].mxu1 }
 0x4a5   : > { %3462 = vrot.lane.b32.xlu1 %v3461_v63, %s3579_s9  ;;  %v2956_v14 = vpop.f32.mrb[60].mxu0 }
 0x4a6   : > { %v1883_v58 = vpop.f32.mrb[61].mxu0 }
 0x4a7   : > { %v3466_v22 = vpack.i.bf16 %v2956_v14, %v1883_v58  ;;  %v2862_v11 = vpop.f32.mrb[8].mxu1 }
 0x4a8   : > { %v1075_v4 = vpop.f32.mrb[9].mxu1 }
 0x4a9   : > { %3467 = vrot.lane.b32.xlu0 %v3466_v22, %s3579_s9  ;;  %v2959_v54 = vpop.f32.mrb[62].mxu0 }
 0x4aa   : > { %v1893_v51 = vpop.f32.mrb[63].mxu0 }
 0x4ab   : > { %v3471_v38 = vpack.i.bf16 %v2959_v54, %v1893_v51  ;;  %v4624_v40 = vpop.f32.mrb[10].mxu1 }
 0x4ac   : > { %v1085_v34 = vpop.f32.mrb[11].mxu1 }
 0x4ad   : > { %3472 = vrot.lane.b32.xlu1 %v3471_v38, %s3579_s9 }
 0x4af   : > { %v4627_v23 = vpop.f32.mrb[12].mxu1 }
 0x4b0   : > { %v4629_v10 = vpop.f32.mrb[13].mxu1 }
 0x4b3   : > { %v4631_v15 = vpop.f32.mrb[14].mxu1 }
 0x4b4   : > { %v4633_v19 = vpop.f32.mrb[15].mxu1 }
 0x4b7   : > { %v4635_v27 = vpop.f32.mrb[16].mxu1 }
 0x4b8   : > { %v4637_v44 = vpop.f32.mrb[17].mxu1 }
 0x4bb   : > { %v4639_v49 = vpop.f32.mrb[18].mxu1 }
 0x4bc   : > { %v4641_v59 = vpop.f32.mrb[19].mxu1 }
 0x4bf   : > { %v4643_v52 = vpop.f32.mrb[20].mxu1 }
 0x4c0   : > { %v4645_v24 = vpop.f32.mrb[21].mxu1 }
 0x4c3   : > { %v4647_v16 = vpop.f32.mrb[22].mxu1 }
 0x4c4   : > { %v4649_v12 = vpop.f32.mrb[23].mxu1 }
 0x4c7   : > { %v4651_v32 = vpop.f32.mrb[24].mxu1 }
 0x4c8   : > { %v4653_v28 = vpop.f32.mrb[25].mxu1 }
 0x4cb   : > { %v4655_v33 = vpop.f32.mrb[26].mxu1 }
 0x4cc   : > { %v4657_v25 = vpop.f32.mrb[27].mxu1 }
 0x4cf   : > { %v4659_v48 = vpop.f32.mrb[28].mxu1 }
 0x4d0   : > { %v4661_v37 = vpop.f32.mrb[29].mxu1 }
 0x4d3   : > { %v4663_v60 = vpop.f32.mrb[30].mxu1 }
 0x4d4   : > { %v4665_v46 = vpop.f32.mrb[31].mxu1 }
 0x4d8   : > { %v3398_v47 = vpop.permute.xlu0 %3397 }
 0x4d9   : > { %v3400_v35 = vunpack.i.h.bf16 %v3398_v47  ;;  %v3399_v39 = vunpack.i.l.bf16 %v3398_v47 }
 0x4db   : > { %v2031_v3 = vsel %vm760_vm0, %v2850_v5, %v3400_v35  ;;  %v2030_v9 = vsel %vm760_vm0, %v1035_v2, %v3399_v39 }
 0x4dc   : > { %2992 = vmatprep.mubr.f32.mxu1 %v2030_v9  ;;  %v3403_v7 = vpop.permute.xlu1 %3402 }
 0x4dd   : > { %v3405_v18 = vunpack.i.h.bf16 %v3403_v7  ;;  %v3404_v61 = vunpack.i.l.bf16 %v3403_v7  ;;  %2993 = vmatmul.mubr.f32.vlgmr.msra.gmra.mrb[32].mxu1 %v2031_v3 }
 0x4df   : > { %v2032_v41 = vsel %vm760_vm0, %v1045_v0, %v3404_v61  ;;  %v2033_v6 = vsel %vm760_vm0, %v2853_v1, %v3405_v18 }
 0x4e0   : > { %v3408_v45 = vpop.permute.xlu0 %3407  ;;  %2995 = vmatprep.mubr.f32.mxu1 %v2032_v41 }
 0x4e1   : > { %v3410_v53 = vunpack.i.h.bf16 %v3408_v45  ;;  %v3409_v17 = vunpack.i.l.bf16 %v3408_v45  ;;  %2996 = vmatmul.mubr.f32.gmra.mrb[34].mxu1 %v2033_v6 }
 0x4e3   : > { %v2034_v50 = vsel %vm760_vm0, %v1055_v21, %v3409_v17  ;;  %v2035_v30 = vsel %vm760_vm0, %v2856_v36, %v3410_v53 }
 0x4e4   : > { %v3413_v20 = vpop.permute.xlu1 %3412  ;;  %2998 = vmatprep.mubr.f32.mxu1 %v2034_v50 }
 0x4e5   : > { %v3415_v42 = vunpack.i.h.bf16 %v3413_v20  ;;  %v3414_v5 = vunpack.i.l.bf16 %v3413_v20  ;;  %2999 = vmatmul.mubr.f32.gmra.mrb[36].mxu1 %v2035_v30 }
 0x4e7   : > { %v2036_v2 = vsel %vm760_vm0, %v1065_v62, %v3414_v5  ;;  %v2037_v55 = vsel %vm760_vm0, %v2859_v57, %v3415_v42 }
 0x4e8   : > { %v3418_v43 = vpop.permute.xlu0 %3417  ;;  %3001 = vmatprep.mubr.f32.mxu1 %v2036_v2 }
 0x4e9   : > { %v3420_v29 = vunpack.i.h.bf16 %v3418_v43  ;;  %v3419_v1 = vunpack.i.l.bf16 %v3418_v43  ;;  %3002 = vmatmul.mubr.f32.gmra.mrb[38].mxu1 %v2037_v55 }
 0x4eb   : > { %v2038_v0 = vsel %vm760_vm0, %v1075_v4, %v3419_v1  ;;  %v2039_v31 = vsel %vm760_vm0, %v2862_v11, %v3420_v29  ;;  %v2306_v1 = vld [vmem:[%s4724_s24 + $0x18] sm:$0xff] }
 0x4ec   : > { %v3423_v13 = vpop.permute.xlu1 %3422  ;;  %3004 = vmatprep.mubr.f32.mxu1 %v2038_v0  ;;  %v2305_v0 = vld [vmem:[%s4724_s24 + $0x10] sm:$0xff] }
 0x4ed   : > { %v3425_v56 = vunpack.i.h.bf16 %v3423_v13  ;;  %v3424_v36 = vunpack.i.l.bf16 %v3423_v13  ;;  %3005 = vmatmul.mubr.f32.gmra.mrb[40].mxu1 %v2039_v31 }
 0x4ef   : > { %v2040_v21 = vsel %vm760_vm0, %v1085_v34, %v3424_v36  ;;  %v2041_v8 = vsel %vm760_vm0, %v4624_v40, %v3425_v56 }
 0x4f0   : > { %3007 = vmatprep.mubr.f32.mxu1 %v2040_v21  ;;  %v2308_v21 = vld [vmem:[%s4724_s24 + $0x28] sm:$0xff] }
 0x4f1   : > { %3008 = vmatmul.mubr.f32.gmra.mrb[42].mxu1 %v2041_v8  ;;  %v2307_v8 = vld [vmem:[%s4724_s24 + $0x20] sm:$0xff] }
 0x4fb   : > { %v3428_v26 = vpop.permute.xlu0 %3427 }
 0x4fc   : > { %v3430_v63 = vunpack.i.h.bf16 %v3428_v26  ;;  %v3429_v57 = vunpack.i.l.bf16 %v3428_v26 }
 0x4fe   : > { %v2042_v62 = vsel %vm760_vm0, %v4629_v10, %v3429_v57  ;;  %v2043_v14 = vsel %vm760_vm0, %v4627_v23, %v3430_v63 }
 0x4ff   : > { %v3433_v58 = vpop.permute.xlu1 %3432  ;;  %3010 = vmatprep.mubr.f32.mxu1 %v2042_v62 }
 0x500   : > { %v3435_v22 = vunpack.i.h.bf16 %v3433_v58  ;;  %v3434_v11 = vunpack.i.l.bf16 %v3433_v58  ;;  %3011 = vmatmul.mubr.f32.gmra.mrb[44].mxu1 %v2043_v14  ;;  %v2310_v14 = vld [vmem:[%s4724_s24 + $0x38] sm:$0xff]  ;;  %v2309_v58 = vld [vmem:[%s4724_s24 + $0x30] sm:$0xff] }
 0x502   : > { %v2044_v4 = vsel %vm760_vm0, %v4633_v19, %v3434_v11  ;;  %v2045_v54 = vsel %vm760_vm0, %v4631_v15, %v3435_v22 }
 0x503   : > { %v3438_v51 = vpop.permute.xlu0 %3437  ;;  %3013 = vmatprep.mubr.f32.mxu1 %v2044_v4 }
 0x504   : > { %v3440_v38 = vunpack.i.h.bf16 %v3438_v51  ;;  %v3439_v40 = vunpack.i.l.bf16 %v3438_v51  ;;  %3014 = vmatmul.mubr.f32.gmra.mrb[46].mxu1 %v2045_v54  ;;  %v2312_v51 = vld [vmem:[%s4724_s24 + $0x48] sm:$0xff] }
 0x506   : > { %v2046_v34 = vsel %vm760_vm0, %v4637_v44, %v3439_v40  ;;  %v2047_v23 = vsel %vm760_vm0, %v4635_v27, %v3440_v38  ;;  %v2311_v38 = vld [vmem:[%s4724_s24 + $0x40] sm:$0xff] }
 0x507   : > { %v3443_v10 = vpop.permute.xlu1 %3442  ;;  %3016 = vmatprep.mubr.f32.mxu1 %v2046_v34 }
 0x508   : > { %v3445_v47 = vunpack.i.h.bf16 %v3443_v10  ;;  %v3444_v35 = vunpack.i.l.bf16 %v3443_v10  ;;  %3017 = vmatmul.mubr.f32.gmra.mrb[48].mxu1 %v2047_v23 }
 0x50a   : > { %v2048_v19 = vsel %vm760_vm0, %v4641_v59, %v3444_v35  ;;  %v2049_v15 = vsel %vm760_vm0, %v4639_v49, %v3445_v47  ;;  %v2314_v47 = vld [vmem:[%s4724_s24 + $0x58] sm:$0xff]  ;;  %v2313_v35 = vld [vmem:[%s4724_s24 + $0x50] sm:$0xff] }
 0x50b   : > { %v3448_v39 = vpop.permute.xlu0 %3447  ;;  %3019 = vmatprep.mubr.f32.mxu1 %v2048_v19 }
 0x50c   : > { %v3450_v3 = vunpack.i.h.bf16 %v3448_v39  ;;  %v3449_v9 = vunpack.i.l.bf16 %v3448_v39  ;;  %3020 = vmatmul.mubr.f32.gmra.mrb[50].mxu1 %v2049_v15 }
 0x50e   : > { %v2050_v44 = vsel %vm760_vm0, %v4645_v24, %v3449_v9  ;;  %v2051_v27 = vsel %vm760_vm0, %v4643_v52, %v3450_v3  ;;  %v2316_v9 = vld [vmem:[%s4724_s24 + $0x68] sm:$0xff] }
 0x50f   : > { %v3453_v7 = vpop.permute.xlu1 %3452  ;;  %3022 = vmatprep.mubr.f32.mxu1 %v2050_v44  ;;  %v2315_v44 = vld [vmem:[%s4724_s24 + $0x60] sm:$0xff] }
 0x510   : > { %v3455_v18 = vunpack.i.h.bf16 %v3453_v7  ;;  %v3454_v61 = vunpack.i.l.bf16 %v3453_v7  ;;  %3023 = vmatmul.mubr.f32.gmra.mrb[52].mxu1 %v2051_v27 }
 0x512   : > { %v2052_v59 = vsel %vm760_vm0, %v4649_v12, %v3454_v61  ;;  %v2053_v49 = vsel %vm760_vm0, %v4647_v16, %v3455_v18 }
 0x513   : > { %v3458_v41 = vpop.permute.xlu0 %3457  ;;  %3025 = vmatprep.mubr.f32.mxu1 %v2052_v59  ;;  %v2318_v59 = vld [vmem:[%s4724_s24 + $0x78] sm:$0xff] }
 0x514   : > { %v3460_v6 = vunpack.i.h.bf16 %v3458_v41  ;;  %v3459_v45 = vunpack.i.l.bf16 %v3458_v41  ;;  %3026 = vmatmul.mubr.f32.gmra.mrb[54].mxu1 %v2053_v49  ;;  %v2317_v49 = vld [vmem:[%s4724_s24 + $0x70] sm:$0xff] }
 0x516   : > { %v2054_v24 = vsel %vm760_vm0, %v4653_v28, %v3459_v45  ;;  %v2055_v52 = vsel %vm760_vm0, %v4651_v32, %v3460_v6 }
 0x517   : > { %v3463_v53 = vpop.permute.xlu1 %3462  ;;  %3028 = vmatprep.mubr.f32.mxu1 %v2054_v24 }
 0x518   : > { %v3465_v17 = vunpack.i.h.bf16 %v3463_v53  ;;  %v3464_v50 = vunpack.i.l.bf16 %v3463_v53  ;;  %3029 = vmatmul.mubr.f32.gmra.mrb[56].mxu1 %v2055_v52  ;;  %v2320_v52 = vld [vmem:[%s4724_s24 + $0x88] sm:$0xff]  ;;  %v2319_v53 = vld [vmem:[%s4724_s24 + $0x80] sm:$0xff] }
 0x51a   : > { %v2056_v12 = vsel %vm760_vm0, %v4657_v25, %v3464_v50  ;;  %v2057_v16 = vsel %vm760_vm0, %v4655_v33, %v3465_v17 }
 0x51b   : > { %v3468_v30 = vpop.permute.xlu0 %3467  ;;  %3031 = vmatprep.mubr.f32.mxu1 %v2056_v12 }
 0x51c   : > { %v3470_v20 = vunpack.i.h.bf16 %v3468_v30  ;;  %v3469_v42 = vunpack.i.l.bf16 %v3468_v30  ;;  %3032 = vmatmul.mubr.f32.gmra.mrb[58].mxu1 %v2057_v16  ;;  %v2322_v30 = vld [vmem:[%s4724_s24 + $0x98] sm:$0xff] }
 0x51e   : > { %v2058_v32 = vsel %vm760_vm0, %v4661_v37, %v3469_v42  ;;  %v2059_v28 = vsel %vm760_vm0, %v4659_v48, %v3470_v20  ;;  %v2304_v48 = vld [vmem:[%s4724_s24 + $0x8] sm:$0xff]  ;;  %v2303_v37 = vld [vmem:[%s4724_s24] sm:$0xff]  ;;  %v2321_v20 = vld [vmem:[%s4724_s24 + $0x90] sm:$0xff] }
 0x51f   : > { %v3473_v5 = vpop.permute.xlu1 %3472  ;;  %3034 = vmatprep.mubr.f32.mxu1 %v2058_v32 }
 0x520   : > { %v3475_v2 = vunpack.i.h.bf16 %v3473_v5  ;;  %v3474_v25 = vunpack.i.l.bf16 %v3473_v5  ;;  %3035 = vmatmul.mubr.f32.gmra.mrb[60].mxu1 %v2059_v28 }
 0x522   : > { %v2060_v33 = vsel %vm760_vm0, %v4665_v46, %v3474_v25  ;;  %v2061_v55 = vsel %vm760_vm0, %v4663_v60, %v3475_v2  ;;  %v2324_v2 = vld [vmem:[%s4724_s24 + $0xa8] sm:$0xff]  ;;  %v2323_v25 = vld [vmem:[%s4724_s24 + $0xa0] sm:$0xff] }
 0x523   : > { %3037 = vmatprep.mubr.f32.mxu1 %v2060_v33 }
 0x524   : > { %3038 = vmatmul.mubr.f32.gmra.mrb[62].mxu1 %v2061_v55 }
 0x5b0   : > { %v2994_v60 = vpop.f32.mrb[32].mxu1 }
 0x5b1   : > { %v2336_v46 = vadd.f32 %v2994_v60, %v2304_v48  ;;  %v2144_v43 = vpop.f32.mrb[33].mxu1  ;;  %v2326_v60 = vld [vmem:[%s4724_s24 + $0xb8] sm:$0xff] }
 0x5b2   : > { %v2335_v29 = vadd.f32 %v2303_v37, %v2144_v43 }
 0x5b3   : > { %2368 = vst [vmem:[%s4732_s28 + $0x8] sm:$0xff] %v2336_v46  ;;  %v2325_v46 = vld [vmem:[%s4724_s24 + $0xb0] sm:$0xff] }
 0x5b4   : > { %2367 = vst [vmem:[%s4732_s28] sm:$0xff] %v2335_v29  ;;  %v2997_v31 = vpop.f32.mrb[34].mxu1 }
 0x5b5   : > { %v2338_v13 = vadd.f32 %v2997_v31, %v2306_v1  ;;  %v2154_v56 = vpop.f32.mrb[35].mxu1  ;;  %v2328_v31 = vld [vmem:[%s4724_s24 + $0xc8] sm:$0xff] }
 0x5b6   : > { %v2337_v36 = vadd.f32 %v2305_v0, %v2154_v56 }
 0x5b7   : > { %2370 = vst [vmem:[%s4732_s28 + $0x18] sm:$0xff] %v2338_v13  ;;  %v2327_v13 = vld [vmem:[%s4724_s24 + $0xc0] sm:$0xff] }
 0x5b8   : > { %2369 = vst [vmem:[%s4732_s28 + $0x10] sm:$0xff] %v2337_v36  ;;  %v3000_v26 = vpop.f32.mrb[36].mxu1 }
 0x5b9   : > { %v2340_v63 = vadd.f32 %v3000_v26, %v2308_v21  ;;  %v2164_v57 = vpop.f32.mrb[37].mxu1  ;;  %v2330_v26 = vld [vmem:[%s4724_s24 + $0xd8] sm:$0xff] }
 0x5ba   : > { %v2339_v62 = vadd.f32 %v2307_v8, %v2164_v57 }
 0x5bb   : > { %2372 = vst [vmem:[%s4732_s28 + $0x28] sm:$0xff] %v2340_v63  ;;  %v2329_v63 = vld [vmem:[%s4724_s24 + $0xd0] sm:$0xff] }
 0x5bc   : > { %2371 = vst [vmem:[%s4732_s28 + $0x20] sm:$0xff] %v2339_v62  ;;  %v3003_v22 = vpop.f32.mrb[38].mxu1 }
 0x5bd   : > { %v2342_v11 = vadd.f32 %v3003_v22, %v2310_v14  ;;  %v2174_v4 = vpop.f32.mrb[39].mxu1  ;;  %v2332_v22 = vld [vmem:[%s4724_s24 + $0xe8] sm:$0xff] }
 0x5be   : > { %v2341_v54 = vadd.f32 %v2309_v58, %v2174_v4 }
 0x5bf   : > { %2374 = vst [vmem:[%s4732_s28 + $0x38] sm:$0xff] %v2342_v11  ;;  %v2331_v11 = vld [vmem:[%s4724_s24 + $0xe0] sm:$0xff] }
 0x5c0   : > { %2373 = vst [vmem:[%s4732_s28 + $0x30] sm:$0xff] %v2341_v54  ;;  %v3006_v40 = vpop.f32.mrb[40].mxu1 }
 0x5c1   : > { %v2344_v34 = vadd.f32 %v3006_v40, %v2312_v51  ;;  %v2184_v23 = vpop.f32.mrb[41].mxu1  ;;  %v2334_v40 = vld [vmem:[%s4724_s24 + $0xf8] sm:$0xff] }
 0x5c2   : > { %v2343_v10 = vadd.f32 %v2311_v38, %v2184_v23 }
 0x5c3   : > { %2376 = vst [vmem:[%s4732_s28 + $0x48] sm:$0xff] %v2344_v34  ;;  %v2333_v34 = vld [vmem:[%s4724_s24 + $0xf0] sm:$0xff] }
 0x5c4   : > { %2375 = vst [vmem:[%s4732_s28 + $0x40] sm:$0xff] %v2343_v10  ;;  %v3009_v19 = vpop.f32.mrb[42].mxu1 }
 0x5c5   : > { %v2346_v15 = vadd.f32 %v3009_v19, %v2314_v47  ;;  %v2194_v39 = vpop.f32.mrb[43].mxu1 }
 0x5c6   : > { %v2345_v3 = vadd.f32 %v2313_v35, %v2194_v39 }
 0x5c7   : > { %2378 = vst [vmem:[%s4732_s28 + $0x58] sm:$0xff] %v2346_v15 }
 0x5c8   : > { %2377 = vst [vmem:[%s4732_s28 + $0x50] sm:$0xff] %v2345_v3 }
 0x5d3   : > { %v3012_v27 = vpop.f32.mrb[44].mxu1 }
 0x5d4   : > { %v2348_v7 = vadd.f32 %v3012_v27, %v2316_v9  ;;  %v2204_v18 = vpop.f32.mrb[45].mxu1 }
 0x5d5   : > { %v2347_v61 = vadd.f32 %v2315_v44, %v2204_v18 }
 0x5d6   : > { %2380 = vst [vmem:[%s4732_s28 + $0x68] sm:$0xff] %v2348_v7 }
 0x5d7   : > { %2379 = vst [vmem:[%s4732_s28 + $0x60] sm:$0xff] %v2347_v61  ;;  %v3015_v41 = vpop.f32.mrb[46].mxu1 }
 0x5d8   : > { %v2350_v6 = vadd.f32 %v3015_v41, %v2318_v59  ;;  %v2214_v45 = vpop.f32.mrb[47].mxu1 }
 0x5d9   : > { %v2349_v24 = vadd.f32 %v2317_v49, %v2214_v45 }
 0x5da   : > { %2382 = vst [vmem:[%s4732_s28 + $0x78] sm:$0xff] %v2350_v6 }
 0x5db   : > { %2381 = vst [vmem:[%s4732_s28 + $0x70] sm:$0xff] %v2349_v24  ;;  %v3018_v17 = vpop.f32.mrb[48].mxu1 }
 0x5dc   : > { %v2352_v50 = vadd.f32 %v3018_v17, %v2320_v52  ;;  %v2224_v12 = vpop.f32.mrb[49].mxu1 }
 0x5dd   : > { %v2351_v16 = vadd.f32 %v2319_v53, %v2224_v12 }
 0x5de   : > { %2384 = vst [vmem:[%s4732_s28 + $0x88] sm:$0xff] %v2352_v50 }
 0x5df   : > { %2383 = vst [vmem:[%s4732_s28 + $0x80] sm:$0xff] %v2351_v16  ;;  %v3021_v42 = vpop.f32.mrb[50].mxu1 }
 0x5e0   : > { %v2354_v32 = vadd.f32 %v3021_v42, %v2322_v30  ;;  %v2234_v28 = vpop.f32.mrb[51].mxu1 }
 0x5e1   : > { %v2353_v5 = vadd.f32 %v2321_v20, %v2234_v28 }
 0x5e2   : > { %2386 = vst [vmem:[%s4732_s28 + $0x98] sm:$0xff] %v2354_v32 }
 0x5e3   : > { %2385 = vst [vmem:[%s4732_s28 + $0x90] sm:$0xff] %v2353_v5  ;;  %v3024_v33 = vpop.f32.mrb[52].mxu1 }
 0x5e4   : > { %v2356_v55 = vadd.f32 %v3024_v33, %v2324_v2  ;;  %v2244_v48 = vpop.f32.mrb[53].mxu1 }
 0x5e5   : > { %v2355_v37 = vadd.f32 %v2323_v25, %v2244_v48 }
 0x5e6   : > { %2388 = vst [vmem:[%s4732_s28 + $0xa8] sm:$0xff] %v2356_v55 }
 0x5e7   : > { %2387 = vst [vmem:[%s4732_s28 + $0xa0] sm:$0xff] %v2355_v37  ;;  %v3027_v43 = vpop.f32.mrb[54].mxu1 }
 0x5e8   : > { %v2358_v29 = vadd.f32 %v3027_v43, %v2326_v60  ;;  %v2254_v1 = vpop.f32.mrb[55].mxu1 }
 0x5e9   : > { %v2357_v0 = vadd.f32 %v2325_v46, %v2254_v1 }
 0x5ea   : > { %2390 = vst [vmem:[%s4732_s28 + $0xb8] sm:$0xff] %v2358_v29 }
 0x5eb   : > { %2389 = vst [vmem:[%s4732_s28 + $0xb0] sm:$0xff] %v2357_v0  ;;  %v3030_v56 = vpop.f32.mrb[56].mxu1 }
 0x5ec   : > { %v2360_v36 = vadd.f32 %v3030_v56, %v2328_v31  ;;  %v2264_v21 = vpop.f32.mrb[57].mxu1 }
 0x5ed   : > { %v2359_v8 = vadd.f32 %v2327_v13, %v2264_v21 }
 0x5ee   : > { %2392 = vst [vmem:[%s4732_s28 + $0xc8] sm:$0xff] %v2360_v36 }
 0x5ef   : > { %2391 = vst [vmem:[%s4732_s28 + $0xc0] sm:$0xff] %v2359_v8  ;;  %v3033_v57 = vpop.f32.mrb[58].mxu1 }
 0x5f0   : > { %v2362_v62 = vadd.f32 %v3033_v57, %v2330_v26  ;;  %v2274_v14 = vpop.f32.mrb[59].mxu1 }
 0x5f1   : > { %v2361_v58 = vadd.f32 %v2329_v63, %v2274_v14 }
 0x5f2   : > { %2394 = vst [vmem:[%s4732_s28 + $0xd8] sm:$0xff] %v2362_v62 }
 0x5f3   : > { %2393 = vst [vmem:[%s4732_s28 + $0xd0] sm:$0xff] %v2361_v58  ;;  %v3036_v4 = vpop.f32.mrb[60].mxu1 }
 0x5f4   : > { %v2364_v54 = vadd.f32 %v3036_v4, %v2332_v22  ;;  %v2284_v51 = vpop.f32.mrb[61].mxu1 }
 0x5f5   : > { %v2363_v38 = vadd.f32 %v2331_v11, %v2284_v51 }
 0x5f6   : > { %2396 = vst [vmem:[%s4732_s28 + $0xe8] sm:$0xff] %v2364_v54 }
 0x5f7   : > { %2395 = vst [vmem:[%s4732_s28 + $0xe0] sm:$0xff] %v2363_v38  ;;  %v3039_v23 = vpop.f32.mrb[62].mxu1 }
 0x5f8   : > { %v2366_v10 = vadd.f32 %v3039_v23, %v2334_v40  ;;  %v2294_v47 = vpop.f32.mrb[63].mxu1 }
 0x5f9   : > { %v2365_v35 = vadd.f32 %v2333_v34, %v2294_v47 }
 0x5fa   : > { %2398 = vst [vmem:[%s4732_s28 + $0xf8] sm:$0xff] %v2366_v10 }
 0x5fb   : > { %2397 = vst [vmem:[%s4732_s28 + $0xf0] sm:$0xff] %v2365_v35 }
 0x5fc PF: > { %s16_s18 = sadd.s32 1, %s3576_s18  }
 0x5fd   : > { %p13_p1 = scmp.ge.s32.totalorder %s16_s18, 4  }
 0x5ff   :  { %15 = sbr.rel (!%p13_p1) target bundleno = 1 (0x1), region = 81 }
 0x606   :  { %2420 = vsyncpa [#allocation3], 1 }
 0x607   :  { %2422 = vsyncpa [#allocation3 + $0x1], 1 }

</bundles_post_ra>
